<compile_context>
chip_gen: v5e
topology: v5e:2x2
jax: 0.10.0
libtpu: 0.0.40
codegen_flags: <defaults>
</compile_context>

<pallas_src>
import functools
import math

import jax
import jax.numpy as jnp
import numpy as np
from jax.experimental import pallas as pl
from jax.experimental.pallas import tpu as pltpu


# ----------------------------------------------------------------------------
# Static shape configuration
# ----------------------------------------------------------------------------
def make_config(img=28, c_in=3, k=5, o1=6, o2=10, y_dim=16, cnn_dim=8, hidden=8,
                fc1=200, fc2=100, f1=1000, f2=100):
    W = img
    oh1 = img - k + 1                      # 24 (conv1 valid output)
    assert oh1 % 2 == 0
    ph1 = oh1 // 2                         # 12 (after pool1)
    oh2 = ph1 - k + 1                      # 8  (conv2 valid output)
    assert oh2 % 2 == 0
    ph2 = oh2 // 2                         # 4  (after pool2)
    # "wide" row-flattened layouts: flat index p = W*row + col (row stride = W)
    p1 = oh1 * W                           # conv1 wide width      (672)
    lm1 = 2 * W * (ph1 - 1) + 2 * (ph1 - 1) + 1   # pool1 shifted-max width (639)
    assert lm1 + W + 1 <= p1
    lm2 = 2 * W * (ph2 - 1) + 2 * (ph2 - 1) + 1   # pool2 shifted-max width (175)
    p2 = lm2 + W + 1                       # conv2 wide width      (204)
    pool1_cols = max(W * (ph1 - 1) + ph1, p2 + (k - 1) * (W + 1))     # 320
    img_pad = -(-(p1 + (k - 1) * (W + 1)) // 128) * 128               # 896
    img_pad = max(img_pad, W * W)
    feat = ph2 * ph2                       # 16 pixels per conv2 channel
    assert cnn_dim == hidden, "original: f1_in = (hidden+3)*hidden => seq = cnn_dim+3"
    t = cnn_dim + 3                        # LSTM sequence length (11)
    return dict(W=W, K=k, C_IN=c_in, O1=o1, O2=o2, OH1=oh1, OH2=oh2, PH1=ph1,
                PH2=ph2, P1=p1, P2=p2, LM1=lm1, LM2=lm2, POOL1_COLS=pool1_cols,
                IMG_PAD=img_pad, FEAT=feat, Y_DIM=y_dim, CNN_DIM=cnn_dim,
                HID=hidden, T=t, FC1=fc1, FC2=fc2, FC1_IN=o2 * feat + y_dim,
                F1=f1, F2=f2)


def _pool_select_matrix(in_cols, out_cols, n, w_stride, out_stride):
    """0/1 matrix S with S[2*w_stride*y + 2*x, out_stride*y + x] = 1 (y,x < n).

    Right-multiplying the max-of-4-shifts map by S performs the stride-2
    lane compaction of a 2x2 max-pool on the MXU (no strided lane loads)."""
    S = np.zeros((in_cols, out_cols), np.float32)
    for y in range(n):
        for x in range(n):
            S[2 * w_stride * y + 2 * x, out_stride * y + x] = 1.0
    return jnp.asarray(S)


# ----------------------------------------------------------------------------
# The single fused Pallas kernel
# ----------------------------------------------------------------------------
def _fused_kernel(
        img_ref, y_ref, color_ref,
        w1_ref, b1_ref, w2_ref, b2_ref, s1_ref, s2_ref,
        fc1w_ref, fc1b_ref, fc2w_ref, fc2b_ref, fc3w_ref, fc3b_ref,
        wih_ref, whh_ref, lstmb_ref,
        f1w_ref, f1b_ref, f2w_ref, f2b_ref, f3w_ref, f3b_ref,
        out_ref,
        out1_scr, pool1_scr, out2_scr, feat_scr,
        *, cfg):
    f32 = jnp.float32
    W, K = cfg["W"], cfg["K"]

    # ---- conv1 + bias + ReLU, row-flattened "wide" layout --------------------
    # out1[o, W*y + x] = relu(b1[o] + sum_{c,di,dj} w1[o,c,di,dj]*img[c,y+di,x+dj])
    acc1 = jnp.zeros((cfg["O1"], cfg["P1"]), f32)
    for di in range(K):
        for dj in range(K):
            acc1 = acc1 + jnp.dot(
                w1_ref[di * K + dj],                               # (O1, C_in)
                img_ref[:, pl.ds(di * W + dj, cfg["P1"])],         # (C_in, P1)
                preferred_element_type=f32)
    out1_scr[...] = jnp.maximum(acc1 + b1_ref[...], 0.0)

    # ---- 2x2 max-pool #1: max of 4 shifts, then lane-compaction matmul -------
    m1 = jnp.maximum(
        jnp.maximum(out1_scr[:, pl.ds(0, cfg["LM1"])],
                    out1_scr[:, pl.ds(1, cfg["LM1"])]),
        jnp.maximum(out1_scr[:, pl.ds(W, cfg["LM1"])],
                    out1_scr[:, pl.ds(W + 1, cfg["LM1"])]))
    pool1_scr[...] = jnp.dot(m1, s1_ref[...], preferred_element_type=f32)

    # ---- conv2 + bias + ReLU --------------------------------------------------
    acc2 = jnp.zeros((cfg["O2"], cfg["P2"]), f32)
    for di in range(K):
        for dj in range(K):
            acc2 = acc2 + jnp.dot(
                w2_ref[di * K + dj],                               # (O2, O1)
                pool1_scr[:, pl.ds(di * W + dj, cfg["P2"])],       # (O1, P2)
                preferred_element_type=f32)
    out2_scr[...] = jnp.maximum(acc2 + b2_ref[...], 0.0)

    # ---- 2x2 max-pool #2 -> compact (O2, PH2*PH2) feature block ---------------
    m2 = jnp.maximum(
        jnp.maximum(out2_scr[:, pl.ds(0, cfg["LM2"])],
                    out2_scr[:, pl.ds(1, cfg["LM2"])]),
        jnp.maximum(out2_scr[:, pl.ds(W, cfg["LM2"])],
                    out2_scr[:, pl.ds(W + 1, cfg["LM2"])]))
    feat_scr[...] = jnp.dot(m2, s2_ref[...], preferred_element_type=f32)

    # ---- CNN head: fc1 (cat(flat_feats, y)) -> relu -> fc2 -> relu -> fc3 -----
    fpix = cfg["FEAT"]
    acc = fc1b_ref[...]                                            # (1, 200)
    for o in range(cfg["O2"]):                                     # flatten order (o, y, x)
        acc = acc + jnp.dot(feat_scr[pl.ds(o, 1), :],              # (1, 16)
                            fc1w_ref[pl.ds(o * fpix, fpix), :],    # (16, 200)
                            preferred_element_type=f32)
    acc = acc + jnp.dot(y_ref[...],                                # (1, Y_DIM)
                        fc1w_ref[pl.ds(cfg["O2"] * fpix, cfg["Y_DIM"]), :],
                        preferred_element_type=f32)
    h1 = jnp.maximum(acc, 0.0)
    h2 = jnp.maximum(jnp.dot(h1, fc2w_ref[...], preferred_element_type=f32)
                     + fc2b_ref[...], 0.0)
    cnn_out = (jnp.dot(h2, fc3w_ref[...], preferred_element_type=f32)
               + fc3b_ref[...])                                    # (1, CNN_DIM)

    # ---- LSTM over T scalar steps (fully unrolled), f1 fused as accumulation --
    Hd = cfg["HID"]
    wih = wih_ref[...]                                             # (1, 4H), order (i,f,o,g)
    whh = whh_ref[...]                                             # (H, 4H)
    bl = lstmb_ref[...]                                            # (1, 4H) = b_ih + b_hh
    color = color_ref[...]                                         # (1, 3)
    h = jnp.zeros((1, Hd), f32)
    c = jnp.zeros((1, Hd), f32)
    f1_acc = f1b_ref[...]                                          # (1, 1000): start at bias
    for t in range(cfg["T"]):
        if t < cfg["CNN_DIM"]:
            x_t = cnn_out[:, t:t + 1]                              # (1, 1)
        else:
            j = t - cfg["CNN_DIM"]
            x_t = color[:, j:j + 1]
        gates = x_t * wih + jnp.dot(h, whh, preferred_element_type=f32) + bl
        sig = jax.nn.sigmoid(gates[:, 0:3 * Hd])                   # one EUP pass for i,f,o
        i_g = sig[:, 0:Hd]
        f_g = sig[:, Hd:2 * Hd]
        o_g = sig[:, 2 * Hd:3 * Hd]
        g_g = jnp.tanh(gates[:, 3 * Hd:4 * Hd])
        c = f_g * c + i_g * g_g
        h = o_g * jnp.tanh(c)
        # f1 fused: h_seq.view(1,-1) @ f1_w  ==  sum_t h_t @ f1_w[t*H:(t+1)*H, :]
        f1_acc = f1_acc + jnp.dot(h, f1w_ref[pl.ds(t * Hd, Hd), :],
                                  preferred_element_type=f32)

    # ---- head: relu(f1) -> relu(f2) -> tanh(f3) --------------------------------
    g1 = jnp.maximum(f1_acc, 0.0)
    g2 = jnp.maximum(jnp.dot(g1, f2w_ref[...], preferred_element_type=f32)
                     + f2b_ref[...], 0.0)
    g3 = jnp.dot(g2, f3w_ref[...], preferred_element_type=f32) + f3b_ref[...]
    out_ref[...] = jnp.tanh(g3)


# ----------------------------------------------------------------------------
# Wrapper
# ----------------------------------------------------------------------------
def make_forward(cfg):
    def forward(params, x_hwc, color, y):
        C, W = cfg["C_IN"], cfg["W"]
        # HWC -> CHW -> (C, H*W), zero-padded lanes (one-time cheap layout prep)
        img = jnp.transpose(x_hwc, (2, 0, 1)).astype(jnp.float32).reshape(C, W * W)
        img = jnp.pad(img, ((0, 0), (0, cfg["IMG_PAD"] - W * W)))
        color_row = color.astype(jnp.float32).reshape(1, -1)
        y32 = y.astype(jnp.float32)
        inputs = (img, y32, color_row,
                  params["w1"], params["b1"], params["w2"], params["b2"],
                  params["s1"], params["s2"],
                  params["fc1_w"], params["fc1_b"], params["fc2_w"], params["fc2_b"],
                  params["fc3_w"], params["fc3_b"],
                  params["wih"], params["whh"], params["lstm_b"],
                  params["f1_w"], params["f1_b"], params["f2_w"], params["f2_b"],
                  params["f3_w"], params["f3_b"])
        fused = pl.pallas_call(
            functools.partial(_fused_kernel, cfg=cfg),
            out_shape=jax.ShapeDtypeStruct((1, 1), jnp.float32),
            in_specs=[pl.BlockSpec(memory_space=pltpu.MemorySpace.VMEM)] * len(inputs),
            out_specs=pl.BlockSpec(memory_space=pltpu.MemorySpace.VMEM),
            scratch_shapes=[
                pltpu.VMEM((cfg["O1"], cfg["P1"]), jnp.float32),          # conv1 wide
                pltpu.VMEM((cfg["O1"], cfg["POOL1_COLS"]), jnp.float32),  # pooled1 wide
                pltpu.VMEM((cfg["O2"], cfg["P2"]), jnp.float32),          # conv2 wide
                pltpu.VMEM((cfg["O2"], cfg["FEAT"]), jnp.float32),        # pooled2 compact
            ],
        )
        return fused(*inputs)

    return jax.jit(forward)


# ----------------------------------------------------------------------------
# Deterministic parameter init (PyTorch-style uniform(-1/sqrt(fan_in)))
# ----------------------------------------------------------------------------
def init_params(key, cfg):
    def uni(k, shape, fan_in):
        b = 1.0 / math.sqrt(fan_in)
        return jax.random.uniform(k, shape, jnp.float32, -b, b)

    keys = iter(jax.random.split(key, 32))
    K, C, O1, O2 = cfg["K"], cfg["C_IN"], cfg["O1"], cfg["O2"]
    H, T = cfg["HID"], cfg["T"]
    p = {}
    # conv weights stored as (k*k, O, C): w[di*k+dj, o, c] == torch_w[o, c, di, dj]
    p["w1"] = uni(next(keys), (K * K, O1, C), C * K * K)
    p["b1"] = uni(next(keys), (O1, 1), C * K * K)
    p["w2"] = uni(next(keys), (K * K, O2, O1), O1 * K * K)
    p["b2"] = uni(next(keys), (O2, 1), O1 * K * K)
    fc1_in = cfg["FC1_IN"]
    p["fc1_w"] = uni(next(keys), (fc1_in, cfg["FC1"]), fc1_in)
    p["fc1_b"] = uni(next(keys), (1, cfg["FC1"]), fc1_in)
    p["fc2_w"] = uni(next(keys), (cfg["FC1"], cfg["FC2"]), cfg["FC1"])
    p["fc2_b"] = uni(next(keys), (1, cfg["FC2"]), cfg["FC1"])
    p["fc3_w"] = uni(next(keys), (cfg["FC2"], cfg["CNN_DIM"]), cfg["FC2"])
    p["fc3_b"] = uni(next(keys), (1, cfg["CNN_DIM"]), cfg["FC2"])
    # LSTM (input_size=1), pre-transposed, gate order (i, f, o, g)
    p["wih"] = uni(next(keys), (1, 4 * H), H)
    p["whh"] = uni(next(keys), (H, 4 * H), H)
    p["lstm_b"] = uni(next(keys), (1, 4 * H), H) + uni(next(keys), (1, 4 * H), H)
    f1_in = T * H
    p["f1_w"] = uni(next(keys), (f1_in, cfg["F1"]), f1_in)
    p["f1_b"] = uni(next(keys), (1, cfg["F1"]), f1_in)
    p["f2_w"] = uni(next(keys), (cfg["F1"], cfg["F2"]), cfg["F1"])
    p["f2_b"] = uni(next(keys), (1, cfg["F2"]), cfg["F1"])
    p["f3_w"] = uni(next(keys), (cfg["F2"], 1), cfg["F2"])
    p["f3_b"] = uni(next(keys), (1, 1), cfg["F2"])
    # constant pool-compaction selection matrices (not trained)
    p["s1"] = _pool_select_matrix(cfg["LM1"], cfg["POOL1_COLS"], cfg["PH1"],
                                  cfg["W"], cfg["W"])
    p["s2"] = _pool_select_matrix(cfg["LM2"], cfg["FEAT"], cfg["PH2"],
                                  cfg["W"], cfg["PH2"])
    return p


# ----------------------------------------------------------------------------
# Plain-JAX reference of the same (reconstructed) forward, for verification
# ----------------------------------------------------------------------------
def _ref_forward(p, x_hwc, color, y, cfg):
    K, H = cfg["K"], cfg["HID"]
    x = jnp.transpose(x_hwc, (2, 0, 1)).astype(jnp.float32)

    def conv_relu(inp, w_k, b):
        O = w_k.shape[1]
        oh = inp.shape[1] - K + 1
        ow = inp.shape[2] - K + 1
        out = jnp.zeros((O, oh, ow), jnp.float32)
        for di in range(K):
            for dj in range(K):
                out = out + jnp.einsum("oc,cyx->oyx", w_k[di * K + dj],
                                       inp[:, di:di + oh, dj:dj + ow])
        return jax.nn.relu(out + b.reshape(O, 1, 1))

    def pool(z):
        O, Hh, Ww = z.shape
        return jnp.max(z.reshape(O, Hh // 2, 2, Ww // 2, 2), axis=(2, 4))

    a = pool(conv_relu(x, p["w1"], p["b1"]))
    a = pool(conv_relu(a, p["w2"], p["b2"]))
    z = jnp.concatenate([a.reshape(1, -1), y.astype(jnp.float32)], axis=1)
    z = jax.nn.relu(z @ p["fc1_w"] + p["fc1_b"])
    z = jax.nn.relu(z @ p["fc2_w"] + p["fc2_b"])
    cnn_out = z @ p["fc3_w"] + p["fc3_b"]

    seq = jnp.concatenate([cnn_out.reshape(-1), color.astype(jnp.float32)])
    h = jnp.zeros((1, H), jnp.float32)
    c = jnp.zeros((1, H), jnp.float32)
    hs = []
    for t in range(cfg["T"]):
        g = seq[t] * p["wih"] + h @ p["whh"] + p["lstm_b"]
        i_g = jax.nn.sigmoid(g[:, 0:H])
        f_g = jax.nn.sigmoid(g[:, H:2 * H])
        o_g = jax.nn.sigmoid(g[:, 2 * H:3 * H])
        g_g = jnp.tanh(g[:, 3 * H:4 * H])
        c = f_g * c + i_g * g_g
        h = o_g * jnp.tanh(c)
        hs.append(h)
    hcat = jnp.concatenate(hs, axis=1)
    z = jax.nn.relu(hcat @ p["f1_w"] + p["f1_b"])
    z = jax.nn.relu(z @ p["f2_w"] + p["f2_b"])
    return jnp.tanh(z @ p["f3_w"] + p["f3_b"])


# ----------------------------------------------------------------------------
if __name__ == "__main__":
    cfg = make_config()                      # 28x28x3 image, cnn_dim = hidden = 8
    key = jax.random.PRNGKey(0)
    kx, kc, ky, kp = jax.random.split(key, 4)
    x = jax.random.uniform(kx, (cfg["W"], cfg["W"], cfg["C_IN"]), jnp.float32)  # HWC
    color = jax.random.uniform(kc, (3,), jnp.float32)
    y = jax.random.uniform(ky, (1, cfg["Y_DIM"]), jnp.float32)
    params = init_params(kp, cfg)

    forward = make_forward(cfg)
    out = jax.block_until_ready(forward(params, x, color, y))
    assert out.shape == (1, 1), out.shape
    assert bool(jnp.all(jnp.isfinite(out)))
    assert bool(jnp.all(jnp.abs(out) <= 1.0))        # tanh output

    ref = jax.block_until_ready(_ref_forward(params, x, color, y, cfg))
    assert bool(jnp.max(jnp.abs(out - ref)) < 2e-2), (out, ref)

    print("KERNEL_OK")
</pallas_src>

<mosaic_0001>
module attributes {stable_mosaic.version = 11 : i64} {
  func.func @_fused_kernel(%arg0: memref<3x896xf32, #tpu.memory_space<vmem>>, %arg1: memref<1x16xf32, #tpu.memory_space<vmem>>, %arg2: memref<1x3xf32, #tpu.memory_space<vmem>>, %arg3: memref<25x6x3xf32, #tpu.memory_space<vmem>>, %arg4: memref<6x1xf32, #tpu.memory_space<vmem>>, %arg5: memref<25x10x6xf32, #tpu.memory_space<vmem>>, %arg6: memref<10x1xf32, #tpu.memory_space<vmem>>, %arg7: memref<639x320xf32, #tpu.memory_space<vmem>>, %arg8: memref<175x16xf32, #tpu.memory_space<vmem>>, %arg9: memref<176x200xf32, #tpu.memory_space<vmem>>, %arg10: memref<1x200xf32, #tpu.memory_space<vmem>>, %arg11: memref<200x100xf32, #tpu.memory_space<vmem>>, %arg12: memref<1x100xf32, #tpu.memory_space<vmem>>, %arg13: memref<100x8xf32, #tpu.memory_space<vmem>>, %arg14: memref<1x8xf32, #tpu.memory_space<vmem>>, %arg15: memref<1x32xf32, #tpu.memory_space<vmem>>, %arg16: memref<8x32xf32, #tpu.memory_space<vmem>>, %arg17: memref<1x32xf32, #tpu.memory_space<vmem>>, %arg18: memref<88x1000xf32, #tpu.memory_space<vmem>>, %arg19: memref<1x1000xf32, #tpu.memory_space<vmem>>, %arg20: memref<1000x100xf32, #tpu.memory_space<vmem>>, %arg21: memref<1x100xf32, #tpu.memory_space<vmem>>, %arg22: memref<100x1xf32, #tpu.memory_space<vmem>>, %arg23: memref<1x1xf32, #tpu.memory_space<vmem>>, %arg24: memref<1x1xf32, #tpu.memory_space<vmem>>, %arg25: memref<6x672xf32, #tpu.memory_space<vmem>>, %arg26: memref<6x320xf32, #tpu.memory_space<vmem>>, %arg27: memref<10x204xf32, #tpu.memory_space<vmem>>, %arg28: memref<10x16xf32, #tpu.memory_space<vmem>>) attributes {dimension_semantics = [], scalar_prefetch = 0 : i64, scratch_operands = 4 : i64, tpu.core_type = #tpu.core_type<tc>} {
    %cst = arith.constant 0.000000e+00 : f32
    %0 = vector.broadcast %cst : f32 to vector<6x672xf32>
    %c0 = arith.constant 0 : index
    %c0_0 = arith.constant 0 : index
    %c0_1 = arith.constant 0 : index
    %1 = vector.load %arg3[%c0, %c0_0, %c0_1] : memref<25x6x3xf32, #tpu.memory_space<vmem>>, vector<1x6x3xf32>
    %2 = vector.shape_cast %1 : vector<1x6x3xf32> to vector<6x3xf32>
    %c0_2 = arith.constant 0 : index
    %c0_3 = arith.constant 0 : index
    %3 = vector.load %arg0[%c0_2, %c0_3] : memref<3x896xf32, #tpu.memory_space<vmem>>, vector<3x672xf32>
    %cst_4 = arith.constant dense<0.000000e+00> : vector<6x672xf32>
    %4 = tpu.matmul %2, %3, %cst_4 {dimension_numbers = #tpu.dot_dimension_numbers<[1], [0], [0], [1], [0, 0, 1, 1], [], []>} : vector<6x3xf32>, vector<3x672xf32>, vector<6x672xf32> -> vector<6x672xf32>
    %5 = arith.addf %0, %4 : vector<6x672xf32>
    %c1 = arith.constant 1 : index
    %c0_5 = arith.constant 0 : index
    %c0_6 = arith.constant 0 : index
    %6 = vector.load %arg3[%c1, %c0_5, %c0_6] : memref<25x6x3xf32, #tpu.memory_space<vmem>>, vector<1x6x3xf32>
    %7 = vector.shape_cast %6 : vector<1x6x3xf32> to vector<6x3xf32>
    %c0_7 = arith.constant 0 : index
    %c1_8 = arith.constant 1 : index
    %8 = vector.load %arg0[%c0_7, %c1_8] : memref<3x896xf32, #tpu.memory_space<vmem>>, vector<3x672xf32>
    %cst_9 = arith.constant dense<0.000000e+00> : vector<6x672xf32>
    %9 = tpu.matmul %7, %8, %cst_9 {dimension_numbers = #tpu.dot_dimension_numbers<[1], [0], [0], [1], [0, 0, 1, 1], [], []>} : vector<6x3xf32>, vector<3x672xf32>, vector<6x672xf32> -> vector<6x672xf32>
    %10 = arith.addf %5, %9 : vector<6x672xf32>
    %c2 = arith.constant 2 : index
    %c0_10 = arith.constant 0 : index
    %c0_11 = arith.constant 0 : index
    %11 = vector.load %arg3[%c2, %c0_10, %c0_11] : memref<25x6x3xf32, #tpu.memory_space<vmem>>, vector<1x6x3xf32>
    %12 = vector.shape_cast %11 : vector<1x6x3xf32> to vector<6x3xf32>
    %c0_12 = arith.constant 0 : index
    %c2_13 = arith.constant 2 : index
    %13 = vector.load %arg0[%c0_12, %c2_13] : memref<3x896xf32, #tpu.memory_space<vmem>>, vector<3x672xf32>
    %cst_14 = arith.constant dense<0.000000e+00> : vector<6x672xf32>
    %14 = tpu.matmul %12, %13, %cst_14 {dimension_numbers = #tpu.dot_dimension_numbers<[1], [0], [0], [1], [0, 0, 1, 1], [], []>} : vector<6x3xf32>, vector<3x672xf32>, vector<6x672xf32> -> vector<6x672xf32>
    %15 = arith.addf %10, %14 : vector<6x672xf32>
    %c3 = arith.constant 3 : index
    %c0_15 = arith.constant 0 : index
    %c0_16 = arith.constant 0 : index
    %16 = vector.load %arg3[%c3, %c0_15, %c0_16] : memref<25x6x3xf32, #tpu.memory_space<vmem>>, vector<1x6x3xf32>
    %17 = vector.shape_cast %16 : vector<1x6x3xf32> to vector<6x3xf32>
    %c0_17 = arith.constant 0 : index
    %c3_18 = arith.constant 3 : index
    %18 = vector.load %arg0[%c0_17, %c3_18] : memref<3x896xf32, #tpu.memory_space<vmem>>, vector<3x672xf32>
    %cst_19 = arith.constant dense<0.000000e+00> : vector<6x672xf32>
    %19 = tpu.matmul %17, %18, %cst_19 {dimension_numbers = #tpu.dot_dimension_numbers<[1], [0], [0], [1], [0, 0, 1, 1], [], []>} : vector<6x3xf32>, vector<3x672xf32>, vector<6x672xf32> -> vector<6x672xf32>
    %20 = arith.addf %15, %19 : vector<6x672xf32>
    %c4 = arith.constant 4 : index
    %c0_20 = arith.constant 0 : index
    %c0_21 = arith.constant 0 : index
    %21 = vector.load %arg3[%c4, %c0_20, %c0_21] : memref<25x6x3xf32, #tpu.memory_space<vmem>>, vector<1x6x3xf32>
    %22 = vector.shape_cast %21 : vector<1x6x3xf32> to vector<6x3xf32>
    %c0_22 = arith.constant 0 : index
    %c4_23 = arith.constant 4 : index
    %23 = vector.load %arg0[%c0_22, %c4_23] : memref<3x896xf32, #tpu.memory_space<vmem>>, vector<3x672xf32>
    %cst_24 = arith.constant dense<0.000000e+00> : vector<6x672xf32>
    %24 = tpu.matmul %22, %23, %cst_24 {dimension_numbers = #tpu.dot_dimension_numbers<[1], [0], [0], [1], [0, 0, 1, 1], [], []>} : vector<6x3xf32>, vector<3x672xf32>, vector<6x672xf32> -> vector<6x672xf32>
    %25 = arith.addf %20, %24 : vector<6x672xf32>
    %c5 = arith.constant 5 : index
    %c0_25 = arith.constant 0 : index
    %c0_26 = arith.constant 0 : index
    %26 = vector.load %arg3[%c5, %c0_25, %c0_26] : memref<25x6x3xf32, #tpu.memory_space<vmem>>, vector<1x6x3xf32>
    %27 = vector.shape_cast %26 : vector<1x6x3xf32> to vector<6x3xf32>
    %c0_27 = arith.constant 0 : index
    %c28 = arith.constant 28 : index
    %28 = vector.load %arg0[%c0_27, %c28] : memref<3x896xf32, #tpu.memory_space<vmem>>, vector<3x672xf32>
    %cst_28 = arith.constant dense<0.000000e+00> : vector<6x672xf32>
    %29 = tpu.matmul %27, %28, %cst_28 {dimension_numbers = #tpu.dot_dimension_numbers<[1], [0], [0], [1], [0, 0, 1, 1], [], []>} : vector<6x3xf32>, vector<3x672xf32>, vector<6x672xf32> -> vector<6x672xf32>
    %30 = arith.addf %25, %29 : vector<6x672xf32>
    %c6 = arith.constant 6 : index
    %c0_29 = arith.constant 0 : index
    %c0_30 = arith.constant 0 : index
    %31 = vector.load %arg3[%c6, %c0_29, %c0_30] : memref<25x6x3xf32, #tpu.memory_space<vmem>>, vector<1x6x3xf32>
    %32 = vector.shape_cast %31 : vector<1x6x3xf32> to vector<6x3xf32>
    %c0_31 = arith.constant 0 : index
    %c29 = arith.constant 29 : index
    %33 = vector.load %arg0[%c0_31, %c29] : memref<3x896xf32, #tpu.memory_space<vmem>>, vector<3x672xf32>
    %cst_32 = arith.constant dense<0.000000e+00> : vector<6x672xf32>
    %34 = tpu.matmul %32, %33, %cst_32 {dimension_numbers = #tpu.dot_dimension_numbers<[1], [0], [0], [1], [0, 0, 1, 1], [], []>} : vector<6x3xf32>, vector<3x672xf32>, vector<6x672xf32> -> vector<6x672xf32>
    %35 = arith.addf %30, %34 : vector<6x672xf32>
    %c7 = arith.constant 7 : index
    %c0_33 = arith.constant 0 : index
    %c0_34 = arith.constant 0 : index
    %36 = vector.load %arg3[%c7, %c0_33, %c0_34] : memref<25x6x3xf32, #tpu.memory_space<vmem>>, vector<1x6x3xf32>
    %37 = vector.shape_cast %36 : vector<1x6x3xf32> to vector<6x3xf32>
    %c0_35 = arith.constant 0 : index
    %c30 = arith.constant 30 : index
    %38 = vector.load %arg0[%c0_35, %c30] : memref<3x896xf32, #tpu.memory_space<vmem>>, vector<3x672xf32>
    %cst_36 = arith.constant dense<0.000000e+00> : vector<6x672xf32>
    %39 = tpu.matmul %37, %38, %cst_36 {dimension_numbers = #tpu.dot_dimension_numbers<[1], [0], [0], [1], [0, 0, 1, 1], [], []>} : vector<6x3xf32>, vector<3x672xf32>, vector<6x672xf32> -> vector<6x672xf32>
    %40 = arith.addf %35, %39 : vector<6x672xf32>
    %c8 = arith.constant 8 : index
    %c0_37 = arith.constant 0 : index
    %c0_38 = arith.constant 0 : index
    %41 = vector.load %arg3[%c8, %c0_37, %c0_38] : memref<25x6x3xf32, #tpu.memory_space<vmem>>, vector<1x6x3xf32>
    %42 = vector.shape_cast %41 : vector<1x6x3xf32> to vector<6x3xf32>
    %c0_39 = arith.constant 0 : index
    %c31 = arith.constant 31 : index
    %43 = vector.load %arg0[%c0_39, %c31] : memref<3x896xf32, #tpu.memory_space<vmem>>, vector<3x672xf32>
    %cst_40 = arith.constant dense<0.000000e+00> : vector<6x672xf32>
    %44 = tpu.matmul %42, %43, %cst_40 {dimension_numbers = #tpu.dot_dimension_numbers<[1], [0], [0], [1], [0, 0, 1, 1], [], []>} : vector<6x3xf32>, vector<3x672xf32>, vector<6x672xf32> -> vector<6x672xf32>
    %45 = arith.addf %40, %44 : vector<6x672xf32>
    %c9 = arith.constant 9 : index
    %c0_41 = arith.constant 0 : index
    %c0_42 = arith.constant 0 : index
    %46 = vector.load %arg3[%c9, %c0_41, %c0_42] : memref<25x6x3xf32, #tpu.memory_space<vmem>>, vector<1x6x3xf32>
    %47 = vector.shape_cast %46 : vector<1x6x3xf32> to vector<6x3xf32>
    %c0_43 = arith.constant 0 : index
    %c32 = arith.constant 32 : index
    %48 = vector.load %arg0[%c0_43, %c32] : memref<3x896xf32, #tpu.memory_space<vmem>>, vector<3x672xf32>
    %cst_44 = arith.constant dense<0.000000e+00> : vector<6x672xf32>
    %49 = tpu.matmul %47, %48, %cst_44 {dimension_numbers = #tpu.dot_dimension_numbers<[1], [0], [0], [1], [0, 0, 1, 1], [], []>} : vector<6x3xf32>, vector<3x672xf32>, vector<6x672xf32> -> vector<6x672xf32>
    %50 = arith.addf %45, %49 : vector<6x672xf32>
    %c10 = arith.constant 10 : index
    %c0_45 = arith.constant 0 : index
    %c0_46 = arith.constant 0 : index
    %51 = vector.load %arg3[%c10, %c0_45, %c0_46] : memref<25x6x3xf32, #tpu.memory_space<vmem>>, vector<1x6x3xf32>
    %52 = vector.shape_cast %51 : vector<1x6x3xf32> to vector<6x3xf32>
    %c0_47 = arith.constant 0 : index
    %c56 = arith.constant 56 : index
    %53 = vector.load %arg0[%c0_47, %c56] : memref<3x896xf32, #tpu.memory_space<vmem>>, vector<3x672xf32>
    %cst_48 = arith.constant dense<0.000000e+00> : vector<6x672xf32>
    %54 = tpu.matmul %52, %53, %cst_48 {dimension_numbers = #tpu.dot_dimension_numbers<[1], [0], [0], [1], [0, 0, 1, 1], [], []>} : vector<6x3xf32>, vector<3x672xf32>, vector<6x672xf32> -> vector<6x672xf32>
    %55 = arith.addf %50, %54 : vector<6x672xf32>
    %c11 = arith.constant 11 : index
    %c0_49 = arith.constant 0 : index
    %c0_50 = arith.constant 0 : index
    %56 = vector.load %arg3[%c11, %c0_49, %c0_50] : memref<25x6x3xf32, #tpu.memory_space<vmem>>, vector<1x6x3xf32>
    %57 = vector.shape_cast %56 : vector<1x6x3xf32> to vector<6x3xf32>
    %c0_51 = arith.constant 0 : index
    %c57 = arith.constant 57 : index
    %58 = vector.load %arg0[%c0_51, %c57] : memref<3x896xf32, #tpu.memory_space<vmem>>, vector<3x672xf32>
    %cst_52 = arith.constant dense<0.000000e+00> : vector<6x672xf32>
    %59 = tpu.matmul %57, %58, %cst_52 {dimension_numbers = #tpu.dot_dimension_numbers<[1], [0], [0], [1], [0, 0, 1, 1], [], []>} : vector<6x3xf32>, vector<3x672xf32>, vector<6x672xf32> -> vector<6x672xf32>
    %60 = arith.addf %55, %59 : vector<6x672xf32>
    %c12 = arith.constant 12 : index
    %c0_53 = arith.constant 0 : index
    %c0_54 = arith.constant 0 : index
    %61 = vector.load %arg3[%c12, %c0_53, %c0_54] : memref<25x6x3xf32, #tpu.memory_space<vmem>>, vector<1x6x3xf32>
    %62 = vector.shape_cast %61 : vector<1x6x3xf32> to vector<6x3xf32>
    %c0_55 = arith.constant 0 : index
    %c58 = arith.constant 58 : index
    %63 = vector.load %arg0[%c0_55, %c58] : memref<3x896xf32, #tpu.memory_space<vmem>>, vector<3x672xf32>
    %cst_56 = arith.constant dense<0.000000e+00> : vector<6x672xf32>
    %64 = tpu.matmul %62, %63, %cst_56 {dimension_numbers = #tpu.dot_dimension_numbers<[1], [0], [0], [1], [0, 0, 1, 1], [], []>} : vector<6x3xf32>, vector<3x672xf32>, vector<6x672xf32> -> vector<6x672xf32>
    %65 = arith.addf %60, %64 : vector<6x672xf32>
    %c13 = arith.constant 13 : index
    %c0_57 = arith.constant 0 : index
    %c0_58 = arith.constant 0 : index
    %66 = vector.load %arg3[%c13, %c0_57, %c0_58] : memref<25x6x3xf32, #tpu.memory_space<vmem>>, vector<1x6x3xf32>
    %67 = vector.shape_cast %66 : vector<1x6x3xf32> to vector<6x3xf32>
    %c0_59 = arith.constant 0 : index
    %c59 = arith.constant 59 : index
    %68 = vector.load %arg0[%c0_59, %c59] : memref<3x896xf32, #tpu.memory_space<vmem>>, vector<3x672xf32>
    %cst_60 = arith.constant dense<0.000000e+00> : vector<6x672xf32>
    %69 = tpu.matmul %67, %68, %cst_60 {dimension_numbers = #tpu.dot_dimension_numbers<[1], [0], [0], [1], [0, 0, 1, 1], [], []>} : vector<6x3xf32>, vector<3x672xf32>, vector<6x672xf32> -> vector<6x672xf32>
    %70 = arith.addf %65, %69 : vector<6x672xf32>
    %c14 = arith.constant 14 : index
    %c0_61 = arith.constant 0 : index
    %c0_62 = arith.constant 0 : index
    %71 = vector.load %arg3[%c14, %c0_61, %c0_62] : memref<25x6x3xf32, #tpu.memory_space<vmem>>, vector<1x6x3xf32>
    %72 = vector.shape_cast %71 : vector<1x6x3xf32> to vector<6x3xf32>
    %c0_63 = arith.constant 0 : index
    %c60 = arith.constant 60 : index
    %73 = vector.load %arg0[%c0_63, %c60] : memref<3x896xf32, #tpu.memory_space<vmem>>, vector<3x672xf32>
    %cst_64 = arith.constant dense<0.000000e+00> : vector<6x672xf32>
    %74 = tpu.matmul %72, %73, %cst_64 {dimension_numbers = #tpu.dot_dimension_numbers<[1], [0], [0], [1], [0, 0, 1, 1], [], []>} : vector<6x3xf32>, vector<3x672xf32>, vector<6x672xf32> -> vector<6x672xf32>
    %75 = arith.addf %70, %74 : vector<6x672xf32>
    %c15 = arith.constant 15 : index
    %c0_65 = arith.constant 0 : index
    %c0_66 = arith.constant 0 : index
    %76 = vector.load %arg3[%c15, %c0_65, %c0_66] : memref<25x6x3xf32, #tpu.memory_space<vmem>>, vector<1x6x3xf32>
    %77 = vector.shape_cast %76 : vector<1x6x3xf32> to vector<6x3xf32>
    %c0_67 = arith.constant 0 : index
    %c84 = arith.constant 84 : index
    %78 = vector.load %arg0[%c0_67, %c84] : memref<3x896xf32, #tpu.memory_space<vmem>>, vector<3x672xf32>
    %cst_68 = arith.constant dense<0.000000e+00> : vector<6x672xf32>
    %79 = tpu.matmul %77, %78, %cst_68 {dimension_numbers = #tpu.dot_dimension_numbers<[1], [0], [0], [1], [0, 0, 1, 1], [], []>} : vector<6x3xf32>, vector<3x672xf32>, vector<6x672xf32> -> vector<6x672xf32>
    %80 = arith.addf %75, %79 : vector<6x672xf32>
    %c16 = arith.constant 16 : index
    %c0_69 = arith.constant 0 : index
    %c0_70 = arith.constant 0 : index
    %81 = vector.load %arg3[%c16, %c0_69, %c0_70] : memref<25x6x3xf32, #tpu.memory_space<vmem>>, vector<1x6x3xf32>
    %82 = vector.shape_cast %81 : vector<1x6x3xf32> to vector<6x3xf32>
    %c0_71 = arith.constant 0 : index
    %c85 = arith.constant 85 : index
    %83 = vector.load %arg0[%c0_71, %c85] : memref<3x896xf32, #tpu.memory_space<vmem>>, vector<3x672xf32>
    %cst_72 = arith.constant dense<0.000000e+00> : vector<6x672xf32>
    %84 = tpu.matmul %82, %83, %cst_72 {dimension_numbers = #tpu.dot_dimension_numbers<[1], [0], [0], [1], [0, 0, 1, 1], [], []>} : vector<6x3xf32>, vector<3x672xf32>, vector<6x672xf32> -> vector<6x672xf32>
    %85 = arith.addf %80, %84 : vector<6x672xf32>
    %c17 = arith.constant 17 : index
    %c0_73 = arith.constant 0 : index
    %c0_74 = arith.constant 0 : index
    %86 = vector.load %arg3[%c17, %c0_73, %c0_74] : memref<25x6x3xf32, #tpu.memory_space<vmem>>, vector<1x6x3xf32>
    %87 = vector.shape_cast %86 : vector<1x6x3xf32> to vector<6x3xf32>
    %c0_75 = arith.constant 0 : index
    %c86 = arith.constant 86 : index
    %88 = vector.load %arg0[%c0_75, %c86] : memref<3x896xf32, #tpu.memory_space<vmem>>, vector<3x672xf32>
    %cst_76 = arith.constant dense<0.000000e+00> : vector<6x672xf32>
    %89 = tpu.matmul %87, %88, %cst_76 {dimension_numbers = #tpu.dot_dimension_numbers<[1], [0], [0], [1], [0, 0, 1, 1], [], []>} : vector<6x3xf32>, vector<3x672xf32>, vector<6x672xf32> -> vector<6x672xf32>
    %90 = arith.addf %85, %89 : vector<6x672xf32>
    %c18 = arith.constant 18 : index
    %c0_77 = arith.constant 0 : index
    %c0_78 = arith.constant 0 : index
    %91 = vector.load %arg3[%c18, %c0_77, %c0_78] : memref<25x6x3xf32, #tpu.memory_space<vmem>>, vector<1x6x3xf32>
    %92 = vector.shape_cast %91 : vector<1x6x3xf32> to vector<6x3xf32>
    %c0_79 = arith.constant 0 : index
    %c87 = arith.constant 87 : index
    %93 = vector.load %arg0[%c0_79, %c87] : memref<3x896xf32, #tpu.memory_space<vmem>>, vector<3x672xf32>
    %cst_80 = arith.constant dense<0.000000e+00> : vector<6x672xf32>
    %94 = tpu.matmul %92, %93, %cst_80 {dimension_numbers = #tpu.dot_dimension_numbers<[1], [0], [0], [1], [0, 0, 1, 1], [], []>} : vector<6x3xf32>, vector<3x672xf32>, vector<6x672xf32> -> vector<6x672xf32>
    %95 = arith.addf %90, %94 : vector<6x672xf32>
    %c19 = arith.constant 19 : index
    %c0_81 = arith.constant 0 : index
    %c0_82 = arith.constant 0 : index
    %96 = vector.load %arg3[%c19, %c0_81, %c0_82] : memref<25x6x3xf32, #tpu.memory_space<vmem>>, vector<1x6x3xf32>
    %97 = vector.shape_cast %96 : vector<1x6x3xf32> to vector<6x3xf32>
    %c0_83 = arith.constant 0 : index
    %c88 = arith.constant 88 : index
    %98 = vector.load %arg0[%c0_83, %c88] : memref<3x896xf32, #tpu.memory_space<vmem>>, vector<3x672xf32>
    %cst_84 = arith.constant dense<0.000000e+00> : vector<6x672xf32>
    %99 = tpu.matmul %97, %98, %cst_84 {dimension_numbers = #tpu.dot_dimension_numbers<[1], [0], [0], [1], [0, 0, 1, 1], [], []>} : vector<6x3xf32>, vector<3x672xf32>, vector<6x672xf32> -> vector<6x672xf32>
    %100 = arith.addf %95, %99 : vector<6x672xf32>
    %c20 = arith.constant 20 : index
    %c0_85 = arith.constant 0 : index
    %c0_86 = arith.constant 0 : index
    %101 = vector.load %arg3[%c20, %c0_85, %c0_86] : memref<25x6x3xf32, #tpu.memory_space<vmem>>, vector<1x6x3xf32>
    %102 = vector.shape_cast %101 : vector<1x6x3xf32> to vector<6x3xf32>
    %c0_87 = arith.constant 0 : index
    %c112 = arith.constant 112 : index
    %103 = vector.load %arg0[%c0_87, %c112] : memref<3x896xf32, #tpu.memory_space<vmem>>, vector<3x672xf32>
    %cst_88 = arith.constant dense<0.000000e+00> : vector<6x672xf32>
    %104 = tpu.matmul %102, %103, %cst_88 {dimension_numbers = #tpu.dot_dimension_numbers<[1], [0], [0], [1], [0, 0, 1, 1], [], []>} : vector<6x3xf32>, vector<3x672xf32>, vector<6x672xf32> -> vector<6x672xf32>
    %105 = arith.addf %100, %104 : vector<6x672xf32>
    %c21 = arith.constant 21 : index
    %c0_89 = arith.constant 0 : index
    %c0_90 = arith.constant 0 : index
    %106 = vector.load %arg3[%c21, %c0_89, %c0_90] : memref<25x6x3xf32, #tpu.memory_space<vmem>>, vector<1x6x3xf32>
    %107 = vector.shape_cast %106 : vector<1x6x3xf32> to vector<6x3xf32>
    %c0_91 = arith.constant 0 : index
    %c113 = arith.constant 113 : index
    %108 = vector.load %arg0[%c0_91, %c113] : memref<3x896xf32, #tpu.memory_space<vmem>>, vector<3x672xf32>
    %cst_92 = arith.constant dense<0.000000e+00> : vector<6x672xf32>
    %109 = tpu.matmul %107, %108, %cst_92 {dimension_numbers = #tpu.dot_dimension_numbers<[1], [0], [0], [1], [0, 0, 1, 1], [], []>} : vector<6x3xf32>, vector<3x672xf32>, vector<6x672xf32> -> vector<6x672xf32>
    %110 = arith.addf %105, %109 : vector<6x672xf32>
    %c22 = arith.constant 22 : index
    %c0_93 = arith.constant 0 : index
    %c0_94 = arith.constant 0 : index
    %111 = vector.load %arg3[%c22, %c0_93, %c0_94] : memref<25x6x3xf32, #tpu.memory_space<vmem>>, vector<1x6x3xf32>
    %112 = vector.shape_cast %111 : vector<1x6x3xf32> to vector<6x3xf32>
    %c0_95 = arith.constant 0 : index
    %c114 = arith.constant 114 : index
    %113 = vector.load %arg0[%c0_95, %c114] : memref<3x896xf32, #tpu.memory_space<vmem>>, vector<3x672xf32>
    %cst_96 = arith.constant dense<0.000000e+00> : vector<6x672xf32>
    %114 = tpu.matmul %112, %113, %cst_96 {dimension_numbers = #tpu.dot_dimension_numbers<[1], [0], [0], [1], [0, 0, 1, 1], [], []>} : vector<6x3xf32>, vector<3x672xf32>, vector<6x672xf32> -> vector<6x672xf32>
    %115 = arith.addf %110, %114 : vector<6x672xf32>
    %c23 = arith.constant 23 : index
    %c0_97 = arith.constant 0 : index
    %c0_98 = arith.constant 0 : index
    %116 = vector.load %arg3[%c23, %c0_97, %c0_98] : memref<25x6x3xf32, #tpu.memory_space<vmem>>, vector<1x6x3xf32>
    %117 = vector.shape_cast %116 : vector<1x6x3xf32> to vector<6x3xf32>
    %c0_99 = arith.constant 0 : index
    %c115 = arith.constant 115 : index
    %118 = vector.load %arg0[%c0_99, %c115] : memref<3x896xf32, #tpu.memory_space<vmem>>, vector<3x672xf32>
    %cst_100 = arith.constant dense<0.000000e+00> : vector<6x672xf32>
    %119 = tpu.matmul %117, %118, %cst_100 {dimension_numbers = #tpu.dot_dimension_numbers<[1], [0], [0], [1], [0, 0, 1, 1], [], []>} : vector<6x3xf32>, vector<3x672xf32>, vector<6x672xf32> -> vector<6x672xf32>
    %120 = arith.addf %115, %119 : vector<6x672xf32>
    %c24 = arith.constant 24 : index
    %c0_101 = arith.constant 0 : index
    %c0_102 = arith.constant 0 : index
    %121 = vector.load %arg3[%c24, %c0_101, %c0_102] : memref<25x6x3xf32, #tpu.memory_space<vmem>>, vector<1x6x3xf32>
    %122 = vector.shape_cast %121 : vector<1x6x3xf32> to vector<6x3xf32>
    %c0_103 = arith.constant 0 : index
    %c116 = arith.constant 116 : index
    %123 = vector.load %arg0[%c0_103, %c116] : memref<3x896xf32, #tpu.memory_space<vmem>>, vector<3x672xf32>
    %cst_104 = arith.constant dense<0.000000e+00> : vector<6x672xf32>
    %124 = tpu.matmul %122, %123, %cst_104 {dimension_numbers = #tpu.dot_dimension_numbers<[1], [0], [0], [1], [0, 0, 1, 1], [], []>} : vector<6x3xf32>, vector<3x672xf32>, vector<6x672xf32> -> vector<6x672xf32>
    %125 = arith.addf %120, %124 : vector<6x672xf32>
    %c0_105 = arith.constant 0 : index
    %c0_106 = arith.constant 0 : index
    %126 = vector.load %arg4[%c0_105, %c0_106] : memref<6x1xf32, #tpu.memory_space<vmem>>, vector<6x1xf32>
    %127 = vector.broadcast %126 : vector<6x1xf32> to vector<6x672xf32>
    %128 = arith.addf %125, %127 : vector<6x672xf32>
    %cst_107 = arith.constant 0.000000e+00 : f32
    %129 = vector.broadcast %cst_107 : f32 to vector<6x672xf32>
    %130 = arith.maximumf %128, %129 : vector<6x672xf32>
    %c0_108 = arith.constant 0 : index
    %c0_109 = arith.constant 0 : index
    %131 = vector.load %arg25[%c0_108, %c0_109] : memref<6x672xf32, #tpu.memory_space<vmem>>, vector<6x672xf32>
    tpu.vector_store %arg25[%c0_108, %c0_109], %130 {strides = array<i32>} : memref<6x672xf32, #tpu.memory_space<vmem>>, vector<6x672xf32>,
    %c0_110 = arith.constant 0 : index
    %c0_111 = arith.constant 0 : index
    %132 = vector.load %arg25[%c0_110, %c0_111] : memref<6x672xf32, #tpu.memory_space<vmem>>, vector<6x639xf32>
    %c0_112 = arith.constant 0 : index
    %c1_113 = arith.constant 1 : index
    %133 = vector.load %arg25[%c0_112, %c1_113] : memref<6x672xf32, #tpu.memory_space<vmem>>, vector<6x639xf32>
    %134 = arith.maximumf %132, %133 : vector<6x639xf32>
    %c0_114 = arith.constant 0 : index
    %c28_115 = arith.constant 28 : index
    %135 = vector.load %arg25[%c0_114, %c28_115] : memref<6x672xf32, #tpu.memory_space<vmem>>, vector<6x639xf32>
    %c0_116 = arith.constant 0 : index
    %c29_117 = arith.constant 29 : index
    %136 = vector.load %arg25[%c0_116, %c29_117] : memref<6x672xf32, #tpu.memory_space<vmem>>, vector<6x639xf32>
    %137 = arith.maximumf %135, %136 : vector<6x639xf32>
    %138 = arith.maximumf %134, %137 : vector<6x639xf32>
    %c0_118 = arith.constant 0 : index
    %c0_119 = arith.constant 0 : index
    %139 = vector.load %arg7[%c0_118, %c0_119] : memref<639x320xf32, #tpu.memory_space<vmem>>, vector<639x320xf32>
    %cst_120 = arith.constant dense<0.000000e+00> : vector<6x320xf32>
    %140 = tpu.matmul %138, %139, %cst_120 {dimension_numbers = #tpu.dot_dimension_numbers<[1], [0], [0], [1], [0, 0, 1, 1], [], []>} : vector<6x639xf32>, vector<639x320xf32>, vector<6x320xf32> -> vector<6x320xf32>
    %c0_121 = arith.constant 0 : index
    %c0_122 = arith.constant 0 : index
    %141 = vector.load %arg26[%c0_121, %c0_122] : memref<6x320xf32, #tpu.memory_space<vmem>>, vector<6x320xf32>
    tpu.vector_store %arg26[%c0_121, %c0_122], %140 {strides = array<i32>} : memref<6x320xf32, #tpu.memory_space<vmem>>, vector<6x320xf32>,
    %cst_123 = arith.constant 0.000000e+00 : f32
    %142 = vector.broadcast %cst_123 : f32 to vector<10x204xf32>
    %c0_124 = arith.constant 0 : index
    %c0_125 = arith.constant 0 : index
    %c0_126 = arith.constant 0 : index
    %143 = vector.load %arg5[%c0_124, %c0_125, %c0_126] : memref<25x10x6xf32, #tpu.memory_space<vmem>>, vector<1x10x6xf32>
    %144 = vector.shape_cast %143 : vector<1x10x6xf32> to vector<10x6xf32>
    %c0_127 = arith.constant 0 : index
    %c0_128 = arith.constant 0 : index
    %145 = vector.load %arg26[%c0_127, %c0_128] : memref<6x320xf32, #tpu.memory_space<vmem>>, vector<6x204xf32>
    %cst_129 = arith.constant dense<0.000000e+00> : vector<10x204xf32>
    %146 = tpu.matmul %144, %145, %cst_129 {dimension_numbers = #tpu.dot_dimension_numbers<[1], [0], [0], [1], [0, 0, 1, 1], [], []>} : vector<10x6xf32>, vector<6x204xf32>, vector<10x204xf32> -> vector<10x204xf32>
    %147 = arith.addf %142, %146 : vector<10x204xf32>
    %c1_130 = arith.constant 1 : index
    %c0_131 = arith.constant 0 : index
    %c0_132 = arith.constant 0 : index
    %148 = vector.load %arg5[%c1_130, %c0_131, %c0_132] : memref<25x10x6xf32, #tpu.memory_space<vmem>>, vector<1x10x6xf32>
    %149 = vector.shape_cast %148 : vector<1x10x6xf32> to vector<10x6xf32>
    %c0_133 = arith.constant 0 : index
    %c1_134 = arith.constant 1 : index
    %150 = vector.load %arg26[%c0_133, %c1_134] : memref<6x320xf32, #tpu.memory_space<vmem>>, vector<6x204xf32>
    %cst_135 = arith.constant dense<0.000000e+00> : vector<10x204xf32>
    %151 = tpu.matmul %149, %150, %cst_135 {dimension_numbers = #tpu.dot_dimension_numbers<[1], [0], [0], [1], [0, 0, 1, 1], [], []>} : vector<10x6xf32>, vector<6x204xf32>, vector<10x204xf32> -> vector<10x204xf32>
    %152 = arith.addf %147, %151 : vector<10x204xf32>
    %c2_136 = arith.constant 2 : index
    %c0_137 = arith.constant 0 : index
    %c0_138 = arith.constant 0 : index
    %153 = vector.load %arg5[%c2_136, %c0_137, %c0_138] : memref<25x10x6xf32, #tpu.memory_space<vmem>>, vector<1x10x6xf32>
    %154 = vector.shape_cast %153 : vector<1x10x6xf32> to vector<10x6xf32>
    %c0_139 = arith.constant 0 : index
    %c2_140 = arith.constant 2 : index
    %155 = vector.load %arg26[%c0_139, %c2_140] : memref<6x320xf32, #tpu.memory_space<vmem>>, vector<6x204xf32>
    %cst_141 = arith.constant dense<0.000000e+00> : vector<10x204xf32>
    %156 = tpu.matmul %154, %155, %cst_141 {dimension_numbers = #tpu.dot_dimension_numbers<[1], [0], [0], [1], [0, 0, 1, 1], [], []>} : vector<10x6xf32>, vector<6x204xf32>, vector<10x204xf32> -> vector<10x204xf32>
    %157 = arith.addf %152, %156 : vector<10x204xf32>
    %c3_142 = arith.constant 3 : index
    %c0_143 = arith.constant 0 : index
    %c0_144 = arith.constant 0 : index
    %158 = vector.load %arg5[%c3_142, %c0_143, %c0_144] : memref<25x10x6xf32, #tpu.memory_space<vmem>>, vector<1x10x6xf32>
    %159 = vector.shape_cast %158 : vector<1x10x6xf32> to vector<10x6xf32>
    %c0_145 = arith.constant 0 : index
    %c3_146 = arith.constant 3 : index
    %160 = vector.load %arg26[%c0_145, %c3_146] : memref<6x320xf32, #tpu.memory_space<vmem>>, vector<6x204xf32>
    %cst_147 = arith.constant dense<0.000000e+00> : vector<10x204xf32>
    %161 = tpu.matmul %159, %160, %cst_147 {dimension_numbers = #tpu.dot_dimension_numbers<[1], [0], [0], [1], [0, 0, 1, 1], [], []>} : vector<10x6xf32>, vector<6x204xf32>, vector<10x204xf32> -> vector<10x204xf32>
    %162 = arith.addf %157, %161 : vector<10x204xf32>
    %c4_148 = arith.constant 4 : index
    %c0_149 = arith.constant 0 : index
    %c0_150 = arith.constant 0 : index
    %163 = vector.load %arg5[%c4_148, %c0_149, %c0_150] : memref<25x10x6xf32, #tpu.memory_space<vmem>>, vector<1x10x6xf32>
    %164 = vector.shape_cast %163 : vector<1x10x6xf32> to vector<10x6xf32>
    %c0_151 = arith.constant 0 : index
    %c4_152 = arith.constant 4 : index
    %165 = vector.load %arg26[%c0_151, %c4_152] : memref<6x320xf32, #tpu.memory_space<vmem>>, vector<6x204xf32>
    %cst_153 = arith.constant dense<0.000000e+00> : vector<10x204xf32>
    %166 = tpu.matmul %164, %165, %cst_153 {dimension_numbers = #tpu.dot_dimension_numbers<[1], [0], [0], [1], [0, 0, 1, 1], [], []>} : vector<10x6xf32>, vector<6x204xf32>, vector<10x204xf32> -> vector<10x204xf32>
    %167 = arith.addf %162, %166 : vector<10x204xf32>
    %c5_154 = arith.constant 5 : index
    %c0_155 = arith.constant 0 : index
    %c0_156 = arith.constant 0 : index
    %168 = vector.load %arg5[%c5_154, %c0_155, %c0_156] : memref<25x10x6xf32, #tpu.memory_space<vmem>>, vector<1x10x6xf32>
    %169 = vector.shape_cast %168 : vector<1x10x6xf32> to vector<10x6xf32>
    %c0_157 = arith.constant 0 : index
    %c28_158 = arith.constant 28 : index
    %170 = vector.load %arg26[%c0_157, %c28_158] : memref<6x320xf32, #tpu.memory_space<vmem>>, vector<6x204xf32>
    %cst_159 = arith.constant dense<0.000000e+00> : vector<10x204xf32>
    %171 = tpu.matmul %169, %170, %cst_159 {dimension_numbers = #tpu.dot_dimension_numbers<[1], [0], [0], [1], [0, 0, 1, 1], [], []>} : vector<10x6xf32>, vector<6x204xf32>, vector<10x204xf32> -> vector<10x204xf32>
    %172 = arith.addf %167, %171 : vector<10x204xf32>
    %c6_160 = arith.constant 6 : index
    %c0_161 = arith.constant 0 : index
    %c0_162 = arith.constant 0 : index
    %173 = vector.load %arg5[%c6_160, %c0_161, %c0_162] : memref<25x10x6xf32, #tpu.memory_space<vmem>>, vector<1x10x6xf32>
    %174 = vector.shape_cast %173 : vector<1x10x6xf32> to vector<10x6xf32>
    %c0_163 = arith.constant 0 : index
    %c29_164 = arith.constant 29 : index
    %175 = vector.load %arg26[%c0_163, %c29_164] : memref<6x320xf32, #tpu.memory_space<vmem>>, vector<6x204xf32>
    %cst_165 = arith.constant dense<0.000000e+00> : vector<10x204xf32>
    %176 = tpu.matmul %174, %175, %cst_165 {dimension_numbers = #tpu.dot_dimension_numbers<[1], [0], [0], [1], [0, 0, 1, 1], [], []>} : vector<10x6xf32>, vector<6x204xf32>, vector<10x204xf32> -> vector<10x204xf32>
    %177 = arith.addf %172, %176 : vector<10x204xf32>
    %c7_166 = arith.constant 7 : index
    %c0_167 = arith.constant 0 : index
    %c0_168 = arith.constant 0 : index
    %178 = vector.load %arg5[%c7_166, %c0_167, %c0_168] : memref<25x10x6xf32, #tpu.memory_space<vmem>>, vector<1x10x6xf32>
    %179 = vector.shape_cast %178 : vector<1x10x6xf32> to vector<10x6xf32>
    %c0_169 = arith.constant 0 : index
    %c30_170 = arith.constant 30 : index
    %180 = vector.load %arg26[%c0_169, %c30_170] : memref<6x320xf32, #tpu.memory_space<vmem>>, vector<6x204xf32>
    %cst_171 = arith.constant dense<0.000000e+00> : vector<10x204xf32>
    %181 = tpu.matmul %179, %180, %cst_171 {dimension_numbers = #tpu.dot_dimension_numbers<[1], [0], [0], [1], [0, 0, 1, 1], [], []>} : vector<10x6xf32>, vector<6x204xf32>, vector<10x204xf32> -> vector<10x204xf32>
    %182 = arith.addf %177, %181 : vector<10x204xf32>
    %c8_172 = arith.constant 8 : index
    %c0_173 = arith.constant 0 : index
    %c0_174 = arith.constant 0 : index
    %183 = vector.load %arg5[%c8_172, %c0_173, %c0_174] : memref<25x10x6xf32, #tpu.memory_space<vmem>>, vector<1x10x6xf32>
    %184 = vector.shape_cast %183 : vector<1x10x6xf32> to vector<10x6xf32>
    %c0_175 = arith.constant 0 : index
    %c31_176 = arith.constant 31 : index
    %185 = vector.load %arg26[%c0_175, %c31_176] : memref<6x320xf32, #tpu.memory_space<vmem>>, vector<6x204xf32>
    %cst_177 = arith.constant dense<0.000000e+00> : vector<10x204xf32>
    %186 = tpu.matmul %184, %185, %cst_177 {dimension_numbers = #tpu.dot_dimension_numbers<[1], [0], [0], [1], [0, 0, 1, 1], [], []>} : vector<10x6xf32>, vector<6x204xf32>, vector<10x204xf32> -> vector<10x204xf32>
    %187 = arith.addf %182, %186 : vector<10x204xf32>
    %c9_178 = arith.constant 9 : index
    %c0_179 = arith.constant 0 : index
    %c0_180 = arith.constant 0 : index
    %188 = vector.load %arg5[%c9_178, %c0_179, %c0_180] : memref<25x10x6xf32, #tpu.memory_space<vmem>>, vector<1x10x6xf32>
    %189 = vector.shape_cast %188 : vector<1x10x6xf32> to vector<10x6xf32>
    %c0_181 = arith.constant 0 : index
    %c32_182 = arith.constant 32 : index
    %190 = vector.load %arg26[%c0_181, %c32_182] : memref<6x320xf32, #tpu.memory_space<vmem>>, vector<6x204xf32>
    %cst_183 = arith.constant dense<0.000000e+00> : vector<10x204xf32>
    %191 = tpu.matmul %189, %190, %cst_183 {dimension_numbers = #tpu.dot_dimension_numbers<[1], [0], [0], [1], [0, 0, 1, 1], [], []>} : vector<10x6xf32>, vector<6x204xf32>, vector<10x204xf32> -> vector<10x204xf32>
    %192 = arith.addf %187, %191 : vector<10x204xf32>
    %c10_184 = arith.constant 10 : index
    %c0_185 = arith.constant 0 : index
    %c0_186 = arith.constant 0 : index
    %193 = vector.load %arg5[%c10_184, %c0_185, %c0_186] : memref<25x10x6xf32, #tpu.memory_space<vmem>>, vector<1x10x6xf32>
    %194 = vector.shape_cast %193 : vector<1x10x6xf32> to vector<10x6xf32>
    %c0_187 = arith.constant 0 : index
    %c56_188 = arith.constant 56 : index
    %195 = vector.load %arg26[%c0_187, %c56_188] : memref<6x320xf32, #tpu.memory_space<vmem>>, vector<6x204xf32>
    %cst_189 = arith.constant dense<0.000000e+00> : vector<10x204xf32>
    %196 = tpu.matmul %194, %195, %cst_189 {dimension_numbers = #tpu.dot_dimension_numbers<[1], [0], [0], [1], [0, 0, 1, 1], [], []>} : vector<10x6xf32>, vector<6x204xf32>, vector<10x204xf32> -> vector<10x204xf32>
    %197 = arith.addf %192, %196 : vector<10x204xf32>
    %c11_190 = arith.constant 11 : index
    %c0_191 = arith.constant 0 : index
    %c0_192 = arith.constant 0 : index
    %198 = vector.load %arg5[%c11_190, %c0_191, %c0_192] : memref<25x10x6xf32, #tpu.memory_space<vmem>>, vector<1x10x6xf32>
    %199 = vector.shape_cast %198 : vector<1x10x6xf32> to vector<10x6xf32>
    %c0_193 = arith.constant 0 : index
    %c57_194 = arith.constant 57 : index
    %200 = vector.load %arg26[%c0_193, %c57_194] : memref<6x320xf32, #tpu.memory_space<vmem>>, vector<6x204xf32>
    %cst_195 = arith.constant dense<0.000000e+00> : vector<10x204xf32>
    %201 = tpu.matmul %199, %200, %cst_195 {dimension_numbers = #tpu.dot_dimension_numbers<[1], [0], [0], [1], [0, 0, 1, 1], [], []>} : vector<10x6xf32>, vector<6x204xf32>, vector<10x204xf32> -> vector<10x204xf32>
    %202 = arith.addf %197, %201 : vector<10x204xf32>
    %c12_196 = arith.constant 12 : index
    %c0_197 = arith.constant 0 : index
    %c0_198 = arith.constant 0 : index
    %203 = vector.load %arg5[%c12_196, %c0_197, %c0_198] : memref<25x10x6xf32, #tpu.memory_space<vmem>>, vector<1x10x6xf32>
    %204 = vector.shape_cast %203 : vector<1x10x6xf32> to vector<10x6xf32>
    %c0_199 = arith.constant 0 : index
    %c58_200 = arith.constant 58 : index
    %205 = vector.load %arg26[%c0_199, %c58_200] : memref<6x320xf32, #tpu.memory_space<vmem>>, vector<6x204xf32>
    %cst_201 = arith.constant dense<0.000000e+00> : vector<10x204xf32>
    %206 = tpu.matmul %204, %205, %cst_201 {dimension_numbers = #tpu.dot_dimension_numbers<[1], [0], [0], [1], [0, 0, 1, 1], [], []>} : vector<10x6xf32>, vector<6x204xf32>, vector<10x204xf32> -> vector<10x204xf32>
    %207 = arith.addf %202, %206 : vector<10x204xf32>
    %c13_202 = arith.constant 13 : index
    %c0_203 = arith.constant 0 : index
    %c0_204 = arith.constant 0 : index
    %208 = vector.load %arg5[%c13_202, %c0_203, %c0_204] : memref<25x10x6xf32, #tpu.memory_space<vmem>>, vector<1x10x6xf32>
    %209 = vector.shape_cast %208 : vector<1x10x6xf32> to vector<10x6xf32>
    %c0_205 = arith.constant 0 : index
    %c59_206 = arith.constant 59 : index
    %210 = vector.load %arg26[%c0_205, %c59_206] : memref<6x320xf32, #tpu.memory_space<vmem>>, vector<6x204xf32>
    %cst_207 = arith.constant dense<0.000000e+00> : vector<10x204xf32>
    %211 = tpu.matmul %209, %210, %cst_207 {dimension_numbers = #tpu.dot_dimension_numbers<[1], [0], [0], [1], [0, 0, 1, 1], [], []>} : vector<10x6xf32>, vector<6x204xf32>, vector<10x204xf32> -> vector<10x204xf32>
    %212 = arith.addf %207, %211 : vector<10x204xf32>
    %c14_208 = arith.constant 14 : index
    %c0_209 = arith.constant 0 : index
    %c0_210 = arith.constant 0 : index
    %213 = vector.load %arg5[%c14_208, %c0_209, %c0_210] : memref<25x10x6xf32, #tpu.memory_space<vmem>>, vector<1x10x6xf32>
    %214 = vector.shape_cast %213 : vector<1x10x6xf32> to vector<10x6xf32>
    %c0_211 = arith.constant 0 : index
    %c60_212 = arith.constant 60 : index
    %215 = vector.load %arg26[%c0_211, %c60_212] : memref<6x320xf32, #tpu.memory_space<vmem>>, vector<6x204xf32>
    %cst_213 = arith.constant dense<0.000000e+00> : vector<10x204xf32>
    %216 = tpu.matmul %214, %215, %cst_213 {dimension_numbers = #tpu.dot_dimension_numbers<[1], [0], [0], [1], [0, 0, 1, 1], [], []>} : vector<10x6xf32>, vector<6x204xf32>, vector<10x204xf32> -> vector<10x204xf32>
    %217 = arith.addf %212, %216 : vector<10x204xf32>
    %c15_214 = arith.constant 15 : index
    %c0_215 = arith.constant 0 : index
    %c0_216 = arith.constant 0 : index
    %218 = vector.load %arg5[%c15_214, %c0_215, %c0_216] : memref<25x10x6xf32, #tpu.memory_space<vmem>>, vector<1x10x6xf32>
    %219 = vector.shape_cast %218 : vector<1x10x6xf32> to vector<10x6xf32>
    %c0_217 = arith.constant 0 : index
    %c84_218 = arith.constant 84 : index
    %220 = vector.load %arg26[%c0_217, %c84_218] : memref<6x320xf32, #tpu.memory_space<vmem>>, vector<6x204xf32>
    %cst_219 = arith.constant dense<0.000000e+00> : vector<10x204xf32>
    %221 = tpu.matmul %219, %220, %cst_219 {dimension_numbers = #tpu.dot_dimension_numbers<[1], [0], [0], [1], [0, 0, 1, 1], [], []>} : vector<10x6xf32>, vector<6x204xf32>, vector<10x204xf32> -> vector<10x204xf32>
    %222 = arith.addf %217, %221 : vector<10x204xf32>
    %c16_220 = arith.constant 16 : index
    %c0_221 = arith.constant 0 : index
    %c0_222 = arith.constant 0 : index
    %223 = vector.load %arg5[%c16_220, %c0_221, %c0_222] : memref<25x10x6xf32, #tpu.memory_space<vmem>>, vector<1x10x6xf32>
    %224 = vector.shape_cast %223 : vector<1x10x6xf32> to vector<10x6xf32>
    %c0_223 = arith.constant 0 : index
    %c85_224 = arith.constant 85 : index
    %225 = vector.load %arg26[%c0_223, %c85_224] : memref<6x320xf32, #tpu.memory_space<vmem>>, vector<6x204xf32>
    %cst_225 = arith.constant dense<0.000000e+00> : vector<10x204xf32>
    %226 = tpu.matmul %224, %225, %cst_225 {dimension_numbers = #tpu.dot_dimension_numbers<[1], [0], [0], [1], [0, 0, 1, 1], [], []>} : vector<10x6xf32>, vector<6x204xf32>, vector<10x204xf32> -> vector<10x204xf32>
    %227 = arith.addf %222, %226 : vector<10x204xf32>
    %c17_226 = arith.constant 17 : index
    %c0_227 = arith.constant 0 : index
    %c0_228 = arith.constant 0 : index
    %228 = vector.load %arg5[%c17_226, %c0_227, %c0_228] : memref<25x10x6xf32, #tpu.memory_space<vmem>>, vector<1x10x6xf32>
    %229 = vector.shape_cast %228 : vector<1x10x6xf32> to vector<10x6xf32>
    %c0_229 = arith.constant 0 : index
    %c86_230 = arith.constant 86 : index
    %230 = vector.load %arg26[%c0_229, %c86_230] : memref<6x320xf32, #tpu.memory_space<vmem>>, vector<6x204xf32>
    %cst_231 = arith.constant dense<0.000000e+00> : vector<10x204xf32>
    %231 = tpu.matmul %229, %230, %cst_231 {dimension_numbers = #tpu.dot_dimension_numbers<[1], [0], [0], [1], [0, 0, 1, 1], [], []>} : vector<10x6xf32>, vector<6x204xf32>, vector<10x204xf32> -> vector<10x204xf32>
    %232 = arith.addf %227, %231 : vector<10x204xf32>
    %c18_232 = arith.constant 18 : index
    %c0_233 = arith.constant 0 : index
    %c0_234 = arith.constant 0 : index
    %233 = vector.load %arg5[%c18_232, %c0_233, %c0_234] : memref<25x10x6xf32, #tpu.memory_space<vmem>>, vector<1x10x6xf32>
    %234 = vector.shape_cast %233 : vector<1x10x6xf32> to vector<10x6xf32>
    %c0_235 = arith.constant 0 : index
    %c87_236 = arith.constant 87 : index
    %235 = vector.load %arg26[%c0_235, %c87_236] : memref<6x320xf32, #tpu.memory_space<vmem>>, vector<6x204xf32>
    %cst_237 = arith.constant dense<0.000000e+00> : vector<10x204xf32>
    %236 = tpu.matmul %234, %235, %cst_237 {dimension_numbers = #tpu.dot_dimension_numbers<[1], [0], [0], [1], [0, 0, 1, 1], [], []>} : vector<10x6xf32>, vector<6x204xf32>, vector<10x204xf32> -> vector<10x204xf32>
    %237 = arith.addf %232, %236 : vector<10x204xf32>
    %c19_238 = arith.constant 19 : index
    %c0_239 = arith.constant 0 : index
    %c0_240 = arith.constant 0 : index
    %238 = vector.load %arg5[%c19_238, %c0_239, %c0_240] : memref<25x10x6xf32, #tpu.memory_space<vmem>>, vector<1x10x6xf32>
    %239 = vector.shape_cast %238 : vector<1x10x6xf32> to vector<10x6xf32>
    %c0_241 = arith.constant 0 : index
    %c88_242 = arith.constant 88 : index
    %240 = vector.load %arg26[%c0_241, %c88_242] : memref<6x320xf32, #tpu.memory_space<vmem>>, vector<6x204xf32>
    %cst_243 = arith.constant dense<0.000000e+00> : vector<10x204xf32>
    %241 = tpu.matmul %239, %240, %cst_243 {dimension_numbers = #tpu.dot_dimension_numbers<[1], [0], [0], [1], [0, 0, 1, 1], [], []>} : vector<10x6xf32>, vector<6x204xf32>, vector<10x204xf32> -> vector<10x204xf32>
    %242 = arith.addf %237, %241 : vector<10x204xf32>
    %c20_244 = arith.constant 20 : index
    %c0_245 = arith.constant 0 : index
    %c0_246 = arith.constant 0 : index
    %243 = vector.load %arg5[%c20_244, %c0_245, %c0_246] : memref<25x10x6xf32, #tpu.memory_space<vmem>>, vector<1x10x6xf32>
    %244 = vector.shape_cast %243 : vector<1x10x6xf32> to vector<10x6xf32>
    %c0_247 = arith.constant 0 : index
    %c112_248 = arith.constant 112 : index
    %245 = vector.load %arg26[%c0_247, %c112_248] : memref<6x320xf32, #tpu.memory_space<vmem>>, vector<6x204xf32>
    %cst_249 = arith.constant dense<0.000000e+00> : vector<10x204xf32>
    %246 = tpu.matmul %244, %245, %cst_249 {dimension_numbers = #tpu.dot_dimension_numbers<[1], [0], [0], [1], [0, 0, 1, 1], [], []>} : vector<10x6xf32>, vector<6x204xf32>, vector<10x204xf32> -> vector<10x204xf32>
    %247 = arith.addf %242, %246 : vector<10x204xf32>
    %c21_250 = arith.constant 21 : index
    %c0_251 = arith.constant 0 : index
    %c0_252 = arith.constant 0 : index
    %248 = vector.load %arg5[%c21_250, %c0_251, %c0_252] : memref<25x10x6xf32, #tpu.memory_space<vmem>>, vector<1x10x6xf32>
    %249 = vector.shape_cast %248 : vector<1x10x6xf32> to vector<10x6xf32>
    %c0_253 = arith.constant 0 : index
    %c113_254 = arith.constant 113 : index
    %250 = vector.load %arg26[%c0_253, %c113_254] : memref<6x320xf32, #tpu.memory_space<vmem>>, vector<6x204xf32>
    %cst_255 = arith.constant dense<0.000000e+00> : vector<10x204xf32>
    %251 = tpu.matmul %249, %250, %cst_255 {dimension_numbers = #tpu.dot_dimension_numbers<[1], [0], [0], [1], [0, 0, 1, 1], [], []>} : vector<10x6xf32>, vector<6x204xf32>, vector<10x204xf32> -> vector<10x204xf32>
    %252 = arith.addf %247, %251 : vector<10x204xf32>
    %c22_256 = arith.constant 22 : index
    %c0_257 = arith.constant 0 : index
    %c0_258 = arith.constant 0 : index
    %253 = vector.load %arg5[%c22_256, %c0_257, %c0_258] : memref<25x10x6xf32, #tpu.memory_space<vmem>>, vector<1x10x6xf32>
    %254 = vector.shape_cast %253 : vector<1x10x6xf32> to vector<10x6xf32>
    %c0_259 = arith.constant 0 : index
    %c114_260 = arith.constant 114 : index
    %255 = vector.load %arg26[%c0_259, %c114_260] : memref<6x320xf32, #tpu.memory_space<vmem>>, vector<6x204xf32>
    %cst_261 = arith.constant dense<0.000000e+00> : vector<10x204xf32>
    %256 = tpu.matmul %254, %255, %cst_261 {dimension_numbers = #tpu.dot_dimension_numbers<[1], [0], [0], [1], [0, 0, 1, 1], [], []>} : vector<10x6xf32>, vector<6x204xf32>, vector<10x204xf32> -> vector<10x204xf32>
    %257 = arith.addf %252, %256 : vector<10x204xf32>
    %c23_262 = arith.constant 23 : index
    %c0_263 = arith.constant 0 : index
    %c0_264 = arith.constant 0 : index
    %258 = vector.load %arg5[%c23_262, %c0_263, %c0_264] : memref<25x10x6xf32, #tpu.memory_space<vmem>>, vector<1x10x6xf32>
    %259 = vector.shape_cast %258 : vector<1x10x6xf32> to vector<10x6xf32>
    %c0_265 = arith.constant 0 : index
    %c115_266 = arith.constant 115 : index
    %260 = vector.load %arg26[%c0_265, %c115_266] : memref<6x320xf32, #tpu.memory_space<vmem>>, vector<6x204xf32>
    %cst_267 = arith.constant dense<0.000000e+00> : vector<10x204xf32>
    %261 = tpu.matmul %259, %260, %cst_267 {dimension_numbers = #tpu.dot_dimension_numbers<[1], [0], [0], [1], [0, 0, 1, 1], [], []>} : vector<10x6xf32>, vector<6x204xf32>, vector<10x204xf32> -> vector<10x204xf32>
    %262 = arith.addf %257, %261 : vector<10x204xf32>
    %c24_268 = arith.constant 24 : index
    %c0_269 = arith.constant 0 : index
    %c0_270 = arith.constant 0 : index
    %263 = vector.load %arg5[%c24_268, %c0_269, %c0_270] : memref<25x10x6xf32, #tpu.memory_space<vmem>>, vector<1x10x6xf32>
    %264 = vector.shape_cast %263 : vector<1x10x6xf32> to vector<10x6xf32>
    %c0_271 = arith.constant 0 : index
    %c116_272 = arith.constant 116 : index
    %265 = vector.load %arg26[%c0_271, %c116_272] : memref<6x320xf32, #tpu.memory_space<vmem>>, vector<6x204xf32>
    %cst_273 = arith.constant dense<0.000000e+00> : vector<10x204xf32>
    %266 = tpu.matmul %264, %265, %cst_273 {dimension_numbers = #tpu.dot_dimension_numbers<[1], [0], [0], [1], [0, 0, 1, 1], [], []>} : vector<10x6xf32>, vector<6x204xf32>, vector<10x204xf32> -> vector<10x204xf32>
    %267 = arith.addf %262, %266 : vector<10x204xf32>
    %c0_274 = arith.constant 0 : index
    %c0_275 = arith.constant 0 : index
    %268 = vector.load %arg6[%c0_274, %c0_275] : memref<10x1xf32, #tpu.memory_space<vmem>>, vector<10x1xf32>
    %269 = vector.broadcast %268 : vector<10x1xf32> to vector<10x204xf32>
    %270 = arith.addf %267, %269 : vector<10x204xf32>
    %cst_276 = arith.constant 0.000000e+00 : f32
    %271 = vector.broadcast %cst_276 : f32 to vector<10x204xf32>
    %272 = arith.maximumf %270, %271 : vector<10x204xf32>
    %c0_277 = arith.constant 0 : index
    %c0_278 = arith.constant 0 : index
    %273 = vector.load %arg27[%c0_277, %c0_278] : memref<10x204xf32, #tpu.memory_space<vmem>>, vector<10x204xf32>
    tpu.vector_store %arg27[%c0_277, %c0_278], %272 {strides = array<i32>} : memref<10x204xf32, #tpu.memory_space<vmem>>, vector<10x204xf32>,
    %c0_279 = arith.constant 0 : index
    %c0_280 = arith.constant 0 : index
    %274 = vector.load %arg27[%c0_279, %c0_280] : memref<10x204xf32, #tpu.memory_space<vmem>>, vector<10x175xf32>
    %c0_281 = arith.constant 0 : index
    %c1_282 = arith.constant 1 : index
    %275 = vector.load %arg27[%c0_281, %c1_282] : memref<10x204xf32, #tpu.memory_space<vmem>>, vector<10x175xf32>
    %276 = arith.maximumf %274, %275 : vector<10x175xf32>
    %c0_283 = arith.constant 0 : index
    %c28_284 = arith.constant 28 : index
    %277 = vector.load %arg27[%c0_283, %c28_284] : memref<10x204xf32, #tpu.memory_space<vmem>>, vector<10x175xf32>
    %c0_285 = arith.constant 0 : index
    %c29_286 = arith.constant 29 : index
    %278 = vector.load %arg27[%c0_285, %c29_286] : memref<10x204xf32, #tpu.memory_space<vmem>>, vector<10x175xf32>
    %279 = arith.maximumf %277, %278 : vector<10x175xf32>
    %280 = arith.maximumf %276, %279 : vector<10x175xf32>
    %c0_287 = arith.constant 0 : index
    %c0_288 = arith.constant 0 : index
    %281 = vector.load %arg8[%c0_287, %c0_288] : memref<175x16xf32, #tpu.memory_space<vmem>>, vector<175x16xf32>
    %cst_289 = arith.constant dense<0.000000e+00> : vector<10x16xf32>
    %282 = tpu.matmul %280, %281, %cst_289 {dimension_numbers = #tpu.dot_dimension_numbers<[1], [0], [0], [1], [0, 0, 1, 1], [], []>} : vector<10x175xf32>, vector<175x16xf32>, vector<10x16xf32> -> vector<10x16xf32>
    %c0_290 = arith.constant 0 : index
    %c0_291 = arith.constant 0 : index
    %283 = vector.load %arg28[%c0_290, %c0_291] : memref<10x16xf32, #tpu.memory_space<vmem>>, vector<10x16xf32>
    tpu.vector_store %arg28[%c0_290, %c0_291], %282 {strides = array<i32>} : memref<10x16xf32, #tpu.memory_space<vmem>>, vector<10x16xf32>,
    %c0_292 = arith.constant 0 : index
    %c0_293 = arith.constant 0 : index
    %284 = vector.load %arg10[%c0_292, %c0_293] : memref<1x200xf32, #tpu.memory_space<vmem>>, vector<1x200xf32>
    %c0_294 = arith.constant 0 : index
    %c0_295 = arith.constant 0 : index
    %285 = vector.load %arg28[%c0_294, %c0_295] : memref<10x16xf32, #tpu.memory_space<vmem>>, vector<1x16xf32>
    %c0_296 = arith.constant 0 : index
    %c0_297 = arith.constant 0 : index
    %286 = vector.load %arg9[%c0_296, %c0_297] : memref<176x200xf32, #tpu.memory_space<vmem>>, vector<16x200xf32>
    %cst_298 = arith.constant dense<0.000000e+00> : vector<1x200xf32>
    %287 = tpu.matmul %285, %286, %cst_298 {dimension_numbers = #tpu.dot_dimension_numbers<[1], [0], [0], [1], [0, 0, 1, 1], [], []>} : vector<1x16xf32>, vector<16x200xf32>, vector<1x200xf32> -> vector<1x200xf32>
    %288 = arith.addf %284, %287 : vector<1x200xf32>
    %c1_299 = arith.constant 1 : index
    %c0_300 = arith.constant 0 : index
    %289 = vector.load %arg28[%c1_299, %c0_300] : memref<10x16xf32, #tpu.memory_space<vmem>>, vector<1x16xf32>
    %c16_301 = arith.constant 16 : index
    %c0_302 = arith.constant 0 : index
    %290 = vector.load %arg9[%c16_301, %c0_302] : memref<176x200xf32, #tpu.memory_space<vmem>>, vector<16x200xf32>
    %cst_303 = arith.constant dense<0.000000e+00> : vector<1x200xf32>
    %291 = tpu.matmul %289, %290, %cst_303 {dimension_numbers = #tpu.dot_dimension_numbers<[1], [0], [0], [1], [0, 0, 1, 1], [], []>} : vector<1x16xf32>, vector<16x200xf32>, vector<1x200xf32> -> vector<1x200xf32>
    %292 = arith.addf %288, %291 : vector<1x200xf32>
    %c2_304 = arith.constant 2 : index
    %c0_305 = arith.constant 0 : index
    %293 = vector.load %arg28[%c2_304, %c0_305] : memref<10x16xf32, #tpu.memory_space<vmem>>, vector<1x16xf32>
    %c32_306 = arith.constant 32 : index
    %c0_307 = arith.constant 0 : index
    %294 = vector.load %arg9[%c32_306, %c0_307] : memref<176x200xf32, #tpu.memory_space<vmem>>, vector<16x200xf32>
    %cst_308 = arith.constant dense<0.000000e+00> : vector<1x200xf32>
    %295 = tpu.matmul %293, %294, %cst_308 {dimension_numbers = #tpu.dot_dimension_numbers<[1], [0], [0], [1], [0, 0, 1, 1], [], []>} : vector<1x16xf32>, vector<16x200xf32>, vector<1x200xf32> -> vector<1x200xf32>
    %296 = arith.addf %292, %295 : vector<1x200xf32>
    %c3_309 = arith.constant 3 : index
    %c0_310 = arith.constant 0 : index
    %297 = vector.load %arg28[%c3_309, %c0_310] : memref<10x16xf32, #tpu.memory_space<vmem>>, vector<1x16xf32>
    %c48 = arith.constant 48 : index
    %c0_311 = arith.constant 0 : index
    %298 = vector.load %arg9[%c48, %c0_311] : memref<176x200xf32, #tpu.memory_space<vmem>>, vector<16x200xf32>
    %cst_312 = arith.constant dense<0.000000e+00> : vector<1x200xf32>
    %299 = tpu.matmul %297, %298, %cst_312 {dimension_numbers = #tpu.dot_dimension_numbers<[1], [0], [0], [1], [0, 0, 1, 1], [], []>} : vector<1x16xf32>, vector<16x200xf32>, vector<1x200xf32> -> vector<1x200xf32>
    %300 = arith.addf %296, %299 : vector<1x200xf32>
    %c4_313 = arith.constant 4 : index
    %c0_314 = arith.constant 0 : index
    %301 = vector.load %arg28[%c4_313, %c0_314] : memref<10x16xf32, #tpu.memory_space<vmem>>, vector<1x16xf32>
    %c64 = arith.constant 64 : index
    %c0_315 = arith.constant 0 : index
    %302 = vector.load %arg9[%c64, %c0_315] : memref<176x200xf32, #tpu.memory_space<vmem>>, vector<16x200xf32>
    %cst_316 = arith.constant dense<0.000000e+00> : vector<1x200xf32>
    %303 = tpu.matmul %301, %302, %cst_316 {dimension_numbers = #tpu.dot_dimension_numbers<[1], [0], [0], [1], [0, 0, 1, 1], [], []>} : vector<1x16xf32>, vector<16x200xf32>, vector<1x200xf32> -> vector<1x200xf32>
    %304 = arith.addf %300, %303 : vector<1x200xf32>
    %c5_317 = arith.constant 5 : index
    %c0_318 = arith.constant 0 : index
    %305 = vector.load %arg28[%c5_317, %c0_318] : memref<10x16xf32, #tpu.memory_space<vmem>>, vector<1x16xf32>
    %c80 = arith.constant 80 : index
    %c0_319 = arith.constant 0 : index
    %306 = vector.load %arg9[%c80, %c0_319] : memref<176x200xf32, #tpu.memory_space<vmem>>, vector<16x200xf32>
    %cst_320 = arith.constant dense<0.000000e+00> : vector<1x200xf32>
    %307 = tpu.matmul %305, %306, %cst_320 {dimension_numbers = #tpu.dot_dimension_numbers<[1], [0], [0], [1], [0, 0, 1, 1], [], []>} : vector<1x16xf32>, vector<16x200xf32>, vector<1x200xf32> -> vector<1x200xf32>
    %308 = arith.addf %304, %307 : vector<1x200xf32>
    %c6_321 = arith.constant 6 : index
    %c0_322 = arith.constant 0 : index
    %309 = vector.load %arg28[%c6_321, %c0_322] : memref<10x16xf32, #tpu.memory_space<vmem>>, vector<1x16xf32>
    %c96 = arith.constant 96 : index
    %c0_323 = arith.constant 0 : index
    %310 = vector.load %arg9[%c96, %c0_323] : memref<176x200xf32, #tpu.memory_space<vmem>>, vector<16x200xf32>
    %cst_324 = arith.constant dense<0.000000e+00> : vector<1x200xf32>
    %311 = tpu.matmul %309, %310, %cst_324 {dimension_numbers = #tpu.dot_dimension_numbers<[1], [0], [0], [1], [0, 0, 1, 1], [], []>} : vector<1x16xf32>, vector<16x200xf32>, vector<1x200xf32> -> vector<1x200xf32>
    %312 = arith.addf %308, %311 : vector<1x200xf32>
    %c7_325 = arith.constant 7 : index
    %c0_326 = arith.constant 0 : index
    %313 = vector.load %arg28[%c7_325, %c0_326] : memref<10x16xf32, #tpu.memory_space<vmem>>, vector<1x16xf32>
    %c112_327 = arith.constant 112 : index
    %c0_328 = arith.constant 0 : index
    %314 = vector.load %arg9[%c112_327, %c0_328] : memref<176x200xf32, #tpu.memory_space<vmem>>, vector<16x200xf32>
    %cst_329 = arith.constant dense<0.000000e+00> : vector<1x200xf32>
    %315 = tpu.matmul %313, %314, %cst_329 {dimension_numbers = #tpu.dot_dimension_numbers<[1], [0], [0], [1], [0, 0, 1, 1], [], []>} : vector<1x16xf32>, vector<16x200xf32>, vector<1x200xf32> -> vector<1x200xf32>
    %316 = arith.addf %312, %315 : vector<1x200xf32>
    %c8_330 = arith.constant 8 : index
    %c0_331 = arith.constant 0 : index
    %317 = vector.load %arg28[%c8_330, %c0_331] : memref<10x16xf32, #tpu.memory_space<vmem>>, vector<1x16xf32>
    %c128 = arith.constant 128 : index
    %c0_332 = arith.constant 0 : index
    %318 = vector.load %arg9[%c128, %c0_332] : memref<176x200xf32, #tpu.memory_space<vmem>>, vector<16x200xf32>
    %cst_333 = arith.constant dense<0.000000e+00> : vector<1x200xf32>
    %319 = tpu.matmul %317, %318, %cst_333 {dimension_numbers = #tpu.dot_dimension_numbers<[1], [0], [0], [1], [0, 0, 1, 1], [], []>} : vector<1x16xf32>, vector<16x200xf32>, vector<1x200xf32> -> vector<1x200xf32>
    %320 = arith.addf %316, %319 : vector<1x200xf32>
    %c9_334 = arith.constant 9 : index
    %c0_335 = arith.constant 0 : index
    %321 = vector.load %arg28[%c9_334, %c0_335] : memref<10x16xf32, #tpu.memory_space<vmem>>, vector<1x16xf32>
    %c144 = arith.constant 144 : index
    %c0_336 = arith.constant 0 : index
    %322 = vector.load %arg9[%c144, %c0_336] : memref<176x200xf32, #tpu.memory_space<vmem>>, vector<16x200xf32>
    %cst_337 = arith.constant dense<0.000000e+00> : vector<1x200xf32>
    %323 = tpu.matmul %321, %322, %cst_337 {dimension_numbers = #tpu.dot_dimension_numbers<[1], [0], [0], [1], [0, 0, 1, 1], [], []>} : vector<1x16xf32>, vector<16x200xf32>, vector<1x200xf32> -> vector<1x200xf32>
    %324 = arith.addf %320, %323 : vector<1x200xf32>
    %c0_338 = arith.constant 0 : index
    %c0_339 = arith.constant 0 : index
    %325 = vector.load %arg1[%c0_338, %c0_339] : memref<1x16xf32, #tpu.memory_space<vmem>>, vector<1x16xf32>
    %c160 = arith.constant 160 : index
    %c0_340 = arith.constant 0 : index
    %326 = vector.load %arg9[%c160, %c0_340] : memref<176x200xf32, #tpu.memory_space<vmem>>, vector<16x200xf32>
    %cst_341 = arith.constant dense<0.000000e+00> : vector<1x200xf32>
    %327 = tpu.matmul %325, %326, %cst_341 {dimension_numbers = #tpu.dot_dimension_numbers<[1], [0], [0], [1], [0, 0, 1, 1], [], []>} : vector<1x16xf32>, vector<16x200xf32>, vector<1x200xf32> -> vector<1x200xf32>
    %328 = arith.addf %324, %327 : vector<1x200xf32>
    %cst_342 = arith.constant 0.000000e+00 : f32
    %329 = vector.broadcast %cst_342 : f32 to vector<1x200xf32>
    %330 = arith.maximumf %328, %329 : vector<1x200xf32>
    %c0_343 = arith.constant 0 : index
    %c0_344 = arith.constant 0 : index
    %331 = vector.load %arg11[%c0_343, %c0_344] : memref<200x100xf32, #tpu.memory_space<vmem>>, vector<200x100xf32>
    %cst_345 = arith.constant dense<0.000000e+00> : vector<1x100xf32>
    %332 = tpu.matmul %330, %331, %cst_345 {dimension_numbers = #tpu.dot_dimension_numbers<[1], [0], [0], [1], [0, 0, 1, 1], [], []>} : vector<1x200xf32>, vector<200x100xf32>, vector<1x100xf32> -> vector<1x100xf32>
    %c0_346 = arith.constant 0 : index
    %c0_347 = arith.constant 0 : index
    %333 = vector.load %arg12[%c0_346, %c0_347] : memref<1x100xf32, #tpu.memory_space<vmem>>, vector<1x100xf32>
    %334 = arith.addf %332, %333 : vector<1x100xf32>
    %cst_348 = arith.constant 0.000000e+00 : f32
    %335 = vector.broadcast %cst_348 : f32 to vector<1x100xf32>
    %336 = arith.maximumf %334, %335 : vector<1x100xf32>
    %c0_349 = arith.constant 0 : index
    %c0_350 = arith.constant 0 : index
    %337 = vector.load %arg13[%c0_349, %c0_350] : memref<100x8xf32, #tpu.memory_space<vmem>>, vector<100x8xf32>
    %cst_351 = arith.constant dense<0.000000e+00> : vector<1x8xf32>
    %338 = tpu.matmul %336, %337, %cst_351 {dimension_numbers = #tpu.dot_dimension_numbers<[1], [0], [0], [1], [0, 0, 1, 1], [], []>} : vector<1x100xf32>, vector<100x8xf32>, vector<1x8xf32> -> vector<1x8xf32>
    %c0_352 = arith.constant 0 : index
    %c0_353 = arith.constant 0 : index
    %339 = vector.load %arg14[%c0_352, %c0_353] : memref<1x8xf32, #tpu.memory_space<vmem>>, vector<1x8xf32>
    %340 = arith.addf %338, %339 : vector<1x8xf32>
    %c0_354 = arith.constant 0 : index
    %c0_355 = arith.constant 0 : index
    %341 = vector.load %arg15[%c0_354, %c0_355] : memref<1x32xf32, #tpu.memory_space<vmem>>, vector<1x32xf32>
    %c0_356 = arith.constant 0 : index
    %c0_357 = arith.constant 0 : index
    %342 = vector.load %arg16[%c0_356, %c0_357] : memref<8x32xf32, #tpu.memory_space<vmem>>, vector<8x32xf32>
    %c0_358 = arith.constant 0 : index
    %c0_359 = arith.constant 0 : index
    %343 = vector.load %arg17[%c0_358, %c0_359] : memref<1x32xf32, #tpu.memory_space<vmem>>, vector<1x32xf32>
    %c0_360 = arith.constant 0 : index
    %c0_361 = arith.constant 0 : index
    %344 = vector.load %arg2[%c0_360, %c0_361] : memref<1x3xf32, #tpu.memory_space<vmem>>, vector<1x3xf32>
    %cst_362 = arith.constant 0.000000e+00 : f32
    %345 = vector.broadcast %cst_362 : f32 to vector<1x8xf32>
    %cst_363 = arith.constant 0.000000e+00 : f32
    %346 = vector.broadcast %cst_363 : f32 to vector<1x8xf32>
    %c0_364 = arith.constant 0 : index
    %c0_365 = arith.constant 0 : index
    %347 = vector.load %arg19[%c0_364, %c0_365] : memref<1x1000xf32, #tpu.memory_space<vmem>>, vector<1x1000xf32>
    %348 = vector.extract_strided_slice %340 {offsets = [0, 0], sizes = [1, 1], strides = [1, 1]} : vector<1x8xf32> to vector<1x1xf32>
    %349 = vector.broadcast %348 : vector<1x1xf32> to vector<1x32xf32>
    %350 = arith.mulf %349, %341 : vector<1x32xf32>
    %cst_366 = arith.constant dense<0.000000e+00> : vector<1x32xf32>
    %351 = tpu.matmul %345, %342, %cst_366 {dimension_numbers = #tpu.dot_dimension_numbers<[1], [0], [0], [1], [0, 0, 1, 1], [], []>} : vector<1x8xf32>, vector<8x32xf32>, vector<1x32xf32> -> vector<1x32xf32>
    %352 = arith.addf %350, %351 : vector<1x32xf32>
    %353 = arith.addf %352, %343 : vector<1x32xf32>
    %354 = vector.extract_strided_slice %353 {offsets = [0, 0], sizes = [1, 24], strides = [1, 1]} : vector<1x32xf32> to vector<1x24xf32>
    %355 = arith.negf %354 : vector<1x24xf32>
    %356 = math.exp %355 : vector<1x24xf32>
    %cst_367 = arith.constant 1.000000e+00 : f32
    %357 = vector.broadcast %cst_367 : f32 to vector<1x24xf32>
    %358 = arith.addf %357, %356 : vector<1x24xf32>
    %359 = arith.divf %357, %358 : vector<1x24xf32>
    %360 = vector.extract_strided_slice %359 {offsets = [0, 0], sizes = [1, 8], strides = [1, 1]} : vector<1x24xf32> to vector<1x8xf32>
    %361 = vector.extract_strided_slice %359 {offsets = [0, 8], sizes = [1, 8], strides = [1, 1]} : vector<1x24xf32> to vector<1x8xf32>
    %362 = vector.extract_strided_slice %359 {offsets = [0, 16], sizes = [1, 8], strides = [1, 1]} : vector<1x24xf32> to vector<1x8xf32>
    %363 = vector.extract_strided_slice %353 {offsets = [0, 24], sizes = [1, 8], strides = [1, 1]} : vector<1x32xf32> to vector<1x8xf32>
    %364 = math.tanh %363 : vector<1x8xf32>
    %365 = arith.mulf %361, %346 : vector<1x8xf32>
    %366 = arith.mulf %360, %364 : vector<1x8xf32>
    %367 = arith.addf %365, %366 : vector<1x8xf32>
    %368 = math.tanh %367 : vector<1x8xf32>
    %369 = arith.mulf %362, %368 : vector<1x8xf32>
    %c0_368 = arith.constant 0 : index
    %c0_369 = arith.constant 0 : index
    %370 = vector.load %arg18[%c0_368, %c0_369] : memref<88x1000xf32, #tpu.memory_space<vmem>>, vector<8x1000xf32>
    %cst_370 = arith.constant dense<0.000000e+00> : vector<1x1000xf32>
    %371 = tpu.matmul %369, %370, %cst_370 {dimension_numbers = #tpu.dot_dimension_numbers<[1], [0], [0], [1], [0, 0, 1, 1], [], []>} : vector<1x8xf32>, vector<8x1000xf32>, vector<1x1000xf32> -> vector<1x1000xf32>
    %372 = arith.addf %347, %371 : vector<1x1000xf32>
    %373 = vector.extract_strided_slice %340 {offsets = [0, 1], sizes = [1, 1], strides = [1, 1]} : vector<1x8xf32> to vector<1x1xf32>
    %374 = vector.broadcast %373 : vector<1x1xf32> to vector<1x32xf32>
    %375 = arith.mulf %374, %341 : vector<1x32xf32>
    %cst_371 = arith.constant dense<0.000000e+00> : vector<1x32xf32>
    %376 = tpu.matmul %369, %342, %cst_371 {dimension_numbers = #tpu.dot_dimension_numbers<[1], [0], [0], [1], [0, 0, 1, 1], [], []>} : vector<1x8xf32>, vector<8x32xf32>, vector<1x32xf32> -> vector<1x32xf32>
    %377 = arith.addf %375, %376 : vector<1x32xf32>
    %378 = arith.addf %377, %343 : vector<1x32xf32>
    %379 = vector.extract_strided_slice %378 {offsets = [0, 0], sizes = [1, 24], strides = [1, 1]} : vector<1x32xf32> to vector<1x24xf32>
    %380 = arith.negf %379 : vector<1x24xf32>
    %381 = math.exp %380 : vector<1x24xf32>
    %cst_372 = arith.constant 1.000000e+00 : f32
    %382 = vector.broadcast %cst_372 : f32 to vector<1x24xf32>
    %383 = arith.addf %382, %381 : vector<1x24xf32>
    %384 = arith.divf %382, %383 : vector<1x24xf32>
    %385 = vector.extract_strided_slice %384 {offsets = [0, 0], sizes = [1, 8], strides = [1, 1]} : vector<1x24xf32> to vector<1x8xf32>
    %386 = vector.extract_strided_slice %384 {offsets = [0, 8], sizes = [1, 8], strides = [1, 1]} : vector<1x24xf32> to vector<1x8xf32>
    %387 = vector.extract_strided_slice %384 {offsets = [0, 16], sizes = [1, 8], strides = [1, 1]} : vector<1x24xf32> to vector<1x8xf32>
    %388 = vector.extract_strided_slice %378 {offsets = [0, 24], sizes = [1, 8], strides = [1, 1]} : vector<1x32xf32> to vector<1x8xf32>
    %389 = math.tanh %388 : vector<1x8xf32>
    %390 = arith.mulf %386, %367 : vector<1x8xf32>
    %391 = arith.mulf %385, %389 : vector<1x8xf32>
    %392 = arith.addf %390, %391 : vector<1x8xf32>
    %393 = math.tanh %392 : vector<1x8xf32>
    %394 = arith.mulf %387, %393 : vector<1x8xf32>
    %c8_373 = arith.constant 8 : index
    %c0_374 = arith.constant 0 : index
    %395 = vector.load %arg18[%c8_373, %c0_374] : memref<88x1000xf32, #tpu.memory_space<vmem>>, vector<8x1000xf32>
    %cst_375 = arith.constant dense<0.000000e+00> : vector<1x1000xf32>
    %396 = tpu.matmul %394, %395, %cst_375 {dimension_numbers = #tpu.dot_dimension_numbers<[1], [0], [0], [1], [0, 0, 1, 1], [], []>} : vector<1x8xf32>, vector<8x1000xf32>, vector<1x1000xf32> -> vector<1x1000xf32>
    %397 = arith.addf %372, %396 : vector<1x1000xf32>
    %398 = vector.extract_strided_slice %340 {offsets = [0, 2], sizes = [1, 1], strides = [1, 1]} : vector<1x8xf32> to vector<1x1xf32>
    %399 = vector.broadcast %398 : vector<1x1xf32> to vector<1x32xf32>
    %400 = arith.mulf %399, %341 : vector<1x32xf32>
    %cst_376 = arith.constant dense<0.000000e+00> : vector<1x32xf32>
    %401 = tpu.matmul %394, %342, %cst_376 {dimension_numbers = #tpu.dot_dimension_numbers<[1], [0], [0], [1], [0, 0, 1, 1], [], []>} : vector<1x8xf32>, vector<8x32xf32>, vector<1x32xf32> -> vector<1x32xf32>
    %402 = arith.addf %400, %401 : vector<1x32xf32>
    %403 = arith.addf %402, %343 : vector<1x32xf32>
    %404 = vector.extract_strided_slice %403 {offsets = [0, 0], sizes = [1, 24], strides = [1, 1]} : vector<1x32xf32> to vector<1x24xf32>
    %405 = arith.negf %404 : vector<1x24xf32>
    %406 = math.exp %405 : vector<1x24xf32>
    %cst_377 = arith.constant 1.000000e+00 : f32
    %407 = vector.broadcast %cst_377 : f32 to vector<1x24xf32>
    %408 = arith.addf %407, %406 : vector<1x24xf32>
    %409 = arith.divf %407, %408 : vector<1x24xf32>
    %410 = vector.extract_strided_slice %409 {offsets = [0, 0], sizes = [1, 8], strides = [1, 1]} : vector<1x24xf32> to vector<1x8xf32>
    %411 = vector.extract_strided_slice %409 {offsets = [0, 8], sizes = [1, 8], strides = [1, 1]} : vector<1x24xf32> to vector<1x8xf32>
    %412 = vector.extract_strided_slice %409 {offsets = [0, 16], sizes = [1, 8], strides = [1, 1]} : vector<1x24xf32> to vector<1x8xf32>
    %413 = vector.extract_strided_slice %403 {offsets = [0, 24], sizes = [1, 8], strides = [1, 1]} : vector<1x32xf32> to vector<1x8xf32>
    %414 = math.tanh %413 : vector<1x8xf32>
    %415 = arith.mulf %411, %392 : vector<1x8xf32>
    %416 = arith.mulf %410, %414 : vector<1x8xf32>
    %417 = arith.addf %415, %416 : vector<1x8xf32>
    %418 = math.tanh %417 : vector<1x8xf32>
    %419 = arith.mulf %412, %418 : vector<1x8xf32>
    %c16_378 = arith.constant 16 : index
    %c0_379 = arith.constant 0 : index
    %420 = vector.load %arg18[%c16_378, %c0_379] : memref<88x1000xf32, #tpu.memory_space<vmem>>, vector<8x1000xf32>
    %cst_380 = arith.constant dense<0.000000e+00> : vector<1x1000xf32>
    %421 = tpu.matmul %419, %420, %cst_380 {dimension_numbers = #tpu.dot_dimension_numbers<[1], [0], [0], [1], [0, 0, 1, 1], [], []>} : vector<1x8xf32>, vector<8x1000xf32>, vector<1x1000xf32> -> vector<1x1000xf32>
    %422 = arith.addf %397, %421 : vector<1x1000xf32>
    %423 = vector.extract_strided_slice %340 {offsets = [0, 3], sizes = [1, 1], strides = [1, 1]} : vector<1x8xf32> to vector<1x1xf32>
    %424 = vector.broadcast %423 : vector<1x1xf32> to vector<1x32xf32>
    %425 = arith.mulf %424, %341 : vector<1x32xf32>
    %cst_381 = arith.constant dense<0.000000e+00> : vector<1x32xf32>
    %426 = tpu.matmul %419, %342, %cst_381 {dimension_numbers = #tpu.dot_dimension_numbers<[1], [0], [0], [1], [0, 0, 1, 1], [], []>} : vector<1x8xf32>, vector<8x32xf32>, vector<1x32xf32> -> vector<1x32xf32>
    %427 = arith.addf %425, %426 : vector<1x32xf32>
    %428 = arith.addf %427, %343 : vector<1x32xf32>
    %429 = vector.extract_strided_slice %428 {offsets = [0, 0], sizes = [1, 24], strides = [1, 1]} : vector<1x32xf32> to vector<1x24xf32>
    %430 = arith.negf %429 : vector<1x24xf32>
    %431 = math.exp %430 : vector<1x24xf32>
    %cst_382 = arith.constant 1.000000e+00 : f32
    %432 = vector.broadcast %cst_382 : f32 to vector<1x24xf32>
    %433 = arith.addf %432, %431 : vector<1x24xf32>
    %434 = arith.divf %432, %433 : vector<1x24xf32>
    %435 = vector.extract_strided_slice %434 {offsets = [0, 0], sizes = [1, 8], strides = [1, 1]} : vector<1x24xf32> to vector<1x8xf32>
    %436 = vector.extract_strided_slice %434 {offsets = [0, 8], sizes = [1, 8], strides = [1, 1]} : vector<1x24xf32> to vector<1x8xf32>
    %437 = vector.extract_strided_slice %434 {offsets = [0, 16], sizes = [1, 8], strides = [1, 1]} : vector<1x24xf32> to vector<1x8xf32>
    %438 = vector.extract_strided_slice %428 {offsets = [0, 24], sizes = [1, 8], strides = [1, 1]} : vector<1x32xf32> to vector<1x8xf32>
    %439 = math.tanh %438 : vector<1x8xf32>
    %440 = arith.mulf %436, %417 : vector<1x8xf32>
    %441 = arith.mulf %435, %439 : vector<1x8xf32>
    %442 = arith.addf %440, %441 : vector<1x8xf32>
    %443 = math.tanh %442 : vector<1x8xf32>
    %444 = arith.mulf %437, %443 : vector<1x8xf32>
    %c24_383 = arith.constant 24 : index
    %c0_384 = arith.constant 0 : index
    %445 = vector.load %arg18[%c24_383, %c0_384] : memref<88x1000xf32, #tpu.memory_space<vmem>>, vector<8x1000xf32>
    %cst_385 = arith.constant dense<0.000000e+00> : vector<1x1000xf32>
    %446 = tpu.matmul %444, %445, %cst_385 {dimension_numbers = #tpu.dot_dimension_numbers<[1], [0], [0], [1], [0, 0, 1, 1], [], []>} : vector<1x8xf32>, vector<8x1000xf32>, vector<1x1000xf32> -> vector<1x1000xf32>
    %447 = arith.addf %422, %446 : vector<1x1000xf32>
    %448 = vector.extract_strided_slice %340 {offsets = [0, 4], sizes = [1, 1], strides = [1, 1]} : vector<1x8xf32> to vector<1x1xf32>
    %449 = vector.broadcast %448 : vector<1x1xf32> to vector<1x32xf32>
    %450 = arith.mulf %449, %341 : vector<1x32xf32>
    %cst_386 = arith.constant dense<0.000000e+00> : vector<1x32xf32>
    %451 = tpu.matmul %444, %342, %cst_386 {dimension_numbers = #tpu.dot_dimension_numbers<[1], [0], [0], [1], [0, 0, 1, 1], [], []>} : vector<1x8xf32>, vector<8x32xf32>, vector<1x32xf32> -> vector<1x32xf32>
    %452 = arith.addf %450, %451 : vector<1x32xf32>
    %453 = arith.addf %452, %343 : vector<1x32xf32>
    %454 = vector.extract_strided_slice %453 {offsets = [0, 0], sizes = [1, 24], strides = [1, 1]} : vector<1x32xf32> to vector<1x24xf32>
    %455 = arith.negf %454 : vector<1x24xf32>
    %456 = math.exp %455 : vector<1x24xf32>
    %cst_387 = arith.constant 1.000000e+00 : f32
    %457 = vector.broadcast %cst_387 : f32 to vector<1x24xf32>
    %458 = arith.addf %457, %456 : vector<1x24xf32>
    %459 = arith.divf %457, %458 : vector<1x24xf32>
    %460 = vector.extract_strided_slice %459 {offsets = [0, 0], sizes = [1, 8], strides = [1, 1]} : vector<1x24xf32> to vector<1x8xf32>
    %461 = vector.extract_strided_slice %459 {offsets = [0, 8], sizes = [1, 8], strides = [1, 1]} : vector<1x24xf32> to vector<1x8xf32>
    %462 = vector.extract_strided_slice %459 {offsets = [0, 16], sizes = [1, 8], strides = [1, 1]} : vector<1x24xf32> to vector<1x8xf32>
    %463 = vector.extract_strided_slice %453 {offsets = [0, 24], sizes = [1, 8], strides = [1, 1]} : vector<1x32xf32> to vector<1x8xf32>
    %464 = math.tanh %463 : vector<1x8xf32>
    %465 = arith.mulf %461, %442 : vector<1x8xf32>
    %466 = arith.mulf %460, %464 : vector<1x8xf32>
    %467 = arith.addf %465, %466 : vector<1x8xf32>
    %468 = math.tanh %467 : vector<1x8xf32>
    %469 = arith.mulf %462, %468 : vector<1x8xf32>
    %c32_388 = arith.constant 32 : index
    %c0_389 = arith.constant 0 : index
    %470 = vector.load %arg18[%c32_388, %c0_389] : memref<88x1000xf32, #tpu.memory_space<vmem>>, vector<8x1000xf32>
    %cst_390 = arith.constant dense<0.000000e+00> : vector<1x1000xf32>
    %471 = tpu.matmul %469, %470, %cst_390 {dimension_numbers = #tpu.dot_dimension_numbers<[1], [0], [0], [1], [0, 0, 1, 1], [], []>} : vector<1x8xf32>, vector<8x1000xf32>, vector<1x1000xf32> -> vector<1x1000xf32>
    %472 = arith.addf %447, %471 : vector<1x1000xf32>
    %473 = vector.extract_strided_slice %340 {offsets = [0, 5], sizes = [1, 1], strides = [1, 1]} : vector<1x8xf32> to vector<1x1xf32>
    %474 = vector.broadcast %473 : vector<1x1xf32> to vector<1x32xf32>
    %475 = arith.mulf %474, %341 : vector<1x32xf32>
    %cst_391 = arith.constant dense<0.000000e+00> : vector<1x32xf32>
    %476 = tpu.matmul %469, %342, %cst_391 {dimension_numbers = #tpu.dot_dimension_numbers<[1], [0], [0], [1], [0, 0, 1, 1], [], []>} : vector<1x8xf32>, vector<8x32xf32>, vector<1x32xf32> -> vector<1x32xf32>
    %477 = arith.addf %475, %476 : vector<1x32xf32>
    %478 = arith.addf %477, %343 : vector<1x32xf32>
    %479 = vector.extract_strided_slice %478 {offsets = [0, 0], sizes = [1, 24], strides = [1, 1]} : vector<1x32xf32> to vector<1x24xf32>
    %480 = arith.negf %479 : vector<1x24xf32>
    %481 = math.exp %480 : vector<1x24xf32>
    %cst_392 = arith.constant 1.000000e+00 : f32
    %482 = vector.broadcast %cst_392 : f32 to vector<1x24xf32>
    %483 = arith.addf %482, %481 : vector<1x24xf32>
    %484 = arith.divf %482, %483 : vector<1x24xf32>
    %485 = vector.extract_strided_slice %484 {offsets = [0, 0], sizes = [1, 8], strides = [1, 1]} : vector<1x24xf32> to vector<1x8xf32>
    %486 = vector.extract_strided_slice %484 {offsets = [0, 8], sizes = [1, 8], strides = [1, 1]} : vector<1x24xf32> to vector<1x8xf32>
    %487 = vector.extract_strided_slice %484 {offsets = [0, 16], sizes = [1, 8], strides = [1, 1]} : vector<1x24xf32> to vector<1x8xf32>
    %488 = vector.extract_strided_slice %478 {offsets = [0, 24], sizes = [1, 8], strides = [1, 1]} : vector<1x32xf32> to vector<1x8xf32>
    %489 = math.tanh %488 : vector<1x8xf32>
    %490 = arith.mulf %486, %467 : vector<1x8xf32>
    %491 = arith.mulf %485, %489 : vector<1x8xf32>
    %492 = arith.addf %490, %491 : vector<1x8xf32>
    %493 = math.tanh %492 : vector<1x8xf32>
    %494 = arith.mulf %487, %493 : vector<1x8xf32>
    %c40 = arith.constant 40 : index
    %c0_393 = arith.constant 0 : index
    %495 = vector.load %arg18[%c40, %c0_393] : memref<88x1000xf32, #tpu.memory_space<vmem>>, vector<8x1000xf32>
    %cst_394 = arith.constant dense<0.000000e+00> : vector<1x1000xf32>
    %496 = tpu.matmul %494, %495, %cst_394 {dimension_numbers = #tpu.dot_dimension_numbers<[1], [0], [0], [1], [0, 0, 1, 1], [], []>} : vector<1x8xf32>, vector<8x1000xf32>, vector<1x1000xf32> -> vector<1x1000xf32>
    %497 = arith.addf %472, %496 : vector<1x1000xf32>
    %498 = vector.extract_strided_slice %340 {offsets = [0, 6], sizes = [1, 1], strides = [1, 1]} : vector<1x8xf32> to vector<1x1xf32>
    %499 = vector.broadcast %498 : vector<1x1xf32> to vector<1x32xf32>
    %500 = arith.mulf %499, %341 : vector<1x32xf32>
    %cst_395 = arith.constant dense<0.000000e+00> : vector<1x32xf32>
    %501 = tpu.matmul %494, %342, %cst_395 {dimension_numbers = #tpu.dot_dimension_numbers<[1], [0], [0], [1], [0, 0, 1, 1], [], []>} : vector<1x8xf32>, vector<8x32xf32>, vector<1x32xf32> -> vector<1x32xf32>
    %502 = arith.addf %500, %501 : vector<1x32xf32>
    %503 = arith.addf %502, %343 : vector<1x32xf32>
    %504 = vector.extract_strided_slice %503 {offsets = [0, 0], sizes = [1, 24], strides = [1, 1]} : vector<1x32xf32> to vector<1x24xf32>
    %505 = arith.negf %504 : vector<1x24xf32>
    %506 = math.exp %505 : vector<1x24xf32>
    %cst_396 = arith.constant 1.000000e+00 : f32
    %507 = vector.broadcast %cst_396 : f32 to vector<1x24xf32>
    %508 = arith.addf %507, %506 : vector<1x24xf32>
    %509 = arith.divf %507, %508 : vector<1x24xf32>
    %510 = vector.extract_strided_slice %509 {offsets = [0, 0], sizes = [1, 8], strides = [1, 1]} : vector<1x24xf32> to vector<1x8xf32>
    %511 = vector.extract_strided_slice %509 {offsets = [0, 8], sizes = [1, 8], strides = [1, 1]} : vector<1x24xf32> to vector<1x8xf32>
    %512 = vector.extract_strided_slice %509 {offsets = [0, 16], sizes = [1, 8], strides = [1, 1]} : vector<1x24xf32> to vector<1x8xf32>
    %513 = vector.extract_strided_slice %503 {offsets = [0, 24], sizes = [1, 8], strides = [1, 1]} : vector<1x32xf32> to vector<1x8xf32>
    %514 = math.tanh %513 : vector<1x8xf32>
    %515 = arith.mulf %511, %492 : vector<1x8xf32>
    %516 = arith.mulf %510, %514 : vector<1x8xf32>
    %517 = arith.addf %515, %516 : vector<1x8xf32>
    %518 = math.tanh %517 : vector<1x8xf32>
    %519 = arith.mulf %512, %518 : vector<1x8xf32>
    %c48_397 = arith.constant 48 : index
    %c0_398 = arith.constant 0 : index
    %520 = vector.load %arg18[%c48_397, %c0_398] : memref<88x1000xf32, #tpu.memory_space<vmem>>, vector<8x1000xf32>
    %cst_399 = arith.constant dense<0.000000e+00> : vector<1x1000xf32>
    %521 = tpu.matmul %519, %520, %cst_399 {dimension_numbers = #tpu.dot_dimension_numbers<[1], [0], [0], [1], [0, 0, 1, 1], [], []>} : vector<1x8xf32>, vector<8x1000xf32>, vector<1x1000xf32> -> vector<1x1000xf32>
    %522 = arith.addf %497, %521 : vector<1x1000xf32>
    %523 = vector.extract_strided_slice %340 {offsets = [0, 7], sizes = [1, 1], strides = [1, 1]} : vector<1x8xf32> to vector<1x1xf32>
    %524 = vector.broadcast %523 : vector<1x1xf32> to vector<1x32xf32>
    %525 = arith.mulf %524, %341 : vector<1x32xf32>
    %cst_400 = arith.constant dense<0.000000e+00> : vector<1x32xf32>
    %526 = tpu.matmul %519, %342, %cst_400 {dimension_numbers = #tpu.dot_dimension_numbers<[1], [0], [0], [1], [0, 0, 1, 1], [], []>} : vector<1x8xf32>, vector<8x32xf32>, vector<1x32xf32> -> vector<1x32xf32>
    %527 = arith.addf %525, %526 : vector<1x32xf32>
    %528 = arith.addf %527, %343 : vector<1x32xf32>
    %529 = vector.extract_strided_slice %528 {offsets = [0, 0], sizes = [1, 24], strides = [1, 1]} : vector<1x32xf32> to vector<1x24xf32>
    %530 = arith.negf %529 : vector<1x24xf32>
    %531 = math.exp %530 : vector<1x24xf32>
    %cst_401 = arith.constant 1.000000e+00 : f32
    %532 = vector.broadcast %cst_401 : f32 to vector<1x24xf32>
    %533 = arith.addf %532, %531 : vector<1x24xf32>
    %534 = arith.divf %532, %533 : vector<1x24xf32>
    %535 = vector.extract_strided_slice %534 {offsets = [0, 0], sizes = [1, 8], strides = [1, 1]} : vector<1x24xf32> to vector<1x8xf32>
    %536 = vector.extract_strided_slice %534 {offsets = [0, 8], sizes = [1, 8], strides = [1, 1]} : vector<1x24xf32> to vector<1x8xf32>
    %537 = vector.extract_strided_slice %534 {offsets = [0, 16], sizes = [1, 8], strides = [1, 1]} : vector<1x24xf32> to vector<1x8xf32>
    %538 = vector.extract_strided_slice %528 {offsets = [0, 24], sizes = [1, 8], strides = [1, 1]} : vector<1x32xf32> to vector<1x8xf32>
    %539 = math.tanh %538 : vector<1x8xf32>
    %540 = arith.mulf %536, %517 : vector<1x8xf32>
    %541 = arith.mulf %535, %539 : vector<1x8xf32>
    %542 = arith.addf %540, %541 : vector<1x8xf32>
    %543 = math.tanh %542 : vector<1x8xf32>
    %544 = arith.mulf %537, %543 : vector<1x8xf32>
    %c56_402 = arith.constant 56 : index
    %c0_403 = arith.constant 0 : index
    %545 = vector.load %arg18[%c56_402, %c0_403] : memref<88x1000xf32, #tpu.memory_space<vmem>>, vector<8x1000xf32>
    %cst_404 = arith.constant dense<0.000000e+00> : vector<1x1000xf32>
    %546 = tpu.matmul %544, %545, %cst_404 {dimension_numbers = #tpu.dot_dimension_numbers<[1], [0], [0], [1], [0, 0, 1, 1], [], []>} : vector<1x8xf32>, vector<8x1000xf32>, vector<1x1000xf32> -> vector<1x1000xf32>
    %547 = arith.addf %522, %546 : vector<1x1000xf32>
    %548 = vector.extract_strided_slice %344 {offsets = [0, 0], sizes = [1, 1], strides = [1, 1]} : vector<1x3xf32> to vector<1x1xf32>
    %549 = vector.broadcast %548 : vector<1x1xf32> to vector<1x32xf32>
    %550 = arith.mulf %549, %341 : vector<1x32xf32>
    %cst_405 = arith.constant dense<0.000000e+00> : vector<1x32xf32>
    %551 = tpu.matmul %544, %342, %cst_405 {dimension_numbers = #tpu.dot_dimension_numbers<[1], [0], [0], [1], [0, 0, 1, 1], [], []>} : vector<1x8xf32>, vector<8x32xf32>, vector<1x32xf32> -> vector<1x32xf32>
    %552 = arith.addf %550, %551 : vector<1x32xf32>
    %553 = arith.addf %552, %343 : vector<1x32xf32>
    %554 = vector.extract_strided_slice %553 {offsets = [0, 0], sizes = [1, 24], strides = [1, 1]} : vector<1x32xf32> to vector<1x24xf32>
    %555 = arith.negf %554 : vector<1x24xf32>
    %556 = math.exp %555 : vector<1x24xf32>
    %cst_406 = arith.constant 1.000000e+00 : f32
    %557 = vector.broadcast %cst_406 : f32 to vector<1x24xf32>
    %558 = arith.addf %557, %556 : vector<1x24xf32>
    %559 = arith.divf %557, %558 : vector<1x24xf32>
    %560 = vector.extract_strided_slice %559 {offsets = [0, 0], sizes = [1, 8], strides = [1, 1]} : vector<1x24xf32> to vector<1x8xf32>
    %561 = vector.extract_strided_slice %559 {offsets = [0, 8], sizes = [1, 8], strides = [1, 1]} : vector<1x24xf32> to vector<1x8xf32>
    %562 = vector.extract_strided_slice %559 {offsets = [0, 16], sizes = [1, 8], strides = [1, 1]} : vector<1x24xf32> to vector<1x8xf32>
    %563 = vector.extract_strided_slice %553 {offsets = [0, 24], sizes = [1, 8], strides = [1, 1]} : vector<1x32xf32> to vector<1x8xf32>
    %564 = math.tanh %563 : vector<1x8xf32>
    %565 = arith.mulf %561, %542 : vector<1x8xf32>
    %566 = arith.mulf %560, %564 : vector<1x8xf32>
    %567 = arith.addf %565, %566 : vector<1x8xf32>
    %568 = math.tanh %567 : vector<1x8xf32>
    %569 = arith.mulf %562, %568 : vector<1x8xf32>
    %c64_407 = arith.constant 64 : index
    %c0_408 = arith.constant 0 : index
    %570 = vector.load %arg18[%c64_407, %c0_408] : memref<88x1000xf32, #tpu.memory_space<vmem>>, vector<8x1000xf32>
    %cst_409 = arith.constant dense<0.000000e+00> : vector<1x1000xf32>
    %571 = tpu.matmul %569, %570, %cst_409 {dimension_numbers = #tpu.dot_dimension_numbers<[1], [0], [0], [1], [0, 0, 1, 1], [], []>} : vector<1x8xf32>, vector<8x1000xf32>, vector<1x1000xf32> -> vector<1x1000xf32>
    %572 = arith.addf %547, %571 : vector<1x1000xf32>
    %573 = vector.extract_strided_slice %344 {offsets = [0, 1], sizes = [1, 1], strides = [1, 1]} : vector<1x3xf32> to vector<1x1xf32>
    %574 = vector.broadcast %573 : vector<1x1xf32> to vector<1x32xf32>
    %575 = arith.mulf %574, %341 : vector<1x32xf32>
    %cst_410 = arith.constant dense<0.000000e+00> : vector<1x32xf32>
    %576 = tpu.matmul %569, %342, %cst_410 {dimension_numbers = #tpu.dot_dimension_numbers<[1], [0], [0], [1], [0, 0, 1, 1], [], []>} : vector<1x8xf32>, vector<8x32xf32>, vector<1x32xf32> -> vector<1x32xf32>
    %577 = arith.addf %575, %576 : vector<1x32xf32>
    %578 = arith.addf %577, %343 : vector<1x32xf32>
    %579 = vector.extract_strided_slice %578 {offsets = [0, 0], sizes = [1, 24], strides = [1, 1]} : vector<1x32xf32> to vector<1x24xf32>
    %580 = arith.negf %579 : vector<1x24xf32>
    %581 = math.exp %580 : vector<1x24xf32>
    %cst_411 = arith.constant 1.000000e+00 : f32
    %582 = vector.broadcast %cst_411 : f32 to vector<1x24xf32>
    %583 = arith.addf %582, %581 : vector<1x24xf32>
    %584 = arith.divf %582, %583 : vector<1x24xf32>
    %585 = vector.extract_strided_slice %584 {offsets = [0, 0], sizes = [1, 8], strides = [1, 1]} : vector<1x24xf32> to vector<1x8xf32>
    %586 = vector.extract_strided_slice %584 {offsets = [0, 8], sizes = [1, 8], strides = [1, 1]} : vector<1x24xf32> to vector<1x8xf32>
    %587 = vector.extract_strided_slice %584 {offsets = [0, 16], sizes = [1, 8], strides = [1, 1]} : vector<1x24xf32> to vector<1x8xf32>
    %588 = vector.extract_strided_slice %578 {offsets = [0, 24], sizes = [1, 8], strides = [1, 1]} : vector<1x32xf32> to vector<1x8xf32>
    %589 = math.tanh %588 : vector<1x8xf32>
    %590 = arith.mulf %586, %567 : vector<1x8xf32>
    %591 = arith.mulf %585, %589 : vector<1x8xf32>
    %592 = arith.addf %590, %591 : vector<1x8xf32>
    %593 = math.tanh %592 : vector<1x8xf32>
    %594 = arith.mulf %587, %593 : vector<1x8xf32>
    %c72 = arith.constant 72 : index
    %c0_412 = arith.constant 0 : index
    %595 = vector.load %arg18[%c72, %c0_412] : memref<88x1000xf32, #tpu.memory_space<vmem>>, vector<8x1000xf32>
    %cst_413 = arith.constant dense<0.000000e+00> : vector<1x1000xf32>
    %596 = tpu.matmul %594, %595, %cst_413 {dimension_numbers = #tpu.dot_dimension_numbers<[1], [0], [0], [1], [0, 0, 1, 1], [], []>} : vector<1x8xf32>, vector<8x1000xf32>, vector<1x1000xf32> -> vector<1x1000xf32>
    %597 = arith.addf %572, %596 : vector<1x1000xf32>
    %598 = vector.extract_strided_slice %344 {offsets = [0, 2], sizes = [1, 1], strides = [1, 1]} : vector<1x3xf32> to vector<1x1xf32>
    %599 = vector.broadcast %598 : vector<1x1xf32> to vector<1x32xf32>
    %600 = arith.mulf %599, %341 : vector<1x32xf32>
    %cst_414 = arith.constant dense<0.000000e+00> : vector<1x32xf32>
    %601 = tpu.matmul %594, %342, %cst_414 {dimension_numbers = #tpu.dot_dimension_numbers<[1], [0], [0], [1], [0, 0, 1, 1], [], []>} : vector<1x8xf32>, vector<8x32xf32>, vector<1x32xf32> -> vector<1x32xf32>
    %602 = arith.addf %600, %601 : vector<1x32xf32>
    %603 = arith.addf %602, %343 : vector<1x32xf32>
    %604 = vector.extract_strided_slice %603 {offsets = [0, 0], sizes = [1, 24], strides = [1, 1]} : vector<1x32xf32> to vector<1x24xf32>
    %605 = arith.negf %604 : vector<1x24xf32>
    %606 = math.exp %605 : vector<1x24xf32>
    %cst_415 = arith.constant 1.000000e+00 : f32
    %607 = vector.broadcast %cst_415 : f32 to vector<1x24xf32>
    %608 = arith.addf %607, %606 : vector<1x24xf32>
    %609 = arith.divf %607, %608 : vector<1x24xf32>
    %610 = vector.extract_strided_slice %609 {offsets = [0, 0], sizes = [1, 8], strides = [1, 1]} : vector<1x24xf32> to vector<1x8xf32>
    %611 = vector.extract_strided_slice %609 {offsets = [0, 8], sizes = [1, 8], strides = [1, 1]} : vector<1x24xf32> to vector<1x8xf32>
    %612 = vector.extract_strided_slice %609 {offsets = [0, 16], sizes = [1, 8], strides = [1, 1]} : vector<1x24xf32> to vector<1x8xf32>
    %613 = vector.extract_strided_slice %603 {offsets = [0, 24], sizes = [1, 8], strides = [1, 1]} : vector<1x32xf32> to vector<1x8xf32>
    %614 = math.tanh %613 : vector<1x8xf32>
    %615 = arith.mulf %611, %592 : vector<1x8xf32>
    %616 = arith.mulf %610, %614 : vector<1x8xf32>
    %617 = arith.addf %615, %616 : vector<1x8xf32>
    %618 = math.tanh %617 : vector<1x8xf32>
    %619 = arith.mulf %612, %618 : vector<1x8xf32>
    %c80_416 = arith.constant 80 : index
    %c0_417 = arith.constant 0 : index
    %620 = vector.load %arg18[%c80_416, %c0_417] : memref<88x1000xf32, #tpu.memory_space<vmem>>, vector<8x1000xf32>
    %cst_418 = arith.constant dense<0.000000e+00> : vector<1x1000xf32>
    %621 = tpu.matmul %619, %620, %cst_418 {dimension_numbers = #tpu.dot_dimension_numbers<[1], [0], [0], [1], [0, 0, 1, 1], [], []>} : vector<1x8xf32>, vector<8x1000xf32>, vector<1x1000xf32> -> vector<1x1000xf32>
    %622 = arith.addf %597, %621 : vector<1x1000xf32>
    %cst_419 = arith.constant 0.000000e+00 : f32
    %623 = vector.broadcast %cst_419 : f32 to vector<1x1000xf32>
    %624 = arith.maximumf %622, %623 : vector<1x1000xf32>
    %c0_420 = arith.constant 0 : index
    %c0_421 = arith.constant 0 : index
    %625 = vector.load %arg20[%c0_420, %c0_421] : memref<1000x100xf32, #tpu.memory_space<vmem>>, vector<1000x100xf32>
    %cst_422 = arith.constant dense<0.000000e+00> : vector<1x100xf32>
    %626 = tpu.matmul %624, %625, %cst_422 {dimension_numbers = #tpu.dot_dimension_numbers<[1], [0], [0], [1], [0, 0, 1, 1], [], []>} : vector<1x1000xf32>, vector<1000x100xf32>, vector<1x100xf32> -> vector<1x100xf32>
    %c0_423 = arith.constant 0 : index
    %c0_424 = arith.constant 0 : index
    %627 = vector.load %arg21[%c0_423, %c0_424] : memref<1x100xf32, #tpu.memory_space<vmem>>, vector<1x100xf32>
    %628 = arith.addf %626, %627 : vector<1x100xf32>
    %cst_425 = arith.constant 0.000000e+00 : f32
    %629 = vector.broadcast %cst_425 : f32 to vector<1x100xf32>
    %630 = arith.maximumf %628, %629 : vector<1x100xf32>
    %c0_426 = arith.constant 0 : index
    %c0_427 = arith.constant 0 : index
    %631 = vector.load %arg22[%c0_426, %c0_427] : memref<100x1xf32, #tpu.memory_space<vmem>>, vector<100x1xf32>
    %cst_428 = arith.constant dense<0.000000e+00> : vector<1x1xf32>
    %632 = tpu.matmul %630, %631, %cst_428 {dimension_numbers = #tpu.dot_dimension_numbers<[1], [0], [0], [1], [0, 0, 1, 1], [], []>} : vector<1x100xf32>, vector<100x1xf32>, vector<1x1xf32> -> vector<1x1xf32>
    %c0_429 = arith.constant 0 : index
    %c0_430 = arith.constant 0 : index
    %633 = vector.load %arg23[%c0_429, %c0_430] : memref<1x1xf32, #tpu.memory_space<vmem>>, vector<1x1xf32>
    %634 = arith.addf %632, %633 : vector<1x1xf32>
    %635 = math.tanh %634 : vector<1x1xf32>
    %c0_431 = arith.constant 0 : index
    %c0_432 = arith.constant 0 : index
    %636 = vector.load %arg24[%c0_431, %c0_432] : memref<1x1xf32, #tpu.memory_space<vmem>>, vector<1x1xf32>
    tpu.vector_store %arg24[%c0_431, %c0_432], %635 {strides = array<i32>} : memref<1x1xf32, #tpu.memory_space<vmem>>, vector<1x1xf32>,
    return
  }
}

</mosaic_0001>

<bundles_post_ra>
// kernel: forward.1
= control target key start
LH: loop header
LB: loop body
LE: loop exit
PB: predicated region body
PF: predicated region fallthrough
CT: control target
= control target key end

     0   :  { %s16603_s0 = inlined_call_operand.vmem [shape: f32[3,896], index: 0, kind: input, shape index: {}]   ;;  %s16604_s1 = inlined_call_operand.vmem [shape: f32[1,16], index: 1, kind: input, shape index: {}]   ;;  %s16605_s2 = inlined_call_operand.vmem [shape: f32[1,3], index: 2, kind: input, shape index: {}]   ;;  %s16606_s3 = inlined_call_operand.vmem [shape: f32[25,6,3], index: 3, kind: input, shape index: {}]   ;;  %s16607_s4 = inlined_call_operand.vmem [shape: f32[6,1], index: 4, kind: input, shape index: {}]   ;;  %s16608_s5 = inlined_call_operand.vmem [shape: f32[25,10,6], index: 5, kind: input, shape index: {}]   ;;  %s16609_s6 = inlined_call_operand.vmem [shape: f32[10,1], index: 6, kind: input, shape index: {}]   ;;  %s16610_s7 = inlined_call_operand.vmem [shape: f32[639,320], index: 7, kind: input, shape index: {}]   ;;  %s16611_s8 = inlined_call_operand.vmem [shape: f32[175,16], index: 8, kind: input, shape index: {}]   ;;  %s16612_s9 = inlined_call_operand.vmem [shape: f32[176,200], index: 9, kind: input, shape index: {}]   ;;  %s16613_s10 = inlined_call_operand.vmem [shape: f32[1,200], index: 10, kind: input, shape index: {}]   ;;  %s16614_s11 = inlined_call_operand.vmem [shape: f32[200,100], index: 11, kind: input, shape index: {}]   ;;  %s16615_s12 = inlined_call_operand.vmem [shape: f32[1,100], index: 12, kind: input, shape index: {}]   ;;  %s16616_s13 = inlined_call_operand.vmem [shape: f32[100,8], index: 13, kind: input, shape index: {}]   ;;  %s16617_s14 = inlined_call_operand.vmem [shape: f32[1,8], index: 14, kind: input, shape index: {}]   ;;  %s16618_s15 = inlined_call_operand.vmem [shape: f32[1,32], index: 15, kind: input, shape index: {}]   ;;  %s16619_s16 = inlined_call_operand.vmem [shape: f32[8,32], index: 16, kind: input, shape index: {}]   ;;  %s16620_s17 = inlined_call_operand.vmem [shape: f32[1,32], index: 17, kind: input, shape index: {}]   ;;  %s16621_s18 = inlined_call_operand.vmem [shape: f32[88,1000], index: 18, kind: input, shape index: {}]   ;;  %s16622_s19 = inlined_call_operand.vmem [shape: f32[1,1000], index: 19, kind: input, shape index: {}]   ;;  %s16623_s20 = inlined_call_operand.vmem [shape: f32[1000,100], index: 20, kind: input, shape index: {}]   ;;  %s16624_s21 = inlined_call_operand.vmem [shape: f32[1,100], index: 21, kind: input, shape index: {}]   ;;  %s16625_s22 = inlined_call_operand.vmem [shape: f32[100,1], index: 22, kind: input, shape index: {}]   ;;  %s16626_s23 = inlined_call_operand.<no memory space> [shape: f32[1,1], index: 23, kind: input, shape index: {}]   ;;  %s16627_s24 = inlined_call_operand.hbm [shape: f32[1,1], index: 24, kind: output, shape index: {}]  }
   0x1   :  { %16684 = sst [smem:[#allocation74_spill]] %s16603_s0  ;;  %v29_v0 = vstv %s16626_s23 }
   0x2   :  { %16685 = sst [smem:[#allocation75_spill]] %s16604_s1  ;;  %30 = vst [vmem:[#allocation6] sm:$0x1] %v29_v0 }
   0x3   :  { %16686 = sst [smem:[#allocation76_spill]] %s16605_s2 }
   0x4   :  { %16687 = sst [smem:[#allocation77_spill]] %s16606_s3 }
   0x5   :  { %16688 = sst [smem:[#allocation78_spill]] %s16607_s4 }
   0x6   :  { %16689 = sst [smem:[#allocation79_spill]] %s16608_s5 }
   0x7   :  { %16690 = sst [smem:[#allocation80_spill]] %s16609_s6 }
   0x8   :  { %16691 = sst [smem:[#allocation81_spill]] %s16610_s7 }
   0x9   :  { %16692 = sst [smem:[#allocation82_spill]] %s16611_s8 }
   0xa   :  { %s16693_s6 = sld [smem:[#allocation74_spill]] }
  0x10   :  { %v83_v1 = vld [vmem:[%s16693_s6 + $0x10] sm:$0x77]  ;;  %v82_v2 = vld [vmem:[%s16693_s6 + $0x8] sm:$0x77]  ;;  %v81_v3 = vld [vmem:[%s16693_s6] sm:$0x77] }
  0x11   :  { %93 = vst [vmem:[#allocation1 + $0x20] ss:$2 sm:$0xff] %v83_v1 }
  0x12   :  { %91 = vst [vmem:[#allocation1 + $0x10] ss:$2 sm:$0xff] %v82_v2 }
  0x13   :  { %89 = vst [vmem:[#allocation1] ss:$2 sm:$0xff] %v81_v3 }
  0x14   :  { %31 = vsyncpa [#allocation8], 0  ;;  %s11913_s23 = smov 127   ;;  %v404_v10 = vld [vmem:[%s16693_s6 + $0x8] sm:$0x77]  ;;  %s11914_s2 = smov 126  }
  0x15   :  { %v403_v11 = vld [vmem:[%s16693_s6] sm:$0x77]  ;;  %v405_v12 = vld [vmem:[%s16693_s6 + $0x10] sm:$0x77]  ;;  %v582_v19 = vld [vmem:[%s16693_s6 + $0x8] sm:$0x77] }
  0x16   :  { %v581_v20 = vld [vmem:[%s16693_s6] sm:$0x77]  ;;  %v583_v23 = vld [vmem:[%s16693_s6 + $0x10] sm:$0x77]  ;;  %v760_v28 = vld [vmem:[%s16693_s6 + $0x8] sm:$0x77] }
  0x17   :  { %v759_v29 = vld [vmem:[%s16693_s6] sm:$0x77]  ;;  %v761_v32 = vld [vmem:[%s16693_s6 + $0x10] sm:$0x77]  ;;  %v938_v37 = vld [vmem:[%s16693_s6 + $0x8] sm:$0x77] }
  0x18   :  { %v98_v4 = vld.sshfl [vmem:[#allocation1 + $0x20] sm:$0xff pattern:$0x75316420]  ;;  %v99_v5 = vld.sshfl [vmem:[#allocation1 + $0x28] sm:$0xff pattern:$0x75316420] }
  0x19   :  { %108 = vrot.lane.b32.xlu1 %v98_v4, %s11913_s23  ;;  %v96_v6 = vld.sshfl [vmem:[#allocation1 + $0x10] sm:$0xff pattern:$0x75316420]  ;;  %v97_v7 = vld.sshfl [vmem:[#allocation1 + $0x18] sm:$0xff pattern:$0x75316420] }
  0x1a   :  { %104 = vrot.lane.b32.xlu0 %v96_v6, %s11913_s23  ;;  %257 = vst [vmem:[#allocation1 + $0x10] ss:$2 sm:$0xff] %v82_v2  ;;  %v94_v8 = vld.sshfl [vmem:[#allocation1] sm:$0xff pattern:$0x75316420]  ;;  %s11915_s28 = smov 125  }
  0x1b   :  { %v95_v9 = vld.sshfl [vmem:[#allocation1 + $0x8] sm:$0xff pattern:$0x75316420]  ;;  %259 = vst [vmem:[#allocation1 + $0x20] ss:$2 sm:$0xff] %v83_v1  ;;  %s11916_s8 = smov 124  }
  0x1c   :  { %102 = vrot.lane.b32.xlu2 %v95_v9, %s11913_s23  ;;  %255 = vst [vmem:[#allocation1] ss:$2 sm:$0xff] %v81_v3  ;;  %v937_v38 = vld [vmem:[%s16693_s6] sm:$0x77]  ;;  %v939_v41 = vld [vmem:[%s16693_s6 + $0x10] sm:$0x77] }
  0x1d   :  { %v1116_v47 = vld [vmem:[%s16693_s6 + $0x8] sm:$0x77]  ;;  %v1115_v51 = vld [vmem:[%s16693_s6] sm:$0x77]  ;;  %v1117_v54 = vld [vmem:[%s16693_s6 + $0x10] sm:$0x77] }
  0x1e   :  { %v1294_v59 = vld [vmem:[%s16693_s6 + $0x8] sm:$0x77]  ;;  %v1293_v60 = vld [vmem:[%s16693_s6] sm:$0x77]  ;;  %s11917_s0 = smov 100   ;;  %s16681_s4 = smov 99  }
  0x1f   :  { %v1295_v62 = vld [vmem:[%s16693_s6 + $0x10] sm:$0x77]  ;;  %v1472_v2 = vld [vmem:[%s16693_s6 + $0x8] sm:$0x77]  ;;  %vm122_vm0 = vcmask 1042432   ;;  %s16644_s25 = smov 98  }
  0x20   :  { %vm118_vm1 = vcmask 23552   ;;  %s16694_s29 = sld [smem:[#allocation77_spill]]  ;;  %s16654_s3 = smov 97   ;;  %vm112_vm2 = vcmask 1039360   ;;  %vm432_vm3 = vcmask 1031168   ;;  %vm610_vm4 = vcmask 1022976  }
  0x21   :  { %100 = vrot.lane.b32.xlu1 %v94_v8, %s11913_s23  ;;  %v12100_v13 = vld.sshfl [vmem:[#allocation1 + $0x10] sm:$0xff pattern:$0x75316420]  ;;  %v12102_v14 = vld.sshfl [vmem:[#allocation1 + $0x18] sm:$0xff pattern:$0x75316420] }
  0x22   :  { %106 = vrot.lane.b32.xlu0 %v97_v7, %s11913_s23  ;;  %411 = vst [vmem:[#allocation1 + $0x10] ss:$2 sm:$0xff] %v404_v10  ;;  %v12105_v15 = vld.sshfl [vmem:[#allocation1 + $0x20] sm:$0xff pattern:$0x75316420]  ;;  %s16638_s7 = smov 96  }
  0x23   :  { %v12107_v16 = vld.sshfl [vmem:[#allocation1] sm:$0xff pattern:$0x75316420]  ;;  %v12109_v17 = vld.sshfl [vmem:[#allocation1 + $0x8] sm:$0xff pattern:$0x75316420] }
  0x24   :  { %110 = vrot.lane.b32.xlu2 %v99_v5, %s11913_s23  ;;  %409 = vst [vmem:[#allocation1] ss:$2 sm:$0xff] %v403_v11  ;;  %v12112_v18 = vld.sshfl [vmem:[#allocation1 + $0x28] sm:$0xff pattern:$0x75316420]  ;;  %11074 = vmatpush.msk.msra.mxu2 %vm122_vm0, %v12107_v16  ;;  %s16636_s1 = smov 72  }
  0x25   :  { %413 = vst [vmem:[#allocation1 + $0x20] ss:$2 sm:$0xff] %v405_v12  ;;  %v1471_v5 = vld [vmem:[%s16693_s6] sm:$0x77]  ;;  %v1473_v8 = vld [vmem:[%s16693_s6 + $0x10] sm:$0x77] }
  0x26   :  { %11082 = vmatpush.msk.msrb.mxu2 %vm122_vm0, %v12105_v15  ;;  %v1650_v16 = vld [vmem:[%s16693_s6 + $0x8] sm:$0x77]  ;;  %v1649_v15 = vld [vmem:[%s16693_s6] sm:$0x77]  ;;  %s16634_s27 = smov 71   ;;  %vm788_vm5 = vcmask 1014784  }
  0x27   :  { %s16642_s30 = smov 70   ;;  %vm966_vm6 = vcmask 818176   ;;  %vm1144_vm7 = vcmask 809984   ;;  %s16648_s26 = smov 68   ;;  %vm1322_vm8 = vcmask 801792   ;;  %vm1500_vm9 = vcmask 793600  }
  0x28   :  { %vm1678_vm10 = vcmask 785408   ;;  %vm1856_vm11 = vcmask 588800   ;;  %vm2034_vm12 = vcmask 580608   ;;  %vm2212_vm13 = vcmask 572416   ;;  %s16832_s5 = smov 69  }
  0x29   :  { %v416_v21 = vld.sshfl [vmem:[#allocation1 + $0x10] sm:$0xff pattern:$0x75316420]  ;;  %v417_v22 = vld.sshfl [vmem:[#allocation1 + $0x18] sm:$0xff pattern:$0x75316420] }
  0x2a   :  { %424 = vrot.lane.b32.xlu0 %v416_v21, %s11914_s2  ;;  %426 = vrot.lane.b32.xlu1 %v417_v22, %s11914_s2  ;;  %589 = vst [vmem:[#allocation1 + $0x10] ss:$2 sm:$0xff] %v582_v19  ;;  %v1651_v21 = vld [vmem:[%s16693_s6 + $0x10] sm:$0x77]  ;;  %vm16660_vm14 = vcmask 564224   ;;  %vm16664_vm15 = vcmask 556032  }
  0x2b   :  { %v415_v24 = vld.sshfl [vmem:[#allocation1 + $0x8] sm:$0xff pattern:$0x75316420]  ;;  %v414_v25 = vld.sshfl [vmem:[#allocation1] sm:$0xff pattern:$0x75316420] }
  0x2c   :  { %v418_v26 = vld.sshfl [vmem:[#allocation1 + $0x20] sm:$0xff pattern:$0x75316420]  ;;  %587 = vst [vmem:[#allocation1] ss:$2 sm:$0xff] %v581_v20 }
  0x2d   :  { %428 = vrot.lane.b32.xlu2 %v418_v26, %s11914_s2  ;;  %v419_v27 = vld.sshfl [vmem:[#allocation1 + $0x28] sm:$0xff pattern:$0x75316420] }
  0x2e   :  { %591 = vst [vmem:[#allocation1 + $0x20] ss:$2 sm:$0xff] %v583_v23  ;;  %v12219_v23 = vld [vmem:[%s16694_s29] sm:$0x3f]  ;;  %v1828_v26 = vld [vmem:[%s16693_s6 + $0x8] sm:$0x77] }
  0x2f   :  { %11075 = vmatmul.msk.f32.vlgmr.msra.gmra.mxu2 %vm118_vm1, %v12219_v23 }
  0x31   :  { %v594_v30 = vld.sshfl [vmem:[#allocation1 + $0x10] sm:$0xff pattern:$0x75316420]  ;;  %v595_v31 = vld.sshfl [vmem:[#allocation1 + $0x18] sm:$0xff pattern:$0x75316420] }
  0x32   :  { %422 = vrot.lane.b32.xlu1 %v415_v24, %s11914_s2  ;;  %420 = vrot.lane.b32.xlu0 %v414_v25, %s11914_s2  ;;  %767 = vst [vmem:[#allocation1 + $0x10] ss:$2 sm:$0xff] %v760_v28 }
  0x33   :  { %v593_v33 = vld.sshfl [vmem:[#allocation1 + $0x8] sm:$0xff pattern:$0x75316420]  ;;  %v592_v34 = vld.sshfl [vmem:[#allocation1] sm:$0xff pattern:$0x75316420] }
  0x34   :  { %765 = vst [vmem:[#allocation1] ss:$2 sm:$0xff] %v759_v29  ;;  %v1827_v29 = vld [vmem:[%s16693_s6] sm:$0x77] }
  0x35   :  { %430 = vrot.lane.b32.xlu2 %v419_v27, %s11914_s2  ;;  %v597_v35 = vld.sshfl [vmem:[#allocation1 + $0x28] sm:$0xff pattern:$0x75316420]  ;;  %v596_v36 = vld.sshfl [vmem:[#allocation1 + $0x20] sm:$0xff pattern:$0x75316420] }
  0x36   :  { %769 = vst [vmem:[#allocation1 + $0x20] ss:$2 sm:$0xff] %v761_v32 }
  0x37   :  { %11083 = vmatmul.msk.f32.vlgmr.msrb.gmra.mxu2 %vm118_vm1, %v12219_v23 }
  0x39   :  { %v773_v39 = vld.sshfl [vmem:[#allocation1 + $0x18] sm:$0xff pattern:$0x75316420]  ;;  %v772_v40 = vld.sshfl [vmem:[#allocation1 + $0x10] sm:$0xff pattern:$0x75316420] }
  0x3a   :  { %602 = vrot.lane.b32.xlu1 %v594_v30, %s11915_s28  ;;  %600 = vrot.lane.b32.xlu0 %v593_v33, %s11915_s28  ;;  %945 = vst [vmem:[#allocation1 + $0x10] ss:$2 sm:$0xff] %v938_v37 }
  0x3b   :  { %v771_v42 = vld.sshfl [vmem:[#allocation1 + $0x8] sm:$0xff pattern:$0x75316420]  ;;  %v770_v43 = vld.sshfl [vmem:[#allocation1] sm:$0xff pattern:$0x75316420] }
  0x3c   :  { %943 = vst [vmem:[#allocation1] ss:$2 sm:$0xff] %v937_v38 }
  0x3d   :  { %598 = vrot.lane.b32.xlu2 %v592_v34, %s11915_s28  ;;  %v774_v44 = vld.sshfl [vmem:[#allocation1 + $0x20] sm:$0xff pattern:$0x75316420]  ;;  %v775_v45 = vld.sshfl [vmem:[#allocation1 + $0x28] sm:$0xff pattern:$0x75316420] }
  0x3e   :  { %947 = vst [vmem:[#allocation1 + $0x20] ss:$2 sm:$0xff] %v939_v41 }
  0x41   :  { %v951_v46 = vld.sshfl [vmem:[#allocation1 + $0x18] sm:$0xff pattern:$0x75316420]  ;;  %v950_v48 = vld.sshfl [vmem:[#allocation1 + $0x10] sm:$0xff pattern:$0x75316420] }
  0x42   :  { %608 = vrot.lane.b32.xlu1 %v597_v35, %s11915_s28  ;;  %606 = vrot.lane.b32.xlu0 %v596_v36, %s11915_s28  ;;  %1123 = vst [vmem:[#allocation1 + $0x10] ss:$2 sm:$0xff] %v1116_v47  ;;  %v11061_v35 = vld [vmem:[%s16694_s29 + $0x8] sm:$0x3f] }
  0x43   :  { %v949_v49 = vld.sshfl [vmem:[#allocation1 + $0x8] sm:$0xff pattern:$0x75316420]  ;;  %v948_v50 = vld.sshfl [vmem:[#allocation1] sm:$0xff pattern:$0x75316420] }
  0x44   :  { %1121 = vst [vmem:[#allocation1] ss:$2 sm:$0xff] %v1115_v51 }
  0x45   :  { %604 = vrot.lane.b32.xlu2 %v595_v31, %s11915_s28  ;;  %v953_v52 = vld.sshfl [vmem:[#allocation1 + $0x28] sm:$0xff pattern:$0x75316420]  ;;  %v952_v53 = vld.sshfl [vmem:[#allocation1 + $0x20] sm:$0xff pattern:$0x75316420] }
  0x46   :  { %1125 = vst [vmem:[#allocation1 + $0x20] ss:$2 sm:$0xff] %v1117_v54 }
  0x49   :  { %v1129_v55 = vld.sshfl [vmem:[#allocation1 + $0x18] sm:$0xff pattern:$0x75316420]  ;;  %v1128_v56 = vld.sshfl [vmem:[#allocation1 + $0x10] sm:$0xff pattern:$0x75316420] }
  0x4a   :  { %782 = vrot.lane.b32.xlu1 %v773_v39, %s11916_s8  ;;  %780 = vrot.lane.b32.xlu0 %v772_v40, %s11916_s8  ;;  %1301 = vst [vmem:[#allocation1 + $0x10] ss:$2 sm:$0xff] %v1294_v59  ;;  %v1829_v39 = vld [vmem:[%s16693_s6 + $0x10] sm:$0x77]  ;;  %v2184_v59 = vld [vmem:[%s16693_s6 + $0x8] sm:$0x77] }
  0x4b   :  { %v1127_v57 = vld.sshfl [vmem:[#allocation1 + $0x8] sm:$0xff pattern:$0x75316420]  ;;  %v1126_v58 = vld.sshfl [vmem:[#allocation1] sm:$0xff pattern:$0x75316420] }
  0x4c   :  { %1299 = vst [vmem:[#allocation1] ss:$2 sm:$0xff] %v1293_v60 }
  0x4d   :  { %784 = vrot.lane.b32.xlu2 %v774_v44, %s11916_s8  ;;  %v1131_v61 = vld.sshfl [vmem:[#allocation1 + $0x28] sm:$0xff pattern:$0x75316420]  ;;  %v1130_v63 = vld.sshfl [vmem:[#allocation1 + $0x20] sm:$0xff pattern:$0x75316420] }
  0x4e   :  { %1303 = vst [vmem:[#allocation1 + $0x20] ss:$2 sm:$0xff] %v1295_v62 }
  0x51   :  { %v1307_v0 = vld.sshfl [vmem:[#allocation1 + $0x18] sm:$0xff pattern:$0x75316420]  ;;  %v1306_v1 = vld.sshfl [vmem:[#allocation1 + $0x10] sm:$0xff pattern:$0x75316420] }
  0x52   :  { %778 = vrot.lane.b32.xlu1 %v771_v42, %s11916_s8  ;;  %776 = vrot.lane.b32.xlu0 %v770_v43, %s11916_s8  ;;  %1479 = vst [vmem:[#allocation1 + $0x10] ss:$2 sm:$0xff] %v1472_v2  ;;  %v2006_v42 = vld [vmem:[%s16693_s6 + $0x8] sm:$0x77]  ;;  %v2005_v43 = vld [vmem:[%s16693_s6] sm:$0x77] }
  0x53   :  { %v1305_v3 = vld.sshfl [vmem:[#allocation1 + $0x8] sm:$0xff pattern:$0x75316420]  ;;  %v1304_v4 = vld.sshfl [vmem:[#allocation1] sm:$0xff pattern:$0x75316420] }
  0x54   :  { %1477 = vst [vmem:[#allocation1] ss:$2 sm:$0xff] %v1471_v5 }
  0x55   :  { %954 = vrot.lane.b32.xlu2 %v948_v50, %s11917_s0  ;;  %v1309_v6 = vld.sshfl [vmem:[#allocation1 + $0x28] sm:$0xff pattern:$0x75316420]  ;;  %v1308_v7 = vld.sshfl [vmem:[#allocation1 + $0x20] sm:$0xff pattern:$0x75316420] }
  0x56   :  { %1481 = vst [vmem:[#allocation1 + $0x20] ss:$2 sm:$0xff] %v1473_v8 }
  0x59   :  { %v1485_v9 = vld.sshfl [vmem:[#allocation1 + $0x18] sm:$0xff pattern:$0x75316420]  ;;  %v1484_v10 = vld.sshfl [vmem:[#allocation1 + $0x10] sm:$0xff pattern:$0x75316420] }
  0x5a   :  { %958 = vrot.lane.b32.xlu1 %v950_v48, %s11917_s0  ;;  %956 = vrot.lane.b32.xlu0 %v949_v49, %s11917_s0  ;;  %1657 = vst [vmem:[#allocation1 + $0x10] ss:$2 sm:$0xff] %v1650_v16 }
  0x5b   :  { %v1483_v11 = vld.sshfl [vmem:[#allocation1 + $0x8] sm:$0xff pattern:$0x75316420]  ;;  %v1482_v12 = vld.sshfl [vmem:[#allocation1] sm:$0xff pattern:$0x75316420] }
  0x5c   :  { %1655 = vst [vmem:[#allocation1] ss:$2 sm:$0xff] %v1649_v15 }
  0x5d   :  { %786 = vrot.lane.b32.xlu2 %v775_v45, %s11916_s8  ;;  %v12208_v20 = vld.sshfl [vmem:[#allocation1 + $0x28] sm:$0xff pattern:$0x75316420]  ;;  %v1486_v22 = vld.sshfl [vmem:[#allocation1 + $0x20] sm:$0xff pattern:$0x75316420] }
  0x5e   :  { %1659 = vst [vmem:[#allocation1 + $0x20] ss:$2 sm:$0xff] %v1651_v21 }
  0x61   :  { %v12223_v25 = vld.sshfl [vmem:[#allocation1 + $0x18] sm:$0xff pattern:$0x75316420]  ;;  %v1662_v27 = vld.sshfl [vmem:[#allocation1 + $0x10] sm:$0xff pattern:$0x75316420] }
  0x62   :  { %964 = vrot.lane.b32.xlu1 %v953_v52, %s11917_s0  ;;  %962 = vrot.lane.b32.xlu0 %v952_v53, %s11917_s0  ;;  %1835 = vst [vmem:[#allocation1 + $0x10] ss:$2 sm:$0xff] %v1828_v26  ;;  %v2007_v53 = vld [vmem:[%s16693_s6 + $0x10] sm:$0x77] }
  0x63   :  { %v1661_v31 = vld.sshfl [vmem:[#allocation1 + $0x8] sm:$0xff pattern:$0x75316420]  ;;  %v1660_v32 = vld.sshfl [vmem:[#allocation1] sm:$0xff pattern:$0x75316420] }
  0x64   :  { %1833 = vst [vmem:[#allocation1] ss:$2 sm:$0xff] %v1827_v29 }
  0x65   :  { %960 = vrot.lane.b32.xlu2 %v951_v46, %s11917_s0  ;;  %v1665_v37 = vld.sshfl [vmem:[#allocation1 + $0x28] sm:$0xff pattern:$0x75316420]  ;;  %v1664_v38 = vld.sshfl [vmem:[#allocation1 + $0x20] sm:$0xff pattern:$0x75316420] }
  0x66   :  { %1837 = vst [vmem:[#allocation1 + $0x20] ss:$2 sm:$0xff] %v1829_v39 }
  0x69   :  { %v12255_v40 = vld.sshfl [vmem:[#allocation1 + $0x18] sm:$0xff pattern:$0x75316420]  ;;  %v12257_v41 = vld.sshfl [vmem:[#allocation1 + $0x10] sm:$0xff pattern:$0x75316420] }
  0x6a   :  { %1138 = vrot.lane.b32.xlu1 %v1129_v55, %s16681_s4  ;;  %1136 = vrot.lane.b32.xlu0 %v1128_v56, %s16681_s4  ;;  %2013 = vst [vmem:[#allocation1 + $0x10] ss:$2 sm:$0xff] %v2006_v42 }
  0x6b   :  { %v12267_v45 = vld.sshfl [vmem:[#allocation1 + $0x8] sm:$0xff pattern:$0x75316420] }
  0x6d   :  { %1140 = vrot.lane.b32.xlu2 %v1130_v63, %s16681_s4  ;;  %v12287_v52 = vld.sshfl [vmem:[#allocation1 + $0x28] sm:$0xff pattern:$0x75316420]  ;;  %v1842_v54 = vld.sshfl [vmem:[#allocation1 + $0x20] sm:$0xff pattern:$0x75316420] }
  0x6e   :  { %2015 = vst [vmem:[#allocation1 + $0x20] ss:$2 sm:$0xff] %v2007_v53 }
  0x71   :  { %v12320_v60 = vld.sshfl [vmem:[#allocation1 + $0x10] sm:$0xff pattern:$0x75316420] }
  0x72   :  { %1134 = vrot.lane.b32.xlu1 %v1127_v57, %s16681_s4  ;;  %1132 = vrot.lane.b32.xlu0 %v1126_v58, %s16681_s4  ;;  %v12313_v58 = vld.sshfl [vmem:[#allocation1 + $0x18] sm:$0xff pattern:$0x75316420] }
  0x73   :  { %2191 = vst [vmem:[#allocation1 + $0x10] ss:$2 sm:$0xff] %v2184_v59 }
  0x75   :  { %1310 = vrot.lane.b32.xlu2 %v1304_v4, %s16644_s25  ;;  %v2021_v16 = vld.sshfl [vmem:[#allocation1 + $0x28] sm:$0xff pattern:$0x75316420]  ;;  %v2020_v15 = vld.sshfl [vmem:[#allocation1 + $0x20] sm:$0xff pattern:$0x75316420] }
  0x76   :  { %v103_v19 = vpop.permute.xlu2 %102 }
  0x7a   :  { %1314 = vrot.lane.b32.xlu1 %v1306_v1, %s16644_s25  ;;  %1312 = vrot.lane.b32.xlu0 %v1305_v3, %s16644_s25  ;;  %v2183_v3 = vld [vmem:[%s16693_s6] sm:$0x77]  ;;  %v12378_v21 = vld.sshfl [vmem:[#allocation1 + $0x10] sm:$0xff pattern:$0x75316420] }
  0x7d   :  { %1142 = vrot.lane.b32.xlu2 %v1131_v61, %s16681_s4 }
  0x7e   :  { %v111_v24 = vpop.permute.xlu2 %110 }
  0x82   :  { %1320 = vrot.lane.b32.xlu1 %v1309_v6, %s16644_s25  ;;  %1318 = vrot.lane.b32.xlu0 %v1308_v7, %s16644_s25 }
  0x85   :  { %1316 = vrot.lane.b32.xlu2 %v1307_v0, %s16644_s25  ;;  %s16679_s25 = smov 16  }
  0x87   :  { %v12233_v28 = vpop.permute.xlu2 %428 }
  0x8a   :  { %1494 = vrot.lane.b32.xlu1 %v1485_v9, %s16654_s3  ;;  %1492 = vrot.lane.b32.xlu0 %v1484_v10, %s16654_s3 }
  0x8b   :  { %v109_v30 = vpop.permute.xlu1 %108 }
  0x8c   :  { %v105_v33 = vpop.permute.xlu0 %104  ;;  %v117_v50 = vsel %vm112_vm2, %v109_v30, %v111_v24 }
  0x8d   :  { %v114_v34 = vsel %vm112_vm2, %v103_v19, %v105_v33  ;;  %1496 = vrot.lane.b32.xlu2 %v1486_v22, %s16654_s3  ;;  %v2362_v22 = vld [vmem:[%s16693_s6 + $0x8] sm:$0x77] }
  0x8e   :  { %11064 = vmatpush.msk.msra.mxu1 %vm122_vm0, %v114_v34 }
  0x8f   :  { %v12246_v36 = vpop.permute.xlu2 %430  ;;  %11065 = vmatmul.msk.f32.vlgmr.msra.gmra.mxu1 %vm118_vm1, %v11061_v35 }
  0x90   :  { %11072 = vmatpush.msk.msrb.mxu1 %vm122_vm0, %v111_v24  ;;  %v437_v0 = vsel %vm432_vm3, %v12233_v28, %v12246_v36 }
  0x92   :  { %11080 = vmatpush.msk.msra.mxu1 %vm122_vm0, %v12102_v14  ;;  %1490 = vrot.lane.b32.xlu1 %v1483_v11, %s16654_s3  ;;  %v12269_v14 = vld.sshfl [vmem:[#allocation1] sm:$0xff pattern:$0x75316420]  ;;  %v12361_v11 = vld [vmem:[%s16694_s29 + $0x18] sm:$0x3f] }
  0x93   :  { %1488 = vrot.lane.b32.xlu0 %v1482_v12, %s16654_s3  ;;  %v101_v44 = vpop.permute.xlu1 %100  ;;  %2011 = vst [vmem:[#allocation1] ss:$2 sm:$0xff] %v2005_v43 }
  0x94   :  { %v107_v46 = vpop.permute.xlu0 %106  ;;  %v113_v47 = vsel %vm112_vm2, %v101_v44, %v103_v19  ;;  %v2185_v19 = vld [vmem:[%s16693_s6 + $0x10] sm:$0x77] }
  0x95   :  { %11062 = vmatpush.msk.msra.mxu0 %vm122_vm0, %v113_v47  ;;  %v115_v48 = vsel %vm112_vm2, %v105_v33, %v107_v46  ;;  %v116_v49 = vsel %vm112_vm2, %v107_v46, %v109_v30  ;;  %1666 = vrot.lane.b32.xlu2 %v1660_v32, %s16638_s7  ;;  %2193 = vst [vmem:[#allocation1 + $0x20] ss:$2 sm:$0xff] %v2185_v19  ;;  %v2363_v32 = vld [vmem:[%s16693_s6 + $0x10] sm:$0x77]  ;;  %v2896_v19 = vld [vmem:[%s16693_s6 + $0x8] sm:$0x77] }
  0x96   :  { %11066 = vmatpush.msk.msra.mxu3 %vm122_vm0, %v115_v48  ;;  %11063 = vmatmul.msk.f32.vlgmr.msra.gmra.mxu0 %vm118_vm1, %v11061_v35  ;;  %v2539_v48 = vld [vmem:[%s16693_s6] sm:$0x77] }
  0x97   :  { %11067 = vmatmul.msk.f32.vlgmr.msra.gmra.mxu3 %vm118_vm1, %v11061_v35  ;;  %11070 = vmatpush.msk.msrb.mxu0 %vm122_vm0, %v117_v50  ;;  %v599_v51 = vpop.permute.xlu2 %598 }
  0x98   :  { %11068 = vmatpush.msk.msrb.mxu3 %vm122_vm0, %v116_v49  ;;  %11073 = vmatmul.msk.f32.vlgmr.msrb.gmra.mxu1 %vm118_vm1, %v11061_v35 }
  0x99   :  { %11078 = vmatpush.msk.msra.mxu0 %vm122_vm0, %v12100_v13  ;;  %v12302_v13 = vld [vmem:[%s16694_s29 + $0x10] sm:$0x3f] }
  0x9a   :  { %11076 = vmatpush.msk.msra.mxu3 %vm122_vm0, %v12109_v17  ;;  %1670 = vrot.lane.b32.xlu1 %v1662_v27, %s16638_s7  ;;  %v2017_v4 = vld.sshfl [vmem:[#allocation1 + $0x8] sm:$0xff pattern:$0x75316420]  ;;  %v2016_v5 = vld.sshfl [vmem:[#allocation1] sm:$0xff pattern:$0x75316420] }
  0x9b   :  { %1668 = vrot.lane.b32.xlu0 %v1661_v31, %s16638_s7  ;;  %2189 = vst [vmem:[#allocation1] ss:$2 sm:$0xff] %v2183_v3 }
  0x9c   :  { %v425_v55 = vpop.permute.xlu0 %424  ;;  %v427_v56 = vpop.permute.xlu1 %426  ;;  %v12409_v31 = vld.sshfl [vmem:[#allocation1 + $0x28] sm:$0xff pattern:$0x75316420]  ;;  %v2198_v33 = vld.sshfl [vmem:[#allocation1 + $0x20] sm:$0xff pattern:$0x75316420] }
  0x9d   :  { %v435_v17 = vsel %vm432_vm3, %v425_v55, %v427_v56  ;;  %1498 = vrot.lane.b32.xlu2 %v12208_v20, %s16654_s3  ;;  %v436_v1 = vsel %vm432_vm3, %v427_v56, %v12233_v28  ;;  %v12376_v20 = vld.sshfl [vmem:[#allocation1 + $0x18] sm:$0xff pattern:$0x75316420]  ;;  %2371 = vst [vmem:[#allocation1 + $0x20] ss:$2 sm:$0xff] %v2363_v32  ;;  %s16661_s3 = smov 15  }
  0x9e   :  { %11091 = vmatpush.msk.msra.mxu2 %vm122_vm0, %v435_v17  ;;  %11071 = vmatmul.msk.f32.vlgmr.msrb.gmra.mxu0 %vm118_vm1, %v11061_v35  ;;  %2369 = vst [vmem:[#allocation1 + $0x10] ss:$2 sm:$0xff] %v2362_v22  ;;  %v11125_v56 = vld [vmem:[%s16694_s29 + $0x28] sm:$0x3f]  ;;  %v11151_v32 = vld [vmem:[%s16694_s29 + $0x38] sm:$0x3f] }
  0x9f   :  { %11069 = vmatmul.msk.f32.vlgmr.msrb.gmra.mxu3 %vm118_vm1, %v11061_v35  ;;  %v12305_v57 = vpop.permute.xlu2 %604  ;;  %11092 = vmatmul.msk.f32.vlgmr.msra.gmra.mxu2 %vm118_vm1, %v12302_v13 }
  0xa0   :  { %11084 = vmatpush.msk.msrb.mxu3 %vm122_vm0, %v12112_v18  ;;  %11081 = vmatmul.msk.f32.vlgmr.msra.gmra.mxu1 %vm118_vm1, %v12219_v23 }
  0xa2   :  { %1676 = vrot.lane.b32.xlu1 %v1665_v37, %s16638_s7  ;;  %v12392_v24 = vld.sshfl [vmem:[#allocation1 + $0x8] sm:$0xff pattern:$0x75316420] }
  0xa3   :  { %1674 = vrot.lane.b32.xlu0 %v1664_v38, %s16638_s7  ;;  %v11112_v38 = vld [vmem:[%s16694_s29 + $0x20] sm:$0x3f] }
  0xa4   :  { %v423_v61 = vpop.permute.xlu1 %422  ;;  %v421_v62 = vpop.permute.xlu0 %420 }
  0xa5   :  { %v434_v18 = vsel %vm432_vm3, %v423_v61, %v425_v55  ;;  %v433_v63 = vsel %vm432_vm3, %v421_v62, %v423_v61  ;;  %1672 = vrot.lane.b32.xlu2 %v12223_v25, %s16638_s7  ;;  %v12394_v25 = vld.sshfl [vmem:[#allocation1] sm:$0xff pattern:$0x75316420]  ;;  %v12441_v42 = vld.sshfl [vmem:[#allocation1 + $0x10] sm:$0xff pattern:$0x75316420] }
  0xa6   :  { %11087 = vmatpush.msk.msrb.mxu0 %vm122_vm0, %v433_v63  ;;  %11089 = vmatpush.msk.msrb.mxu1 %vm122_vm0, %v434_v18  ;;  %v2718_v61 = vld [vmem:[%s16693_s6 + $0x8] sm:$0x77]  ;;  %v2717_v62 = vld [vmem:[%s16693_s6] sm:$0x77]  ;;  %s16830_s7 = smov 71  }
  0xa7   :  { %11077 = vmatmul.msk.f32.vlgmr.msra.gmra.mxu3 %vm118_vm1, %v12219_v23  ;;  %11079 = vmatmul.msk.f32.vlgmr.msra.gmra.mxu0 %vm118_vm1, %v12219_v23  ;;  %v12337_v2 = vpop.permute.xlu2 %784 }
  0xa8   :  { %11093 = vmatpush.msk.msra.mxu3 %vm122_vm0, %v436_v1  ;;  %11095 = vmatpush.msk.msra.mxu0 %vm122_vm0, %v437_v0 }
  0xa9   :  { %11097 = vmatpush.msk.msra.mxu1 %vm122_vm0, %v12246_v36 }
  0xaa   :  { %1850 = vrot.lane.b32.xlu1 %v12255_v40, %s16636_s1  ;;  %11090 = vmatmul.msk.f32.vlgmr.msrb.gmra.mxu1 %vm118_vm1, %v12302_v13  ;;  %v12434_v40 = vld.sshfl [vmem:[#allocation1 + $0x18] sm:$0xff pattern:$0x75316420] }
  0xab   :  { %1848 = vrot.lane.b32.xlu0 %v12257_v41, %s16636_s1  ;;  %v2540_v41 = vld [vmem:[%s16693_s6 + $0x8] sm:$0x77] }
  0xac   :  { %v603_v6 = vpop.permute.xlu1 %602  ;;  %v601_v7 = vpop.permute.xlu0 %600  ;;  %2547 = vst [vmem:[#allocation1 + $0x10] ss:$2 sm:$0xff] %v2540_v41 }
  0xad   :  { %v613_v8 = vsel %vm610_vm4, %v603_v6, %v12305_v57  ;;  %v611_v9 = vsel %vm610_vm4, %v599_v51, %v601_v7  ;;  %v612_v10 = vsel %vm610_vm4, %v601_v7, %v603_v6  ;;  %1852 = vrot.lane.b32.xlu2 %v1842_v54, %s16636_s1  ;;  %v2719_v6 = vld [vmem:[%s16693_s6 + $0x10] sm:$0x77] }
  0xae   :  { %11100 = vmatpush.msk.msrb.mxu2 %vm122_vm0, %v611_v9 }
  0xaf   :  { %11085 = vmatmul.msk.f32.vlgmr.msrb.gmra.mxu3 %vm118_vm1, %v12219_v23  ;;  %11088 = vmatmul.msk.f32.vlgmr.msrb.gmra.mxu0 %vm118_vm1, %v12302_v13  ;;  %v12367_v12 = vpop.permute.xlu2 %954  ;;  %v2361_v23 = vld [vmem:[%s16693_s6] sm:$0x77] }
  0xb0   :  { %11102 = vmatpush.msk.msrb.mxu3 %vm122_vm0, %v612_v10  ;;  %11104 = vmatpush.msk.msrb.mxu0 %vm122_vm0, %v613_v8  ;;  %2367 = vst [vmem:[#allocation1] ss:$2 sm:$0xff] %v2361_v23 }
  0xb1   :  { %11101 = vmatmul.msk.f32.vlgmr.msrb.gmra.mxu2 %vm118_vm1, %v12361_v11 }
  0xb2   :  { %1846 = vrot.lane.b32.xlu1 %v12267_v45, %s16636_s1  ;;  %11098 = vmatmul.msk.f32.vlgmr.msra.gmra.mxu1 %vm118_vm1, %v12302_v13 }
  0xb3   :  { %1844 = vrot.lane.b32.xlu0 %v12269_v14, %s16636_s1  ;;  %v12486_v59 = vld.sshfl [vmem:[#allocation1 + $0x18] sm:$0xff pattern:$0x75316420] }
  0xb4   :  { %v609_v26 = vpop.permute.xlu1 %608  ;;  %v607_v27 = vpop.permute.xlu0 %606 }
  0xb5   :  { %v614_v28 = vsel %vm610_vm4, %v12305_v57, %v607_v27  ;;  %v615_v29 = vsel %vm610_vm4, %v607_v27, %v609_v26  ;;  %2022 = vrot.lane.b32.xlu2 %v2016_v5, %s16634_s27  ;;  %v2376_v57 = vld.sshfl [vmem:[#allocation1 + $0x20] sm:$0xff pattern:$0x75316420] }
  0xb6   :  { %11106 = vmatpush.msk.msrb.mxu1 %vm122_vm0, %v614_v28  ;;  %11108 = vmatpush.msk.msra.mxu2 %vm122_vm0, %v615_v29  ;;  %v2895_v27 = vld [vmem:[%s16693_s6] sm:$0x77] }
  0xb7   :  { %11094 = vmatmul.msk.f32.vlgmr.msra.gmra.mxu3 %vm118_vm1, %v12302_v13  ;;  %11096 = vmatmul.msk.f32.vlgmr.msra.gmra.mxu0 %vm118_vm1, %v12302_v13  ;;  %v787_v30 = vpop.permute.xlu2 %786  ;;  %v2373_v49 = vld.sshfl [vmem:[#allocation1 + $0x8] sm:$0xff pattern:$0x75316420]  ;;  %v2372_v50 = vld.sshfl [vmem:[#allocation1] sm:$0xff pattern:$0x75316420] }
  0xb8   :  { %11110 = vmatpush.msk.msra.mxu3 %vm122_vm0, %v609_v26  ;;  %v793_v46 = vsel %vm788_vm5, %v12337_v2, %v787_v30  ;;  %2545 = vst [vmem:[#allocation1] ss:$2 sm:$0xff] %v2539_v48  ;;  %v2377_v13 = vld.sshfl [vmem:[#allocation1 + $0x28] sm:$0xff pattern:$0x75316420] }
  0xb9   :  { %11109 = vmatmul.msk.f32.vlgmr.msra.gmra.mxu2 %vm118_vm1, %v12361_v11 }
  0xba   :  { %2026 = vrot.lane.b32.xlu1 %v12320_v60, %s16634_s27  ;;  %11107 = vmatmul.msk.f32.vlgmr.msrb.gmra.mxu1 %vm118_vm1, %v12361_v11  ;;  %v12488_v60 = vld.sshfl [vmem:[#allocation1 + $0x10] sm:$0xff pattern:$0x75316420] }
  0xbb   :  { %2024 = vrot.lane.b32.xlu0 %v2017_v4, %s16634_s27  ;;  %2725 = vst [vmem:[#allocation1 + $0x10] ss:$2 sm:$0xff] %v2718_v61 }
  0xbc   :  { %v783_v34 = vpop.permute.xlu1 %782  ;;  %v781_v35 = vpop.permute.xlu0 %780 }
  0xbd   :  { %v792_v36 = vsel %vm788_vm5, %v783_v34, %v12337_v2  ;;  %v791_v37 = vsel %vm788_vm5, %v781_v35, %v783_v34  ;;  %1854 = vrot.lane.b32.xlu2 %v12287_v52, %s16636_s1  ;;  %s16650_s1 = smov 42  }
  0xbe   :  { %11117 = vmatpush.msk.msrb.mxu2 %vm122_vm0, %v791_v37 }
  0xbf   :  { %11103 = vmatmul.msk.f32.vlgmr.msrb.gmra.mxu3 %vm118_vm1, %v12361_v11  ;;  %11105 = vmatmul.msk.f32.vlgmr.msrb.gmra.mxu0 %vm118_vm1, %v12361_v11  ;;  %v961_v39 = vpop.permute.xlu2 %960  ;;  %v12500_v18 = vld.sshfl [vmem:[#allocation1 + $0x8] sm:$0xff pattern:$0x75316420]  ;;  %v12502_v63 = vld.sshfl [vmem:[#allocation1] sm:$0xff pattern:$0x75316420] }
  0xc0   :  { %11119 = vmatpush.msk.msrb.mxu3 %vm122_vm0, %v792_v36  ;;  %2723 = vst [vmem:[#allocation1] ss:$2 sm:$0xff] %v2717_v62 }
  0xc1   :  { %11118 = vmatmul.msk.f32.vlgmr.msrb.gmra.mxu2 %vm118_vm1, %v11112_v38 }
  0xc2   :  { %2032 = vrot.lane.b32.xlu1 %v2021_v16, %s16634_s27 }
  0xc3   :  { %2030 = vrot.lane.b32.xlu0 %v2020_v15, %s16634_s27  ;;  %v12534_v15 = vld.sshfl [vmem:[#allocation1 + $0x18] sm:$0xff pattern:$0x75316420] }
  0xc4   :  { %v779_v43 = vpop.permute.xlu1 %778  ;;  %v777_v44 = vpop.permute.xlu0 %776 }
  0xc5   :  { %v790_v45 = vsel %vm788_vm5, %v779_v43, %v781_v35  ;;  %v789_v14 = vsel %vm788_vm5, %v777_v44, %v779_v43  ;;  %2028 = vrot.lane.b32.xlu2 %v12313_v58, %s16634_s27  ;;  %v2541_v58 = vld [vmem:[%s16693_s6 + $0x10] sm:$0x77]  ;;  %s16640_s27 = smov 69   ;;  %v3073_v43 = vld [vmem:[%s16693_s6] sm:$0x77] }
  0xc6   :  { %11113 = vmatpush.msk.msra.mxu0 %vm122_vm0, %v789_v14  ;;  %11115 = vmatpush.msk.msra.mxu1 %vm122_vm0, %v790_v45  ;;  %2549 = vst [vmem:[#allocation1 + $0x20] ss:$2 sm:$0xff] %v2541_v58  ;;  %v3252_v58 = vld [vmem:[%s16693_s6 + $0x8] sm:$0x77] }
  0xc7   :  { %11111 = vmatmul.msk.f32.vlgmr.msra.gmra.mxu3 %vm118_vm1, %v12361_v11  ;;  %v12454_v47 = vpop.permute.xlu2 %1140  ;;  %11114 = vmatmul.msk.f32.vlgmr.msra.gmra.mxu0 %vm118_vm1, %v11112_v38  ;;  %v2729_v28 = vld.sshfl [vmem:[#allocation1 + $0x8] sm:$0xff pattern:$0x75316420]  ;;  %v2728_v29 = vld.sshfl [vmem:[#allocation1] sm:$0xff pattern:$0x75316420] }
  0xc8   :  { %11121 = vmatpush.msk.msrb.mxu0 %vm122_vm0, %v793_v46  ;;  %11123 = vmatpush.msk.msrb.mxu1 %vm122_vm0, %v787_v30  ;;  %2901 = vst [vmem:[#allocation1] ss:$2 sm:$0xff] %v2895_v27 }
  0xc9   :  { %11116 = vmatmul.msk.f32.vlgmr.msra.gmra.mxu1 %vm118_vm1, %v11112_v38 }
  0xca   :  { %2206 = vrot.lane.b32.xlu1 %v12376_v20, %s16642_s30  ;;  %v12541_v20 = vld.sshfl [vmem:[#allocation1 + $0x10] sm:$0xff pattern:$0x75316420] }
  0xcb   :  { %2204 = vrot.lane.b32.xlu0 %v12378_v21, %s16642_s30  ;;  %2903 = vst [vmem:[#allocation1 + $0x10] ss:$2 sm:$0xff] %v2896_v19 }
  0xcc   :  { %v959_v51 = vpop.permute.xlu1 %958  ;;  %v957_v52 = vpop.permute.xlu0 %956 }
  0xcd   :  { %v969_v53 = vsel %vm966_vm6, %v959_v51, %v961_v39  ;;  %v967_v54 = vsel %vm966_vm6, %v12367_v12, %v957_v52  ;;  %v968_v55 = vsel %vm966_vm6, %v957_v52, %v959_v51  ;;  %2208 = vrot.lane.b32.xlu2 %v2198_v33, %s16642_s30  ;;  %v12514_v5 = vld.sshfl [vmem:[#allocation1 + $0x28] sm:$0xff pattern:$0x75316420]  ;;  %v2554_v7 = vld.sshfl [vmem:[#allocation1 + $0x20] sm:$0xff pattern:$0x75316420] }
  0xce   :  { %11126 = vmatpush.msk.msra.mxu2 %vm122_vm0, %v967_v54  ;;  %11128 = vmatpush.msk.msra.mxu3 %vm122_vm0, %v968_v55  ;;  %2727 = vst [vmem:[#allocation1 + $0x20] ss:$2 sm:$0xff] %v2719_v6  ;;  %v11138_v12 = vld [vmem:[%s16694_s29 + $0x30] sm:$0x3f]  ;;  %v11164_v55 = vld [vmem:[%s16694_s29 + $0x40] sm:$0x3f] }
  0xcf   :  { %11120 = vmatmul.msk.f32.vlgmr.msrb.gmra.mxu3 %vm118_vm1, %v11112_v38  ;;  %11130 = vmatpush.msk.msra.mxu0 %vm122_vm0, %v969_v53  ;;  %v12478_v17 = vpop.permute.xlu2 %1310  ;;  %v12595_v44 = vld.sshfl [vmem:[#allocation1 + $0x8] sm:$0xff pattern:$0x75316420]  ;;  %v12597_v45 = vld.sshfl [vmem:[#allocation1] sm:$0xff pattern:$0x75316420] }
  0xd0   :  { %11127 = vmatmul.msk.f32.vlgmr.msra.gmra.mxu2 %vm118_vm1, %v11125_v56  ;;  %11122 = vmatmul.msk.f32.vlgmr.msrb.gmra.mxu0 %vm118_vm1, %v11112_v38  ;;  %3079 = vst [vmem:[#allocation1] ss:$2 sm:$0xff] %v3073_v43  ;;  %v3075_v51 = vld [vmem:[%s16693_s6 + $0x10] sm:$0x77] }
  0xd1   :  { %11124 = vmatmul.msk.f32.vlgmr.msrb.gmra.mxu1 %vm118_vm1, %v11112_v38 }
  0xd2   :  { %2202 = vrot.lane.b32.xlu1 %v12392_v24, %s16642_s30  ;;  %v2908_v41 = vld.sshfl [vmem:[#allocation1 + $0x10] sm:$0xff pattern:$0x75316420] }
  0xd3   :  { %2200 = vrot.lane.b32.xlu0 %v12394_v25, %s16642_s30 }
  0xd4   :  { %v965_v0 = vpop.permute.xlu1 %964  ;;  %v963_v1 = vpop.permute.xlu0 %962 }
  0xd5   :  { %v970_v2 = vsel %vm966_vm6, %v961_v39, %v963_v1  ;;  %v971_v3 = vsel %vm966_vm6, %v963_v1, %v965_v0  ;;  %11136 = vmatpush.msk.msrb.mxu3 %vm122_vm0, %v965_v0  ;;  %2378 = vrot.lane.b32.xlu2 %v2372_v50, %s16640_s27  ;;  %v2733_v37 = vld.sshfl [vmem:[#allocation1 + $0x28] sm:$0xff pattern:$0x75316420]  ;;  %v2732_v38 = vld.sshfl [vmem:[#allocation1 + $0x20] sm:$0xff pattern:$0x75316420] }
  0xd6   :  { %11132 = vmatpush.msk.msra.mxu1 %vm122_vm0, %v970_v2  ;;  %11134 = vmatpush.msk.msrb.mxu2 %vm122_vm0, %v971_v3  ;;  %v2897_v39 = vld [vmem:[%s16693_s6 + $0x10] sm:$0x77]  ;;  %v3251_v1 = vld [vmem:[%s16693_s6] sm:$0x77] }
  0xd7   :  { %11129 = vmatmul.msk.f32.vlgmr.msra.gmra.mxu3 %vm118_vm1, %v11125_v56  ;;  %v1143_v4 = vpop.permute.xlu2 %1142  ;;  %2905 = vst [vmem:[#allocation1 + $0x20] ss:$2 sm:$0xff] %v2897_v39  ;;  %v3085_v2 = vld.sshfl [vmem:[#allocation1 + $0x8] sm:$0xff pattern:$0x75316420] }
  0xd8   :  { %11135 = vmatmul.msk.f32.vlgmr.msrb.gmra.mxu2 %vm118_vm1, %v11125_v56  ;;  %11131 = vmatmul.msk.f32.vlgmr.msra.gmra.mxu0 %vm118_vm1, %v11125_v56  ;;  %v1149_v25 = vsel %vm1144_vm7, %v12454_v47, %v1143_v4  ;;  %v3084_v3 = vld.sshfl [vmem:[#allocation1] sm:$0xff pattern:$0x75316420]  ;;  %v3608_v39 = vld [vmem:[%s16693_s6 + $0x8] sm:$0x77] }
  0xd9   :  { %11133 = vmatmul.msk.f32.vlgmr.msra.gmra.mxu1 %vm118_vm1, %v11125_v56  ;;  %3257 = vst [vmem:[#allocation1] ss:$2 sm:$0xff] %v3251_v1 }
  0xda   :  { %2382 = vrot.lane.b32.xlu1 %v12441_v42, %s16640_s27  ;;  %v3074_v42 = vld [vmem:[%s16693_s6 + $0x8] sm:$0x77] }
  0xdb   :  { %2380 = vrot.lane.b32.xlu0 %v2373_v49, %s16640_s27 }
  0xdc   :  { %v1139_v8 = vpop.permute.xlu1 %1138  ;;  %v1137_v9 = vpop.permute.xlu0 %1136 }
  0xdd   :  { %v1148_v10 = vsel %vm1144_vm7, %v1139_v8, %v12454_v47  ;;  %v1147_v11 = vsel %vm1144_vm7, %v1137_v9, %v1139_v8  ;;  %2210 = vrot.lane.b32.xlu2 %v12409_v31, %s16642_s30  ;;  %s16652_s30 = smov 43   ;;  %v11177_v8 = vld [vmem:[%s16694_s29 + $0x48] sm:$0x3f] }
  0xde   :  { %11143 = vmatpush.msk.msra.mxu2 %vm122_vm0, %v1147_v11  ;;  %11145 = vmatpush.msk.msra.mxu3 %vm122_vm0, %v1148_v10  ;;  %v12609_v50 = vld.sshfl [vmem:[#allocation1 + $0x28] sm:$0xff pattern:$0x75316420]  ;;  %v2910_v52 = vld.sshfl [vmem:[#allocation1 + $0x20] sm:$0xff pattern:$0x75316420] }
  0xdf   :  { %11137 = vmatmul.msk.f32.vlgmr.msrb.gmra.mxu3 %vm118_vm1, %v11125_v56  ;;  %v1317_v16 = vpop.permute.xlu2 %1316  ;;  %3083 = vst [vmem:[#allocation1 + $0x20] ss:$2 sm:$0xff] %v3075_v51 }
  0xe0   :  { %11144 = vmatmul.msk.f32.vlgmr.msra.gmra.mxu2 %vm118_vm1, %v11138_v12 }
  0xe2   :  { %2388 = vrot.lane.b32.xlu1 %v2377_v13, %s16640_s27 }
  0xe3   :  { %2386 = vrot.lane.b32.xlu0 %v2376_v57, %s16640_s27 }
  0xe4   :  { %v1135_v21 = vpop.permute.xlu1 %1134  ;;  %v1133_v22 = vpop.permute.xlu0 %1132 }
  0xe5   :  { %v1146_v23 = vsel %vm1144_vm7, %v1135_v21, %v1137_v9  ;;  %v1145_v24 = vsel %vm1144_vm7, %v1133_v22, %v1135_v21  ;;  %2384 = vrot.lane.b32.xlu2 %v12434_v40, %s16640_s27  ;;  %v2909_v40 = vld.sshfl [vmem:[#allocation1 + $0x18] sm:$0xff pattern:$0x75316420]  ;;  %s16646_s27 = smov 44   ;;  %v3429_v21 = vld [vmem:[%s16693_s6] sm:$0x77] }
  0xe6   :  { %11139 = vmatpush.msk.msrb.mxu0 %vm122_vm0, %v1145_v24  ;;  %11141 = vmatpush.msk.msrb.mxu1 %vm122_vm0, %v1146_v23  ;;  %3081 = vst [vmem:[#allocation1 + $0x10] ss:$2 sm:$0xff] %v3074_v42  ;;  %v3089_v11 = vld.sshfl [vmem:[#allocation1 + $0x28] sm:$0xff pattern:$0x75316420] }
  0xe7   :  { %11146 = vmatmul.msk.f32.vlgmr.msra.gmra.mxu3 %vm118_vm1, %v11138_v12  ;;  %v12553_v26 = vpop.permute.xlu2 %1496  ;;  %11140 = vmatmul.msk.f32.vlgmr.msrb.gmra.mxu0 %vm118_vm1, %v11138_v12  ;;  %v12687_v22 = vld.sshfl [vmem:[#allocation1 + $0x8] sm:$0xff pattern:$0x75316420]  ;;  %v12689_v23 = vld.sshfl [vmem:[#allocation1] sm:$0xff pattern:$0x75316420] }
  0xe8   :  { %11147 = vmatpush.msk.msra.mxu0 %vm122_vm0, %v1149_v25  ;;  %11142 = vmatmul.msk.f32.vlgmr.msrb.gmra.mxu1 %vm118_vm1, %v11138_v12  ;;  %3435 = vst [vmem:[#allocation1] ss:$2 sm:$0xff] %v3429_v21 }
  0xe9   :  { %11149 = vmatpush.msk.msra.mxu1 %vm122_vm0, %v1143_v4 }
  0xea   :  { %2562 = vrot.lane.b32.xlu1 %v12486_v59, %s16648_s26 }
  0xeb   :  { %2560 = vrot.lane.b32.xlu0 %v12488_v60, %s16648_s26 }
  0xec   :  { %v1315_v30 = vpop.permute.xlu1 %1314  ;;  %v1313_v31 = vpop.permute.xlu0 %1312 }
  0xed   :  { %v1323_v33 = vsel %vm1322_vm8, %v12478_v17, %v1313_v31  ;;  %v1324_v34 = vsel %vm1322_vm8, %v1313_v31, %v1315_v30  ;;  %2564 = vrot.lane.b32.xlu2 %v2554_v7, %s16648_s26  ;;  %v1325_v35 = vsel %vm1322_vm8, %v1315_v30, %v1317_v16  ;;  %v12629_v57 = vld.sshfl [vmem:[#allocation1 + $0x18] sm:$0xff pattern:$0x75316420]  ;;  %v12636_v59 = vld.sshfl [vmem:[#allocation1 + $0x10] sm:$0xff pattern:$0x75316420] }
  0xee   :  { %11152 = vmatpush.msk.msrb.mxu2 %vm122_vm0, %v1323_v33  ;;  %11154 = vmatpush.msk.msrb.mxu3 %vm122_vm0, %v1324_v34  ;;  %3259 = vst [vmem:[#allocation1 + $0x10] ss:$2 sm:$0xff] %v3252_v58  ;;  %v3431_v30 = vld [vmem:[%s16693_s6 + $0x10] sm:$0x77] }
  0xef   :  { %11153 = vmatmul.msk.f32.vlgmr.msrb.gmra.mxu2 %vm118_vm1, %v11151_v32  ;;  %11155 = vmatmul.msk.f32.vlgmr.msrb.gmra.mxu3 %vm118_vm1, %v11151_v32  ;;  %v12577_v36 = vpop.permute.xlu2 %1666 }
  0xf0   :  { %11148 = vmatmul.msk.f32.vlgmr.msra.gmra.mxu0 %vm118_vm1, %v11138_v12  ;;  %11150 = vmatmul.msk.f32.vlgmr.msra.gmra.mxu1 %vm118_vm1, %v11138_v12  ;;  %v3088_v12 = vld.sshfl [vmem:[#allocation1 + $0x20] sm:$0xff pattern:$0x75316420] }
  0xf1   :  { %11156 = vmatpush.msk.msrb.mxu0 %vm122_vm0, %v1325_v35 }
  0xf2   :  { %2558 = vrot.lane.b32.xlu1 %v12500_v18, %s16648_s26 }
  0xf3   :  { %2556 = vrot.lane.b32.xlu0 %v12502_v63, %s16648_s26 }
  0xf4   :  { %v1321_v14 = vpop.permute.xlu1 %1320  ;;  %v1319_v46 = vpop.permute.xlu0 %1318 }
  0xf5   :  { %v1326_v47 = vsel %vm1322_vm8, %v1317_v16, %v1319_v46  ;;  %v1327_v48 = vsel %vm1322_vm8, %v1319_v46, %v1321_v14  ;;  %11162 = vmatpush.msk.msra.mxu3 %vm122_vm0, %v1321_v14  ;;  %2734 = vrot.lane.b32.xlu2 %v2728_v29, %s16646_s27  ;;  %v3253_v16 = vld [vmem:[%s16693_s6 + $0x10] sm:$0x77]  ;;  %v3607_v46 = vld [vmem:[%s16693_s6] sm:$0x77] }
  0xf6   :  { %11158 = vmatpush.msk.msrb.mxu1 %vm122_vm0, %v1326_v47  ;;  %11160 = vmatpush.msk.msra.mxu2 %vm122_vm0, %v1327_v48  ;;  %v3264_v19 = vld.sshfl [vmem:[#allocation1 + $0x10] sm:$0xff pattern:$0x75316420]  ;;  %3261 = vst [vmem:[#allocation1 + $0x20] ss:$2 sm:$0xff] %v3253_v16 }
  0xf7   :  { %11161 = vmatmul.msk.f32.vlgmr.msra.gmra.mxu2 %vm118_vm1, %v11151_v32  ;;  %11163 = vmatmul.msk.f32.vlgmr.msra.gmra.mxu3 %vm118_vm1, %v11151_v32  ;;  %v1499_v49 = vpop.permute.xlu2 %1498  ;;  %v3441_v47 = vld.sshfl [vmem:[#allocation1 + $0x8] sm:$0xff pattern:$0x75316420]  ;;  %v3440_v48 = vld.sshfl [vmem:[#allocation1] sm:$0xff pattern:$0x75316420] }
  0xf8   :  { %11157 = vmatmul.msk.f32.vlgmr.msrb.gmra.mxu0 %vm118_vm1, %v11151_v32  ;;  %11159 = vmatmul.msk.f32.vlgmr.msrb.gmra.mxu1 %vm118_vm1, %v11151_v32  ;;  %v1505_v63 = vsel %vm1500_vm9, %v12553_v26, %v1499_v49  ;;  %3615 = vst [vmem:[#allocation1] ss:$2 sm:$0xff] %v3607_v46  ;;  %v3979_v46 = vld [vmem:[%s16693_s6] sm:$0x77] }
  0xfa   :  { %2738 = vrot.lane.b32.xlu1 %v12541_v20, %s16646_s27  ;;  %v3430_v20 = vld [vmem:[%s16693_s6 + $0x8] sm:$0x77] }
  0xfb   :  { %2736 = vrot.lane.b32.xlu0 %v2729_v28, %s16646_s27 }
  0xfc   :  { %v1495_v53 = vpop.permute.xlu1 %1494  ;;  %v1493_v54 = vpop.permute.xlu0 %1492 }
  0xfd   :  { %v1504_v56 = vsel %vm1500_vm9, %v1495_v53, %v12553_v26  ;;  %v1503_v17 = vsel %vm1500_vm9, %v1493_v54, %v1495_v53  ;;  %2566 = vrot.lane.b32.xlu2 %v12514_v5, %s16648_s26  ;;  %v12701_v29 = vld.sshfl [vmem:[#allocation1 + $0x28] sm:$0xff pattern:$0x75316420]  ;;  %v3266_v31 = vld.sshfl [vmem:[#allocation1 + $0x20] sm:$0xff pattern:$0x75316420] }
  0xfe   :  { %11169 = vmatpush.msk.msrb.mxu2 %vm122_vm0, %v1503_v17  ;;  %11171 = vmatpush.msk.msrb.mxu3 %vm122_vm0, %v1504_v56  ;;  %3439 = vst [vmem:[#allocation1 + $0x20] ss:$2 sm:$0xff] %v3431_v30  ;;  %v11203_v53 = vld [vmem:[%s16694_s29 + $0x58] sm:$0x3f]  ;;  %s16829_s26 = smov 72  }
  0xff   :  { %11170 = vmatmul.msk.f32.vlgmr.msrb.gmra.mxu2 %vm118_vm1, %v11164_v55  ;;  %11172 = vmatmul.msk.f32.vlgmr.msrb.gmra.mxu3 %vm118_vm1, %v11164_v55  ;;  %v1673_v13 = vpop.permute.xlu2 %1672 }
 0x102   :  { %2744 = vrot.lane.b32.xlu1 %v2733_v37, %s16646_s27 }
 0x103   :  { %2742 = vrot.lane.b32.xlu0 %v2732_v38, %s16646_s27 }
 0x104   :  { %v1491_v60 = vpop.permute.xlu1 %1490 }
 0x105   :  { %v1489_v61 = vpop.permute.xlu0 %1488  ;;  %v1502_v62 = vsel %vm1500_vm9, %v1491_v60, %v1493_v54  ;;  %2740 = vrot.lane.b32.xlu2 %v12534_v15, %s16646_s27  ;;  %v3265_v15 = vld.sshfl [vmem:[#allocation1 + $0x18] sm:$0xff pattern:$0x75316420]  ;;  %s16658_s27 = smov 41  }
 0x106   :  { %v1501_v18 = vsel %vm1500_vm9, %v1489_v61, %v1491_v60  ;;  %11167 = vmatpush.msk.msra.mxu1 %vm122_vm0, %v1502_v62  ;;  %3437 = vst [vmem:[#allocation1 + $0x10] ss:$2 sm:$0xff] %v3430_v20  ;;  %v3445_v56 = vld.sshfl [vmem:[#allocation1 + $0x28] sm:$0xff pattern:$0x75316420]  ;;  %v12828_v20 = vpop.f32.mrf.mxu2 }
 0x107   :  { %11165 = vmatpush.msk.msra.mxu0 %vm122_vm0, %v1501_v18  ;;  %11168 = vmatmul.msk.f32.vlgmr.msra.gmra.mxu1 %vm118_vm1, %v11164_v55  ;;  %v12648_v0 = vpop.permute.xlu2 %1852  ;;  %v3444_v17 = vld.sshfl [vmem:[#allocation1 + $0x20] sm:$0xff pattern:$0x75316420]  ;;  %v3794_v60 = vld [vmem:[%s16693_s6 + $0x8] sm:$0x77] }
 0x108   :  { %11166 = vmatmul.msk.f32.vlgmr.msra.gmra.mxu0 %vm118_vm1, %v11164_v55  ;;  %11175 = vmatpush.msk.msrb.mxu1 %vm122_vm0, %v1499_v49  ;;  %v3793_v61 = vld [vmem:[%s16693_s6] sm:$0x77]  ;;  %v12785_v62 = vld.sshfl [vmem:[#allocation1 + $0x8] sm:$0xff pattern:$0x75316420] }
 0x109   :  { %11173 = vmatpush.msk.msrb.mxu0 %vm122_vm0, %v1505_v63  ;;  %v12787_v18 = vld.sshfl [vmem:[#allocation1] sm:$0xff pattern:$0x75316420] }
 0x10a   :  { %2918 = vrot.lane.b32.xlu1 %v2909_v40, %s16652_s30  ;;  %3801 = vst [vmem:[#allocation1] ss:$2 sm:$0xff] %v3793_v61 }
 0x10b   :  { %2916 = vrot.lane.b32.xlu0 %v2908_v41, %s16652_s30 }
 0x10c   :  { %v1671_v4 = vpop.permute.xlu1 %1670 }
 0x10d   :  { %v1669_v5 = vpop.permute.xlu0 %1668  ;;  %2920 = vrot.lane.b32.xlu2 %v2910_v52, %s16652_s30  ;;  %v1681_v9 = vsel %vm1678_vm10, %v1671_v4, %v1673_v13  ;;  %v12721_v38 = vld.sshfl [vmem:[#allocation1 + $0x18] sm:$0xff pattern:$0x75316420]  ;;  %v12728_v40 = vld.sshfl [vmem:[#allocation1 + $0x10] sm:$0xff pattern:$0x75316420] }
 0x10e   :  { %v1679_v6 = vsel %vm1678_vm10, %v12577_v36, %v1669_v5  ;;  %v1680_v7 = vsel %vm1678_vm10, %v1669_v5, %v1671_v4  ;;  %11182 = vmatpush.msk.msra.mxu0 %vm122_vm0, %v1681_v9  ;;  %v11190_v36 = vld [vmem:[%s16694_s29 + $0x50] sm:$0x3f]  ;;  %3617 = vst [vmem:[#allocation1 + $0x10] ss:$2 sm:$0xff] %v3608_v39  ;;  %v3610_v9 = vld [vmem:[%s16693_s6 + $0x18] sm:$0x7] }
 0x10f   :  { %11178 = vmatpush.msk.msra.mxu2 %vm122_vm0, %v1679_v6  ;;  %11180 = vmatpush.msk.msra.mxu3 %vm122_vm0, %v1680_v7  ;;  %v12669_v10 = vpop.permute.xlu2 %2022  ;;  %v12803_v6 = vpop.f32.mrf.mxu1  ;;  %3621 = vst [vmem:[#allocation1 + $0x30] ss:$2 sm:$0xff] %v3610_v9  ;;  %v3981_v39 = vld [vmem:[%s16693_s6 + $0x10] sm:$0x77] }
 0x110   :  { %11174 = vmatmul.msk.f32.vlgmr.msrb.gmra.mxu0 %vm118_vm1, %v11164_v55  ;;  %11176 = vmatmul.msk.f32.vlgmr.msrb.gmra.mxu1 %vm118_vm1, %v11164_v55 }
 0x111   :  { %11179 = vmatmul.msk.f32.vlgmr.msra.gmra.mxu2 %vm118_vm1, %v11177_v8  ;;  %11181 = vmatmul.msk.f32.vlgmr.msra.gmra.mxu3 %vm118_vm1, %v11177_v8 }
 0x112   :  { %2914 = vrot.lane.b32.xlu1 %v12595_v44, %s16652_s30 }
 0x113   :  { %2912 = vrot.lane.b32.xlu0 %v12597_v45, %s16652_s30 }
 0x114   :  { %v1677_v24 = vpop.permute.xlu1 %1676 }
 0x115   :  { %v1675_v25 = vpop.permute.xlu0 %1674  ;;  %11188 = vmatpush.msk.msrb.mxu3 %vm122_vm0, %v1677_v24  ;;  %3090 = vrot.lane.b32.xlu2 %v3084_v3, %s16650_s1  ;;  %v12771_v58 = vld.sshfl [vmem:[#allocation1 + $0x18] sm:$0xff pattern:$0x75316420]  ;;  %v12795_v3 = vpop.f32.mrf.mxu0 }
 0x116   :  { %v1682_v26 = vsel %vm1678_vm10, %v1673_v13, %v1675_v25  ;;  %v1683_v27 = vsel %vm1678_vm10, %v1675_v25, %v1677_v24  ;;  %v3609_v13 = vld [vmem:[%s16693_s6 + $0x10] sm:$0x77]  ;;  %v3796_v25 = vld [vmem:[%s16693_s6 + $0x18] sm:$0x7] }
 0x117   :  { %11184 = vmatpush.msk.msra.mxu1 %vm122_vm0, %v1682_v26  ;;  %11186 = vmatpush.msk.msrb.mxu2 %vm122_vm0, %v1683_v27  ;;  %v1855_v28 = vpop.permute.xlu2 %1854  ;;  %3619 = vst [vmem:[#allocation1 + $0x20] ss:$2 sm:$0xff] %v3609_v13  ;;  %v12840_v24 = vld.sshfl [vmem:[#allocation1 + $0x30] sm:$0xff pattern:$0x75316420] }
 0x118   :  { %11183 = vmatmul.msk.f32.vlgmr.msra.gmra.mxu0 %vm118_vm1, %v11177_v8  ;;  %11185 = vmatmul.msk.f32.vlgmr.msra.gmra.mxu1 %vm118_vm1, %v11177_v8  ;;  %v1861_v45 = vsel %vm1856_vm11, %v12648_v0, %v1855_v28  ;;  %3807 = vst [vmem:[#allocation1 + $0x30] ss:$2 sm:$0xff] %v3796_v25 }
 0x119   :  { %11187 = vmatmul.msk.f32.vlgmr.msrb.gmra.mxu2 %vm118_vm1, %v11177_v8  ;;  %11189 = vmatmul.msk.f32.vlgmr.msrb.gmra.mxu3 %vm118_vm1, %v11177_v8  ;;  %v3795_v8 = vld [vmem:[%s16693_s6 + $0x10] sm:$0x77] }
 0x11a   :  { %3094 = vrot.lane.b32.xlu1 %v12636_v59, %s16650_s1  ;;  %v12773_v59 = vld.sshfl [vmem:[#allocation1 + $0x10] sm:$0xff pattern:$0x75316420] }
 0x11b   :  { %3092 = vrot.lane.b32.xlu0 %v3085_v2, %s16650_s1  ;;  %3803 = vst [vmem:[#allocation1 + $0x10] ss:$2 sm:$0xff] %v3794_v60 }
 0x11c   :  { %v1851_v32 = vpop.permute.xlu1 %1850 }
 0x11d   :  { %v1849_v33 = vpop.permute.xlu0 %1848  ;;  %v1860_v34 = vsel %vm1856_vm11, %v1851_v32, %v12648_v0  ;;  %2922 = vrot.lane.b32.xlu2 %v12609_v50, %s16652_s30  ;;  %s16733_s30 = sld [smem:[#allocation78_spill]] }
 0x11e   :  { %v1859_v35 = vsel %vm1856_vm11, %v1849_v33, %v1851_v32  ;;  %11197 = vmatpush.msk.msra.mxu3 %vm122_vm0, %v1860_v34  ;;  %v12801_v5 = vld.sshfl [vmem:[#allocation1 + $0x28] sm:$0xff pattern:$0x75316420]  ;;  %v12805_v7 = vld.sshfl [vmem:[#allocation1 + $0x20] sm:$0xff pattern:$0x75316420]  ;;  %v12863_v34 = vpop.f32.mrf.mxu2 }
 0x11f   :  { %11195 = vmatpush.msk.msra.mxu2 %vm122_vm0, %v1859_v35  ;;  %v2029_v37 = vpop.permute.xlu2 %2028  ;;  %3805 = vst [vmem:[#allocation1 + $0x20] ss:$2 sm:$0xff] %v3795_v8 }
 0x121   :  { %11196 = vmatmul.msk.f32.vlgmr.msra.gmra.mxu2 %vm118_vm1, %v11190_v36  ;;  %11198 = vmatmul.msk.f32.vlgmr.msra.gmra.mxu3 %vm118_vm1, %v11190_v36 }
 0x122   :  { %3100 = vrot.lane.b32.xlu1 %v3089_v11, %s16650_s1 }
 0x123   :  { %3098 = vrot.lane.b32.xlu0 %v3088_v12, %s16650_s1 }
 0x124   :  { %v1847_v41 = vpop.permute.xlu1 %1846 }
 0x125   :  { %v1845_v42 = vpop.permute.xlu0 %1844  ;;  %v1858_v43 = vsel %vm1856_vm11, %v1847_v41, %v1849_v33  ;;  %3096 = vrot.lane.b32.xlu2 %v12629_v57, %s16650_s1  ;;  %v12768_v57 = vpop.f32.mrf.mxu3  ;;  %s16656_s1 = smov 40  }
 0x126   :  { %v1857_v44 = vsel %vm1856_vm11, %v1845_v42, %v1847_v41  ;;  %11193 = vmatpush.msk.msrb.mxu1 %vm122_vm0, %v1858_v43  ;;  %v12861_v33 = vld.sshfl [vmem:[#allocation1 + $0x28] sm:$0xff pattern:$0x75316420]  ;;  %v12865_v35 = vld.sshfl [vmem:[#allocation1 + $0x20] sm:$0xff pattern:$0x75316420] }
 0x127   :  { %11191 = vmatpush.msk.msrb.mxu0 %vm122_vm0, %v1857_v44  ;;  %11194 = vmatmul.msk.f32.vlgmr.msrb.gmra.mxu1 %vm118_vm1, %v11190_v36  ;;  %v12740_v14 = vpop.permute.xlu2 %2208  ;;  %v11229_v41 = vld [vmem:[%s16694_s29 + $0x68] sm:$0x3f]  ;;  %v12884_v43 = vld.sshfl [vmem:[#allocation1 + $0x30] sm:$0xff pattern:$0x75316420] }
 0x128   :  { %11192 = vmatmul.msk.f32.vlgmr.msrb.gmra.mxu0 %vm118_vm1, %v11190_v36  ;;  %11201 = vmatpush.msk.msra.mxu1 %vm122_vm0, %v1855_v28  ;;  %v3809_v42 = vld.sshfl [vmem:[#allocation1 + $0x8] sm:$0xff pattern:$0x75316420]  ;;  %3991 = vst [vmem:[#allocation1 + $0x20] ss:$2 sm:$0xff] %v3981_v39 }
 0x129   :  { %11199 = vmatpush.msk.msra.mxu0 %vm122_vm0, %v1861_v45 }
 0x12a   :  { %3274 = vrot.lane.b32.xlu1 %v3265_v15, %s16658_s27 }
 0x12b   :  { %3272 = vrot.lane.b32.xlu0 %v3264_v19, %s16658_s27  ;;  %v11216_v19 = vld [vmem:[%s16694_s29 + $0x60] sm:$0x3f] }
 0x12c   :  { %v2027_v49 = vpop.permute.xlu1 %2026 }
 0x12d   :  { %v2025_v50 = vpop.permute.xlu0 %2024  ;;  %3276 = vrot.lane.b32.xlu2 %v3266_v31, %s16658_s27  ;;  %v2037_v54 = vsel %vm2034_vm12, %v2027_v49, %v2029_v37 }
 0x12e   :  { %v2035_v51 = vsel %vm2034_vm12, %v12669_v10, %v2025_v50  ;;  %v2036_v52 = vsel %vm2034_vm12, %v2025_v50, %v2027_v49  ;;  %11208 = vmatpush.msk.msrb.mxu0 %vm122_vm0, %v2037_v54  ;;  %v12816_v10 = vpop.f32.mrf.mxu3  ;;  %v3808_v50 = vld.sshfl [vmem:[#allocation1] sm:$0xff pattern:$0x75316420]  ;;  %v12916_v54 = vpop.f32.mrf.mxu2 }
 0x12f   :  { %11204 = vmatpush.msk.msrb.mxu2 %vm122_vm0, %v2035_v51  ;;  %11206 = vmatpush.msk.msrb.mxu3 %vm122_vm0, %v2036_v52  ;;  %v12761_v55 = vpop.permute.xlu2 %2378  ;;  %3987 = vst [vmem:[#allocation1] ss:$2 sm:$0xff] %v3979_v46  ;;  %v3998_v25 = vld.sshfl [vmem:[#allocation1 + $0x20] sm:$0xff pattern:$0x75316420] }
 0x130   :  { %11200 = vmatmul.msk.f32.vlgmr.msra.gmra.mxu0 %vm118_vm1, %v11190_v36  ;;  %11202 = vmatmul.msk.f32.vlgmr.msra.gmra.mxu1 %vm118_vm1, %v11190_v36  ;;  %v12867_v36 = vld.sshfl [vmem:[#allocation1 + $0x18] sm:$0xff pattern:$0x75316420] }
 0x131   :  { %11205 = vmatmul.msk.f32.vlgmr.msrb.gmra.mxu2 %vm118_vm1, %v11203_v53  ;;  %11207 = vmatmul.msk.f32.vlgmr.msrb.gmra.mxu3 %vm118_vm1, %v11203_v53 }
 0x132   :  { %3270 = vrot.lane.b32.xlu1 %v12687_v22, %s16658_s27  ;;  %v12834_v22 = vpop.f32.mrf.mxu0 }
 0x133   :  { %3268 = vrot.lane.b32.xlu0 %v12689_v23, %s16658_s27  ;;  %v12838_v23 = vpop.f32.mrf.mxu1 }
 0x134   :  { %v2033_v63 = vpop.permute.xlu1 %2032 }
 0x135   :  { %v2031_v0 = vpop.permute.xlu0 %2030  ;;  %11214 = vmatpush.msk.msra.mxu3 %vm122_vm0, %v2033_v63  ;;  %3446 = vrot.lane.b32.xlu2 %v3440_v48, %s16656_s1 }
 0x136   :  { %v2038_v1 = vsel %vm2034_vm12, %v2029_v37, %v2031_v0  ;;  %v2039_v2 = vsel %vm2034_vm12, %v2031_v0, %v2033_v63  ;;  %v12845_v28 = vpop.f32.mrf.mxu3  ;;  %v3810_v37 = vld.sshfl [vmem:[#allocation1 + $0x10] sm:$0xff pattern:$0x75316420]  ;;  %v12928_v60 = vld.sshfl [vmem:[#allocation1 + $0x8] sm:$0xff pattern:$0x75316420]  ;;  %v12949_v8 = vpop.f32.mrf.mxu2 }
 0x137   :  { %11210 = vmatpush.msk.msrb.mxu1 %vm122_vm0, %v2038_v1  ;;  %11212 = vmatpush.msk.msra.mxu2 %vm122_vm0, %v2039_v2  ;;  %v2211_v4 = vpop.permute.xlu2 %2210  ;;  %v12930_v61 = vld.sshfl [vmem:[#allocation1] sm:$0xff pattern:$0x75316420]  ;;  %v4166_v2 = vld [vmem:[%s16693_s6 + $0x8] sm:$0x77] }
 0x138   :  { %11209 = vmatmul.msk.f32.vlgmr.msrb.gmra.mxu0 %vm118_vm1, %v11203_v53  ;;  %11211 = vmatmul.msk.f32.vlgmr.msrb.gmra.mxu1 %vm118_vm1, %v11203_v53  ;;  %v2217_v31 = vsel %vm2212_vm13, %v12740_v14, %v2211_v4 }
 0x139   :  { %11213 = vmatmul.msk.f32.vlgmr.msra.gmra.mxu2 %vm118_vm1, %v11203_v53  ;;  %11215 = vmatmul.msk.f32.vlgmr.msra.gmra.mxu3 %vm118_vm1, %v11203_v53 }
 0x13a   :  { %3450 = vrot.lane.b32.xlu1 %v12728_v40, %s16656_s1  ;;  %v12879_v40 = vpop.f32.mrf.mxu0 }
 0x13b   :  { %3448 = vrot.lane.b32.xlu0 %v3441_v47, %s16656_s1  ;;  %v12892_v47 = vpop.f32.mrf.mxu1 }
 0x13c   :  { %v2207_v11 = vpop.permute.xlu1 %2206 }
 0x13d   :  { %v2205_v12 = vpop.permute.xlu0 %2204  ;;  %v2216_v16 = vsel %vm2212_vm13, %v2207_v11, %v12740_v14  ;;  %3278 = vrot.lane.b32.xlu2 %v12701_v29, %s16658_s27  ;;  %v3980_v14 = vld [vmem:[%s16693_s6 + $0x8] sm:$0x77]  ;;  %s16673_s27 = smov 12  }
 0x13e   :  { %v2215_v15 = vsel %vm2212_vm13, %v2205_v12, %v2207_v11  ;;  %11223 = vmatpush.msk.msrb.mxu3 %vm122_vm0, %v2216_v16  ;;  %3989 = vst [vmem:[#allocation1 + $0x10] ss:$2 sm:$0xff] %v3980_v14  ;;  %v12903_v52 = vpop.f32.mrf.mxu3  ;;  %v11255_v14 = vld [vmem:[%s16694_s29 + $0x78] sm:$0x3f] }
 0x13f   :  { %11221 = vmatpush.msk.msrb.mxu2 %vm122_vm0, %v2215_v15  ;;  %v12830_v21 = vpop.permute.xlu2 %2384 }
 0x141   :  { %11222 = vmatmul.msk.f32.vlgmr.msrb.gmra.mxu2 %vm118_vm1, %v11216_v19  ;;  %11224 = vmatmul.msk.f32.vlgmr.msrb.gmra.mxu3 %vm118_vm1, %v11216_v19 }
 0x142   :  { %3456 = vrot.lane.b32.xlu1 %v3445_v56, %s16656_s1  ;;  %v12921_v13 = vpop.f32.mrf.mxu0 }
 0x143   :  { %3454 = vrot.lane.b32.xlu0 %v3444_v17, %s16656_s1 }
 0x144   :  { %v2203_v26 = vpop.permute.xlu1 %2202 }
 0x145   :  { %v2201_v27 = vpop.permute.xlu0 %2200  ;;  %v2214_v29 = vsel %vm2212_vm13, %v2203_v26, %v2205_v12  ;;  %3452 = vrot.lane.b32.xlu2 %v12721_v38, %s16656_s1  ;;  %v3982_v38 = vld [vmem:[%s16693_s6 + $0x18] sm:$0x7]  ;;  %v3996_v1 = vld.sshfl [vmem:[#allocation1 + $0x10] sm:$0xff pattern:$0x75316420]  ;;  %s16677_s1 = smov 14  }
 0x146   :  { %v2213_v30 = vsel %vm2212_vm13, %v2201_v27, %v2203_v26  ;;  %11219 = vmatpush.msk.msra.mxu1 %vm122_vm0, %v2214_v29  ;;  %3993 = vst [vmem:[#allocation1 + $0x30] ss:$2 sm:$0xff] %v3982_v38  ;;  %v12940_v63 = vpop.f32.mrf.mxu3  ;;  %v12942_v0 = vld.sshfl [vmem:[#allocation1 + $0x18] sm:$0xff pattern:$0x75316420] }
 0x147   :  { %11217 = vmatpush.msk.msra.mxu0 %vm122_vm0, %v2213_v30  ;;  %11220 = vmatmul.msk.f32.vlgmr.msra.gmra.mxu1 %vm118_vm1, %v11216_v19  ;;  %v12857_v32 = vpop.permute.xlu2 %2564  ;;  %4175 = vst [vmem:[#allocation1 + $0x10] ss:$2 sm:$0xff] %v4166_v2  ;;  %v11242_v12 = vld [vmem:[%s16694_s29 + $0x70] sm:$0x3f]  ;;  %v4352_v38 = vld [vmem:[%s16693_s6 + $0x8] sm:$0x77] }
 0x148   :  { %11218 = vmatmul.msk.f32.vlgmr.msra.gmra.mxu0 %vm118_vm1, %v11216_v19  ;;  %11227 = vmatpush.msk.msrb.mxu1 %vm122_vm0, %v2211_v4  ;;  %v4167_v26 = vld [vmem:[%s16693_s6 + $0x10] sm:$0x77] }
 0x149   :  { %11225 = vmatpush.msk.msrb.mxu0 %vm122_vm0, %v2217_v31 }
 0x14a   :  { %3635 = vrot.lane.b32.xlu1 %v12771_v58, %s16679_s25  ;;  %v12961_v16 = vpop.f32.mrf.mxu0 }
 0x14b   :  { %3633 = vrot.lane.b32.xlu0 %v12773_v59, %s16679_s25 }
 0x14c   :  { %v2383_v44 = vpop.permute.xlu1 %2382 }
 0x14d   :  { %v2381_v45 = vpop.permute.xlu0 %2380  ;;  %3637 = vrot.lane.b32.xlu2 %v12805_v7, %s16679_s25  ;;  %v2393_v51 = vsel %vm16660_vm14, %v2383_v44, %v12830_v21 }
 0x14e   :  { %v2391_v48 = vsel %vm16660_vm14, %v12761_v55, %v2381_v45  ;;  %v2392_v49 = vsel %vm16660_vm14, %v2381_v45, %v2383_v44  ;;  %11234 = vmatpush.msk.msra.mxu0 %vm122_vm0, %v2393_v51  ;;  %v4165_v55 = vld [vmem:[%s16693_s6] sm:$0x77]  ;;  %v4000_v51 = vld.sshfl [vmem:[#allocation1 + $0x30] sm:$0xff pattern:$0x75316420] }
 0x14f   :  { %11230 = vmatpush.msk.msra.mxu2 %vm122_vm0, %v2391_v48  ;;  %11232 = vmatpush.msk.msra.mxu3 %vm122_vm0, %v2392_v49  ;;  %v12907_v53 = vpop.permute.xlu2 %2734  ;;  %4173 = vst [vmem:[#allocation1] ss:$2 sm:$0xff] %v4165_v55 }
 0x150   :  { %11226 = vmatmul.msk.f32.vlgmr.msrb.gmra.mxu0 %vm118_vm1, %v11216_v19  ;;  %11228 = vmatmul.msk.f32.vlgmr.msrb.gmra.mxu1 %vm118_vm1, %v11216_v19 }
 0x151   :  { %11231 = vmatmul.msk.f32.vlgmr.msra.gmra.mxu2 %vm118_vm1, %v11229_v41  ;;  %11233 = vmatmul.msk.f32.vlgmr.msra.gmra.mxu3 %vm118_vm1, %v11229_v41 }
 0x152   :  { %3631 = vrot.lane.b32.xlu1 %v12785_v62, %s16679_s25  ;;  %v12934_v62 = vpop.f32.mrf.mxu1 }
 0x153   :  { %3629 = vrot.lane.b32.xlu0 %v12787_v18, %s16679_s25 }
 0x154   :  { %v2389_v56 = vpop.permute.xlu1 %2388 }
 0x155   :  { %v2387_v17 = vpop.permute.xlu0 %2386  ;;  %11240 = vmatpush.msk.msrb.mxu3 %vm122_vm0, %v2389_v56  ;;  %3815 = vrot.lane.b32.xlu2 %v3808_v50, %s16661_s3 }
 0x156   :  { %v2394_v58 = vsel %vm16660_vm14, %v12830_v21, %v2387_v17  ;;  %v2395_v59 = vsel %vm16660_vm14, %v2387_v17, %v2389_v56  ;;  %v12975_v21 = vpop.f32.mrf.mxu3  ;;  %vm16663_vm14 = vcmask 359424   ;;  %v4180_v56 = vld.sshfl [vmem:[#allocation1] sm:$0xff pattern:$0x75316420] }
 0x157   :  { %11236 = vmatpush.msk.msra.mxu1 %vm122_vm0, %v2394_v58  ;;  %11238 = vmatpush.msk.msrb.mxu2 %vm122_vm0, %v2395_v59  ;;  %v2567_v18 = vpop.permute.xlu2 %2566 }
 0x158   :  { %11235 = vmatmul.msk.f32.vlgmr.msra.gmra.mxu0 %vm118_vm1, %v11229_v41  ;;  %11237 = vmatmul.msk.f32.vlgmr.msra.gmra.mxu1 %vm118_vm1, %v11229_v41 }
 0x159   :  { %11239 = vmatmul.msk.f32.vlgmr.msrb.gmra.mxu2 %vm118_vm1, %v11229_v41  ;;  %11241 = vmatmul.msk.f32.vlgmr.msrb.gmra.mxu3 %vm118_vm1, %v11229_v41  ;;  %v13009_v41 = vld.sshfl [vmem:[#allocation1 + $0x10] sm:$0xff pattern:$0x75316420] }
 0x15a   :  { %3819 = vrot.lane.b32.xlu1 %v3810_v37, %s16661_s3  ;;  %v12967_v19 = vpop.f32.mrf.mxu1 }
 0x15b   :  { %3817 = vrot.lane.b32.xlu0 %v3809_v42, %s16661_s3 }
 0x15c   :  { %v2563_v4 = vpop.permute.xlu1 %2562 }
 0x15d   :  { %v2561_v7 = vpop.permute.xlu0 %2560  ;;  %v2572_v9 = vsel %vm16664_vm15, %v2563_v4, %v12857_v32  ;;  %3639 = vrot.lane.b32.xlu2 %v12801_v5, %s16679_s25  ;;  %v12973_v5 = vld.sshfl [vmem:[#allocation1 + $0x28] sm:$0xff pattern:$0x75316420] }
 0x15e   :  { %v2571_v11 = vsel %vm16664_vm15, %v2561_v7, %v2563_v4  ;;  %11249 = vmatpush.msk.msra.mxu3 %vm122_vm0, %v2572_v9  ;;  %4177 = vst [vmem:[#allocation1 + $0x20] ss:$2 sm:$0xff] %v4167_v26  ;;  %v13011_v45 = vpop.f32.mrf.mxu3 }
 0x15f   :  { %11247 = vmatpush.msk.msra.mxu2 %vm122_vm0, %v2571_v11  ;;  %v12963_v15 = vpop.permute.xlu2 %2740 }
 0x161   :  { %11248 = vmatmul.msk.f32.vlgmr.msra.gmra.mxu2 %vm118_vm1, %v11242_v12  ;;  %11250 = vmatmul.msk.f32.vlgmr.msra.gmra.mxu3 %vm118_vm1, %v11242_v12 }
 0x162   :  { %3823 = vrot.lane.b32.xlu1 %v12865_v35, %s16661_s3  ;;  %v2573_v35 = vsel %vm16664_vm15, %v12857_v32, %v2567_v18  ;;  %v13002_v32 = vld.sshfl [vmem:[#allocation1 + $0x18] sm:$0xff pattern:$0x75316420]  ;;  %v13007_v39 = vpop.f32.mrf.mxu1 }
 0x163   :  { %3641 = vrot.lane.b32.xlu0 %v12840_v24, %s16679_s25  ;;  %v12986_v24 = vpop.f32.mrf.mxu2  ;;  %4361 = vst [vmem:[#allocation1 + $0x10] ss:$2 sm:$0xff] %v4352_v38 }
 0x164   :  { %v2559_v27 = vpop.permute.xlu1 %2558 }
 0x165   :  { %v2557_v29 = vpop.permute.xlu0 %2556  ;;  %v2570_v30 = vsel %vm16664_vm15, %v2559_v27, %v2561_v7  ;;  %3825 = vrot.lane.b32.xlu2 %v12861_v33, %s16661_s3  ;;  %v12996_v33 = vpop.f32.mrf.mxu0  ;;  %v13036_v50 = vld.sshfl [vmem:[#allocation1 + $0x20] sm:$0xff pattern:$0x75316420]  ;;  %v4185_v17 = vld.sshfl [vmem:[#allocation1 + $0x28] sm:$0xff pattern:$0x75316420] }
 0x166   :  { %v2569_v31 = vsel %vm16664_vm15, %v2557_v29, %v2559_v27  ;;  %11245 = vmatpush.msk.msrb.mxu1 %vm122_vm0, %v2570_v30  ;;  %v4181_v7 = vld.sshfl [vmem:[#allocation1 + $0x8] sm:$0xff pattern:$0x75316420]  ;;  %v13059_v9 = vpop.f32.mrf.mxu3  ;;  %v11268_v30 = vld [vmem:[%s16694_s29 + $0x80] sm:$0x3f]  ;;  %vm16665_vm15 = vcmask 343040  }
 0x167   :  { %11243 = vmatpush.msk.msrb.mxu0 %vm122_vm0, %v2569_v31  ;;  %11246 = vmatmul.msk.f32.vlgmr.msrb.gmra.mxu1 %vm118_vm1, %v11242_v12  ;;  %v12992_v37 = vpop.permute.xlu2 %2920 }
 0x168   :  { %11244 = vmatmul.msk.f32.vlgmr.msrb.gmra.mxu0 %vm118_vm1, %v11242_v12  ;;  %11253 = vmatpush.msk.msra.mxu1 %vm122_vm0, %v2567_v18  ;;  %v4353_v18 = vld [vmem:[%s16693_s6 + $0x10] sm:$0x77] }
 0x169   :  { %11251 = vmatpush.msk.msra.mxu0 %vm122_vm0, %v2573_v35  ;;  %4363 = vst [vmem:[#allocation1 + $0x20] ss:$2 sm:$0xff] %v4353_v18  ;;  %v11281_v18 = vld [vmem:[%s16694_s29 + $0x88] sm:$0x3f] }
 0x16a   :  { %3821 = vrot.lane.b32.xlu1 %v12867_v36, %s16661_s3 }
 0x16b   :  { %3827 = vrot.lane.b32.xlu0 %v12884_v43, %s16661_s3  ;;  %v13030_v49 = vpop.f32.mrf.mxu2  ;;  %s16675_s3 = smov 13  }
 0x16c   :  { %v2739_v42 = vpop.permute.xlu1 %2738 }
 0x16d   :  { %v2737_v44 = vpop.permute.xlu0 %2736  ;;  %4005 = vrot.lane.b32.xlu2 %v3996_v1, %s16677_s1  ;;  %v2749_v46 = vsel %vm16663_vm14, %v2739_v42, %v12963_v15  ;;  %v13041_v55 = vpop.f32.mrf.mxu0 }
 0x16e   :  { %v2747_v36 = vsel %vm16663_vm14, %v12907_v53, %v2737_v44  ;;  %v2748_v43 = vsel %vm16663_vm14, %v2737_v44, %v2739_v42  ;;  %11260 = vmatpush.msk.msrb.mxu0 %vm122_vm0, %v2749_v46  ;;  %v4168_v53 = vld [vmem:[%s16693_s6 + $0x18] sm:$0x7]  ;;  %v13049_v1 = vpop.f32.mrf.mxu1  ;;  %v13088_v38 = vpop.f32.mrf.mxu3 }
 0x16f   :  { %11256 = vmatpush.msk.msrb.mxu2 %vm122_vm0, %v2747_v36  ;;  %11258 = vmatpush.msk.msrb.mxu3 %vm122_vm0, %v2748_v43  ;;  %v13026_v48 = vpop.permute.xlu2 %3090  ;;  %4179 = vst [vmem:[#allocation1 + $0x30] ss:$2 sm:$0xff] %v4168_v53 }
 0x170   :  { %11252 = vmatmul.msk.f32.vlgmr.msra.gmra.mxu0 %vm118_vm1, %v11242_v12  ;;  %11254 = vmatmul.msk.f32.vlgmr.msra.gmra.mxu1 %vm118_vm1, %v11242_v12  ;;  %v4354_v12 = vld [vmem:[%s16693_s6 + $0x18] sm:$0x7] }
 0x171   :  { %11257 = vmatmul.msk.f32.vlgmr.msrb.gmra.mxu2 %vm118_vm1, %v11255_v14  ;;  %11259 = vmatmul.msk.f32.vlgmr.msrb.gmra.mxu3 %vm118_vm1, %v11255_v14 }
 0x172   :  { %4009 = vrot.lane.b32.xlu1 %v3998_v25, %s16677_s1 }
 0x173   :  { %4007 = vrot.lane.b32.xlu0 %v12942_v0, %s16677_s1  ;;  %v4351_v0 = vld [vmem:[%s16693_s6] sm:$0x77]  ;;  %s16824_s6 = sld [smem:[#allocation81_spill]] }
 0x174   :  { %v2745_v58 = vpop.permute.xlu1 %2744  ;;  %4359 = vst [vmem:[#allocation1] ss:$2 sm:$0xff] %v4351_v0 }
 0x175   :  { %v2743_v59 = vpop.permute.xlu0 %2742  ;;  %11266 = vmatpush.msk.msra.mxu3 %vm122_vm0, %v2745_v58  ;;  %4001 = vrot.lane.b32.xlu2 %v12930_v61, %s16677_s1  ;;  %v13073_v27 = vpop.f32.mrf.mxu0 }
 0x176   :  { %v2750_v2 = vsel %vm16663_vm14, %v12963_v15, %v2743_v59  ;;  %v2751_v4 = vsel %vm16663_vm14, %v2743_v59, %v2745_v58  ;;  %vm16666_vm14 = vcmask 351232   ;;  %v4186_v61 = vld.sshfl [vmem:[#allocation1 + $0x30] sm:$0xff pattern:$0x75316420]  ;;  %v13071_v15 = vpop.f32.mrf.mxu2  ;;  %v13084_v31 = vpop.f32.mrf.mxu1 }
 0x177   :  { %11262 = vmatpush.msk.msrb.mxu1 %vm122_vm0, %v2750_v2  ;;  %11264 = vmatpush.msk.msra.mxu2 %vm122_vm0, %v2751_v4  ;;  %v2923_v11 = vpop.permute.xlu2 %2922  ;;  %4365 = vst [vmem:[#allocation1 + $0x30] ss:$2 sm:$0xff] %v4354_v12  ;;  %v13116_v53 = vpop.f32.mrf.mxu3  ;;  %v4369_v4 = vld.sshfl [vmem:[#allocation1 + $0x18] sm:$0xff pattern:$0x75316420] }
 0x178   :  { %11261 = vmatmul.msk.f32.vlgmr.msrb.gmra.mxu0 %vm118_vm1, %v11255_v14  ;;  %11263 = vmatmul.msk.f32.vlgmr.msrb.gmra.mxu1 %vm118_vm1, %v11255_v14 }
 0x179   :  { %11265 = vmatmul.msk.f32.vlgmr.msra.gmra.mxu2 %vm118_vm1, %v11255_v14  ;;  %11267 = vmatmul.msk.f32.vlgmr.msra.gmra.mxu3 %vm118_vm1, %v11255_v14 }
 0x17a   :  { %4187 = vrot.lane.b32.xlu1 %v4180_v56, %s16675_s3 }
 0x17b   :  { %4003 = vrot.lane.b32.xlu0 %v12928_v60, %s16677_s1 }
 0x17c   :  { %v2919_v25 = vpop.permute.xlu1 %2918 }
 0x17d   :  { %v2917_v26 = vpop.permute.xlu0 %2916  ;;  %v2928_v29 = vsel %vm16666_vm14, %v2919_v25, %v12992_v37  ;;  %4189 = vrot.lane.b32.xlu2 %v4181_v7, %s16675_s3  ;;  %v13101_v46 = vpop.f32.mrf.mxu0 }
 0x17e   :  { %v2927_v60 = vsel %vm16666_vm14, %v2917_v26, %v2919_v25  ;;  %11275 = vmatpush.msk.msrb.mxu3 %vm122_vm0, %v2928_v29  ;;  %v13094_v36 = vpop.f32.mrf.mxu2  ;;  %v4366_v29 = vld.sshfl [vmem:[#allocation1] sm:$0xff pattern:$0x75316420] }
 0x17f   :  { %11273 = vmatpush.msk.msrb.mxu2 %vm122_vm0, %v2927_v60  ;;  %v3097_v35 = vpop.permute.xlu2 %3096  ;;  %v13144_v12 = vpop.f32.mrf.mxu3 }
 0x181   :  { %11274 = vmatmul.msk.f32.vlgmr.msrb.gmra.mxu2 %vm118_vm1, %v11268_v30  ;;  %11276 = vmatmul.msk.f32.vlgmr.msrb.gmra.mxu3 %vm118_vm1, %v11268_v30 }
 0x182   :  { %4011 = vrot.lane.b32.xlu1 %v12973_v5, %s16677_s1 }
 0x183   :  { %4191 = vrot.lane.b32.xlu0 %v13009_v41, %s16675_s3  ;;  %v2929_v41 = vsel %vm16666_vm14, %v12992_v37, %v2923_v11 }
 0x184   :  { %v2915_v42 = vpop.permute.xlu1 %2914 }
 0x185   :  { %v2913_v44 = vpop.permute.xlu0 %2912  ;;  %v2926_v43 = vsel %vm16666_vm14, %v2915_v42, %v2917_v26  ;;  %4013 = vrot.lane.b32.xlu2 %v4000_v51, %s16677_s1  ;;  %v13111_v51 = vpop.f32.mrf.mxu1  ;;  %s16833_s1 = sld [smem:[#allocation79_spill]] }
 0x186   :  { %v2925_v14 = vsel %vm16666_vm14, %v2913_v44, %v2915_v42  ;;  %11271 = vmatpush.msk.msra.mxu1 %vm122_vm0, %v2926_v43  ;;  %v13136_v2 = vpop.f32.mrf.mxu0  ;;  %vm16668_vm14 = vcmask 326656  }
 0x187   :  { %11269 = vmatpush.msk.msra.mxu0 %vm122_vm0, %v2925_v14  ;;  %11272 = vmatmul.msk.f32.vlgmr.msra.gmra.mxu1 %vm118_vm1, %v11268_v30  ;;  %v13107_v5 = vpop.permute.xlu2 %3276 }
 0x188   :  { %11270 = vmatmul.msk.f32.vlgmr.msra.gmra.mxu0 %vm118_vm1, %v11268_v30  ;;  %11279 = vmatpush.msk.msrb.mxu1 %vm122_vm0, %v2923_v11 }
 0x189   :  { %11277 = vmatpush.msk.msrb.mxu0 %vm122_vm0, %v2929_v41 }
 0x18a   :  { %4197 = vrot.lane.b32.xlu1 %v4185_v17, %s16675_s3  ;;  %v13128_v17 = vpop.f32.mrf.mxu2 }
 0x18b   :  { %4195 = vrot.lane.b32.xlu0 %v13036_v50, %s16675_s3 }
 0x18c   :  { %v3095_v37 = vpop.permute.xlu1 %3094 }
 0x18d   :  { %v3093_v56 = vpop.permute.xlu0 %3092  ;;  %4199 = vrot.lane.b32.xlu2 %v4186_v61, %s16675_s3  ;;  %v3105_v50 = vsel %vm16665_vm15, %v3095_v37, %v3097_v35  ;;  %v13142_v7 = vpop.f32.mrf.mxu1 }
 0x18e   :  { %v3103_v58 = vsel %vm16665_vm15, %v13026_v48, %v3093_v56  ;;  %v3104_v59 = vsel %vm16665_vm15, %v3093_v56, %v3095_v37  ;;  %v4368_v48 = vld.sshfl [vmem:[#allocation1 + $0x10] sm:$0xff pattern:$0x75316420]  ;;  %11286 = vmatpush.msk.msra.mxu0 %vm122_vm0, %v3105_v50  ;;  %v13160_v42 = vpop.f32.mrf.mxu0 }
 0x18f   :  { %11282 = vmatpush.msk.msra.mxu2 %vm122_vm0, %v3103_v58  ;;  %11284 = vmatpush.msk.msra.mxu3 %vm122_vm0, %v3104_v59  ;;  %v13132_v0 = vpop.permute.xlu2 %3446  ;;  %16695 = vst [vmem:[#allocation10_spill] sm:$0xff] %v13160_v42  ;;  %v11294_v56 = vld [vmem:[%s16694_s29 + $0x90] sm:$0x3f]  ;;  %v13173_v58 = vpop.f32.mrf.mxu3  ;;  %v4371_v59 = vld.sshfl [vmem:[#allocation1 + $0x28] sm:$0xff pattern:$0x75316420] }
 0x190   :  { %11278 = vmatmul.msk.f32.vlgmr.msrb.gmra.mxu0 %vm118_vm1, %v11268_v30  ;;  %11280 = vmatmul.msk.f32.vlgmr.msrb.gmra.mxu1 %vm118_vm1, %v11268_v30 }
 0x191   :  { %11283 = vmatmul.msk.f32.vlgmr.msra.gmra.mxu2 %vm118_vm1, %v11281_v18  ;;  %11285 = vmatmul.msk.f32.vlgmr.msra.gmra.mxu3 %vm118_vm1, %v11281_v18 }
 0x192   :  { %4377 = vrot.lane.b32.xlu1 %v4368_v48, %s16673_s27  ;;  %v13156_v30 = vpop.f32.mrf.mxu2 }
 0x193   :  { %4193 = vrot.lane.b32.xlu0 %v13002_v32, %s16675_s3  ;;  %v4370_v32 = vld.sshfl [vmem:[#allocation1 + $0x20] sm:$0xff pattern:$0x75316420]  ;;  %s16834_s3 = smov 68  }
 0x194   :  { %v3101_v11 = vpop.permute.xlu1 %3100 }
 0x195   :  { %v3099_v61 = vpop.permute.xlu0 %3098  ;;  %11292 = vmatpush.msk.msrb.mxu3 %vm122_vm0, %v3101_v11  ;;  %4379 = vrot.lane.b32.xlu2 %v4369_v4, %s16673_s27  ;;  %v13162_v14 = vpop.f32.mrf.mxu1 }
 0x196   :  { %v3106_v25 = vsel %vm16665_vm15, %v3097_v35, %v3099_v61  ;;  %v3107_v26 = vsel %vm16665_vm15, %v3099_v61, %v3101_v11  ;;  %vm16667_vm15 = vcmask 334848   ;;  %v4367_v35 = vld.sshfl [vmem:[#allocation1 + $0x8] sm:$0xff pattern:$0x75316420]  ;;  %16696 = vst [vmem:[#allocation11_spill] sm:$0xff] %v13162_v14 }
 0x197   :  { %11288 = vmatpush.msk.msra.mxu1 %vm122_vm0, %v3106_v25  ;;  %11290 = vmatpush.msk.msrb.mxu2 %vm122_vm0, %v3107_v26  ;;  %v3279_v60 = vpop.permute.xlu2 %3278  ;;  %v13183_v26 = vpop.f32.mrf.mxu0 }
 0x198   :  { %11287 = vmatmul.msk.f32.vlgmr.msra.gmra.mxu0 %vm118_vm1, %v11281_v18  ;;  %11289 = vmatmul.msk.f32.vlgmr.msra.gmra.mxu1 %vm118_vm1, %v11281_v18 }
 0x199   :  { %11291 = vmatmul.msk.f32.vlgmr.msrb.gmra.mxu2 %vm118_vm1, %v11281_v18  ;;  %11293 = vmatmul.msk.f32.vlgmr.msrb.gmra.mxu3 %vm118_vm1, %v11281_v18  ;;  %v4372_v18 = vld.sshfl [vmem:[#allocation1 + $0x30] sm:$0xff pattern:$0x75316420] }
 0x19a   :  { %4373 = vrot.lane.b32.xlu1 %v4366_v29, %s16673_s27  ;;  %v13179_v48 = vpop.f32.mrf.mxu2  ;;  %v3285_v29 = vsel %vm16667_vm15, %v13107_v5, %v3279_v60 }
 0x19b   :  { %4381 = vrot.lane.b32.xlu0 %v4370_v32, %s16673_s27  ;;  %16697 = vst [vmem:[#allocation12_spill] sm:$0xff] %v13179_v48 }
 0x19c   :  { %v3275_v44 = vpop.permute.xlu1 %3274 }
 0x19d   :  { %v3273_v43 = vpop.permute.xlu0 %3272  ;;  %v3284_v41 = vsel %vm16667_vm15, %v3275_v44, %v13107_v5  ;;  %4375 = vrot.lane.b32.xlu2 %v4367_v35, %s16673_s27  ;;  %v13187_v32 = vpop.f32.mrf.mxu1 }
 0x19e   :  { %v3283_v37 = vsel %vm16667_vm15, %v3273_v43, %v3275_v44  ;;  %11301 = vmatpush.msk.msra.mxu3 %vm122_vm0, %v3284_v41  ;;  %16698 = vst [vmem:[#allocation13_spill] sm:$0xff] %v13187_v32  ;;  %v13195_v44 = vpop.f32.mrf.mxu3 }
 0x19f   :  { %11299 = vmatpush.msk.msra.mxu2 %vm122_vm0, %v3283_v37  ;;  %v3453_v50 = vpop.permute.xlu2 %3452  ;;  %16699 = vst [vmem:[#allocation14_spill] sm:$0xff] %v13195_v44  ;;  %v11320_v44 = vld [vmem:[%s16694_s29 + $0xa0] sm:$0x3f] }
 0x1a1   :  { %11300 = vmatmul.msk.f32.vlgmr.msra.gmra.mxu2 %vm118_vm1, %v11294_v56  ;;  %11302 = vmatmul.msk.f32.vlgmr.msra.gmra.mxu3 %vm118_vm1, %v11294_v56 }
 0x1a2   :  { %4385 = vrot.lane.b32.xlu1 %v4372_v18, %s16673_s27  ;;  %v13197_v37 = vpop.f32.mrf.mxu2  ;;  %v11307_v18 = vld [vmem:[%s16694_s29 + $0x98] sm:$0x3f] }
 0x1a3   :  { %4383 = vrot.lane.b32.xlu0 %v4371_v59, %s16673_s27  ;;  %s16839_s27 = smov 40  }
 0x1a4   :  { %v3271_v4 = vpop.permute.xlu1 %3270 }
 0x1a5   :  { %v3269_v11 = vpop.permute.xlu0 %3268  ;;  %v3282_v61 = vsel %vm16667_vm15, %v3271_v4, %v3273_v43 }
 0x1a6   :  { %v3281_v25 = vsel %vm16667_vm15, %v3269_v11, %v3271_v4  ;;  %11297 = vmatpush.msk.msrb.mxu1 %vm122_vm0, %v3282_v61  ;;  %v13217_v61 = vpop.f32.mrf.mxu3  ;;  %vm16669_vm15 = vcmask 130048  }
 0x1a7   :  { %11295 = vmatpush.msk.msrb.mxu0 %vm122_vm0, %v3281_v25  ;;  %11298 = vmatmul.msk.f32.vlgmr.msrb.gmra.mxu1 %vm118_vm1, %v11294_v56  ;;  %v3638_v35 = vpop.permute.xlu2 %3637  ;;  %16700 = vst [vmem:[#allocation15_spill] sm:$0xff] %v13217_v61 }
 0x1a8   :  { %11296 = vmatmul.msk.f32.vlgmr.msrb.gmra.mxu0 %vm118_vm1, %v11294_v56  ;;  %11305 = vmatpush.msk.msra.mxu1 %vm122_vm0, %v3279_v60  ;;  %v13208_v60 = vpop.f32.mrf.mxu0 }
 0x1a9   :  { %11303 = vmatpush.msk.msra.mxu0 %vm122_vm0, %v3285_v29 }
 0x1ac   :  { %v3451_v43 = vpop.permute.xlu1 %3450 }
 0x1ad   :  { %v3449_v41 = vpop.permute.xlu0 %3448  ;;  %v3461_v4 = vsel %vm16668_vm14, %v3451_v43, %v3453_v50 }
 0x1ae   :  { %v3459_v59 = vsel %vm16668_vm14, %v13132_v0, %v3449_v41  ;;  %v3460_v5 = vsel %vm16668_vm14, %v3449_v41, %v3451_v43  ;;  %v13214_v0 = vpop.f32.mrf.mxu1  ;;  %11312 = vmatpush.msk.msrb.mxu0 %vm122_vm0, %v3461_v4  ;;  %v13219_v43 = vpop.f32.mrf.mxu2 }
 0x1af   :  { %11308 = vmatpush.msk.msrb.mxu2 %vm122_vm0, %v3459_v59  ;;  %11310 = vmatpush.msk.msrb.mxu3 %vm122_vm0, %v3460_v5  ;;  %v3816_v11 = vpop.permute.xlu2 %3815  ;;  %16701 = vst [vmem:[#allocation16_spill] sm:$0xff] %v13219_v43  ;;  %v13234_v4 = vpop.f32.mrf.mxu3 }
 0x1b0   :  { %11304 = vmatmul.msk.f32.vlgmr.msra.gmra.mxu0 %vm118_vm1, %v11294_v56  ;;  %11306 = vmatmul.msk.f32.vlgmr.msra.gmra.mxu1 %vm118_vm1, %v11294_v56  ;;  %v13230_v5 = vpop.f32.mrf.mxu0  ;;  %16704 = vst [vmem:[#allocation19_spill] sm:$0xff] %v13234_v4 }
 0x1b1   :  { %11309 = vmatmul.msk.f32.vlgmr.msrb.gmra.mxu2 %vm118_vm1, %v11307_v18  ;;  %11311 = vmatmul.msk.f32.vlgmr.msrb.gmra.mxu3 %vm118_vm1, %v11307_v18  ;;  %16702 = vst [vmem:[#allocation17_spill] sm:$0xff] %v13230_v5 }
 0x1b4   :  { %v3457_v25 = vpop.permute.xlu1 %3456 }
 0x1b5   :  { %v3455_v29 = vpop.permute.xlu0 %3454  ;;  %11318 = vmatpush.msk.msra.mxu3 %vm122_vm0, %v3457_v25 }
 0x1b6   :  { %v3462_v41 = vsel %vm16668_vm14, %v3453_v50, %v3455_v29  ;;  %v3463_v59 = vsel %vm16668_vm14, %v3455_v29, %v3457_v25  ;;  %v13232_v50 = vpop.f32.mrf.mxu1  ;;  %vm16670_vm14 = vcmask 121856  }
 0x1b7   :  { %11314 = vmatpush.msk.msrb.mxu1 %vm122_vm0, %v3462_v41  ;;  %11316 = vmatpush.msk.msra.mxu2 %vm122_vm0, %v3463_v59  ;;  %v3640_v56 = vpop.permute.xlu2 %3639  ;;  %16703 = vst [vmem:[#allocation18_spill] sm:$0xff] %v13232_v50 }
 0x1b8   :  { %11313 = vmatmul.msk.f32.vlgmr.msrb.gmra.mxu0 %vm118_vm1, %v11307_v18  ;;  %11315 = vmatmul.msk.f32.vlgmr.msrb.gmra.mxu1 %vm118_vm1, %v11307_v18  ;;  %v13247_v50 = vpop.f32.mrf.mxu0 }
 0x1b9   :  { %11317 = vmatmul.msk.f32.vlgmr.msra.gmra.mxu2 %vm118_vm1, %v11307_v18  ;;  %11319 = vmatmul.msk.f32.vlgmr.msra.gmra.mxu3 %vm118_vm1, %v11307_v18  ;;  %v13243_v18 = vpop.f32.mrf.mxu2  ;;  %16706 = vst [vmem:[#allocation21_spill] sm:$0xff] %v13247_v50 }
 0x1ba   :  { %16705 = vst [vmem:[#allocation20_spill] sm:$0xff] %v13243_v18 }
 0x1bc   :  { %v3636_v25 = vpop.permute.xlu1 %3635 }
 0x1bd   :  { %v3634_v29 = vpop.permute.xlu0 %3633  ;;  %v3647_v41 = vsel %vm16669_vm15, %v3636_v25, %v3638_v35 }
 0x1be   :  { %v3646_v59 = vsel %vm16669_vm15, %v3634_v29, %v3636_v25  ;;  %11327 = vmatpush.msk.msrb.mxu3 %vm122_vm0, %v3647_v41  ;;  %v13249_v25 = vpop.f32.mrf.mxu1  ;;  %v3648_v41 = vsel %vm16669_vm15, %v3638_v35, %v3640_v56 }
 0x1bf   :  { %11325 = vmatpush.msk.msrb.mxu2 %vm122_vm0, %v3646_v59  ;;  %v3826_v5 = vpop.permute.xlu2 %3825  ;;  %16707 = vst [vmem:[#allocation22_spill] sm:$0xff] %v13249_v25  ;;  %v13253_v59 = vpop.f32.mrf.mxu3 }
 0x1c0   :  { %16708 = vst [vmem:[#allocation23_spill] sm:$0xff] %v13253_v59 }
 0x1c1   :  { %11326 = vmatmul.msk.f32.vlgmr.msrb.gmra.mxu2 %vm118_vm1, %v11320_v44  ;;  %11328 = vmatmul.msk.f32.vlgmr.msrb.gmra.mxu3 %vm118_vm1, %v11320_v44  ;;  %v13263_v25 = vpop.f32.mrf.mxu2 }
 0x1c2   :  { %16709 = vst [vmem:[#allocation24_spill] sm:$0xff] %v13263_v25 }
 0x1c4   :  { %v3632_v61 = vpop.permute.xlu1 %3631 }
 0x1c5   :  { %v3630_v48 = vpop.permute.xlu0 %3629  ;;  %v3645_v32 = vsel %vm16669_vm15, %v3632_v61, %v3634_v29 }
 0x1c6   :  { %v3644_v4 = vsel %vm16669_vm15, %v3630_v48, %v3632_v61  ;;  %11323 = vmatpush.msk.msra.mxu1 %vm122_vm0, %v3645_v32  ;;  %v13265_v48 = vpop.f32.mrf.mxu0  ;;  %v11333_v32 = vld [vmem:[%s16694_s29 + $0xa8] sm:$0x3f]  ;;  %v13270_v35 = vpop.f32.mrf.mxu1 }
 0x1c7   :  { %11321 = vmatpush.msk.msra.mxu0 %vm122_vm0, %v3644_v4  ;;  %11324 = vmatmul.msk.f32.vlgmr.msra.gmra.mxu1 %vm118_vm1, %v11320_v44  ;;  %v13260_v18 = vpop.permute.xlu2 %4005  ;;  %16710 = vst [vmem:[#allocation25_spill] sm:$0xff] %v13265_v48 }
 0x1c8   :  { %11322 = vmatmul.msk.f32.vlgmr.msra.gmra.mxu0 %vm118_vm1, %v11320_v44  ;;  %16711 = vst [vmem:[#allocation26_spill] sm:$0xff] %v13270_v35 }
 0x1c9   :  { %11329 = vmatpush.msk.msrb.mxu0 %vm122_vm0, %v3648_v41  ;;  %v13278_v41 = vpop.f32.mrf.mxu3  ;;  %v13281_v48 = vpop.f32.mrf.mxu2 }
 0x1ca   :  { %16712 = vst [vmem:[#allocation27_spill] sm:$0xff] %v13278_v41 }
 0x1cb   :  { %16713 = vst [vmem:[#allocation28_spill] sm:$0xff] %v13281_v48 }
 0x1cc   :  { %v3820_v61 = vpop.permute.xlu1 %3819 }
 0x1cd   :  { %v3818_v29 = vpop.permute.xlu0 %3817 }
 0x1ce   :  { %v3830_v4 = vsel %vm16670_vm14, %v3816_v11, %v3818_v29  ;;  %v3831_v59 = vsel %vm16670_vm14, %v3818_v29, %v3820_v61  ;;  %v13283_v11 = vpop.f32.mrf.mxu0 }
 0x1cf   :  { %11334 = vmatpush.msk.msra.mxu2 %vm122_vm0, %v3830_v4  ;;  %11336 = vmatpush.msk.msra.mxu3 %vm122_vm0, %v3831_v59  ;;  %v4002_v25 = vpop.permute.xlu2 %4001  ;;  %16714 = vst [vmem:[#allocation29_spill] sm:$0xff] %v13283_v11  ;;  %v13289_v59 = vpop.f32.mrf.mxu1 }
 0x1d0   :  { %11330 = vmatmul.msk.f32.vlgmr.msrb.gmra.mxu0 %vm118_vm1, %v11320_v44  ;;  %11335 = vmatmul.msk.f32.vlgmr.msra.gmra.mxu2 %vm118_vm1, %v11333_v32  ;;  %16715 = vst [vmem:[#allocation30_spill] sm:$0xff] %v13289_v59 }
 0x1d1   :  { %11337 = vmatmul.msk.f32.vlgmr.msra.gmra.mxu3 %vm118_vm1, %v11333_v32  ;;  %v13293_v41 = vpop.f32.mrf.mxu3  ;;  %v13295_v48 = vpop.f32.mrf.mxu2 }
 0x1d2   :  { %16716 = vst [vmem:[#allocation31_spill] sm:$0xff] %v13295_v48 }
 0x1d4   :  { %v3824_v35 = vpop.permute.xlu1 %3823 }
 0x1d5   :  { %v3642_v14 = vpop.permute.xlu0 %3641  ;;  %v3834_v29 = vsel %vm16670_vm14, %v3824_v35, %v3826_v5 }
 0x1d6   :  { %v3649_v4 = vsel %vm16669_vm15, %v3640_v56, %v3642_v14  ;;  %11342 = vmatpush.msk.msrb.mxu2 %vm122_vm0, %v3834_v29  ;;  %vm16671_vm15 = vcmask 113664  }
 0x1d7   :  { %11331 = vmatpush.msk.msrb.mxu1 %vm122_vm0, %v3649_v4  ;;  %v4190_v43 = vpop.permute.xlu2 %4189  ;;  %v13308_v29 = vpop.f32.mrf.mxu1 }
 0x1d8   :  { %11332 = vmatmul.msk.f32.vlgmr.msrb.gmra.mxu1 %vm118_vm1, %v11320_v44  ;;  %11343 = vmatmul.msk.f32.vlgmr.msrb.gmra.mxu2 %vm118_vm1, %v11333_v32  ;;  %v13302_v44 = vpop.f32.mrf.mxu0  ;;  %16717 = vst [vmem:[#allocation32_spill] sm:$0xff] %v13308_v29  ;;  %v11359_v29 = vld [vmem:[%s16694_s29 + $0xb8] sm:$0x3f] }
 0x1dc   :  { %v3822_v11 = vpop.permute.xlu1 %3821 }
 0x1dd   :  { %v3828_v42 = vpop.permute.xlu0 %3827  ;;  %v3832_v50 = vsel %vm16670_vm14, %v3820_v61, %v3822_v11  ;;  %v3833_v14 = vsel %vm16670_vm14, %v3822_v11, %v3824_v35  ;;  %v13310_v61 = vpop.f32.mrf.mxu3 }
 0x1de   :  { %v3835_v56 = vsel %vm16670_vm14, %v3826_v5, %v3828_v42  ;;  %11338 = vmatpush.msk.msra.mxu0 %vm122_vm0, %v3832_v50  ;;  %11340 = vmatpush.msk.msra.mxu1 %vm122_vm0, %v3833_v14  ;;  %16718 = vst [vmem:[#allocation33_spill] sm:$0xff] %v13310_v61  ;;  %v11346_v50 = vld [vmem:[%s16694_s29 + $0xb0] sm:$0x3f]  ;;  %v13315_v35 = vpop.f32.mrf.mxu2  ;;  %vm4201_vm14 = vcmask 105472  }
 0x1df   :  { %11344 = vmatpush.msk.msrb.mxu3 %vm122_vm0, %v3835_v56  ;;  %11339 = vmatmul.msk.f32.vlgmr.msra.gmra.mxu0 %vm118_vm1, %v11333_v32  ;;  %v4014_v14 = vpop.permute.xlu2 %4013  ;;  %v13326_v56 = vpop.f32.mrf.mxu1 }
 0x1e0   :  { %11341 = vmatmul.msk.f32.vlgmr.msra.gmra.mxu1 %vm118_vm1, %v11333_v32  ;;  %11345 = vmatmul.msk.f32.vlgmr.msrb.gmra.mxu3 %vm118_vm1, %v11333_v32  ;;  %v13322_v32 = vpop.f32.mrf.mxu0  ;;  %16720 = vst [vmem:[#allocation35_spill] sm:$0xff] %v13326_v56 }
 0x1e1   :  { %16719 = vst [vmem:[#allocation34_spill] sm:$0xff] %v13322_v32 }
 0x1e4   :  { %v4010_v42 = vpop.permute.xlu1 %4009 }
 0x1e5   :  { %v4008_v5 = vpop.permute.xlu0 %4007  ;;  %v13337_v32 = vpop.f32.mrf.mxu3 }
 0x1e6   :  { %v4018_v11 = vsel %vm16671_vm15, %v13260_v18, %v4008_v5  ;;  %v4019_v4 = vsel %vm16671_vm15, %v4008_v5, %v4010_v42  ;;  %v13328_v59 = vpop.f32.mrf.mxu2  ;;  %16722 = vst [vmem:[#allocation37_spill] sm:$0xff] %v13337_v32 }
 0x1e7   :  { %11351 = vmatpush.msk.msra.mxu2 %vm122_vm0, %v4018_v11  ;;  %11353 = vmatpush.msk.msra.mxu3 %vm122_vm0, %v4019_v4  ;;  %16721 = vst [vmem:[#allocation36_spill] sm:$0xff] %v13328_v59 }
 0x1e8   :  { %11352 = vmatmul.msk.f32.vlgmr.msra.gmra.mxu2 %vm118_vm1, %v11346_v50  ;;  %11354 = vmatmul.msk.f32.vlgmr.msra.gmra.mxu3 %vm118_vm1, %v11346_v50 }
 0x1ec   :  { %v4188_v48 = vpop.permute.xlu1 %4187 }
 0x1ed   :  { %v4004_v61 = vpop.permute.xlu0 %4003  ;;  %v4202_v4 = vsel %vm4201_vm14, %v4188_v48, %v4190_v43  ;;  %v13347_v48 = vpop.f32.mrf.mxu1 }
 0x1ee   :  { %v4016_v5 = vsel %vm16671_vm15, %v4002_v25, %v4004_v61  ;;  %v4017_v11 = vsel %vm16671_vm15, %v4004_v61, %v13260_v18  ;;  %11360 = vmatpush.msk.msrb.mxu2 %vm122_vm0, %v4202_v4  ;;  %v4200_v25 = vpop.permute.xlu2 %4199  ;;  %v13345_v18 = vpop.f32.mrf.mxu0  ;;  %16724 = vst [vmem:[#allocation39_spill] sm:$0xff] %v13347_v48 }
 0x1ef   :  { %11347 = vmatpush.msk.msrb.mxu0 %vm122_vm0, %v4016_v5  ;;  %11349 = vmatpush.msk.msrb.mxu1 %vm122_vm0, %v4017_v11  ;;  %16723 = vst [vmem:[#allocation38_spill] sm:$0xff] %v13345_v18  ;;  %v13352_v4 = vpop.f32.mrf.mxu3  ;;  %v13356_v56 = vpop.f32.mrf.mxu2 }
 0x1f0   :  { %11348 = vmatmul.msk.f32.vlgmr.msrb.gmra.mxu0 %vm118_vm1, %v11346_v50  ;;  %11350 = vmatmul.msk.f32.vlgmr.msrb.gmra.mxu1 %vm118_vm1, %v11346_v50  ;;  %16725 = vst [vmem:[#allocation40_spill] sm:$0xff] %v13352_v4 }
 0x1f1   :  { %11361 = vmatmul.msk.f32.vlgmr.msrb.gmra.mxu2 %vm118_vm1, %v11359_v29  ;;  %16726 = vst [vmem:[#allocation41_spill] sm:$0xff] %v13356_v56 }
 0x1f4   :  { %v4012_v59 = vpop.permute.xlu1 %4011 }
 0x1f5   :  { %v4192_v61 = vpop.permute.xlu0 %4191  ;;  %v4020_v5 = vsel %vm16671_vm15, %v4010_v42, %v4012_v59  ;;  %v4021_v11 = vsel %vm16671_vm15, %v4012_v59, %v4014_v14  ;;  %v13364_v48 = vpop.f32.mrf.mxu1  ;;  %vm4387_vm15 = vcmask 97280  }
 0x1f6   :  { %v4203_v32 = vsel %vm4201_vm14, %v4190_v43, %v4192_v61  ;;  %11355 = vmatpush.msk.msra.mxu0 %vm122_vm0, %v4020_v5  ;;  %11357 = vmatpush.msk.msra.mxu1 %vm122_vm0, %v4021_v11  ;;  %v4380_v43 = vpop.permute.xlu2 %4379  ;;  %v13362_v42 = vpop.f32.mrf.mxu0  ;;  %16728 = vst [vmem:[#allocation43_spill] sm:$0xff] %v13364_v48 }
 0x1f7   :  { %11362 = vmatpush.msk.msrb.mxu3 %vm122_vm0, %v4203_v32  ;;  %16727 = vst [vmem:[#allocation42_spill] sm:$0xff] %v13362_v42  ;;  %v13374_v32 = vpop.f32.mrf.mxu2 }
 0x1f8   :  { %11356 = vmatmul.msk.f32.vlgmr.msra.gmra.mxu0 %vm118_vm1, %v11346_v50  ;;  %11358 = vmatmul.msk.f32.vlgmr.msra.gmra.mxu1 %vm118_vm1, %v11346_v50  ;;  %v13371_v50 = vpop.f32.mrf.mxu3 }
 0x1f9   :  { %11363 = vmatmul.msk.f32.vlgmr.msrb.gmra.mxu3 %vm118_vm1, %v11359_v29  ;;  %16729 = vst [vmem:[#allocation44_spill] sm:$0xff] %v13371_v50 }
 0x1fc   :  { %v4198_v14 = vpop.permute.xlu1 %4197 }
 0x1fd   :  { %v4196_v59 = vpop.permute.xlu0 %4195  ;;  %v4207_v11 = vsel %vm4201_vm14, %v4198_v14, %v4200_v25  ;;  %v13378_v42 = vpop.f32.mrf.mxu1 }
 0x1fe   :  { %v4206_v5 = vsel %vm4201_vm14, %v4196_v59, %v4198_v14  ;;  %11370 = vmatpush.msk.msra.mxu3 %vm122_vm0, %v4207_v11  ;;  %v13376_v56 = vpop.f32.mrf.mxu0  ;;  %v4376_v48 = vpop.permute.xlu2 %4375  ;;  %16730 = vst [vmem:[#allocation45_spill] sm:$0xff] %v13378_v42  ;;  %v11372_v11 = vld [vmem:[%s16694_s29 + $0xc0] sm:$0x3f]  ;;  %s16831_s29 = smov 70  }
 0x1ff   :  { %11368 = vmatpush.msk.msra.mxu2 %vm122_vm0, %v4206_v5 }
 0x200   :  { %11369 = vmatmul.msk.f32.vlgmr.msra.gmra.mxu2 %vm118_vm1, %v11359_v29 }
 0x201   :  { %11371 = vmatmul.msk.f32.vlgmr.msra.gmra.mxu3 %vm118_vm1, %v11359_v29 }
 0x204   :  { %v4378_v4 = vpop.permute.xlu1 %4377 }
 0x205   :  { %v4194_v18 = vpop.permute.xlu0 %4193  ;;  %v4390_v5 = vsel %vm4387_vm15, %v4378_v4, %v4380_v43  ;;  %v4389_v50 = vsel %vm4387_vm15, %v4376_v48, %v4378_v4 }
 0x206   :  { %v4204_v25 = vsel %vm4201_vm14, %v4192_v61, %v4194_v18  ;;  %v4205_v14 = vsel %vm4201_vm14, %v4194_v18, %v4196_v59  ;;  %11377 = vmatpush.msk.msrb.mxu2 %vm122_vm0, %v4390_v5  ;;  %v13393_v18 = vpop.f32.mrf.mxu2  ;;  %v13396_v61 = vpop.f32.mrf.mxu3 }
 0x207   :  { %11364 = vmatpush.msk.msrb.mxu0 %vm122_vm0, %v4204_v25  ;;  %11366 = vmatpush.msk.msrb.mxu1 %vm122_vm0, %v4205_v14  ;;  %16731 = vst [vmem:[#allocation46_spill] sm:$0xff] %v13396_v61  ;;  %v13400_v42 = vpop.f32.mrf.mxu0  ;;  %v13407_v5 = vpop.f32.mrf.mxu1 }
 0x208   :  { %11365 = vmatmul.msk.f32.vlgmr.msrb.gmra.mxu0 %vm118_vm1, %v11359_v29  ;;  %11367 = vmatmul.msk.f32.vlgmr.msrb.gmra.mxu1 %vm118_vm1, %v11359_v29  ;;  %16732 = vst [vmem:[#allocation47_spill] sm:$0xff] %v13400_v42  ;;  %v4535_v29 = vld [vmem:[%s16733_s30] sm:$0x3f]  ;;  %s16865_s30 = sld [smem:[#allocation80_spill]] }
 0x209   :  { %11378 = vmatmul.msk.f32.vlgmr.msrb.gmra.mxu2 %vm118_vm1, %v11372_v11  ;;  %11375 = vmatpush.msk.msra.mxu1 %vm122_vm0, %v4389_v50  ;;  %16734 = vst [vmem:[#allocation48_spill] sm:$0xff] %v13407_v5 }
 0x20c   :  { %v4374_v25 = vpop.permute.xlu1 %4373 }
 0x20d   :  { %v4382_v59 = vpop.permute.xlu0 %4381  ;;  %v4388_v4 = vsel %vm4387_vm15, %v4374_v25, %v4376_v48 }
 0x20e   :  { %v4391_v14 = vsel %vm4387_vm15, %v4380_v43, %v4382_v59  ;;  %11373 = vmatpush.msk.msra.mxu0 %vm122_vm0, %v4388_v4  ;;  %v16672_v43 = vmov 0   ;;  %v13414_v48 = vpop.f32.mrf.mxu3  ;;  %v13417_v50 = vpop.f32.mrf.mxu2 }
 0x20f   :  { %11379 = vmatpush.msk.msrb.mxu3 %vm122_vm0, %v4391_v14  ;;  %11766 = vset.pattern.permute.xlu2 %v16672_v43  ;;  %16735 = vst [vmem:[#allocation49_spill] sm:$0xff] %v13414_v48  ;;  %v13427_v42 = vpop.f32.mrf.mxu1 }
 0x210   :  { %11374 = vmatmul.msk.f32.vlgmr.msra.gmra.mxu0 %vm118_vm1, %v11372_v11  ;;  %11380 = vmatmul.msk.f32.vlgmr.msrb.gmra.mxu3 %vm118_vm1, %v11372_v11  ;;  %16736 = vst [vmem:[#allocation50_spill] sm:$0xff] %v13417_v50 }
 0x211   :  { %11376 = vmatmul.msk.f32.vlgmr.msra.gmra.mxu1 %vm118_vm1, %v11372_v11  ;;  %4538 = vperm.xlu2 %11766, %v4535_v29   ;;  %v13424_v29 = vpop.f32.mrf.mxu0  ;;  %16737 = vst [vmem:[#allocation51_spill] sm:$0xff] %v13427_v42 }
 0x212   :  { %11782 = vset.pattern.permute.xlu0 %v16672_v43  ;;  %11783 = vset.pattern.permute.xlu1 %v16672_v43 }
 0x214   :  { %v4386_v14 = vpop.permute.xlu1 %4385 }
 0x215   :  { %v4384_v25 = vpop.permute.xlu0 %4383 }
 0x216   :  { %v4392_v4 = vsel %vm4387_vm15, %v4382_v59, %v4384_v25  ;;  %v4393_v5 = vsel %vm4387_vm15, %v4384_v25, %v4386_v14  ;;  %v13429_v43 = vpop.f32.mrf.mxu3  ;;  %v13431_v50 = vpop.f32.mrf.mxu2 }
 0x217   :  { %11381 = vmatpush.msk.msrb.mxu0 %vm122_vm0, %v4392_v4  ;;  %11383 = vmatpush.msk.msrb.mxu1 %vm122_vm0, %v4393_v5  ;;  %16738 = vst [vmem:[#allocation52_spill] sm:$0xff] %v13429_v43  ;;  %v13435_v59 = vpop.f32.mrf.mxu1  ;;  %vm4558_vm0 = vcmask 259072  }
 0x218   :  { %11382 = vmatmul.msk.f32.vlgmr.msrb.gmra.mxu0 %vm118_vm1, %v11372_v11  ;;  %16739 = vst [vmem:[#allocation53_spill] sm:$0xff] %v13431_v50 }
 0x219   :  { %11384 = vmatmul.msk.f32.vlgmr.msrb.gmra.mxu1 %vm118_vm1, %v11372_v11  ;;  %v13433_v61 = vpop.f32.mrf.mxu0  ;;  %16741 = vst [vmem:[#allocation55_spill] sm:$0xff] %v13435_v59  ;;  %vm16683_vm1 = vcmask 1046528  }
 0x21a   :  { %16740 = vst [vmem:[#allocation54_spill] sm:$0xff] %v13433_v61 }
 0x21e   :  { %v13437_v25 = vpop.f32.mrf.mxu3  ;;  %v13439_v14 = vpop.f32.mrf.mxu2 }
 0x21f   :  { %16742 = vst [vmem:[#allocation56_spill] sm:$0xff] %v13437_v25  ;;  %v13443_v4 = vpop.f32.mrf.mxu1 }
 0x220   :  { %16743 = vst [vmem:[#allocation57_spill] sm:$0xff] %v13439_v14 }
 0x221   :  { %v13441_v5 = vpop.f32.mrf.mxu0  ;;  %16745 = vst [vmem:[#allocation59_spill] sm:$0xff] %v13443_v4 }
 0x222   :  { %16744 = vst [vmem:[#allocation58_spill] sm:$0xff] %v13441_v5 }
 0x226   :  { %v13445_v48 = vpop.f32.mrf.mxu3  ;;  %v13447_v11 = vpop.f32.mrf.mxu2 }
 0x227   :  { %16746 = vst [vmem:[#allocation60_spill] sm:$0xff] %v13445_v48  ;;  %v13451_v43 = vpop.f32.mrf.mxu1 }
 0x228   :  { %16747 = vst [vmem:[#allocation61_spill] sm:$0xff] %v13447_v11 }
 0x229   :  { %v13449_v42 = vpop.f32.mrf.mxu0  ;;  %16749 = vst [vmem:[#allocation63_spill] sm:$0xff] %v13451_v43 }
 0x22a   :  { %16748 = vst [vmem:[#allocation62_spill] sm:$0xff] %v13449_v42 }
 0x22e   :  { %v13453_v50 = vpop.f32.mrf.mxu3  ;;  %v13455_v61 = vpop.f32.mrf.mxu2 }
 0x22f   :  { %16750 = vst [vmem:[#allocation64_spill] sm:$0xff] %v13453_v50  ;;  %v13459_v25 = vpop.f32.mrf.mxu1 }
 0x231   :  { %v13457_v59 = vpop.f32.mrf.mxu0 }
 0x232   :  { %16751 = vst [vmem:[#allocation65_spill] sm:$0xff] %v13457_v59  ;;  %v339_v59 = vadd.f32 %v12879_v40, %v12768_v57  ;;  %v359_v57 = vadd.f32 %v12892_v47, %v12816_v10 }
 0x236   :  { %v13461_v14 = vpop.f32.mrf.mxu3  ;;  %v13463_v5 = vpop.f32.mrf.mxu2 }
 0x237   :  { %16752 = vst [vmem:[#allocation66_spill] sm:$0xff] %v13461_v14  ;;  %v13467_v48 = vpop.f32.mrf.mxu1  ;;  %v299_v14 = vadd.f32 %v12828_v20, %v12795_v3 }
 0x238   :  { %16753 = vst [vmem:[#allocation67_spill] sm:$0xff] %v13463_v5  ;;  %v319_v5 = vadd.f32 %v12845_v28, %v12803_v6  ;;  %v379_v6 = vadd.f32 %v12863_v34, %v12834_v22  ;;  %v399_v28 = vadd.f32 %v12903_v52, %v12838_v23 }
 0x239   :  { %v13465_v4 = vpop.f32.mrf.mxu0  ;;  %16755 = vst [vmem:[#allocation69_spill] sm:$0xff] %v13467_v48  ;;  %v575_v48 = vadd.f32 %v12916_v54, %v339_v59 }
 0x23a   :  { %16754 = vst [vmem:[#allocation68_spill] sm:$0xff] %v13465_v4  ;;  %v577_v47 = vadd.f32 %v12961_v16, %v379_v6  ;;  %v578_v22 = vadd.f32 %v12967_v19, %v399_v28  ;;  %v16762_v6 = vld [vmem:[#allocation16_spill] sm:$0xff]  ;;  %v16763_v28 = vld [vmem:[#allocation11_spill] sm:$0xff] }
 0x23b   :  { %v753_v3 = vadd.f32 %v12996_v33, %v575_v48 }
 0x23c   :  { %v756_v16 = vadd.f32 %v13011_v45, %v578_v22 }
 0x23e   :  { %v13469_v11 = vpop.f32.mrf.mxu3  ;;  %v13471_v42 = vpop.f32.mrf.mxu2 }
 0x23f   :  { %16756 = vst [vmem:[#allocation70_spill] sm:$0xff] %v13469_v11  ;;  %v13475_v50 = vpop.f32.mrf.mxu1 }
 0x240   :  { %16757 = vst [vmem:[#allocation71_spill] sm:$0xff] %v13471_v42  ;;  %v573_v42 = vadd.f32 %v12921_v13, %v299_v14  ;;  %v576_v13 = vadd.f32 %v12940_v63, %v359_v57 }
 0x241   :  { %v13473_v43 = vpop.f32.mrf.mxu0  ;;  %16759 = vst [vmem:[#allocation73_spill] sm:$0xff] %v13475_v50 }
 0x242   :  { %16758 = vst [vmem:[#allocation72_spill] sm:$0xff] %v13473_v43  ;;  %v574_v43 = vadd.f32 %v12934_v62, %v319_v5  ;;  %v751_v20 = vadd.f32 %v12949_v8, %v573_v42  ;;  %v931_v62 = vadd.f32 %v13030_v49, %v753_v3  ;;  %v754_v23 = vadd.f32 %v13007_v39, %v576_v13  ;;  %v16760_v5 = vld [vmem:[#allocation21_spill] sm:$0xff]  ;;  %v16765_v13 = vld [vmem:[#allocation24_spill] sm:$0xff] }
 0x244   :  { %v752_v54 = vadd.f32 %v12975_v21, %v574_v43  ;;  %v929_v33 = vadd.f32 %v13041_v55, %v751_v20  ;;  %v1109_v63 = vadd.f32 %v13101_v46, %v931_v62  ;;  %v755_v21 = vadd.f32 %v12986_v24, %v577_v47  ;;  %v16767_v47 = vld [vmem:[#allocation25_spill] sm:$0xff] }
 0x245   :  { %v932_v19 = vadd.f32 %v13059_v9, %v754_v23  ;;  %v934_v43 = vadd.f32 %v13084_v31, %v756_v16 }
 0x246   :  { %v13483_v4 = vpop.f32.mrf.mxu3  ;;  %v13486_v11 = vpop.f32.mrf.mxu2  ;;  %v930_v34 = vadd.f32 %v13049_v1, %v752_v54  ;;  %v1107_v49 = vadd.f32 %v13071_v15, %v929_v33  ;;  %v1287_v1 = vadd.f32 %v13128_v17, %v1109_v63  ;;  %v933_v39 = vadd.f32 %v13073_v27, %v755_v21  ;;  %v16764_v54 = vld [vmem:[#allocation19_spill] sm:$0xff]  ;;  %v16768_v33 = vld [vmem:[#allocation26_spill] sm:$0xff]  ;;  %v16769_v63 = vld [vmem:[#allocation12_spill] sm:$0xff] }
 0x247   :  { %v13494_v40 = vpop.f32.mrf.mxu1  ;;  %v1110_v45 = vadd.f32 %v13111_v51, %v932_v19  ;;  %v1112_v27 = vadd.f32 %v13116_v53, %v934_v43 }
 0x248   :  { %v1108_v55 = vadd.f32 %v13088_v38, %v930_v34  ;;  %v1285_v46 = vadd.f32 %v13136_v2, %v1107_v49  ;;  %v1465_v15 = vadd.f32 %v13183_v26, %v1287_v1  ;;  %v1111_v9 = vadd.f32 %v13094_v36, %v933_v39  ;;  %v16761_v36 = vld [vmem:[#allocation10_spill] sm:$0xff]  ;;  %v16770_v49 = vld [vmem:[#allocation15_spill] sm:$0xff] }
 0x249   :  { %v13490_v50 = vpop.f32.mrf.mxu0  ;;  %v1290_v53 = vadd.f32 %v16763_v28, %v1112_v27  ;;  %v16772_v39 = vld [vmem:[#allocation14_spill] sm:$0xff]  ;;  %v16782_v28 = vld [vmem:[#allocation23_spill] sm:$0xff] }
 0x24a   :  { %v1286_v24 = vadd.f32 %v13142_v7, %v1108_v55  ;;  %v1463_v17 = vadd.f32 %v13156_v30, %v1285_v46  ;;  %v1643_v2 = vadd.f32 %v13197_v37, %v1465_v15  ;;  %v1288_v7 = vadd.f32 %v13144_v12, %v1110_v45  ;;  %v16766_v12 = vld [vmem:[#allocation13_spill] sm:$0xff]  ;;  %v16771_v55 = vld [vmem:[#allocation28_spill] sm:$0xff] }
 0x24b   :  { %v1289_v30 = vadd.f32 %v16761_v36, %v1111_v9  ;;  %v1468_v46 = vadd.f32 %v16772_v39, %v1290_v53  ;;  %v16773_v45 = vld [vmem:[#allocation17_spill] sm:$0xff]  ;;  %v16774_v9 = vld [vmem:[#allocation22_spill] sm:$0xff]  ;;  %v16783_v53 = vld [vmem:[#allocation40_spill] sm:$0xff] }
 0x24c   :  { %v1464_v31 = vadd.f32 %v13173_v58, %v1286_v24  ;;  %v1641_v51 = vadd.f32 %v13208_v60, %v1463_v17  ;;  %v1821_v57 = vadd.f32 %v16760_v5, %v1643_v2  ;;  %v1466_v60 = vadd.f32 %v16766_v12, %v1288_v7  ;;  %v16775_v17 = vld [vmem:[#allocation34_spill] sm:$0xff]  ;;  %v16777_v7 = vld [vmem:[#allocation35_spill] sm:$0xff] }
 0x24d   :  { %v1467_v21 = vadd.f32 %v16769_v63, %v1289_v30  ;;  %v16780_v30 = vld [vmem:[#allocation27_spill] sm:$0xff] }
 0x24e   :  { %v13505_v59 = vpop.f32.mrf.mxu3  ;;  %v1642_v26 = vadd.f32 %v13214_v0, %v1464_v31  ;;  %v1819_v20 = vadd.f32 %v16762_v6, %v1641_v51  ;;  %v1999_v37 = vadd.f32 %v16765_v13, %v1821_v57  ;;  %v1644_v16 = vadd.f32 %v16770_v49, %v1466_v60  ;;  %v16776_v31 = vld [vmem:[#allocation18_spill] sm:$0xff]  ;;  %v16779_v57 = vld [vmem:[#allocation20_spill] sm:$0xff] }
 0x24f   :  { %v1645_v15 = vadd.f32 %v16773_v45, %v1467_v21  ;;  %v1646_v2 = vadd.f32 %v16776_v31, %v1468_v46  ;;  %v16785_v60 = vld [vmem:[#allocation32_spill] sm:$0xff]  ;;  %v16790_v46 = vld [vmem:[#allocation33_spill] sm:$0xff] }
 0x250   :  { %v1820_v58 = vadd.f32 %v16764_v54, %v1642_v26  ;;  %v1997_v0 = vadd.f32 %v16767_v47, %v1819_v20  ;;  %v2177_v34 = vadd.f32 %v13302_v44, %v1999_v37  ;;  %v1822_v44 = vadd.f32 %v16774_v9, %v1644_v16  ;;  %v16778_v26 = vld [vmem:[#allocation42_spill] sm:$0xff]  ;;  %v16781_v20 = vld [vmem:[#allocation36_spill] sm:$0xff]  ;;  %v16784_v37 = vld [vmem:[#allocation29_spill] sm:$0xff] }
 0x251   :  { %v13517_v8 = vpop.f32.mrf.mxu0  ;;  %v1823_v36 = vadd.f32 %v16779_v57, %v1645_v15  ;;  %v16788_v16 = vld [vmem:[#allocation31_spill] sm:$0xff]  ;;  %v16792_v15 = vld [vmem:[#allocation53_spill] sm:$0xff]  ;;  %v16798_v57 = vld [vmem:[#allocation62_spill] sm:$0xff] }
 0x252   :  { %v1998_v22 = vadd.f32 %v16768_v33, %v1820_v58  ;;  %v2175_v19 = vadd.f32 %v16771_v55, %v1997_v0  ;;  %v2355_v24 = vadd.f32 %v13315_v35, %v2177_v34  ;;  %v2000_v6 = vadd.f32 %v16780_v30, %v1822_v44  ;;  %v16786_v33 = vld [vmem:[#allocation30_spill] sm:$0xff]  ;;  %v16787_v34 = vld [vmem:[#allocation45_spill] sm:$0xff] }
 0x253   :  { %v13507_v10 = vpop.f32.mrf.mxu2  ;;  %v1824_v35 = vadd.f32 %v16782_v28, %v1646_v2  ;;  %v2001_v12 = vadd.f32 %v16784_v37, %v1823_v36  ;;  %v16793_v44 = vld [vmem:[#allocation38_spill] sm:$0xff]  ;;  %v16799_v30 = vld [vmem:[#allocation41_spill] sm:$0xff] }
 0x254   :  { %v2176_v43 = vadd.f32 %v13293_v41, %v1998_v22  ;;  %v2353_v27 = vadd.f32 %v16775_v17, %v2175_v19  ;;  %v2533_v5 = vadd.f32 %v16778_v26, %v2355_v24  ;;  %v2178_v47 = vadd.f32 %v16785_v60, %v2000_v6  ;;  %v16789_v19 = vld [vmem:[#allocation37_spill] sm:$0xff] }
 0x255   :  { %v13514_v52 = vpop.f32.mrf.mxu1  ;;  %v2002_v22 = vadd.f32 %v16786_v33, %v1824_v35  ;;  %v2179_v55 = vadd.f32 %v16788_v16, %v2001_v12  ;;  %v16791_v24 = vld [vmem:[#allocation49_spill] sm:$0xff]  ;;  %v16805_v33 = vld [vmem:[#allocation51_spill] sm:$0xff] }
 0x256   :  { %v13525_v42 = vpop.f32.mrf.mxu3  ;;  %v2354_v51 = vadd.f32 %v16777_v7, %v2176_v43  ;;  %v2531_v41 = vadd.f32 %v16781_v20, %v2353_v27  ;;  %v2711_v58 = vadd.f32 %v13374_v32, %v2533_v5  ;;  %v2356_v39 = vadd.f32 %v16789_v19, %v2178_v47  ;;  %v16794_v27 = vld [vmem:[#allocation43_spill] sm:$0xff]  ;;  %v16800_v20 = vld [vmem:[#allocation46_spill] sm:$0xff]  ;;  %v16801_v28 = vld [vmem:[#allocation57_spill] sm:$0xff] }
 0x257   :  { %v2180_v43 = vadd.f32 %v16790_v46, %v2002_v22  ;;  %v2357_v17 = vadd.f32 %v16793_v44, %v2179_v55  ;;  %v16797_v5 = vld [vmem:[#allocation55_spill] sm:$0xff]  ;;  %v16808_v19 = vld [vmem:[#allocation72_spill] sm:$0xff]  ;;  %v16809_v46 = vld [vmem:[#allocation50_spill] sm:$0xff] }
 0x258   :  { %v2532_v54 = vadd.f32 %v16783_v53, %v2354_v51  ;;  %v2709_v0 = vadd.f32 %v13376_v56, %v2531_v41  ;;  %v2889_v21 = vadd.f32 %v13424_v29, %v2711_v58  ;;  %v2534_v31 = vadd.f32 %v16794_v27, %v2356_v39  ;;  %v16795_v29 = vld [vmem:[#allocation54_spill] sm:$0xff]  ;;  %v16796_v51 = vld [vmem:[#allocation39_spill] sm:$0xff]  ;;  %v16802_v53 = vld [vmem:[#allocation44_spill] sm:$0xff] }
 0x259   :  { %v2358_v26 = vadd.f32 %v16796_v51, %v2180_v43  ;;  %v2535_v6 = vadd.f32 %v16799_v30, %v2357_v17  ;;  %v16803_v58 = vld [vmem:[#allocation60_spill] sm:$0xff]  ;;  %v16804_v47 = vld [vmem:[#allocation47_spill] sm:$0xff]  ;;  %v16813_v17 = vld [vmem:[#allocation70_spill] sm:$0xff] }
 0x25a   :  { %v2710_v63 = vadd.f32 %v16787_v34, %v2532_v54  ;;  %v2887_v32 = vadd.f32 %v13393_v18, %v2709_v0  ;;  %v3067_v9 = vadd.f32 %v16792_v15, %v2889_v21  ;;  %v2712_v41 = vadd.f32 %v16800_v20, %v2534_v31  ;;  %v16806_v34 = vld [vmem:[#allocation65_spill] sm:$0xff]  ;;  %v16807_v21 = vld [vmem:[#allocation48_spill] sm:$0xff]  ;;  %v16811_v15 = vld [vmem:[#allocation67_spill] sm:$0xff] }
 0x25b   :  { %v13531_v48 = vpop.f32.mrf.mxu2  ;;  %v2536_v54 = vadd.f32 %v16802_v53, %v2358_v26  ;;  %v2713_v0 = vadd.f32 %v16804_v47, %v2535_v6  ;;  %v16815_v26 = vld [vmem:[#allocation63_spill] sm:$0xff]  ;;  %v16817_v20 = vld [vmem:[#allocation61_spill] sm:$0xff]  ;;  %v16819_v53 = vld [vmem:[#allocation64_spill] sm:$0xff] }
 0x25c   :  { %v13535_v38 = vpop.f32.mrf.mxu0  ;;  %v2888_v45 = vadd.f32 %v16791_v24, %v2710_v63  ;;  %v3065_v2 = vadd.f32 %v16795_v29, %v2887_v32  ;;  %v3245_v36 = vadd.f32 %v16798_v57, %v3067_v9  ;;  %v2890_v22 = vadd.f32 %v16805_v33, %v2712_v41  ;;  %v16810_v24 = vld [vmem:[#allocation56_spill] sm:$0xff]  ;;  %v16816_v57 = vld [vmem:[#allocation59_spill] sm:$0xff]  ;;  %v16821_v47 = vld [vmem:[#allocation73_spill] sm:$0xff] }
 0x25d   :  { %v13539_v14 = vpop.f32.mrf.mxu1  ;;  %v2714_v16 = vadd.f32 %v16807_v21, %v2536_v54  ;;  %v2891_v43 = vadd.f32 %v16809_v46, %v2713_v0  ;;  %v16812_v9 = vld [vmem:[#allocation52_spill] sm:$0xff]  ;;  %v16822_v33 = vld [vmem:[#allocation69_spill] sm:$0xff]  ;;  %v16823_v21 = vld [vmem:[#allocation71_spill] sm:$0xff] }
 0x25e   :  { %v3066_v18 = vadd.f32 %v16797_v5, %v2888_v45  ;;  %v3243_v35 = vadd.f32 %v16801_v28, %v3065_v2  ;;  %v3423_v12 = vadd.f32 %v13455_v61, %v3245_v36  ;;  %v3068_v45 = vadd.f32 %v16810_v24, %v2890_v22  ;;  %v16814_v2 = vld [vmem:[#allocation58_spill] sm:$0xff] }
 0x25f   :  { %v2892_v44 = vadd.f32 %v16812_v9, %v2714_v16  ;;  %v3069_v51 = vadd.f32 %v16814_v2, %v2891_v43  ;;  %v16818_v28 = vld [vmem:[#allocation66_spill] sm:$0xff] }
 0x260   :  { %v3244_v37 = vadd.f32 %v16803_v58, %v3066_v18  ;;  %v3421_v63 = vadd.f32 %v16806_v34, %v3243_v35  ;;  %v3601_v39 = vadd.f32 %v16808_v19, %v3423_v12 }
 0x261   :  { %v3070_v36 = vadd.f32 %v16816_v57, %v2892_v44  ;;  %v3247_v41 = vadd.f32 %v16817_v20, %v3069_v51 }
 0x262   :  { %v3422_v55 = vadd.f32 %v13459_v25, %v3244_v37  ;;  %v3599_v61 = vadd.f32 %v16811_v15, %v3421_v63  ;;  %v3787_v31 = vadd.f32 %v13486_v11, %v3601_v39  ;;  %v3246_v25 = vadd.f32 %v16815_v26, %v3068_v45 }
 0x263   :  { %v13548_v3 = vpop.f32.mrf.mxu3  ;;  %v3248_v54 = vadd.f32 %v16819_v53, %v3070_v36  ;;  %v4777_v53 = vld [vmem:[%s16824_s6 + $0x468] sm:$0xff] }
 0x264   :  { %v3600_v27 = vadd.f32 %v16813_v17, %v3422_v55  ;;  %v3785_v5 = vadd.f32 %v13490_v50, %v3599_v61  ;;  %v3973_v6 = vadd.f32 %v13535_v38, %v3787_v31  ;;  %v3424_v35 = vadd.f32 %v16818_v28, %v3246_v25  ;;  %v16820_v50 = vld [vmem:[#allocation68_spill] sm:$0xff]  ;;  %4929 = vmatpush.msra.mxu0 %v4777_v53 }
 0x265   :  { %v3425_v12 = vadd.f32 %v16820_v50, %v3247_v41  ;;  %v3426_v38 = vadd.f32 %v16822_v33, %v3248_v54  ;;  %v4774_v54 = vld [vmem:[%s16824_s6 + $0x450] sm:$0xff] }
 0x266   :  { %v3786_v30 = vadd.f32 %v13494_v40, %v3600_v27  ;;  %v3971_v11 = vadd.f32 %v13507_v10, %v3785_v5  ;;  %v3602_v0 = vadd.f32 %v16821_v47, %v3424_v35  ;;  %4930 = vmatpush.msra.mxu0 %v4774_v54  ;;  %v4822_v50 = vld [vmem:[%s16824_s6 + $0x5d0] sm:$0xff]  ;;  %v4681_v47 = vld [vmem:[%s16824_s6 + $0x168] sm:$0xff] }
 0x267   :  { %v3603_v10 = vadd.f32 %v16823_v21, %v3425_v12  ;;  %v4768_v12 = vld [vmem:[%s16824_s6 + $0x420] sm:$0xff]  ;;  %4889 = vmatpush.msra.mxu2 %v4681_v47  ;;  %v4678_v33 = vld [vmem:[%s16824_s6 + $0x150] sm:$0xff]  ;;  %v4723_v21 = vld [vmem:[%s16824_s6 + $0x2b8] sm:$0xff] }
 0x268   :  { %v3972_v58 = vadd.f32 %v13525_v42, %v3786_v30  ;;  %v3788_v16 = vadd.f32 %v13505_v59, %v3602_v0  ;;  %v4729_v0 = vld [vmem:[%s16824_s6 + $0x2e8] sm:$0xff]  ;;  %v4702_v53 = vld [vmem:[%s16824_s6 + $0x210] sm:$0xff] }
 0x269   :  { %4909 = vmatpush.msra.mxu3 %v4729_v0  ;;  %4890 = vmatpush.msra.mxu2 %v4678_v33  ;;  %v4789_v47 = vld [vmem:[%s16824_s6 + $0x4c8] sm:$0xff]  ;;  %v4648_v33 = vld [vmem:[%s16824_s6 + $0x60] sm:$0xff] }
 0x26a   :  { %v3974_v24 = vadd.f32 %v13539_v14, %v3788_v16  ;;  %v4672_v16 = vld [vmem:[%s16824_s6 + $0x120] sm:$0xff] }
 0x26b   :  { %v13555_v62 = vpop.f32.mrf.mxu2  ;;  %v13583_v13 = vpop.f32.mrf.mxu3 }
 0x26c   :  { %v4159_v37 = vadd.f32 %v13555_v62, %v3973_v6  ;;  %v4539_v19 = vpop.permute.xlu2 %4538  ;;  %v3604_v62 = vadd.f32 %v13483_v4, %v3426_v38  ;;  %v4726_v38 = vld [vmem:[%s16824_s6 + $0x2d0] sm:$0xff] }
 0x26d   :  { %v13561_v23 = vpop.f32.mrf.mxu0  ;;  %v13566_v1 = vpop.f32.mrf.mxu1  ;;  %4910 = vmatpush.msra.mxu3 %v4726_v38  ;;  %v4730_v38 = vld [vmem:[%s16824_s6 + $0x2f0] sm:$0xff] }
 0x26e   :  { %v4157_v40 = vadd.f32 %v13561_v23, %v3971_v11  ;;  %v4158_v22 = vadd.f32 %v13566_v1, %v3972_v58  ;;  %v3789_v23 = vadd.f32 %v13517_v8, %v3603_v10  ;;  %v3790_v15 = vadd.f32 %v13514_v52, %v3604_v62  ;;  %v4771_v58 = vld [vmem:[%s16824_s6 + $0x438] sm:$0xff]  ;;  %v4762_v10 = vld [vmem:[%s16824_s6 + $0x3f0] sm:$0xff]  ;;  %v4669_v62 = vld [vmem:[%s16824_s6 + $0x108] sm:$0xff] }
 0x26f   :  { %4931 = vmatpush.msra.mxu0 %v4771_v58  ;;  %4911 = vmatpush.msra.mxu3 %v4723_v21  ;;  %v4792_v58 = vld [vmem:[%s16824_s6 + $0x4e0] sm:$0xff]  ;;  %v4693_v21 = vld [vmem:[%s16824_s6 + $0x1c8] sm:$0xff] }
 0x270   :  { %v3975_v59 = vadd.f32 %v13531_v48, %v3789_v23  ;;  %v3976_v4 = vadd.f32 %v13548_v3, %v3790_v15  ;;  %v4756_v23 = vld [vmem:[%s16824_s6 + $0x3c0] sm:$0xff]  ;;  %v4807_v15 = vld [vmem:[%s16824_s6 + $0x558] sm:$0xff] }
 0x271   :  { %4932 = vmatpush.msra.mxu0 %v4768_v12  ;;  %v4699_v12 = vld [vmem:[%s16824_s6 + $0x1f8] sm:$0xff] }
 0x274   :  { %v4240_v49 = vpop.f32.mrf.mxu2 }
 0x275   :  { %v13597_v56 = vpop.f32.mrf.mxu0  ;;  %v13602_v7 = vpop.f32.mrf.mxu1  ;;  %v4343_v55 = vadd.f32 %v4240_v49, %v4157_v40  ;;  %v4160_v49 = vadd.f32 %v13583_v13, %v3974_v24  ;;  %v4819_v40 = vld [vmem:[%s16824_s6 + $0x5b8] sm:$0xff]  ;;  %v4666_v24 = vld [vmem:[%s16824_s6 + $0xf0] sm:$0xff] }
 0x276   :  { %v4161_v27 = vadd.f32 %v13597_v56, %v3975_v59  ;;  %v4162_v14 = vadd.f32 %v13602_v7, %v3976_v4  ;;  %v4663_v59 = vld [vmem:[%s16824_s6 + $0xd8] sm:$0xff] }
 0x27c   :  { %v4260_v60 = vpop.f32.mrf.mxu3 }
 0x27d   :  { %v4344_v39 = vadd.f32 %v4260_v60, %v4158_v22  ;;  %v4765_v22 = vld [vmem:[%s16824_s6 + $0x408] sm:$0xff] }
 0x27e   :  { %4933 = vmatpush.msra.mxu0 %v4765_v22 }
 0x280   :  { %4934 = vmatpush.msra.mxu0 %v4762_v10  ;;  %v4783_v10 = vld [vmem:[%s16824_s6 + $0x498] sm:$0xff] }
 0x283   :  { %v4320_v32 = vpop.f32.mrf.mxu2 }
 0x284   :  { %v4340_v34 = vpop.f32.mrf.mxu3  ;;  %v4347_v2 = vadd.f32 %v4320_v32, %v4161_v27 }
 0x285   :  { %v4280_v29 = vpop.f32.mrf.mxu0  ;;  %v4300_v18 = vpop.f32.mrf.mxu1  ;;  %v4348_v48 = vadd.f32 %v4340_v34, %v4162_v14  ;;  %v4675_v34 = vld [vmem:[%s16824_s6 + $0x138] sm:$0xff]  ;;  %v4801_v14 = vld [vmem:[%s16824_s6 + $0x528] sm:$0xff] }
 0x286   :  { %v4345_v63 = vadd.f32 %v4280_v29, %v4159_v37  ;;  %v4346_v8 = vadd.f32 %v4300_v18, %v4160_v49  ;;  %v4825_v37 = vld [vmem:[%s16824_s6 + $0x5e8] sm:$0xff]  ;;  %4891 = vmatpush.msra.mxu2 %v4675_v34  ;;  %v4804_v49 = vld [vmem:[%s16824_s6 + $0x540] sm:$0xff]  ;;  %v4786_v34 = vld [vmem:[%s16824_s6 + $0x4b0] sm:$0xff] }
 0x287   :  { %4949 = vmatpush.msra.mxu1 %v4825_v37  ;;  %v4651_v37 = vld [vmem:[%s16824_s6 + $0x78] sm:$0xff] }
 0x288   :  { %4892 = vmatpush.msra.mxu2 %v4672_v16  ;;  %v4724_v16 = vld [vmem:[%s16824_s6 + $0x2c0] sm:$0xff] }
 0x289   :  { %4950 = vmatpush.msra.mxu1 %v4822_v50  ;;  %v4735_v50 = vld [vmem:[%s16824_s6 + $0x318] sm:$0xff] }
 0x28a   :  { %4893 = vmatpush.msra.mxu2 %v4669_v62  ;;  %v4721_v62 = vld [vmem:[%s16824_s6 + $0x2a8] sm:$0xff] }
 0x28b   :  { %4951 = vmatpush.msra.mxu1 %v4819_v40  ;;  %v4732_v40 = vld [vmem:[%s16824_s6 + $0x300] sm:$0xff] }
 0x28c   :  { %v4466_v42 = vpop.f32.mrf.mxu2  ;;  %4894 = vmatpush.msra.mxu2 %v4666_v24  ;;  %v4775_v24 = vld [vmem:[%s16824_s6 + $0x458] sm:$0xff] }
 0x28d   :  { %v4531_v46 = vadd.f32 %v4466_v42, %v4345_v63  ;;  %v4426_v43 = vpop.f32.mrf.mxu0  ;;  %v4816_v63 = vld [vmem:[%s16824_s6 + $0x5a0] sm:$0xff] }
 0x28e   :  { %v4529_v45 = vadd.f32 %v4426_v43, %v4343_v55  ;;  %v4446_v1 = vpop.f32.mrf.mxu1  ;;  %v4813_v55 = vld [vmem:[%s16824_s6 + $0x588] sm:$0xff]  ;;  %v4720_v42 = vld [vmem:[%s16824_s6 + $0x2a0] sm:$0xff]  ;;  %4952 = vmatpush.msra.mxu1 %v4816_v63  ;;  %4895 = vmatpush.msra.mxu2 %v4663_v59  ;;  %v4727_v63 = vld [vmem:[%s16824_s6 + $0x2d8] sm:$0xff] }
 0x28f   :  { %v4543_v61 = vadd.f32 %v4539_v19, %v4531_v46  ;;  %v4530_v9 = vadd.f32 %v4446_v1, %v4344_v39  ;;  %v4810_v46 = vld [vmem:[%s16824_s6 + $0x570] sm:$0xff]  ;;  %v4717_v43 = vld [vmem:[%s16824_s6 + $0x288] sm:$0xff]  ;;  %4912 = vmatpush.msra.mxu3 %v4720_v42 }
 0x290   :  { %v4541_v44 = vadd.f32 %v4539_v19, %v4529_v45  ;;  %4953 = vmatpush.msra.mxu1 %v4813_v55  ;;  %v4642_v55 = vld [vmem:[%s16824_s6 + $0x30] sm:$0xff] }
 0x291   :  { %v4549_v60 = vmax.f32 %v4543_v61, 0.0  ;;  %v4542_v17 = vadd.f32 %v4539_v19, %v4530_v9  ;;  %v4714_v61 = vld [vmem:[%s16824_s6 + $0x270] sm:$0xff]  ;;  %v4753_v9 = vld [vmem:[%s16824_s6 + $0x3a8] sm:$0xff]  ;;  %4913 = vmatpush.msra.mxu3 %v4717_v43  ;;  %v4687_v43 = vld [vmem:[%s16824_s6 + $0x198] sm:$0xff] }
 0x292   :  { %v4547_v31 = vmax.f32 %v4541_v44, 0.0  ;;  %4954 = vmatpush.msra.mxu1 %v4810_v46  ;;  %v4711_v44 = vld [vmem:[%s16824_s6 + $0x258] sm:$0xff]  ;;  %v4690_v42 = vld [vmem:[%s16824_s6 + $0x1b0] sm:$0xff] }
 0x293   :  { %4555 = vst [vmem:[#allocation2 + $0x10] sm:$0x3f] %v4549_v60  ;;  %v4548_v29 = vmax.f32 %v4542_v17, 0.0  ;;  %v4486_v52 = vpop.f32.mrf.mxu3  ;;  %v4750_v60 = vld [vmem:[%s16824_s6 + $0x390] sm:$0xff]  ;;  %4914 = vmatpush.msra.mxu3 %v4714_v61  ;;  %v4660_v17 = vld [vmem:[%s16824_s6 + $0xc0] sm:$0xff]  ;;  %v4639_v46 = vld [vmem:[%s16824_s6 + $0x18] sm:$0xff] }
 0x294   :  { %4553 = vst [vmem:[#allocation2] sm:$0x3f] %v4547_v31  ;;  %v4532_v51 = vadd.f32 %v4486_v52, %v4346_v8  ;;  %4955 = vmatpush.msra.mxu1 %v4807_v15  ;;  %v4708_v52 = vld [vmem:[%s16824_s6 + $0x240] sm:$0xff]  ;;  %4896 = vmatpush.msra.mxu2 %v4660_v17  ;;  %v4715_v15 = vld [vmem:[%s16824_s6 + $0x278] sm:$0xff]  ;;  %v4706_v59 = vld [vmem:[%s16824_s6 + $0x230] sm:$0xff] }
 0x295   :  { %4554 = vst [vmem:[#allocation2 + $0x8] sm:$0x3f] %v4548_v29  ;;  %v4506_v13 = vpop.f32.mrf.mxu0  ;;  %v4747_v29 = vld [vmem:[%s16824_s6 + $0x378] sm:$0xff]  ;;  %4915 = vmatpush.msra.mxu3 %v4711_v44  ;;  %v4712_v61 = vld [vmem:[%s16824_s6 + $0x260] sm:$0xff]  ;;  %v4873_v44 = vld [vmem:[%s16824_s6 + $0x768] sm:$0x7f] }
 0x296   :  { %v4544_v26 = vadd.f32 %v4539_v19, %v4532_v51  ;;  %v4533_v25 = vadd.f32 %v4506_v13, %v4347_v2  ;;  %v4526_v3 = vpop.f32.mrf.mxu1  ;;  %4956 = vmatpush.msra.mxu1 %v4804_v49  ;;  %v4703_v49 = vld [vmem:[%s16824_s6 + $0x218] sm:$0xff]  ;;  %v4772_v17 = vld [vmem:[%s16824_s6 + $0x440] sm:$0xff] }
 0x297   :  { %v4534_v5 = vadd.f32 %v4526_v3, %v4348_v48  ;;  %4916 = vmatpush.msra.mxu3 %v4708_v52  ;;  %v4676_v52 = vld [vmem:[%s16824_s6 + $0x140] sm:$0xff] }
 0x298   :  { %v4550_v57 = vmax.f32 %v4544_v26, 0.0  ;;  %v4545_v36 = vadd.f32 %v4539_v19, %v4533_v25  ;;  %v4798_v26 = vld [vmem:[%s16824_s6 + $0x510] sm:$0xff]  ;;  %4957 = vmatpush.msra.mxu1 %v4801_v14  ;;  %v4769_v14 = vld [vmem:[%s16824_s6 + $0x428] sm:$0xff] }
 0x299   :  { %v4546_v56 = vadd.f32 %v4539_v19, %v4534_v5  ;;  %v4759_v19 = vld [vmem:[%s16824_s6 + $0x3d8] sm:$0xff] }
 0x29a   :  { %4556 = vst [vmem:[#allocation2 + $0x18] sm:$0x3f] %v4550_v57  ;;  %v4551_v18 = vmax.f32 %v4545_v36, 0.0  ;;  %v13660_v20 = vld [vmem:[#allocation2 + $0x10] sm:$0x3f]  ;;  %4935 = vmatpush.msra.mxu0 %v4759_v19  ;;  %v4744_v36 = vld [vmem:[%s16824_s6 + $0x360] sm:$0xff]  ;;  %4958 = vmatpush.msra.mxu1 %v4798_v26 }
 0x29b   :  { %v4552_v7 = vmax.f32 %v4546_v56, 0.0  ;;  %v13653_v30 = vld [vmem:[#allocation2] sm:$0x3f]  ;;  %v4780_v19 = vld [vmem:[%s16824_s6 + $0x480] sm:$0xff] }
 0x29c   :  { %4557 = vst [vmem:[#allocation2 + $0x20] sm:$0x3f] %v4551_v18  ;;  %v13655_v32 = vld [vmem:[#allocation2 + $0x8] sm:$0x3f]  ;;  %4936 = vmatpush.msra.mxu0 %v4756_v23  ;;  %v4657_v18 = vld [vmem:[%s16824_s6 + $0xa8] sm:$0xff] }
 0x29d   :  { %4559 = vst.msk [vmem:[#allocation2 + $0x28] sm:$0x3f] %vm4558_vm0, %v4552_v7  ;;  %v11767_v6 = vpack.i.bf16 %v13655_v32, %v13653_v30  ;;  %4897 = vmatpush.msra.mxu2 %v4657_v18  ;;  %v4718_v23 = vld [vmem:[%s16824_s6 + $0x290] sm:$0xff]  ;;  %v4673_v26 = vld [vmem:[%s16824_s6 + $0x128] sm:$0xff]  ;;  %vm5214_vm0 = vcmask 1045504  }
 0x29e   :  { %4937 = vmatpush.msra.mxu0 %v4753_v9  ;;  %v4709_v9 = vld [vmem:[%s16824_s6 + $0x248] sm:$0xff]  ;;  %v4670_v18 = vld [vmem:[%s16824_s6 + $0x110] sm:$0xff] }
 0x29f   :  { %11768 = vrot.lane.b32.xlu0 %v11767_v6, %s11913_s23  ;;  %v4795_v6 = vld [vmem:[%s16824_s6 + $0x4f8] sm:$0xff] }
 0x2a0   :  { %4938 = vmatpush.msra.mxu0 %v4750_v60  ;;  %4959 = vmatpush.msra.mxu1 %v4795_v6  ;;  %v4700_v60 = vld [vmem:[%s16824_s6 + $0x200] sm:$0xff]  ;;  %v4667_v6 = vld [vmem:[%s16824_s6 + $0xf8] sm:$0xff] }
 0x2a1   :  { %v13662_v41 = vld [vmem:[#allocation2 + $0x18] sm:$0x3f] }
 0x2a2   :  { %v11772_v28 = vpack.i.bf16 %v13662_v41, %v13660_v20  ;;  %4939 = vmatpush.msra.mxu0 %v4747_v29  ;;  %4960 = vmatpush.msra.mxu1 %v4792_v58  ;;  %v4867_v29 = vld [vmem:[%s16824_s6 + $0x738] sm:$0xff]  ;;  %v4754_v58 = vld [vmem:[%s16824_s6 + $0x3b0] sm:$0xff] }
 0x2a3   :  { %v13666_v35 = vld [vmem:[#allocation2 + $0x20] sm:$0x3f] }
 0x2a4   :  { %11773 = vrot.lane.b32.xlu1 %v11772_v28, %s11913_s23  ;;  %4578 = vrot.lane.b32.xlu2 %v13666_v35, %s11913_s23  ;;  %v13671_v11 = vld [vmem:[#allocation2 + $0x28] sm:$0x3f] }
 0x2a5   :  { %4940 = vmatpush.msra.mxu0 %v4744_v36  ;;  %v4738_v28 = vld [vmem:[%s16824_s6 + $0x330] sm:$0xff]  ;;  %4961 = vmatpush.msra.mxu1 %v4789_v47  ;;  %v4763_v36 = vld [vmem:[%s16824_s6 + $0x3f8] sm:$0xff]  ;;  %v4849_v47 = vld [vmem:[%s16824_s6 + $0x6a8] sm:$0xff] }
 0x2a7   :  { %4596 = vrot.lane.b32.xlu0 %v13671_v11, %s11913_s23  ;;  %4962 = vmatpush.msra.mxu1 %v4786_v34  ;;  %v4843_v34 = vld [vmem:[%s16824_s6 + $0x678] sm:$0xff] }
 0x2a9   :  { %4963 = vmatpush.msra.mxu1 %v4783_v10  ;;  %v4649_v10 = vld [vmem:[%s16824_s6 + $0x68] sm:$0xff] }
 0x2ab   :  { %4964 = vmatpush.msra.mxu1 %v4780_v19  ;;  %v4736_v19 = vld [vmem:[%s16824_s6 + $0x320] sm:$0xff] }
 0x2fe   :  { %v13784_v2 = vpop.permute.xlu2 %4578 }
 0x311   :  { %v11769_v39 = vpop.permute.xlu0 %11768 }
 0x312   :  { %v11771_v45 = vunpack.i.h.bf16 %v11769_v39  ;;  %v11770_v1 = vunpack.i.l.bf16 %v11769_v39  ;;  %v4778_v39 = vld [vmem:[%s16824_s6 + $0x470] sm:$0xff] }
 0x313   :  { %5029 = vmatpush.msrb.mxu1 %v4778_v39  ;;  %v4643_v39 = vld [vmem:[%s16824_s6 + $0x38] sm:$0xff] }
 0x314   :  { %v4580_v27 = vsel %vm112_vm2, %v11770_v1, %v11771_v45  ;;  %v4684_v1 = vld [vmem:[%s16824_s6 + $0x180] sm:$0xff] }
 0x315   :  { %v13792_v25 = vmax.f32 %v13653_v30, %v4580_v27  ;;  %v4741_v30 = vld [vmem:[%s16824_s6 + $0x348] sm:$0xff]  ;;  %5030 = vmatpush.msrb.mxu1 %v4775_v24  ;;  %v4870_v27 = vld [vmem:[%s16824_s6 + $0x750] sm:$0xff] }
 0x316   :  { %v11774_v4 = vpop.permute.xlu1 %11773  ;;  %4941 = vmatpush.msra.mxu0 %v4741_v30  ;;  %v4760_v30 = vld [vmem:[%s16824_s6 + $0x3e0] sm:$0xff] }
 0x317   :  { %v11776_v8 = vunpack.i.h.bf16 %v11774_v4  ;;  %v11775_v31 = vunpack.i.l.bf16 %v11774_v4  ;;  %v4682_v4 = vld [vmem:[%s16824_s6 + $0x170] sm:$0xff]  ;;  %5031 = vmatpush.msrb.mxu1 %v4772_v17  ;;  %v4665_v17 = vld [vmem:[%s16824_s6 + $0xe8] sm:$0xff] }
 0x318   :  { %4942 = vmatpush.msra.mxu0 %v4738_v28  ;;  %v4757_v28 = vld [vmem:[%s16824_s6 + $0x3c8] sm:$0xff] }
 0x319   :  { %v4581_v51 = vsel %vm112_vm2, %v11771_v45, %v11775_v31  ;;  %v4582_v48 = vsel %vm112_vm2, %v11775_v31, %v11776_v8  ;;  %v4597_v13 = vpop.permute.xlu0 %4596  ;;  %v4583_v54 = vsel %vm112_vm2, %v11776_v8, %v13784_v2  ;;  %v4636_v45 = vld [vmem:[%s16824_s6] sm:$0xff]  ;;  %v4679_v8 = vld [vmem:[%s16824_s6 + $0x158] sm:$0xff]  ;;  %v4697_v31 = vld [vmem:[%s16824_s6 + $0x1e8] sm:$0xff]  ;;  %5032 = vmatpush.msrb.mxu1 %v4769_v14 }
 0x31a   :  { %v13795_v3 = vmax.f32 %v13655_v32, %v4581_v51  ;;  %v13798_v5 = vmax.f32 %v13660_v20, %v4582_v48  ;;  %v4598_v57 = vsel %vm112_vm2, %v13784_v2, %v4597_v13  ;;  %v4705_v32 = vld [vmem:[%s16824_s6 + $0x228] sm:$0xff]  ;;  %v4654_v20 = vld [vmem:[%s16824_s6 + $0x90] sm:$0xff]  ;;  %v13851_v0 = vmax.f32 %v13662_v41, %v4583_v54  ;;  %4943 = vmatpush.msra.mxu0 %v4735_v50  ;;  %v4696_v41 = vld [vmem:[%s16824_s6 + $0x1e0] sm:$0xff] }
 0x31b   :  { %v4601_v56 = vmax.f32 %v13666_v35, %v4598_v57  ;;  %4917 = vmatpush.msra.mxu3 %v4705_v32  ;;  %4898 = vmatpush.msra.mxu2 %v4654_v20  ;;  %v4602_v22 = vmax.f32 %v13671_v11, %v4597_v13  ;;  %v4645_v11 = vld [vmem:[%s16824_s6 + $0x48] sm:$0xff]  ;;  %v4694_v51 = vld [vmem:[%s16824_s6 + $0x1d0] sm:$0xff]  ;;  %v4864_v13 = vld [vmem:[%s16824_s6 + $0x720] sm:$0xff] }
 0x31c   :  { %4613 = vrot.lane.b32.xlu2 %v13798_v5, %s11917_s0  ;;  %v11777_v7 = vpack.i.bf16 %v13795_v3, %v13792_v25  ;;  %4944 = vmatpush.msra.mxu0 %v4732_v40  ;;  %v4766_v48 = vld [vmem:[%s16824_s6 + $0x410] sm:$0xff]  ;;  %v4691_v57 = vld [vmem:[%s16824_s6 + $0x1b8] sm:$0xff]  ;;  %v4685_v20 = vld [vmem:[%s16824_s6 + $0x188] sm:$0xff] }
 0x31d   :  { %4617 = vrot.lane.b32.xlu0 %v4601_v56, %s11917_s0  ;;  %4918 = vmatpush.msra.mxu3 %v4702_v53  ;;  %v4861_v56 = vld [vmem:[%s16824_s6 + $0x708] sm:$0xff]  ;;  %v4858_v32 = vld [vmem:[%s16824_s6 + $0x6f0] sm:$0xff]  ;;  %v4855_v53 = vld [vmem:[%s16824_s6 + $0x6d8] sm:$0xff] }
 0x31e   :  { %11778 = vrot.lane.b32.xlu1 %v11777_v7, %s11917_s0  ;;  %4899 = vmatpush.msra.mxu2 %v4651_v37  ;;  %v4688_v7 = vld [vmem:[%s16824_s6 + $0x1a0] sm:$0xff]  ;;  %v4661_v50 = vld [vmem:[%s16824_s6 + $0xc8] sm:$0xff]  ;;  %v4658_v40 = vld [vmem:[%s16824_s6 + $0xb0] sm:$0xff] }
 0x31f   :  { %4919 = vmatpush.msra.mxu3 %v4699_v12  ;;  %5009 = vmatpush.msrb.mxu0 %v4730_v38  ;;  %v4664_v54 = vld [vmem:[%s16824_s6 + $0xe0] sm:$0xff]  ;;  %v4751_v12 = vld [vmem:[%s16824_s6 + $0x398] sm:$0xff]  ;;  %v4846_v38 = vld [vmem:[%s16824_s6 + $0x690] sm:$0xff] }
 0x320   :  { %4900 = vmatpush.msra.mxu2 %v4648_v33  ;;  %5033 = vmatpush.msrb.mxu1 %v4766_v48  ;;  %v4852_v37 = vld [vmem:[%s16824_s6 + $0x6c0] sm:$0xff] }
 0x321   :  { %4920 = vmatpush.msra.mxu3 %v4696_v41  ;;  %5010 = vmatpush.msrb.mxu0 %v4727_v63  ;;  %v4748_v33 = vld [vmem:[%s16824_s6 + $0x380] sm:$0xff]  ;;  %v4745_v41 = vld [vmem:[%s16824_s6 + $0x368] sm:$0xff] }
 0x322   :  { %4901 = vmatpush.msra.mxu2 %v4645_v11  ;;  %5034 = vmatpush.msrb.mxu1 %v4763_v36  ;;  %v4652_v63 = vld [vmem:[%s16824_s6 + $0x80] sm:$0xff]  ;;  %v4742_v11 = vld [vmem:[%s16824_s6 + $0x350] sm:$0xff] }
 0x323   :  { %4921 = vmatpush.msra.mxu3 %v4693_v21  ;;  %5011 = vmatpush.msrb.mxu0 %v4724_v16  ;;  %v4840_v21 = vld [vmem:[%s16824_s6 + $0x660] sm:$0xff]  ;;  %v4739_v16 = vld [vmem:[%s16824_s6 + $0x338] sm:$0xff] }
 0x324   :  { %4615 = vrot.lane.b32.xlu2 %v13851_v0, %s11917_s0  ;;  %4902 = vmatpush.msra.mxu2 %v4642_v55  ;;  %v4837_v55 = vld [vmem:[%s16824_s6 + $0x648] sm:$0xff] }
 0x325   :  { %4922 = vmatpush.msra.mxu3 %v4690_v42  ;;  %5012 = vmatpush.msrb.mxu0 %v4721_v62  ;;  %v4646_v42 = vld [vmem:[%s16824_s6 + $0x50] sm:$0xff] }
 0x326   :  { %4619 = vrot.lane.b32.xlu1 %v4602_v22, %s11917_s0  ;;  %4903 = vmatpush.msra.mxu2 %v4639_v46  ;;  %v4655_v22 = vld [vmem:[%s16824_s6 + $0x98] sm:$0xff]  ;;  %v4834_v62 = vld [vmem:[%s16824_s6 + $0x630] sm:$0xff]  ;;  %v4733_v46 = vld [vmem:[%s16824_s6 + $0x308] sm:$0xff] }
 0x327   :  { %4923 = vmatpush.msra.mxu3 %v4687_v43  ;;  %5013 = vmatpush.msrb.mxu0 %v4718_v23  ;;  %v4831_v43 = vld [vmem:[%s16824_s6 + $0x618] sm:$0xff]  ;;  %v4640_v23 = vld [vmem:[%s16824_s6 + $0x20] sm:$0xff] }
 0x328   :  { %4904 = vmatpush.msra.mxu2 %v4636_v45  ;;  %5035 = vmatpush.msrb.mxu1 %v4760_v30  ;;  %v4828_v45 = vld [vmem:[%s16824_s6 + $0x600] sm:$0xff]  ;;  %v4874_v30 = vld [vmem:[%s16824_s6 + $0x770] sm:$0x7f] }
 0x329   :  { %4924 = vmatpush.msra.mxu3 %v4684_v1  ;;  %5014 = vmatpush.msrb.mxu0 %v4715_v15  ;;  %v4637_v1 = vld [vmem:[%s16824_s6 + $0x8] sm:$0xff] }
 0x32a   :  { %11385 = vmatpush.msk.msrb.mxu2 %vm16683_vm1, %v4873_v44  ;;  %5036 = vmatpush.msrb.mxu1 %v4757_v28  ;;  %v4677_v44 = vld [vmem:[%s16824_s6 + $0x148] sm:$0xff]  ;;  %v4722_v28 = vld [vmem:[%s16824_s6 + $0x2b0] sm:$0xff] }
 0x32b   :  { %5015 = vmatpush.msrb.mxu0 %v4712_v61  ;;  %4989 = vmatpush.msrb.mxu3 %v4682_v4  ;;  %v4671_v4 = vld [vmem:[%s16824_s6 + $0x118] sm:$0xff] }
 0x32c   :  { %4970 = vmatpush.msrb.mxu2 %v4870_v27  ;;  %5037 = vmatpush.msrb.mxu1 %v4754_v58  ;;  %v4662_v27 = vld [vmem:[%s16824_s6 + $0xd0] sm:$0xff]  ;;  %v4868_v58 = vld [vmem:[%s16824_s6 + $0x740] sm:$0xff] }
 0x32d   :  { %5016 = vmatpush.msrb.mxu0 %v4709_v9  ;;  %4990 = vmatpush.msrb.mxu3 %v4679_v8 }
 0x32e   :  { %4971 = vmatpush.msrb.mxu2 %v4867_v29  ;;  %5038 = vmatpush.msrb.mxu1 %v4751_v12  ;;  %v4659_v29 = vld [vmem:[%s16824_s6 + $0xb8] sm:$0xff] }
 0x32f   :  { %5017 = vmatpush.msrb.mxu0 %v4706_v59  ;;  %4991 = vmatpush.msrb.mxu3 %v4676_v52  ;;  %v4683_v59 = vld [vmem:[%s16824_s6 + $0x178] sm:$0xff] }
 0x330   :  { %4972 = vmatpush.msrb.mxu2 %v4864_v13  ;;  %5039 = vmatpush.msrb.mxu1 %v4748_v33  ;;  %v4731_v13 = vld [vmem:[%s16824_s6 + $0x2f8] sm:$0xff]  ;;  %v4865_v33 = vld [vmem:[%s16824_s6 + $0x728] sm:$0xff] }
 0x331   :  { %5018 = vmatpush.msrb.mxu0 %v4703_v49  ;;  %4992 = vmatpush.msrb.mxu3 %v4673_v26  ;;  %v4680_v49 = vld [vmem:[%s16824_s6 + $0x160] sm:$0xff]  ;;  %v4719_v12 = vld [vmem:[%s16824_s6 + $0x298] sm:$0xff] }
 0x332   :  { %4973 = vmatpush.msrb.mxu2 %v4861_v56  ;;  %5040 = vmatpush.msrb.mxu1 %v4745_v41  ;;  %v4656_v26 = vld [vmem:[%s16824_s6 + $0xa0] sm:$0xff] }
 0x333   :  { %5019 = vmatpush.msrb.mxu0 %v4700_v60  ;;  %4993 = vmatpush.msrb.mxu3 %v4670_v18  ;;  %v4668_v60 = vld [vmem:[%s16824_s6 + $0x100] sm:$0xff] }
 0x334   :  { %4974 = vmatpush.msrb.mxu2 %v4858_v32  ;;  %5041 = vmatpush.msrb.mxu1 %v4742_v11  ;;  %v4823_v32 = vld [vmem:[%s16824_s6 + $0x5d8] sm:$0xff] }
 0x335   :  { %5020 = vmatpush.msrb.mxu0 %v4697_v31  ;;  %4994 = vmatpush.msrb.mxu3 %v4667_v6  ;;  %v4871_v6 = vld [vmem:[%s16824_s6 + $0x758] sm:$0xff] }
 0x336   :  { %4975 = vmatpush.msrb.mxu2 %v4855_v53  ;;  %5042 = vmatpush.msrb.mxu1 %v4739_v16  ;;  %v4811_v11 = vld [vmem:[%s16824_s6 + $0x578] sm:$0xff]  ;;  %v4710_v16 = vld [vmem:[%s16824_s6 + $0x250] sm:$0xff] }
 0x337   :  { %5021 = vmatpush.msrb.mxu0 %v4694_v51  ;;  %4995 = vmatpush.msrb.mxu3 %v4664_v54  ;;  %v4820_v54 = vld [vmem:[%s16824_s6 + $0x5c0] sm:$0xff] }
 0x338   :  { %4976 = vmatpush.msrb.mxu2 %v4852_v37  ;;  %5043 = vmatpush.msrb.mxu1 %v4736_v19  ;;  %v4647_v37 = vld [vmem:[%s16824_s6 + $0x58] sm:$0xff]  ;;  %v4856_v19 = vld [vmem:[%s16824_s6 + $0x6e0] sm:$0xff] }
 0x339   :  { %5022 = vmatpush.msrb.mxu0 %v4691_v57  ;;  %4996 = vmatpush.msrb.mxu3 %v4661_v50 }
 0x33a   :  { %4977 = vmatpush.msrb.mxu2 %v4849_v47  ;;  %5044 = vmatpush.msrb.mxu1 %v4733_v46  ;;  %v4817_v47 = vld [vmem:[%s16824_s6 + $0x5a8] sm:$0xff] }
 0x33b   :  { %5023 = vmatpush.msrb.mxu0 %v4688_v7  ;;  %4997 = vmatpush.msrb.mxu3 %v4658_v40  ;;  %v4826_v7 = vld [vmem:[%s16824_s6 + $0x5f0] sm:$0xff]  ;;  %v4593_v40 = vmax.f32 %v13666_v35, %v13784_v2  ;;  %v4805_v46 = vld [vmem:[%s16824_s6 + $0x548] sm:$0xff] }
 0x33c   :  { %4978 = vmatpush.msrb.mxu2 %v4846_v38  ;;  %v4644_v38 = vld [vmem:[%s16824_s6 + $0x40] sm:$0xff]  ;;  %v4814_v35 = vld [vmem:[%s16824_s6 + $0x590] sm:$0xff] }
 0x33d   :  { %5024 = vmatpush.msrb.mxu0 %v4685_v20  ;;  %4998 = vmatpush.msrb.mxu3 %v4655_v22  ;;  %v4650_v20 = vld [vmem:[%s16824_s6 + $0x70] sm:$0xff]  ;;  %v4716_v22 = vld [vmem:[%s16824_s6 + $0x280] sm:$0xff] }
 0x33e   :  { %4979 = vmatpush.msrb.mxu2 %v4843_v34  ;;  %v4862_v2 = vld [vmem:[%s16824_s6 + $0x710] sm:$0xff]  ;;  %v4641_v34 = vld [vmem:[%s16824_s6 + $0x28] sm:$0xff] }
 0x33f   :  { %4999 = vmatpush.msrb.mxu3 %v4652_v63  ;;  %v4713_v63 = vld [vmem:[%s16824_s6 + $0x268] sm:$0xff] }
 0x340   :  { %4980 = vmatpush.msrb.mxu2 %v4840_v21  ;;  %v4859_v21 = vld [vmem:[%s16824_s6 + $0x6f8] sm:$0xff] }
 0x341   :  { %5000 = vmatpush.msrb.mxu3 %v4649_v10  ;;  %v4638_v10 = vld [vmem:[%s16824_s6 + $0x10] sm:$0xff] }
 0x342   :  { %4981 = vmatpush.msrb.mxu2 %v4837_v55  ;;  %v4875_v55 = vld [vmem:[%s16824_s6 + $0x778] sm:$0x7f] }
 0x343   :  { %5001 = vmatpush.msrb.mxu3 %v4646_v42  ;;  %v4808_v42 = vld [vmem:[%s16824_s6 + $0x560] sm:$0xff] }
 0x344   :  { %4982 = vmatpush.msrb.mxu2 %v4834_v62  ;;  %v4707_v62 = vld [vmem:[%s16824_s6 + $0x238] sm:$0xff] }
 0x345   :  { %5002 = vmatpush.msrb.mxu3 %v4643_v39  ;;  %v4872_v39 = vld [vmem:[%s16824_s6 + $0x760] sm:$0xff] }
 0x346   :  { %4983 = vmatpush.msrb.mxu2 %v4831_v43  ;;  %v4853_v43 = vld [vmem:[%s16824_s6 + $0x6c8] sm:$0xff] }
 0x347   :  { %5003 = vmatpush.msrb.mxu3 %v4640_v23  ;;  %v4704_v23 = vld [vmem:[%s16824_s6 + $0x220] sm:$0xff] }
 0x348   :  { %4984 = vmatpush.msrb.mxu2 %v4828_v45  ;;  %v4802_v45 = vld [vmem:[%s16824_s6 + $0x530] sm:$0xff] }
 0x349   :  { %5004 = vmatpush.msrb.mxu3 %v4637_v1  ;;  %v4850_v1 = vld [vmem:[%s16824_s6 + $0x6b0] sm:$0xff] }
 0x376   :  { %v4614_v24 = vpop.permute.xlu2 %4613 }
 0x37e   :  { %v4616_v15 = vpop.permute.xlu2 %4615 }
 0x37f   :  { %v4623_v61 = vsel %vm966_vm6, %v4614_v24, %v4616_v15 }
 0x380   :  { %v14094_v9 = vmax.f32 %v13798_v5, %v4623_v61  ;;  %v4674_v5 = vld [vmem:[%s16824_s6 + $0x130] sm:$0xff] }
 0x381   :  { %v4866_v61 = vld [vmem:[%s16824_s6 + $0x730] sm:$0xff] }
 0x382   :  { %4945 = vmatmul.f32.vlgmr.msra.gmra.mxu0 %v14094_v9 }
 0x383   :  { %5089 = vmatpush.msra.mxu0 %v4683_v59  ;;  %v4799_v59 = vld [vmem:[%s16824_s6 + $0x518] sm:$0xff] }
 0x385   :  { %5090 = vmatpush.msra.mxu0 %v4680_v49  ;;  %v4847_v49 = vld [vmem:[%s16824_s6 + $0x698] sm:$0xff] }
 0x387   :  { %5091 = vmatpush.msra.mxu0 %v4677_v44  ;;  %v4698_v44 = vld [vmem:[%s16824_s6 + $0x1f0] sm:$0xff] }
 0x389   :  { %5092 = vmatpush.msra.mxu0 %v4674_v5  ;;  %v4863_v5 = vld [vmem:[%s16824_s6 + $0x718] sm:$0xff] }
 0x38b   :  { %5093 = vmatpush.msra.mxu0 %v4671_v4  ;;  %v4796_v4 = vld [vmem:[%s16824_s6 + $0x500] sm:$0xff] }
 0x38d   :  { %5094 = vmatpush.msra.mxu0 %v4668_v60  ;;  %v4844_v60 = vld [vmem:[%s16824_s6 + $0x680] sm:$0xff] }
 0x38f   :  { %5095 = vmatpush.msra.mxu0 %v4665_v17  ;;  %v4618_v8 = vpop.permute.xlu0 %4617  ;;  %v4695_v17 = vld [vmem:[%s16824_s6 + $0x1d8] sm:$0xff] }
 0x390   :  { %v4624_v31 = vsel %vm966_vm6, %v4616_v15, %v4618_v8  ;;  %v11779_v14 = vpop.permute.xlu1 %11778  ;;  %v4701_v15 = vld [vmem:[%s16824_s6 + $0x208] sm:$0xff] }
 0x391   :  { %v14126_v52 = vmax.f32 %v13851_v0, %v4624_v31  ;;  %5096 = vmatpush.msra.mxu0 %v4662_v27  ;;  %v11781_v51 = vunpack.i.h.bf16 %v11779_v14  ;;  %v11780_v48 = vunpack.i.l.bf16 %v11779_v14  ;;  %v4728_v0 = vld [vmem:[%s16824_s6 + $0x2e0] sm:$0xff]  ;;  %v4841_v31 = vld [vmem:[%s16824_s6 + $0x668] sm:$0xff] }
 0x392   :  { %v4860_v27 = vld [vmem:[%s16824_s6 + $0x700] sm:$0xff] }
 0x393   :  { %v4622_v57 = vsel %vm966_vm6, %v11781_v51, %v4614_v24  ;;  %v4621_v36 = vsel %vm966_vm6, %v11780_v48, %v11781_v51  ;;  %4965 = vmatmul.f32.vlgmr.msra.gmra.mxu1 %v14126_v52  ;;  %5097 = vmatpush.msra.mxu0 %v4659_v29  ;;  %v4869_v24 = vld [vmem:[%s16824_s6 + $0x748] sm:$0xff]  ;;  %v4692_v14 = vld [vmem:[%s16824_s6 + $0x1c0] sm:$0xff]  ;;  %v4790_v51 = vld [vmem:[%s16824_s6 + $0x4d0] sm:$0xff] }
 0x394   :  { %v14141_v56 = vmax.f32 %v13795_v3, %v4622_v57  ;;  %v14144_v18 = vmax.f32 %v13792_v25, %v4621_v36  ;;  %5109 = vmatpush.msra.mxu1 %v4731_v13  ;;  %v4653_v3 = vld [vmem:[%s16824_s6 + $0x88] sm:$0xff]  ;;  %v4838_v48 = vld [vmem:[%s16824_s6 + $0x650] sm:$0xff]  ;;  %v4787_v57 = vld [vmem:[%s16824_s6 + $0x4b8] sm:$0xff] }
 0x395   :  { %5098 = vmatpush.msra.mxu0 %v4656_v26  ;;  %v4725_v25 = vld [vmem:[%s16824_s6 + $0x2c8] sm:$0xff]  ;;  %v4854_v26 = vld [vmem:[%s16824_s6 + $0x6d0] sm:$0xff]  ;;  %v4835_v36 = vld [vmem:[%s16824_s6 + $0x638] sm:$0xff] }
 0x396   :  { %5110 = vmatpush.msra.mxu1 %v4728_v0  ;;  %4905 = vmatmul.f32.vlgmr.msra.gmra.mxu2 %v14144_v18  ;;  %v4857_v29 = vld [vmem:[%s16824_s6 + $0x6e8] sm:$0xff]  ;;  %v4686_v0 = vld [vmem:[%s16824_s6 + $0x190] sm:$0xff] }
 0x397   :  { %4925 = vmatmul.f32.vlgmr.msra.gmra.mxu3 %v14141_v56  ;;  %5025 = vmatmul.f32.vlgmr.msrb.gmra.mxu0 %v14141_v56  ;;  %v4689_v13 = vld [vmem:[%s16824_s6 + $0x1a8] sm:$0xff] }
 0x398   :  { %5049 = vmatpush.msra.mxu2 %v4826_v7  ;;  %11387 = vmatpush.msk.msra.mxu3 %vm16683_vm1, %v4874_v30  ;;  %v4620_v53 = vpop.permute.xlu1 %4619  ;;  %v4784_v7 = vld [vmem:[%s16824_s6 + $0x4a0] sm:$0xff] }
 0x399   :  { %5099 = vmatpush.msra.mxu0 %v4653_v3  ;;  %5111 = vmatpush.msra.mxu1 %v4725_v25  ;;  %v4625_v50 = vsel %vm966_vm6, %v4618_v8, %v4620_v53  ;;  %v4793_v8 = vld [vmem:[%s16824_s6 + $0x4e8] sm:$0xff]  ;;  %v4832_v30 = vld [vmem:[%s16824_s6 + $0x620] sm:$0xff] }
 0x39a   :  { %5050 = vmatpush.msra.mxu2 %v4823_v32  ;;  %5070 = vmatpush.msra.mxu3 %v4871_v6  ;;  %v14202_v41 = vmax.f32 %v4593_v40, %v4625_v50  ;;  %v4848_v3 = vld [vmem:[%s16824_s6 + $0x6a0] sm:$0xff]  ;;  %v4781_v25 = vld [vmem:[%s16824_s6 + $0x488] sm:$0xff]  ;;  %v4779_v6 = vld [vmem:[%s16824_s6 + $0x478] sm:$0xff] }
 0x39b   :  { %5100 = vmatpush.msra.mxu0 %v4650_v20  ;;  %5112 = vmatpush.msra.mxu1 %v4722_v28  ;;  %v4829_v32 = vld [vmem:[%s16824_s6 + $0x608] sm:$0xff]  ;;  %v4776_v28 = vld [vmem:[%s16824_s6 + $0x460] sm:$0xff]  ;;  %v4839_v50 = vld [vmem:[%s16824_s6 + $0x658] sm:$0xff] }
 0x39c   :  { %5045 = vmatmul.f32.vlgmr.msrb.gmra.mxu1 %v14094_v9  ;;  %5051 = vmatpush.msra.mxu2 %v4820_v54  ;;  %v4845_v20 = vld [vmem:[%s16824_s6 + $0x688] sm:$0xff]  ;;  %v4824_v53 = vld [vmem:[%s16824_s6 + $0x5e0] sm:$0xff]  ;;  %v4842_v54 = vld [vmem:[%s16824_s6 + $0x670] sm:$0xff] }
 0x39d   :  { %5071 = vmatpush.msra.mxu3 %v4868_v58  ;;  %5101 = vmatpush.msra.mxu0 %v4647_v37  ;;  %v4773_v58 = vld [vmem:[%s16824_s6 + $0x448] sm:$0xff]  ;;  %v4836_v40 = vld [vmem:[%s16824_s6 + $0x640] sm:$0xff] }
 0x39e   :  { %5113 = vmatpush.msra.mxu1 %v4719_v12  ;;  %5052 = vmatpush.msra.mxu2 %v4817_v47  ;;  %v4821_v37 = vld [vmem:[%s16824_s6 + $0x5c8] sm:$0xff]  ;;  %v4770_v12 = vld [vmem:[%s16824_s6 + $0x430] sm:$0xff] }
 0x39f   :  { %5072 = vmatpush.msra.mxu3 %v4865_v33  ;;  %5102 = vmatpush.msra.mxu0 %v4644_v38  ;;  %v4818_v47 = vld [vmem:[%s16824_s6 + $0x5b0] sm:$0xff]  ;;  %v4767_v33 = vld [vmem:[%s16824_s6 + $0x418] sm:$0xff] }
 0x3a0   :  { %5114 = vmatpush.msra.mxu1 %v4716_v22  ;;  %11386 = vmatmul.msk.f32.vlgmr.msrb.gmra.mxu2 %vm112_vm2, %v14202_v41  ;;  %v4815_v38 = vld [vmem:[%s16824_s6 + $0x598] sm:$0xff]  ;;  %v4833_v22 = vld [vmem:[%s16824_s6 + $0x628] sm:$0xff] }
 0x3a1   :  { %5005 = vmatmul.f32.vlgmr.msrb.gmra.mxu3 %v14144_v18  ;;  %5053 = vmatpush.msra.mxu2 %v4814_v35  ;;  %v4764_v35 = vld [vmem:[%s16824_s6 + $0x400] sm:$0xff] }
 0x3a2   :  { %5073 = vmatpush.msra.mxu3 %v4862_v2  ;;  %5103 = vmatpush.msra.mxu0 %v4641_v34  ;;  %v4812_v2 = vld [vmem:[%s16824_s6 + $0x580] sm:$0xff]  ;;  %v4830_v34 = vld [vmem:[%s16824_s6 + $0x610] sm:$0xff] }
 0x3a3   :  { %5115 = vmatpush.msra.mxu1 %v4713_v63  ;;  %5054 = vmatpush.msra.mxu2 %v4811_v11  ;;  %v4761_v63 = vld [vmem:[%s16824_s6 + $0x3e8] sm:$0xff] }
 0x3a4   :  { %5074 = vmatpush.msra.mxu3 %v4859_v21  ;;  %5104 = vmatpush.msra.mxu0 %v4638_v10  ;;  %v4809_v11 = vld [vmem:[%s16824_s6 + $0x568] sm:$0xff]  ;;  %v4758_v21 = vld [vmem:[%s16824_s6 + $0x3d0] sm:$0xff] }
 0x3a5   :  { %5116 = vmatpush.msra.mxu1 %v4710_v16  ;;  %5105 = vmatmul.f32.vlgmr.msra.gmra.mxu0 %v14144_v18  ;;  %v4851_v18 = vld [vmem:[%s16824_s6 + $0x6b8] sm:$0xff]  ;;  %v4806_v10 = vld [vmem:[%s16824_s6 + $0x550] sm:$0xff] }
 0x3a6   :  { %11389 = vmatpush.msk.msrb.mxu0 %vm16683_vm1, %v4875_v55  ;;  %5055 = vmatpush.msra.mxu2 %v4808_v42  ;;  %v4755_v16 = vld [vmem:[%s16824_s6 + $0x3b8] sm:$0xff]  ;;  %v4800_v42 = vld [vmem:[%s16824_s6 + $0x520] sm:$0xff]  ;;  %vm5191_vm1 = vcmask 521216  }
 0x3a7   :  { %5075 = vmatpush.msra.mxu3 %v4856_v19  ;;  %5117 = vmatpush.msra.mxu1 %v4707_v62  ;;  %v4803_v55 = vld [vmem:[%s16824_s6 + $0x538] sm:$0xff]  ;;  %v4749_v19 = vld [vmem:[%s16824_s6 + $0x388] sm:$0xff] }
 0x3a8   :  { %5170 = vmatpush.msrb.mxu0 %v4872_v39  ;;  %5056 = vmatpush.msra.mxu2 %v4805_v46  ;;  %v4797_v62 = vld [vmem:[%s16824_s6 + $0x508] sm:$0xff]  ;;  %v4746_v39 = vld [vmem:[%s16824_s6 + $0x370] sm:$0xff] }
 0x3a9   :  { %5076 = vmatpush.msra.mxu3 %v4853_v43  ;;  %5118 = vmatpush.msra.mxu1 %v4704_v23  ;;  %v4794_v46 = vld [vmem:[%s16824_s6 + $0x4f0] sm:$0xff]  ;;  %v4743_v43 = vld [vmem:[%s16824_s6 + $0x358] sm:$0xff] }
 0x3aa   :  { %5171 = vmatpush.msrb.mxu0 %v4869_v24  ;;  %5057 = vmatpush.msra.mxu2 %v4802_v45  ;;  %v4791_v23 = vld [vmem:[%s16824_s6 + $0x4d8] sm:$0xff]  ;;  %v4740_v24 = vld [vmem:[%s16824_s6 + $0x340] sm:$0xff] }
 0x3ab   :  { %5077 = vmatpush.msra.mxu3 %v4850_v1  ;;  %5119 = vmatpush.msra.mxu1 %v4701_v15  ;;  %v4788_v45 = vld [vmem:[%s16824_s6 + $0x4c0] sm:$0xff]  ;;  %v4737_v1 = vld [vmem:[%s16824_s6 + $0x328] sm:$0xff] }
 0x3ac   :  { %5172 = vmatpush.msrb.mxu0 %v4866_v61  ;;  %5058 = vmatpush.msra.mxu2 %v4799_v59  ;;  %v4785_v15 = vld [vmem:[%s16824_s6 + $0x4a8] sm:$0xff]  ;;  %v4734_v61 = vld [vmem:[%s16824_s6 + $0x310] sm:$0xff] }
 0x3ad   :  { %5078 = vmatpush.msra.mxu3 %v4847_v49  ;;  %5120 = vmatpush.msra.mxu1 %v4698_v44  ;;  %v4782_v59 = vld [vmem:[%s16824_s6 + $0x490] sm:$0xff] }
 0x3ae   :  { %5173 = vmatpush.msrb.mxu0 %v4863_v5  ;;  %5059 = vmatpush.msra.mxu2 %v4796_v4 }
 0x3af   :  { %5079 = vmatpush.msra.mxu3 %v4844_v60  ;;  %5121 = vmatpush.msra.mxu1 %v4695_v17 }
 0x3b0   :  { %5174 = vmatpush.msrb.mxu0 %v4860_v27  ;;  %5060 = vmatpush.msra.mxu2 %v4793_v8 }
 0x3b1   :  { %5080 = vmatpush.msra.mxu3 %v4841_v31  ;;  %5122 = vmatpush.msra.mxu1 %v4692_v14 }
 0x3b2   :  { %5175 = vmatpush.msrb.mxu0 %v4857_v29  ;;  %5061 = vmatpush.msra.mxu2 %v4790_v51 }
 0x3b3   :  { %5081 = vmatpush.msra.mxu3 %v4838_v48  ;;  %5123 = vmatpush.msra.mxu1 %v4689_v13 }
 0x3b4   :  { %5176 = vmatpush.msrb.mxu0 %v4854_v26  ;;  %5062 = vmatpush.msra.mxu2 %v4787_v57 }
 0x3b5   :  { %5082 = vmatpush.msra.mxu3 %v4835_v36  ;;  %5124 = vmatpush.msra.mxu1 %v4686_v0 }
 0x3b6   :  { %5125 = vmatmul.f32.vlgmr.msra.gmra.mxu1 %v14141_v56  ;;  %5177 = vmatpush.msrb.mxu0 %v4851_v18  ;;  %v4827_v56 = vld [vmem:[%s16824_s6 + $0x5f8] sm:$0xff] }
 0x3b7   :  { %5063 = vmatpush.msra.mxu2 %v4784_v7  ;;  %5083 = vmatpush.msra.mxu3 %v4832_v30 }
 0x3b8   :  { %5178 = vmatpush.msrb.mxu0 %v4848_v3 }
 0x3b9   :  { %5064 = vmatpush.msra.mxu2 %v4781_v25  ;;  %5084 = vmatpush.msra.mxu3 %v4829_v32 }
 0x3ba   :  { %5065 = vmatmul.f32.vlgmr.msra.gmra.mxu2 %v14126_v52  ;;  %11388 = vmatmul.msk.f32.vlgmr.msra.gmra.mxu3 %vm112_vm2, %v14202_v41 }
 0x3bb   :  { %5129 = vmatpush.msrb.mxu2 %v4779_v6  ;;  %5149 = vmatpush.msrb.mxu3 %v4827_v56 }
 0x3bc   :  { %5179 = vmatpush.msrb.mxu0 %v4845_v20 }
 0x3bd   :  { %5130 = vmatpush.msrb.mxu2 %v4776_v28  ;;  %5150 = vmatpush.msrb.mxu3 %v4824_v53 }
 0x3be   :  { %5180 = vmatpush.msrb.mxu0 %v4842_v54 }
 0x3bf   :  { %5131 = vmatpush.msrb.mxu2 %v4773_v58  ;;  %5151 = vmatpush.msrb.mxu3 %v4821_v37  ;;  %v5193_v58 = vld [vmem:[%s16833_s1] sm:$0xff]  ;;  %v5194_v37 = vld [vmem:[%s16833_s1 + $0x8] sm:$0x3] }
 0x3c0   :  { %5181 = vmatpush.msrb.mxu0 %v4839_v50 }
 0x3c1   :  { %5132 = vmatpush.msrb.mxu2 %v4770_v12  ;;  %5152 = vmatpush.msrb.mxu3 %v4818_v47 }
 0x3c2   :  { %5182 = vmatpush.msrb.mxu0 %v4836_v40  ;;  %v11413_v40 = vld [vmem:[%s16833_s1 + $0x30] sm:$0xff] }
 0x3c3   :  { %5133 = vmatpush.msrb.mxu2 %v4767_v33  ;;  %5153 = vmatpush.msrb.mxu3 %v4815_v38 }
 0x3c4   :  { %5183 = vmatpush.msrb.mxu0 %v4833_v22  ;;  %v11414_v22 = vld [vmem:[%s16833_s1 + $0x38] sm:$0x3] }
 0x3c5   :  { %5134 = vmatpush.msrb.mxu2 %v4764_v35  ;;  %5154 = vmatpush.msrb.mxu3 %v4812_v2  ;;  %v11391_v2 = vld [vmem:[%s16833_s1 + $0x10] sm:$0xff] }
 0x3c6   :  { %5184 = vmatpush.msrb.mxu0 %v4830_v34 }
 0x3c7   :  { %11390 = vmatmul.msk.f32.vlgmr.msrb.gmra.mxu0 %vm112_vm2, %v14202_v41  ;;  %5135 = vmatpush.msrb.mxu2 %v4761_v63  ;;  %v4752_v41 = vld [vmem:[%s16824_s6 + $0x3a0] sm:$0xff]  ;;  %s16825_s6 = smov 99  }
 0x3c8   :  { %5155 = vmatpush.msrb.mxu3 %v4809_v11 }
 0x3c9   :  { %5136 = vmatpush.msrb.mxu2 %v4758_v21  ;;  %v14581_v21 = vld [vmem:[%s16833_s1 + $0x20] sm:$0xff] }
 0x3ca   :  { %5156 = vmatpush.msrb.mxu3 %v4806_v10 }
 0x3cb   :  { %5137 = vmatpush.msrb.mxu2 %v4755_v16 }
 0x3cc   :  { %5157 = vmatpush.msrb.mxu3 %v4803_v55  ;;  %v11392_v55 = vld [vmem:[%s16833_s1 + $0x18] sm:$0x3] }
 0x3cd   :  { %5138 = vmatpush.msrb.mxu2 %v4752_v41 }
 0x3ce   :  { %5158 = vmatpush.msrb.mxu3 %v4800_v42 }
 0x3cf   :  { %5139 = vmatpush.msrb.mxu2 %v4749_v19  ;;  %v14604_v19 = vld [vmem:[%s16833_s1 + $0x28] sm:$0x3] }
 0x3d0   :  { %5159 = vmatpush.msrb.mxu3 %v4797_v62 }
 0x3d1   :  { %5140 = vmatpush.msrb.mxu2 %v4746_v39 }
 0x3d2   :  { %5160 = vmatpush.msrb.mxu3 %v4794_v46 }
 0x3d3   :  { %5141 = vmatpush.msrb.mxu2 %v4743_v43 }
 0x3d4   :  { %5161 = vmatpush.msrb.mxu3 %v4791_v23 }
 0x3d5   :  { %5142 = vmatpush.msrb.mxu2 %v4740_v24  ;;  %v11421_v24 = vld [vmem:[%s16833_s1 + $0x40] sm:$0xff] }
 0x3d6   :  { %5162 = vmatpush.msrb.mxu3 %v4788_v45  ;;  %v11429_v45 = vld [vmem:[%s16833_s1 + $0x50] sm:$0xff] }
 0x3d7   :  { %5143 = vmatpush.msrb.mxu2 %v4737_v1 }
 0x3d8   :  { %5163 = vmatpush.msrb.mxu3 %v4785_v15 }
 0x3d9   :  { %5144 = vmatpush.msrb.mxu2 %v4734_v61 }
 0x3da   :  { %5164 = vmatpush.msrb.mxu3 %v4782_v59  ;;  %5145 = vmatmul.f32.vlgmr.msrb.gmra.mxu2 %v14094_v9 }
 0x3db   :  { %5165 = vmatmul.f32.vlgmr.msrb.gmra.mxu3 %v14126_v52 }
 0x3ff   :  { %v4946_v4 = vpop.f32.mrf.mxu0 }
 0x410   :  { %v4966_v17 = vpop.f32.mrf.mxu1 }
 0x414   :  { %v5026_v52 = vpop.f32.mrf.mxu0 }
 0x419   :  { %v4906_v49 = vpop.f32.mrf.mxu2  ;;  %v5046_v51 = vpop.f32.mrf.mxu1 }
 0x41a   :  { %v4926_v44 = vpop.f32.mrf.mxu3 }
 0x41b   :  { %v4927_v5 = vadd.f32 %v4926_v44, %v4906_v49  ;;  %v11422_v49 = vld [vmem:[%s16833_s1 + $0x48] sm:$0x3]  ;;  %v11430_v44 = vld [vmem:[%s16833_s1 + $0x58] sm:$0x3] }
 0x41d   :  { %v4947_v60 = vadd.f32 %v4946_v4, %v4927_v5 }
 0x41f   :  { %v4967_v27 = vadd.f32 %v4966_v17, %v4947_v60 }
 0x422   :  { %v5106_v18 = vpop.f32.mrf.mxu0 }
 0x423   :  { %v4986_v8 = vpop.f32.mrf.mxu2 }
 0x424   :  { %v4987_v31 = vadd.f32 %v4986_v8, %v4967_v27  ;;  %v5006_v9 = vpop.f32.mrf.mxu3  ;;  %v11437_v8 = vld [vmem:[%s16833_s1 + $0x60] sm:$0xff] }
 0x425   :  { %v5027_v29 = vadd.f32 %v5026_v52, %v5006_v9 }
 0x426   :  { %5189 = vst [vmem:[#allocation3] sm:$0x3f] %v4987_v31  ;;  %v11445_v31 = vld [vmem:[%s16833_s1 + $0x70] sm:$0xff] }
 0x427   :  { %v5047_v48 = vadd.f32 %v5046_v51, %v5027_v29  ;;  %v11438_v51 = vld [vmem:[%s16833_s1 + $0x68] sm:$0x3] }
 0x42d   :  { %v5195_v14 = vld [vmem:[#allocation3] sm:$0x3f] }
 0x42e   :  { %5324 = vrot.lane.b32.xlu2 %v5195_v14, %s11914_s2  ;;  %5202 = vrot.lane.b32.xlu0 %v5195_v14, %s11913_s23  ;;  %v14488_v28 = vld [vmem:[#allocation3] sm:$0x3f] }
 0x42f   :  { %11399 = vmatpush.msk.msra.mxu2 %vm5214_vm0, %v5195_v14 }
 0x433   :  { %v5126_v7 = vpop.f32.mrf.mxu1 }
 0x434   :  { %v5127_v30 = vadd.f32 %v5126_v7, %v5106_v18  ;;  %v11461_v18 = vld [vmem:[%s16833_s1 + $0x90] sm:$0xff] }
 0x43d   :  { %v5066_v13 = vpop.f32.mrf.mxu2  ;;  %v5086_v57 = vpop.f32.mrf.mxu3 }
 0x43e   :  { %v5067_v26 = vadd.f32 %v5066_v13, %v5047_v48  ;;  %v11446_v48 = vld [vmem:[%s16833_s1 + $0x78] sm:$0x3] }
 0x440   :  { %v5087_v36 = vadd.f32 %v5086_v57, %v5067_v26 }
 0x442   :  { %5190 = vst [vmem:[#allocation3 + $0x8] sm:$0x3f] %v5087_v36  ;;  %v11453_v36 = vld [vmem:[%s16833_s1 + $0x80] sm:$0xff] }
 0x444   :  { %v5186_v56 = vpop.f32.mrf.mxu0 }
 0x449   :  { %v5196_v0 = vld [vmem:[#allocation3 + $0x8] sm:$0x3f] }
 0x44a   :  { %5204 = vrot.lane.b32.xlu1 %v5196_v0, %s11913_s23  ;;  %11402 = vmatpush.msk.msra.mxu3 %vm5214_vm0, %v5196_v0  ;;  %v14497_v54 = vld [vmem:[#allocation3 + $0x8] sm:$0x3f] }
 0x44b   :  { %5394 = vrot.lane.b32.xlu2 %v5196_v0, %s11915_s28  ;;  %5326 = vrot.lane.b32.xlu0 %v5196_v0, %s11914_s2  ;;  %s16826_s2 = smov 97  }
 0x452   :  { %5392 = vrot.lane.b32.xlu1 %v5195_v14, %s11915_s28  ;;  %s16827_s28 = smov 98  }
 0x453   :  { %5528 = vrot.lane.b32.xlu2 %v5195_v14, %s11917_s0  ;;  %5460 = vrot.lane.b32.xlu0 %v5195_v14, %s11916_s8 }
 0x45a   :  { %5462 = vrot.lane.b32.xlu1 %v5196_v0, %s11916_s8  ;;  %s16828_s8 = smov 96  }
 0x45b   :  { %5598 = vrot.lane.b32.xlu2 %v5196_v0, %s16825_s6  ;;  %5530 = vrot.lane.b32.xlu0 %v5196_v0, %s11917_s0 }
 0x45d   :  { %v5146_v3 = vpop.f32.mrf.mxu2 }
 0x45e   :  { %v5147_v25 = vadd.f32 %v5146_v3, %v5127_v30  ;;  %v5166_v32 = vpop.f32.mrf.mxu3 }
 0x460   :  { %v5167_v6 = vadd.f32 %v5166_v32, %v5147_v25  ;;  %v11454_v32 = vld [vmem:[%s16833_s1 + $0x88] sm:$0x3] }
 0x462   :  { %v5187_v20 = vadd.f32 %v5186_v56, %v5167_v6  ;;  %5596 = vrot.lane.b32.xlu1 %v5195_v14, %s16825_s6  ;;  %s16835_s6 = smov 44   ;;  %v11462_v6 = vld [vmem:[%s16833_s1 + $0x98] sm:$0x3] }
 0x463   :  { %5732 = vrot.lane.b32.xlu2 %v5195_v14, %s16826_s2  ;;  %5664 = vrot.lane.b32.xlu0 %v5195_v14, %s16827_s28 }
 0x464   :  { %5192 = vst.msk [vmem:[#allocation3 + $0x10] sm:$0x3f] %vm5191_vm1, %v5187_v20  ;;  %vm5207_vm1 = vcmask 48128  }
 0x465   :  { %11400 = vmatmul.msk.f32.vlgmr.msra.gmra.mxu2 %vm5207_vm1, %v5193_v58  ;;  %11403 = vmatmul.msk.f32.vlgmr.msra.gmra.mxu3 %vm5207_vm1, %v5193_v58 }
 0x46a   :  { %5666 = vrot.lane.b32.xlu1 %v5196_v0, %s16827_s28  ;;  %s16837_s28 = smov 42  }
 0x46b   :  { %5802 = vrot.lane.b32.xlu2 %v5196_v0, %s16828_s8  ;;  %5734 = vrot.lane.b32.xlu0 %v5196_v0, %s16826_s2  ;;  %v14490_v53 = vld [vmem:[#allocation3 + $0x10] sm:$0x3f]  ;;  %s16836_s2 = smov 43  }
 0x46d   :  { %11401 = vmatmul.msk.f32.gmra.mxu2 %vm5207_vm1, %v5194_v37  ;;  %11404 = vmatmul.msk.f32.gmra.mxu3 %vm5207_vm1, %v5194_v37  ;;  %v11477_v37 = vld [vmem:[%s16833_s1 + $0xb0] sm:$0xff] }
 0x472   :  { %5800 = vrot.lane.b32.xlu1 %v5195_v14, %s16828_s8 }
 0x473   :  { %5878 = vrot.lane.b32.xlu2 %v14490_v53, %s16829_s26  ;;  %5874 = vrot.lane.b32.xlu0 %v14488_v28, %s16829_s26 }
 0x47a   :  { %5876 = vrot.lane.b32.xlu1 %v14497_v54, %s16829_s26 }
 0x47b   :  { %5949 = vrot.lane.b32.xlu2 %v14490_v53, %s16830_s7  ;;  %5945 = vrot.lane.b32.xlu0 %v14488_v28, %s16830_s7 }
 0x482   :  { %5947 = vrot.lane.b32.xlu1 %v14497_v54, %s16830_s7  ;;  %s16838_s7 = smov 41  }
 0x483   :  { %6020 = vrot.lane.b32.xlu2 %v14490_v53, %s16831_s29  ;;  %6016 = vrot.lane.b32.xlu0 %v14488_v28, %s16831_s29 }
 0x488   :  { %v5325_v50 = vpop.permute.xlu2 %5324 }
 0x48a   :  { %6018 = vrot.lane.b32.xlu1 %v14497_v54, %s16831_s29 }
 0x48b   :  { %6091 = vrot.lane.b32.xlu2 %v14490_v53, %s16832_s5  ;;  %6087 = vrot.lane.b32.xlu0 %v14488_v28, %s16832_s5 }
 0x492   :  { %6089 = vrot.lane.b32.xlu1 %v14497_v54, %s16832_s5  ;;  %s16844_s5 = smov 12  }
 0x493   :  { %6162 = vrot.lane.b32.xlu2 %v14490_v53, %s16834_s3  ;;  %6158 = vrot.lane.b32.xlu0 %v14488_v28, %s16834_s3 }
 0x49a   :  { %6160 = vrot.lane.b32.xlu1 %v14497_v54, %s16834_s3  ;;  %s16842_s3 = smov 14  }
 0x49b   :  { %6233 = vrot.lane.b32.xlu2 %v14490_v53, %s16835_s6  ;;  %6229 = vrot.lane.b32.xlu0 %v14488_v28, %s16835_s6 }
 0x4a0   :  { %v5203_v33 = vpop.permute.xlu0 %5202 }
 0x4a2   :  { %6231 = vrot.lane.b32.xlu1 %v14497_v54, %s16835_s6  ;;  %s16840_s6 = smov 16  }
 0x4a3   :  { %6304 = vrot.lane.b32.xlu2 %v14490_v53, %s16836_s2  ;;  %6300 = vrot.lane.b32.xlu0 %v14488_v28, %s16836_s2 }
 0x4a5   :  { %v5395_v12 = vpop.permute.xlu2 %5394 }
 0x4a6   :  { %11418 = vmatpush.msk.msrb.mxu3 %vm5214_vm0, %v5395_v12 }
 0x4a7   :  { %11419 = vmatmul.msk.f32.vlgmr.msrb.gmra.mxu3 %vm5207_vm1, %v11413_v40 }
 0x4aa   :  { %6302 = vrot.lane.b32.xlu1 %v14497_v54, %s16836_s2 }
 0x4ab   :  { %6375 = vrot.lane.b32.xlu2 %v14490_v53, %s16837_s28  ;;  %6371 = vrot.lane.b32.xlu0 %v14488_v28, %s16837_s28 }
 0x4ad   :  { %v5529_v47 = vpop.permute.xlu2 %5528 }
 0x4af   :  { %11420 = vmatmul.msk.f32.gmra.mxu3 %vm5207_vm1, %v11414_v22 }
 0x4b2   :  { %6373 = vrot.lane.b32.xlu1 %v14497_v54, %s16837_s28  ;;  %s16843_s28 = smov 13  }
 0x4b3   :  { %6446 = vrot.lane.b32.xlu2 %v14490_v53, %s16838_s7  ;;  %6442 = vrot.lane.b32.xlu0 %v14488_v28, %s16838_s7 }
 0x4b5   :  { %v14562_v38 = vpop.permute.xlu2 %5598 }
 0x4ba   :  { %6444 = vrot.lane.b32.xlu1 %v14497_v54, %s16838_s7  ;;  %s16841_s7 = smov 15  }
 0x4bb   :  { %6517 = vrot.lane.b32.xlu2 %v14490_v53, %s16839_s27  ;;  %6513 = vrot.lane.b32.xlu0 %v14488_v28, %s16839_s27 }
 0x4bc   :  { %v5205_v35 = vpop.permute.xlu1 %5204 }
 0x4bd   :  { %v5206_v34 = vsel %vm112_vm2, %v5203_v33, %v5205_v35  ;;  %v5733_v63 = vpop.permute.xlu2 %5732  ;;  %v5327_v11 = vpop.permute.xlu0 %5326 }
 0x4be   :  { %v5328_v10 = vsel %vm432_vm3, %v5325_v50, %v5327_v11  ;;  %11393 = vmatpush.msk.msrb.mxu1 %vm5214_vm0, %v5206_v34  ;;  %vm16845_vm3 = vcmask 564224  }
 0x4bf   :  { %11407 = vmatpush.msk.msrb.mxu2 %vm5214_vm0, %v5328_v10  ;;  %11394 = vmatmul.msk.f32.vlgmr.msrb.gmra.mxu1 %vm5207_vm1, %v11391_v2  ;;  %v11493_v10 = vld [vmem:[%s16833_s1 + $0xd0] sm:$0xff] }
 0x4c0   :  { %11396 = vmatpush.msk.msra.mxu1 %vm5214_vm0, %v5205_v35  ;;  %11408 = vmatmul.msk.f32.vlgmr.msrb.gmra.mxu2 %vm5207_vm1, %v14581_v21 }
 0x4c2   :  { %11410 = vmatpush.msk.msrb.mxu1 %vm5214_vm0, %v5327_v11  ;;  %6515 = vrot.lane.b32.xlu1 %v14497_v54, %s16839_s27  ;;  %v11485_v11 = vld [vmem:[%s16833_s1 + $0xc0] sm:$0xff]  ;;  %s16882_s27 = sld [smem:[#allocation82_spill]] }
 0x4c3   :  { %6588 = vrot.lane.b32.xlu2 %v14490_v53, %s16840_s6  ;;  %6584 = vrot.lane.b32.xlu0 %v14488_v28, %s16840_s6 }
 0x4c4   :  { %v5393_v16 = vpop.permute.xlu1 %5392 }
 0x4c5   :  { %v5396_v41 = vsel %vm610_vm4, %v5393_v16, %v5395_v12  ;;  %v5461_v42 = vpop.permute.xlu0 %5460  ;;  %v5803_v62 = vpop.permute.xlu2 %5802  ;;  %vm16846_vm4 = vmmov %vm16845_vm3 }
 0x4c6   :  { %11415 = vmatpush.msk.msra.mxu2 %vm5214_vm0, %v5396_v41 }
 0x4c7   :  { %11395 = vmatmul.msk.f32.gmra.mxu1 %vm5207_vm1, %v11392_v55 }
 0x4c8   :  { %11409 = vmatmul.msk.f32.gmra.mxu2 %vm5207_vm1, %v14604_v19 }
 0x4ca   :  { %6586 = vrot.lane.b32.xlu1 %v14497_v54, %s16840_s6  ;;  %s11941_s6 = smov 8  }
 0x4cb   :  { %6659 = vrot.lane.b32.xlu2 %v14490_v53, %s16841_s7  ;;  %6655 = vrot.lane.b32.xlu0 %v14488_v28, %s16841_s7 }
 0x4cc   :  { %v5463_v39 = vpop.permute.xlu1 %5462 }
 0x4cd   :  { %v5464_v46 = vsel %vm788_vm5, %v5461_v42, %v5463_v39  ;;  %v5531_v43 = vpop.permute.xlu0 %5530  ;;  %v14630_v1 = vpop.permute.xlu2 %5878  ;;  %vm16847_vm5 = vcmask 556032  }
 0x4ce   :  { %v5532_v23 = vsel %vm966_vm6, %v5529_v47, %v5531_v43  ;;  %11434 = vmatpush.msk.msra.mxu3 %vm5214_vm0, %v5531_v43  ;;  %11423 = vmatpush.msk.msra.mxu0 %vm5214_vm0, %v5464_v46 }
 0x4cf   :  { %11431 = vmatpush.msk.msrb.mxu2 %vm5214_vm0, %v5532_v23  ;;  %11397 = vmatmul.msk.f32.vlgmr.msra.gmra.mxu1 %vm5207_vm1, %v11391_v2 }
 0x4d0   :  { %11416 = vmatmul.msk.f32.vlgmr.msra.gmra.mxu2 %vm5207_vm1, %v11413_v40  ;;  %11426 = vmatpush.msk.msra.mxu1 %vm5214_vm0, %v5463_v39  ;;  %v11494_v39 = vld [vmem:[%s16833_s1 + $0xd8] sm:$0x3] }
 0x4d1   :  { %11424 = vmatmul.msk.f32.vlgmr.msra.gmra.mxu0 %vm5207_vm1, %v11421_v24  ;;  %11435 = vmatmul.msk.f32.vlgmr.msra.gmra.mxu3 %vm5207_vm1, %v11429_v45 }
 0x4d2   :  { %6657 = vrot.lane.b32.xlu1 %v14497_v54, %s16841_s7 }
 0x4d3   :  { %6730 = vrot.lane.b32.xlu2 %v14490_v53, %s16842_s3  ;;  %6726 = vrot.lane.b32.xlu0 %v14488_v28, %s16842_s3 }
 0x4d4   :  { %v5597_v15 = vpop.permute.xlu1 %5596 }
 0x4d5   :  { %v5600_v61 = vsel %vm1144_vm7, %v5597_v15, %v14562_v38  ;;  %v5665_v59 = vpop.permute.xlu0 %5664  ;;  %v5950_v5 = vpop.permute.xlu2 %5949  ;;  %vm16848_vm7 = vcmask 359424  }
 0x4d6   :  { %11439 = vmatpush.msk.msrb.mxu0 %vm5214_vm0, %v5600_v61 }
 0x4d7   :  { %11398 = vmatmul.msk.f32.gmra.mxu1 %vm5207_vm1, %v11392_v55 }
 0x4d8   :  { %11417 = vmatmul.msk.f32.gmra.mxu2 %vm5207_vm1, %v11414_v22  ;;  %v11478_v22 = vld [vmem:[%s16833_s1 + $0xb8] sm:$0x3] }
 0x4d9   :  { %11425 = vmatmul.msk.f32.gmra.mxu0 %vm5207_vm1, %v11422_v49  ;;  %11436 = vmatmul.msk.f32.gmra.mxu3 %vm5207_vm1, %v11430_v44 }
 0x4da   :  { %6728 = vrot.lane.b32.xlu1 %v14497_v54, %s16842_s3 }
 0x4db   :  { %6801 = vrot.lane.b32.xlu2 %v14490_v53, %s16843_s28  ;;  %6797 = vrot.lane.b32.xlu0 %v14488_v28, %s16843_s28 }
 0x4dc   :  { %v5667_v4 = vpop.permute.xlu1 %5666 }
 0x4dd   :  { %v5668_v60 = vsel %vm1322_vm8, %v5665_v59, %v5667_v4  ;;  %v5735_v17 = vpop.permute.xlu0 %5734  ;;  %11450 = vmatpush.msk.msrb.mxu3 %vm5214_vm0, %v5667_v4  ;;  %v14684_v9 = vpop.permute.xlu2 %6020  ;;  %vm16849_vm8 = vmmov %vm16848_vm7  ;;  %v11510_v4 = vld [vmem:[%s16833_s1 + $0xf8] sm:$0x3] }
 0x4de   :  { %v5736_v27 = vsel %vm1500_vm9, %v5733_v63, %v5735_v17  ;;  %11447 = vmatpush.msk.msra.mxu2 %vm5214_vm0, %v5668_v60  ;;  %vm16850_vm9 = vcmask 351232  }
 0x4df   :  { %11466 = vmatpush.msk.msra.mxu3 %vm5214_vm0, %v5803_v62  ;;  %11455 = vmatpush.msk.msra.mxu0 %vm5214_vm0, %v5736_v27 }
 0x4e0   :  { %11411 = vmatmul.msk.f32.vlgmr.msrb.gmra.mxu1 %vm5207_vm1, %v14581_v21  ;;  %11432 = vmatmul.msk.f32.vlgmr.msrb.gmra.mxu2 %vm5207_vm1, %v11429_v45 }
 0x4e1   :  { %11442 = vmatpush.msk.msrb.mxu1 %vm5214_vm0, %v14562_v38  ;;  %11440 = vmatmul.msk.f32.vlgmr.msrb.gmra.mxu0 %vm5207_vm1, %v11437_v8  ;;  %v11470_v38 = vld [vmem:[%s16833_s1 + $0xa8] sm:$0x3] }
 0x4e2   :  { %11451 = vmatmul.msk.f32.vlgmr.msrb.gmra.mxu3 %vm5207_vm1, %v11445_v31  ;;  %6799 = vrot.lane.b32.xlu1 %v14497_v54, %s16843_s28  ;;  %s16904_s28 = sld [smem:[#allocation75_spill]] }
 0x4e3   :  { %6872 = vrot.lane.b32.xlu2 %v14490_v53, %s16844_s5  ;;  %6868 = vrot.lane.b32.xlu0 %v14488_v28, %s16844_s5 }
 0x4e4   :  { %v5801_v14 = vpop.permute.xlu1 %5800 }
 0x4e5   :  { %v5804_v52 = vsel %vm1678_vm10, %v5801_v14, %v5803_v62  ;;  %v5875_v29 = vpop.permute.xlu0 %5874  ;;  %v6092_v0 = vpop.permute.xlu2 %6091  ;;  %vm16851_vm10 = vmmov %vm16847_vm5 }
 0x4e6   :  { %11463 = vmatpush.msk.msrb.mxu2 %vm5214_vm0, %v5804_v52 }
 0x4e8   :  { %11412 = vmatmul.msk.f32.gmra.mxu1 %vm5207_vm1, %v14604_v19  ;;  %11433 = vmatmul.msk.f32.gmra.mxu2 %vm5207_vm1, %v11430_v44  ;;  %v11486_v19 = vld [vmem:[%s16833_s1 + $0xc8] sm:$0x3]  ;;  %v14825_v52 = vpop.f32.mrf.mxu3 }
 0x4e9   :  { %11441 = vmatmul.msk.f32.gmra.mxu0 %vm5207_vm1, %v11438_v51 }
 0x4ea   :  { %11452 = vmatmul.msk.f32.gmra.mxu3 %vm5207_vm1, %v11446_v48  ;;  %6870 = vrot.lane.b32.xlu1 %v14497_v54, %s16844_s5  ;;  %v11469_v54 = vld [vmem:[%s16833_s1 + $0xa0] sm:$0xff] }
 0x4ec   :  { %v5877_v13 = vpop.permute.xlu1 %5876 }
 0x4ed   :  { %v5880_v26 = vsel %vm1856_vm11, %v5875_v29, %v5877_v13  ;;  %v5946_v57 = vpop.permute.xlu0 %5945  ;;  %v6163_v56 = vpop.permute.xlu2 %6162  ;;  %v5881_v58 = vsel %vm1856_vm11, %v5877_v13, %v14630_v1  ;;  %v11509_v1 = vld [vmem:[%s16833_s1 + $0xf0] sm:$0xff] }
 0x4ee   :  { %11471 = vmatpush.msk.msrb.mxu0 %vm5214_vm0, %v5880_v26  ;;  %v11525_v29 = vld [vmem:[%s16833_s1 + $0x110] sm:$0xff] }
 0x4f0   :  { %11427 = vmatmul.msk.f32.vlgmr.msra.gmra.mxu1 %vm5207_vm1, %v11421_v24  ;;  %11448 = vmatmul.msk.f32.vlgmr.msra.gmra.mxu2 %vm5207_vm1, %v11445_v31  ;;  %v11501_v24 = vld [vmem:[%s16833_s1 + $0xe0] sm:$0xff] }
 0x4f1   :  { %11458 = vmatpush.msk.msra.mxu1 %vm5214_vm0, %v5735_v17  ;;  %11456 = vmatmul.msk.f32.vlgmr.msra.gmra.mxu0 %vm5207_vm1, %v11453_v36  ;;  %v14819_v31 = vld [vmem:[%s16833_s1 + $0x100] sm:$0xff] }
 0x4f2   :  { %11467 = vmatmul.msk.f32.vlgmr.msra.gmra.mxu3 %vm5207_vm1, %v11461_v18 }
 0x4f4   :  { %v5948_v7 = vpop.permute.xlu1 %5947 }
 0x4f5   :  { %v5951_v30 = vsel %vm2034_vm12, %v5946_v57, %v5948_v7  ;;  %v5952_v3 = vsel %vm2034_vm12, %v5948_v7, %v5950_v5  ;;  %v6017_v25 = vpop.permute.xlu0 %6016  ;;  %v6234_v50 = vpop.permute.xlu2 %6233  ;;  %vm16852_vm12 = vcmask 343040   ;;  %v11502_v5 = vld [vmem:[%s16833_s1 + $0xe8] sm:$0x3] }
 0x4f6   :  { %11479 = vmatpush.msk.msra.mxu2 %vm5214_vm0, %v5951_v30  ;;  %11482 = vmatpush.msk.msrb.mxu3 %vm5214_vm0, %v5952_v3  ;;  %v14854_v7 = vpop.f32.mrf.mxu3 }
 0x4f8   :  { %11428 = vmatmul.msk.f32.gmra.mxu1 %vm5207_vm1, %v11422_v49  ;;  %11449 = vmatmul.msk.f32.gmra.mxu2 %vm5207_vm1, %v11446_v48 }
 0x4f9   :  { %11457 = vmatmul.msk.f32.gmra.mxu0 %vm5207_vm1, %v11454_v32 }
 0x4fa   :  { %11468 = vmatmul.msk.f32.gmra.mxu3 %vm5207_vm1, %v11462_v6 }
 0x4fc   :  { %v6019_v20 = vpop.permute.xlu1 %6018 }
 0x4fd   :  { %v6022_v28 = vsel %vm2212_vm13, %v6017_v25, %v6019_v20  ;;  %v6088_v53 = vpop.permute.xlu0 %6087  ;;  %v6305_v2 = vpop.permute.xlu2 %6304  ;;  %v6023_v21 = vsel %vm2212_vm13, %v6019_v20, %v14684_v9  ;;  %vm16853_vm13 = vmmov %vm16852_vm12 }
 0x4fe   :  { %11487 = vmatpush.msk.msra.mxu0 %vm5214_vm0, %v6022_v28  ;;  %v14823_v9 = vpop.f32.mrf.mxu2  ;;  %v11541_v28 = vld [vmem:[%s16833_s1 + $0x130] sm:$0xff] }
 0x500   :  { %11443 = vmatmul.msk.f32.vlgmr.msrb.gmra.mxu1 %vm5207_vm1, %v11437_v8  ;;  %11464 = vmatmul.msk.f32.vlgmr.msrb.gmra.mxu2 %vm5207_vm1, %v11461_v18 }
 0x501   :  { %11474 = vmatpush.msk.msrb.mxu1 %vm5214_vm0, %v5881_v58  ;;  %11472 = vmatmul.msk.f32.vlgmr.msrb.gmra.mxu0 %vm5207_vm1, %v11469_v54 }
 0x502   :  { %11483 = vmatmul.msk.f32.vlgmr.msrb.gmra.mxu3 %vm5207_vm1, %v11477_v37 }
 0x504   :  { %v6090_v12 = vpop.permute.xlu1 %6089 }
 0x505   :  { %v6093_v47 = vsel %vm16845_vm3, %v6088_v53, %v6090_v12  ;;  %v6094_v40 = vsel %vm16846_vm4, %v6090_v12, %v6092_v0  ;;  %v6159_v33 = vpop.permute.xlu0 %6158  ;;  %v6376_v62 = vpop.permute.xlu2 %6375  ;;  %vm16854_vm3 = vcmask 334848   ;;  %vm16855_vm4 = vmmov %vm16850_vm9  ;;  %v11526_v0 = vld [vmem:[%s16833_s1 + $0x118] sm:$0x3] }
 0x506   :  { %11495 = vmatpush.msk.msrb.mxu2 %vm5214_vm0, %v6093_v47  ;;  %11498 = vmatpush.msk.msra.mxu3 %vm5214_vm0, %v6094_v40  ;;  %v14849_v18 = vpop.f32.mrf.mxu2  ;;  %v14888_v47 = vld [vmem:[%s16833_s1 + $0x128] sm:$0x3] }
 0x508   :  { %11444 = vmatmul.msk.f32.gmra.mxu1 %vm5207_vm1, %v11438_v51  ;;  %11465 = vmatmul.msk.f32.gmra.mxu2 %vm5207_vm1, %v11462_v6  ;;  %v14863_v6 = vld [vmem:[%s16833_s1 + $0x120] sm:$0xff] }
 0x509   :  { %11473 = vmatmul.msk.f32.gmra.mxu0 %vm5207_vm1, %v11470_v38 }
 0x50a   :  { %11484 = vmatmul.msk.f32.gmra.mxu3 %vm5207_vm1, %v11478_v22 }
 0x50c   :  { %v6161_v35 = vpop.permute.xlu1 %6160 }
 0x50d   :  { %v6164_v34 = vsel %vm16847_vm5, %v6159_v33, %v6161_v35  ;;  %v6230_v63 = vpop.permute.xlu0 %6229  ;;  %v6165_v45 = vsel %vm16851_vm10, %v6161_v35, %v6163_v56  ;;  %v6447_v15 = vpop.permute.xlu2 %6446  ;;  %vm16856_vm5 = vcmask 326656   ;;  %vm16860_vm10 = vcmask 121856   ;;  %v11542_v33 = vld [vmem:[%s16833_s1 + $0x138] sm:$0x3] }
 0x50e   :  { %11503 = vmatpush.msk.msrb.mxu0 %vm5214_vm0, %v6164_v34 }
 0x510   :  { %11459 = vmatmul.msk.f32.vlgmr.msra.gmra.mxu1 %vm5207_vm1, %v11453_v36  ;;  %11480 = vmatmul.msk.f32.vlgmr.msra.gmra.mxu2 %vm5207_vm1, %v11477_v37  ;;  %v14842_v36 = vld [vmem:[%s16833_s1 + $0x108] sm:$0x3] }
 0x511   :  { %11490 = vmatpush.msk.msra.mxu1 %vm5214_vm0, %v6023_v21  ;;  %11488 = vmatmul.msk.f32.vlgmr.msra.gmra.mxu0 %vm5207_vm1, %v11485_v11  ;;  %v11549_v21 = vld [vmem:[%s16833_s1 + $0x140] sm:$0xff] }
 0x512   :  { %11499 = vmatmul.msk.f32.vlgmr.msra.gmra.mxu3 %vm5207_vm1, %v11493_v10 }
 0x514   :  { %v6232_v16 = vpop.permute.xlu1 %6231 }
 0x515   :  { %v6235_v55 = vsel %vm16848_vm7, %v6230_v63, %v6232_v16  ;;  %v6236_v41 = vsel %vm16849_vm8, %v6232_v16, %v6234_v50  ;;  %v6301_v42 = vpop.permute.xlu0 %6300  ;;  %v6518_v60 = vpop.permute.xlu2 %6517  ;;  %vm16857_vm7 = vmmov %vm16856_vm5  ;;  %vm16858_vm8 = vcmask 130048   ;;  %v11557_v16 = vld [vmem:[%s16833_s1 + $0x150] sm:$0xff] }
 0x516   :  { %11511 = vmatpush.msk.msra.mxu2 %vm5214_vm0, %v6235_v55  ;;  %11514 = vmatpush.msk.msrb.mxu3 %vm5214_vm0, %v6236_v41 }
 0x518   :  { %11460 = vmatmul.msk.f32.gmra.mxu1 %vm5207_vm1, %v11454_v32  ;;  %11481 = vmatmul.msk.f32.gmra.mxu2 %vm5207_vm1, %v11478_v22 }
 0x519   :  { %11489 = vmatmul.msk.f32.gmra.mxu0 %vm5207_vm1, %v11486_v19 }
 0x51a   :  { %11500 = vmatmul.msk.f32.gmra.mxu3 %vm5207_vm1, %v11494_v39 }
 0x51c   :  { %v6303_v46 = vpop.permute.xlu1 %6302 }
 0x51d   :  { %v6306_v43 = vsel %vm16850_vm9, %v6301_v42, %v6303_v46  ;;  %v6372_v23 = vpop.permute.xlu0 %6371  ;;  %v6307_v14 = vsel %vm16855_vm4, %v6303_v46, %v6305_v2  ;;  %v6589_v48 = vpop.permute.xlu2 %6588  ;;  %vm16859_vm9 = vmmov %vm16854_vm3 }
 0x51e   :  { %11519 = vmatpush.msk.msra.mxu0 %vm5214_vm0, %v6306_v43 }
 0x520   :  { %11475 = vmatmul.msk.f32.vlgmr.msrb.gmra.mxu1 %vm5207_vm1, %v11469_v54  ;;  %11496 = vmatmul.msk.f32.vlgmr.msrb.gmra.mxu2 %vm5207_vm1, %v11493_v10 }
 0x521   :  { %11506 = vmatpush.msk.msrb.mxu1 %vm5214_vm0, %v6165_v45  ;;  %11504 = vmatmul.msk.f32.vlgmr.msrb.gmra.mxu0 %vm5207_vm1, %v11501_v24  ;;  %v11558_v45 = vld [vmem:[%s16833_s1 + $0x158] sm:$0x3] }
 0x522   :  { %11515 = vmatmul.msk.f32.vlgmr.msrb.gmra.mxu3 %vm5207_vm1, %v11509_v1 }
 0x524   :  { %v6374_v61 = vpop.permute.xlu1 %6373 }
 0x525   :  { %v6377_v59 = vsel %vm16852_vm12, %v6372_v23, %v6374_v61  ;;  %v6378_v49 = vsel %vm16853_vm13, %v6374_v61, %v6376_v62  ;;  %v6443_v44 = vpop.permute.xlu0 %6442  ;;  %v6660_v56 = vpop.permute.xlu2 %6659  ;;  %vm16861_vm12 = vmmov %vm16860_vm10  ;;  %vm16862_vm13 = vcmask 113664  }
 0x526   :  { %11527 = vmatpush.msk.msrb.mxu2 %vm5214_vm0, %v6377_v59  ;;  %11530 = vmatpush.msk.msra.mxu3 %vm5214_vm0, %v6378_v49 }
 0x528   :  { %11476 = vmatmul.msk.f32.gmra.mxu1 %vm5207_vm1, %v11470_v38  ;;  %11497 = vmatmul.msk.f32.gmra.mxu2 %vm5207_vm1, %v11494_v39 }
 0x529   :  { %11505 = vmatmul.msk.f32.gmra.mxu0 %vm5207_vm1, %v11502_v5 }
 0x52a   :  { %11516 = vmatmul.msk.f32.gmra.mxu3 %vm5207_vm1, %v11510_v4  ;;  %v14875_v53 = vpop.f32.mrf.mxu3 }
 0x52c   :  { %v6445_v17 = vpop.permute.xlu1 %6444 }
 0x52d   :  { %v6448_v27 = vsel %vm16854_vm3, %v6443_v44, %v6445_v17  ;;  %v6514_v8 = vpop.permute.xlu0 %6513  ;;  %v6449_v20 = vsel %vm16859_vm9, %v6445_v17, %v6447_v15  ;;  %v6731_v38 = vpop.permute.xlu2 %6730  ;;  %vm16863_vm3 = vmmov %vm16858_vm8  ;;  %v11573_v17 = vld [vmem:[%s16833_s1 + $0x170] sm:$0xff] }
 0x52e   :  { %11535 = vmatpush.msk.msrb.mxu0 %vm5214_vm0, %v6448_v27  ;;  %vm16884_vm4 = vmmov %vm16863_vm3 }
 0x52f   :  { %vm16887_vm9 = vmmov %vm16863_vm3 }
 0x530   :  { %11491 = vmatmul.msk.f32.vlgmr.msra.gmra.mxu1 %vm5207_vm1, %v11485_v11  ;;  %11512 = vmatmul.msk.f32.vlgmr.msra.gmra.mxu2 %vm5207_vm1, %v11509_v1 }
 0x531   :  { %11522 = vmatpush.msk.msra.mxu1 %vm5214_vm0, %v6307_v14  ;;  %11520 = vmatmul.msk.f32.vlgmr.msra.gmra.mxu0 %vm5207_vm1, %v14819_v31 }
 0x532   :  { %11531 = vmatmul.msk.f32.vlgmr.msra.gmra.mxu3 %vm5207_vm1, %v11525_v29  ;;  %v14900_v35 = vpop.f32.mrf.mxu3 }
 0x534   :  { %v6516_v51 = vpop.permute.xlu1 %6515 }
 0x535   :  { %v6519_v13 = vsel %vm16856_vm5, %v6514_v8, %v6516_v51  ;;  %v6520_v26 = vsel %vm16857_vm7, %v6516_v51, %v6518_v60  ;;  %v6585_v57 = vpop.permute.xlu0 %6584  ;;  %v6802_v41 = vpop.permute.xlu2 %6801  ;;  %vm7089_vm5 = vcmask 123904   ;;  %vm16885_vm7 = vmmov %vm16863_vm3 }
 0x536   :  { %11543 = vmatpush.msk.msra.mxu2 %vm5214_vm0, %v6519_v13  ;;  %11546 = vmatpush.msk.msrb.mxu3 %vm5214_vm0, %v6520_v26 }
 0x538   :  { %11492 = vmatmul.msk.f32.gmra.mxu1 %vm5207_vm1, %v11486_v19  ;;  %11513 = vmatmul.msk.f32.gmra.mxu2 %vm5207_vm1, %v11510_v4  ;;  %v11565_v4 = vld [vmem:[%s16833_s1 + $0x160] sm:$0xff] }
 0x539   :  { %11521 = vmatmul.msk.f32.gmra.mxu0 %vm5207_vm1, %v14842_v36 }
 0x53a   :  { %11532 = vmatmul.msk.f32.gmra.mxu3 %vm5207_vm1, %v11526_v0 }
 0x53c   :  { %v6587_v30 = vpop.permute.xlu1 %6586  ;;  %v14856_v3 = vpop.f32.mrf.mxu1 }
 0x53d   :  { %v6590_v25 = vsel %vm16858_vm8, %v6585_v57, %v6587_v30  ;;  %v6656_v32 = vpop.permute.xlu0 %6655  ;;  %v6591_v10 = vsel %vm16863_vm3, %v6587_v30, %v6589_v48  ;;  %v11574_v48 = vld [vmem:[%s16833_s1 + $0x178] sm:$0x3]  ;;  %v6937_v57 = vld [vmem:[%s16865_s30 + $0x8] sm:$0x3]  ;;  %v11581_v30 = vld [vmem:[%s16833_s1 + $0x180] sm:$0xff] }
 0x53e   :  { %11551 = vmatpush.msk.msra.mxu0 %vm5214_vm0, %v6590_v25  ;;  %6945 = vperm.xlu1 %11783, %v6937_v57   ;;  %v5293_v57 = vadd.f32 %v14823_v9, %v14856_v3  ;;  %vm16886_vm8 = vmmov %vm16863_vm3 }
 0x540   :  { %11507 = vmatmul.msk.f32.vlgmr.msrb.gmra.mxu1 %vm5207_vm1, %v11501_v24  ;;  %11528 = vmatmul.msk.f32.vlgmr.msrb.gmra.mxu2 %vm5207_vm1, %v11525_v29  ;;  %v11550_v24 = vld [vmem:[%s16833_s1 + $0x148] sm:$0x3] }
 0x541   :  { %11538 = vmatpush.msk.msrb.mxu1 %vm5214_vm0, %v6449_v20  ;;  %11536 = vmatmul.msk.f32.vlgmr.msrb.gmra.mxu0 %vm5207_vm1, %v14863_v6  ;;  %v11566_v29 = vld [vmem:[%s16833_s1 + $0x168] sm:$0x3] }
 0x542   :  { %11547 = vmatmul.msk.f32.vlgmr.msrb.gmra.mxu3 %vm5207_vm1, %v11541_v28 }
 0x543   :  { %v14877_v54 = vpop.f32.mrf.mxu2 }
 0x544   :  { %v6658_v58 = vpop.permute.xlu1 %6657  ;;  %v14879_v37 = vpop.f32.mrf.mxu1 }
 0x545   :  { %v6661_v50 = vsel %vm16860_vm10, %v6656_v32, %v6658_v58  ;;  %v6662_v12 = vsel %vm16861_vm12, %v6658_v58, %v6660_v56  ;;  %v6727_v40 = vpop.permute.xlu0 %6726  ;;  %vm16888_vm10 = vmmov %vm16863_vm3 }
 0x546   :  { %11559 = vmatpush.msk.msrb.mxu2 %vm5214_vm0, %v6661_v50  ;;  %11562 = vmatpush.msk.msra.mxu3 %vm5214_vm0, %v6662_v12  ;;  %vm16889_vm12 = vmmov %vm16863_vm3 }
 0x548   :  { %11508 = vmatmul.msk.f32.gmra.mxu1 %vm5207_vm1, %v11502_v5  ;;  %11529 = vmatmul.msk.f32.gmra.mxu2 %vm5207_vm1, %v11526_v0 }
 0x549   :  { %11537 = vmatmul.msk.f32.gmra.mxu0 %vm5207_vm1, %v14888_v47 }
 0x54a   :  { %11548 = vmatmul.msk.f32.gmra.mxu3 %vm5207_vm1, %v11542_v33 }
 0x54b   :  { %v14898_v22 = vpop.f32.mrf.mxu2 }
 0x54c   :  { %v6729_v2 = vpop.permute.xlu1 %6728  ;;  %v14902_v34 = vpop.f32.mrf.mxu1 }
 0x54d   :  { %v6732_v63 = vsel %vm16862_vm13, %v6727_v40, %v6729_v2  ;;  %v6798_v55 = vpop.permute.xlu0 %6797 }
 0x54e   :  { %11567 = vmatpush.msk.msrb.mxu0 %vm5214_vm0, %v6732_v63  ;;  %v14906_v11 = vpop.f32.mrf.mxu0 }
 0x550   :  { %11523 = vmatmul.msk.f32.vlgmr.msra.gmra.mxu1 %vm5207_vm1, %v14819_v31  ;;  %11544 = vmatmul.msk.f32.vlgmr.msra.gmra.mxu2 %vm5207_vm1, %v11541_v28  ;;  %v6936_v31 = vld [vmem:[%s16865_s30] sm:$0xff]  ;;  %v11582_v28 = vld [vmem:[%s16833_s1 + $0x188] sm:$0x3] }
 0x551   :  { %11554 = vmatpush.msk.msra.mxu1 %vm5214_vm0, %v6591_v10  ;;  %11552 = vmatmul.msk.f32.vlgmr.msra.gmra.mxu0 %vm5207_vm1, %v11549_v21 }
 0x552   :  { %11563 = vmatmul.msk.f32.vlgmr.msra.gmra.mxu3 %vm5207_vm1, %v11557_v16  ;;  %6940 = vperm.xlu0 %11782, %v6936_v31  }
 0x553   :  { %v14921_v42 = vpop.f32.mrf.mxu2 }
 0x554   :  { %v6800_v19 = vpop.permute.xlu1 %6799  ;;  %v14923_v62 = vpop.f32.mrf.mxu1 }
 0x555   :  { %v6803_v39 = vsel %vm4201_vm14, %v6798_v55, %v6800_v19  ;;  %v6804_v46 = vsel %vm4201_vm14, %v6800_v19, %v6802_v41  ;;  %v14927_v43 = vpop.f32.mrf.mxu3  ;;  %v6869_v1 = vpop.permute.xlu0 %6868  ;;  %vm16864_vm14 = vmmov %vm16862_vm13 }
 0x556   :  { %11575 = vmatpush.msk.msra.mxu2 %vm5214_vm0, %v6803_v39  ;;  %11578 = vmatpush.msk.msrb.mxu3 %vm5214_vm0, %v6804_v46  ;;  %v14931_v23 = vpop.f32.mrf.mxu0  ;;  %v6733_v60 = vsel %vm16864_vm14, %v6729_v2, %v6731_v38  ;;  %vm16890_vm13 = vmmov %vm16863_vm3 }
 0x557   :  { %vm16891_vm14 = vmmov %vm16863_vm3 }
 0x558   :  { %11524 = vmatmul.msk.f32.gmra.mxu1 %vm5207_vm1, %v14842_v36  ;;  %11545 = vmatmul.msk.f32.gmra.mxu2 %vm5207_vm1, %v11542_v33  ;;  %v6873_v36 = vpop.permute.xlu2 %6872 }
 0x559   :  { %11553 = vmatmul.msk.f32.gmra.mxu0 %vm5207_vm1, %v11550_v24 }
 0x55a   :  { %11564 = vmatmul.msk.f32.gmra.mxu3 %vm5207_vm1, %v11558_v45 }
 0x55b   :  { %v14944_v15 = vpop.f32.mrf.mxu2 }
 0x55c   :  { %v6871_v61 = vpop.permute.xlu1 %6870 }
 0x55d   :  { %v14946_v59 = vpop.f32.mrf.mxu1  ;;  %v6874_v49 = vsel %vm4387_vm15, %v6869_v1, %v6871_v61  ;;  %v14949_v44 = vpop.f32.mrf.mxu3  ;;  %v6875_v25 = vsel %vm4387_vm15, %v6871_v61, %v6873_v36  ;;  %vm6957_vm15 = vcmask 621568  }
 0x55e   :  { %11583 = vmatpush.msk.msra.mxu0 %vm5214_vm0, %v6874_v49  ;;  %v14952_v5 = vpop.f32.mrf.mxu0 }
 0x560   :  { %11539 = vmatmul.msk.f32.vlgmr.msrb.gmra.mxu1 %vm5207_vm1, %v14863_v6  ;;  %11560 = vmatmul.msk.f32.vlgmr.msrb.gmra.mxu2 %vm5207_vm1, %v11557_v16 }
 0x561   :  { %11570 = vmatpush.msk.msrb.mxu1 %vm5214_vm0, %v6733_v60  ;;  %11568 = vmatmul.msk.f32.vlgmr.msrb.gmra.mxu0 %vm5207_vm1, %v11565_v4 }
 0x562   :  { %11579 = vmatmul.msk.f32.vlgmr.msrb.gmra.mxu3 %vm5207_vm1, %v11573_v17 }
 0x563   :  { %v14967_v27 = vpop.f32.mrf.mxu2 }
 0x565   :  { %v14969_v8 = vpop.f32.mrf.mxu1  ;;  %v14979_v51 = vpop.f32.mrf.mxu3 }
 0x566   :  { %v14974_v14 = vpop.f32.mrf.mxu0 }
 0x568   :  { %11540 = vmatmul.msk.f32.gmra.mxu1 %vm5207_vm1, %v14888_v47  ;;  %11561 = vmatmul.msk.f32.gmra.mxu2 %vm5207_vm1, %v11558_v45 }
 0x569   :  { %11569 = vmatmul.msk.f32.gmra.mxu0 %vm5207_vm1, %v11566_v29 }
 0x56a   :  { %11580 = vmatmul.msk.f32.gmra.mxu3 %vm5207_vm1, %v11574_v48 }
 0x56b   :  { %v14989_v13 = vpop.f32.mrf.mxu2 }
 0x56d   :  { %v14991_v26 = vpop.f32.mrf.mxu1  ;;  %v15005_v32 = vpop.f32.mrf.mxu3 }
 0x56e   :  { %v14996_v0 = vpop.f32.mrf.mxu0 }
 0x570   :  { %11555 = vmatmul.msk.f32.vlgmr.msra.gmra.mxu1 %vm5207_vm1, %v11549_v21  ;;  %11576 = vmatmul.msk.f32.vlgmr.msra.gmra.mxu2 %vm5207_vm1, %v11573_v17 }
 0x571   :  { %11586 = vmatpush.msk.msra.mxu1 %vm5214_vm0, %v6875_v25  ;;  %11584 = vmatmul.msk.f32.vlgmr.msra.gmra.mxu0 %vm5207_vm1, %v11581_v30  ;;  %vm6960_vm0 = vcmask 615424  }
 0x573   :  { %v5696_v6 = vpop.f32.mrf.mxu2 }
 0x575   :  { %v15008_v56 = vpop.f32.mrf.mxu1  ;;  %v15018_v58 = vpop.f32.mrf.mxu3 }
 0x576   :  { %v15010_v20 = vpop.f32.mrf.mxu0 }
 0x578   :  { %11556 = vmatmul.msk.f32.gmra.mxu1 %vm5207_vm1, %v11550_v24  ;;  %11577 = vmatmul.msk.f32.gmra.mxu2 %vm5207_vm1, %v11574_v48 }
 0x579   :  { %11585 = vmatmul.msk.f32.gmra.mxu0 %vm5207_vm1, %v11582_v28 }
 0x57b   :  { %v5699_v50 = vpop.f32.mrf.mxu2 }
 0x57d   :  { %v15020_v12 = vpop.f32.mrf.mxu1  ;;  %v15025_v38 = vpop.f32.mrf.mxu3 }
 0x57e   :  { %v5909_v47 = vpop.f32.mrf.mxu0  ;;  %16866 = vst [vmem:[#allocation21_spill] sm:$0xff] %v15025_v38 }
 0x580   :  { %11571 = vmatmul.msk.f32.vlgmr.msrb.gmra.mxu1 %vm5207_vm1, %v11565_v4 }
 0x583   :  { %v5832_v40 = vpop.f32.mrf.mxu2 }
 0x585   :  { %v15023_v33 = vpop.f32.mrf.mxu1  ;;  %v15032_v16 = vpop.f32.mrf.mxu3 }
 0x586   :  { %v15027_v2 = vpop.f32.mrf.mxu0 }
 0x588   :  { %11572 = vmatmul.msk.f32.gmra.mxu1 %vm5207_vm1, %v11566_v29 }
 0x58b   :  { %v5835_v63 = vpop.f32.mrf.mxu2 }
 0x58d   :  { %v15030_v21 = vpop.f32.mrf.mxu1  ;;  %v15040_v39 = vpop.f32.mrf.mxu3 }
 0x58e   :  { %v6051_v10 = vpop.f32.mrf.mxu0  ;;  %16867 = vst [vmem:[#allocation10_spill] sm:$0xff] %v15040_v39 }
 0x590   :  { %11587 = vmatmul.msk.f32.vlgmr.msra.gmra.mxu1 %vm5207_vm1, %v11581_v30  ;;  %v5385_v30 = vadd.f32 %v14877_v54, %v5293_v57 }
 0x592   :  { %v5453_v39 = vadd.f32 %v14921_v42, %v5385_v30 }
 0x593   :  { %v5980_v55 = vpop.f32.mrf.mxu2 }
 0x595   :  { %v15035_v41 = vpop.f32.mrf.mxu1  ;;  %v15044_v1 = vpop.f32.mrf.mxu3 }
 0x596   :  { %v15037_v19 = vpop.f32.mrf.mxu0  ;;  %16868 = vst [vmem:[#allocation16_spill] sm:$0xff] %v15044_v1 }
 0x598   :  { %11588 = vmatmul.msk.f32.gmra.mxu1 %vm5207_vm1, %v11582_v28  ;;  %vm16883_vm1 = vcmask 1046528  }
 0x59b   :  { %v5983_v46 = vpop.f32.mrf.mxu2 }
 0x59d   :  { %v15042_v24 = vpop.f32.mrf.mxu1  ;;  %v15054_v31 = vpop.f32.mrf.mxu3 }
 0x59e   :  { %v6193_v45 = vpop.f32.mrf.mxu0  ;;  %16871 = vst [vmem:[#allocation24_spill] sm:$0xff] %v15054_v31  ;;  %v5296_v31 = vadd.f32 %v14849_v18, %v14879_v37 }
 0x5a0   :  { %v5387_v9 = vadd.f32 %v14898_v22, %v5296_v31 }
 0x5a2   :  { %v5455_v57 = vadd.f32 %v14944_v15, %v5387_v9 }
 0x5a3   :  { %v6122_v61 = vpop.f32.mrf.mxu2 }
 0x5a5   :  { %v15046_v49 = vpop.f32.mrf.mxu1  ;;  %v15065_v28 = vpop.f32.mrf.mxu3 }
 0x5a6   :  { %16869 = vst [vmem:[#allocation11_spill] sm:$0xff] %v15046_v49  ;;  %v15048_v4 = vpop.f32.mrf.mxu0  ;;  %v5521_v49 = vadd.f32 %v14906_v11, %v5453_v39 }
 0x5a7   :  { %16873 = vst [vmem:[#allocation25_spill] sm:$0xff] %v15065_v28  ;;  %v5523_v28 = vadd.f32 %v14931_v23, %v5455_v57 }
 0x5a8   :  { %v5589_v3 = vadd.f32 %v14967_v27, %v5521_v49  ;;  %v5316_v27 = vadd.f32 %v14825_v52, %v14902_v34  ;;  %v5319_v52 = vadd.f32 %v14854_v7, %v14923_v62 }
 0x5a9   :  { %v5591_v37 = vadd.f32 %v14989_v13, %v5523_v28 }
 0x5aa   :  { %v5657_v42 = vadd.f32 %v14952_v5, %v5589_v3  ;;  %v5386_v5 = vadd.f32 %v14946_v59, %v5316_v27 }
 0x5ab   :  { %v15050_v60 = vpop.f32.mrf.mxu2  ;;  %v5659_v15 = vadd.f32 %v14974_v14, %v5591_v37 }
 0x5ac   :  { %v5725_v38 = vadd.f32 %v5696_v6, %v5657_v42  ;;  %v5454_v28 = vadd.f32 %v14875_v53, %v5386_v5 }
 0x5ad   :  { %v15052_v17 = vpop.f32.mrf.mxu1  ;;  %v5727_v6 = vadd.f32 %v5699_v50, %v5659_v15 }
 0x5ae   :  { %16870 = vst [vmem:[#allocation19_spill] sm:$0xff] %v15052_v17  ;;  %v15056_v29 = vpop.f32.mrf.mxu0  ;;  %v5793_v22 = vadd.f32 %v14996_v0, %v5725_v38  ;;  %v5522_v34 = vadd.f32 %v14991_v26, %v5454_v28 }
 0x5af   :  { %v5795_v0 = vadd.f32 %v15010_v20, %v5727_v6 }
 0x5b0   :  { %v5861_v39 = vadd.f32 %v5832_v40, %v5793_v22  ;;  %v5388_v40 = vadd.f32 %v14969_v8, %v5319_v52 }
 0x5b1   :  { %v5863_v14 = vadd.f32 %v5835_v63, %v5795_v0 }
 0x5b2   :  { %v5938_v9 = vadd.f32 %v5909_v47, %v5861_v39  ;;  %v5590_v47 = vadd.f32 %v14927_v43, %v5522_v34  ;;  %v5456_v42 = vadd.f32 %v14900_v35, %v5388_v40  ;;  %v16878_v40 = vld [vmem:[#allocation10_spill] sm:$0xff] }
 0x5b3   :  { %v6264_v48 = vpop.f32.mrf.mxu2  ;;  %v5940_v53 = vadd.f32 %v15027_v2, %v5863_v14  ;;  %v16877_v14 = vld [vmem:[#allocation16_spill] sm:$0xff] }
 0x5b4   :  { %v6009_v38 = vadd.f32 %v5980_v55, %v5938_v9  ;;  %v5658_v7 = vadd.f32 %v15020_v12, %v5590_v47  ;;  %v5524_v26 = vadd.f32 %v15008_v56, %v5456_v42 }
 0x5b5   :  { %v15060_v36 = vpop.f32.mrf.mxu1  ;;  %v6011_v62 = vadd.f32 %v5983_v46, %v5940_v53  ;;  %v16875_v28 = vld [vmem:[#allocation19_spill] sm:$0xff] }
 0x5b6   :  { %16872 = vst [vmem:[#allocation13_spill] sm:$0xff] %v15060_v36  ;;  %v15063_v25 = vpop.f32.mrf.mxu0  ;;  %v15078_v36 = vpop.f32.mrf.mxu3  ;;  %v6080_v3 = vadd.f32 %v6051_v10, %v6009_v38  ;;  %v5726_v63 = vadd.f32 %v14979_v51, %v5658_v7  ;;  %v5592_v43 = vadd.f32 %v14949_v44, %v5524_v26  ;;  %v16880_v7 = vld [vmem:[#allocation25_spill] sm:$0xff] }
 0x5b7   :  { %v6082_v37 = vadd.f32 %v15037_v19, %v6011_v62 }
 0x5b8   :  { %v6151_v20 = vadd.f32 %v6122_v61, %v6080_v3  ;;  %v5794_v2 = vadd.f32 %v15030_v21, %v5726_v63  ;;  %v5660_v12 = vadd.f32 %v15023_v33, %v5592_v43 }
 0x5b9   :  { %v6153_v61 = vadd.f32 %v15050_v60, %v6082_v37  ;;  %v16881_v37 = vld [vmem:[#allocation24_spill] sm:$0xff] }
 0x5ba   :  { %v6222_v8 = vadd.f32 %v6193_v45, %v6151_v20  ;;  %v5862_v46 = vadd.f32 %v15018_v58, %v5794_v2  ;;  %v5728_v19 = vadd.f32 %v15005_v32, %v5660_v12 }
 0x5bb   :  { %v15068_v1 = vpop.f32.mrf.mxu2  ;;  %v6224_v51 = vadd.f32 %v15048_v4, %v6153_v61  ;;  %v16874_v4 = vld [vmem:[#allocation21_spill] sm:$0xff] }
 0x5bc   :  { %v6293_v22 = vadd.f32 %v6264_v48, %v6222_v8  ;;  %v5939_v48 = vadd.f32 %v15042_v24, %v5862_v46  ;;  %v5796_v60 = vadd.f32 %v15035_v41, %v5728_v19  ;;  %v16876_v24 = vld [vmem:[#allocation11_spill] sm:$0xff] }
 0x5bd   :  { %v15073_v17 = vpop.f32.mrf.mxu1  ;;  %v6295_v21 = vadd.f32 %v15068_v1, %v6224_v51  ;;  %v16879_v47 = vld [vmem:[#allocation13_spill] sm:$0xff] }
 0x5be   :  { %v6477_v54 = vpop.f32.mrf.mxu0  ;;  %v15091_v49 = vpop.f32.mrf.mxu3  ;;  %v6364_v56 = vadd.f32 %v15056_v29, %v6293_v22  ;;  %v6010_v33 = vadd.f32 %v15032_v16, %v5939_v48 }
 0x5bf   :  { %v6366_v29 = vadd.f32 %v15063_v25, %v6295_v21 }
 0x5c0   :  { %v6081_v32 = vadd.f32 %v16875_v28, %v6010_v33 }
 0x5c2   :  { %v6152_v41 = vadd.f32 %v16877_v14, %v6081_v32 }
 0x5c3   :  { %v6406_v30 = vpop.f32.mrf.mxu2 }
 0x5c4   :  { %v6435_v45 = vadd.f32 %v6406_v30, %v6364_v56  ;;  %v5864_v30 = vadd.f32 %v16874_v4, %v5796_v60  ;;  %v6223_v25 = vadd.f32 %v15073_v17, %v6152_v41  ;;  %v6941_v43 = vpop.permute.xlu0 %6940 }
 0x5c5   :  { %v15082_v18 = vpop.f32.mrf.mxu1 }
 0x5c6   :  { %v15085_v11 = vpop.f32.mrf.mxu0  ;;  %v15104_v57 = vpop.f32.mrf.mxu3  ;;  %v6506_v5 = vadd.f32 %v6477_v54, %v6435_v45  ;;  %v5941_v38 = vadd.f32 %v16876_v24, %v5864_v30  ;;  %v6294_v62 = vadd.f32 %v16880_v7, %v6223_v25  ;;  %v7025_v25 = vld [vmem:[%s16882_s27 + $0x78] sm:$0xff] }
 0x5c7   :  { %7042 = vmatpush.msrb.mxu2 %v7025_v25 }
 0x5c8   :  { %v6012_v3 = vadd.f32 %v16878_v40, %v5941_v38  ;;  %v7031_v40 = vld [vmem:[%s16882_s27 + $0xa8] sm:$0x7f] }
 0x5c9   :  { %11589 = vmatpush.msk.msra.mxu3 %vm16883_vm1, %v7031_v40  ;;  %v7205_v40 = vld [vmem:[%s16612_s9 + $0x58] sm:$0xff] }
 0x5ca   :  { %v6083_v53 = vadd.f32 %v16879_v47, %v6012_v3  ;;  %v7030_v3 = vld [vmem:[%s16882_s27 + $0xa0] sm:$0xff]  ;;  %v7029_v47 = vld [vmem:[%s16882_s27 + $0x98] sm:$0xff] }
 0x5cb   :  { %v6409_v23 = vpop.f32.mrf.mxu2  ;;  %7076 = vmatpush.msra.mxu3 %v7030_v3  ;;  %v7258_v3 = vld [vmem:[%s16612_s9 + $0x70] sm:$0xff] }
 0x5cc   :  { %v6437_v0 = vadd.f32 %v6409_v23, %v6366_v29  ;;  %v6154_v22 = vadd.f32 %v16881_v37, %v6083_v53  ;;  %v7028_v53 = vld [vmem:[%s16882_s27 + $0x90] sm:$0xff] }
 0x5cd   :  { %v15094_v31 = vpop.f32.mrf.mxu1  ;;  %7077 = vmatpush.msra.mxu3 %v7029_v47 }
 0x5ce   :  { %v6619_v13 = vpop.f32.mrf.mxu0  ;;  %v6571_v35 = vpop.f32.mrf.mxu3  ;;  %v6508_v54 = vadd.f32 %v15085_v11, %v6437_v0  ;;  %v6365_v11 = vadd.f32 %v15094_v31, %v6294_v62  ;;  %v6225_v17 = vadd.f32 %v15082_v18, %v6154_v22 }
 0x5cf   :  { %7078 = vmatpush.msra.mxu3 %v7028_v53  ;;  %v7367_v53 = vld [vmem:[%s16612_s9 + $0xb8] sm:$0xff] }
 0x5d3   :  { %v6548_v59 = vpop.f32.mrf.mxu2 }
 0x5d4   :  { %v6577_v58 = vadd.f32 %v6548_v59, %v6506_v5 }
 0x5d5   :  { %v15102_v50 = vpop.f32.mrf.mxu1 }
 0x5d6   :  { %v6622_v55 = vpop.f32.mrf.mxu0  ;;  %v6574_v9 = vpop.f32.mrf.mxu3  ;;  %v6648_v1 = vadd.f32 %v6619_v13, %v6577_v58 }
 0x5db   :  { %v6551_v10 = vpop.f32.mrf.mxu2 }
 0x5dc   :  { %v6579_v59 = vadd.f32 %v6551_v10, %v6508_v54 }
 0x5dd   :  { %v6500_v27 = vpop.f32.mrf.mxu1 }
 0x5de   :  { %v6761_v15 = vpop.f32.mrf.mxu0  ;;  %v6713_v23 = vpop.f32.mrf.mxu3  ;;  %v6650_v13 = vadd.f32 %v6622_v55, %v6579_v59  ;;  %v6296_v55 = vadd.f32 %v15078_v36, %v6225_v17  ;;  %v7024_v59 = vld [vmem:[%s16882_s27 + $0x70] sm:$0xff] }
 0x5df   :  { %7043 = vmatpush.msrb.mxu2 %v7024_v59  ;;  %v7020_v17 = vld [vmem:[%s16882_s27 + $0x50] sm:$0xff] }
 0x5e0   :  { %v6367_v18 = vadd.f32 %v15102_v50, %v6296_v55  ;;  %v7015_v55 = vld [vmem:[%s16882_s27 + $0x28] sm:$0xff] }
 0x5e2   :  { %v6438_v5 = vadd.f32 %v15104_v57, %v6367_v18 }
 0x5e3   :  { %v6690_v44 = vpop.f32.mrf.mxu2 }
 0x5e4   :  { %v6719_v16 = vadd.f32 %v6690_v44, %v6648_v1  ;;  %v6946_v44 = vpop.permute.xlu1 %6945 }
 0x5e5   :  { %v6503_v39 = vpop.f32.mrf.mxu1 }
 0x5e6   :  { %v6764_v6 = vpop.f32.mrf.mxu0  ;;  %v6790_v42 = vadd.f32 %v6761_v15, %v6719_v16  ;;  %v6436_v15 = vadd.f32 %v15091_v49, %v6365_v11  ;;  %v6716_v19 = vpop.f32.mrf.mxu3  ;;  %v7023_v11 = vld [vmem:[%s16882_s27 + $0x68] sm:$0xff] }
 0x5e7   :  { %7044 = vmatpush.msrb.mxu2 %v7023_v11  ;;  %v7310_v11 = vld [vmem:[%s16612_s9 + $0x80] sm:$0xff] }
 0x5e8   :  { %v6507_v46 = vadd.f32 %v6500_v27, %v6436_v15  ;;  %v6509_v27 = vadd.f32 %v6503_v39, %v6438_v5  ;;  %v7018_v15 = vld [vmem:[%s16882_s27 + $0x40] sm:$0xff] }
 0x5ea   :  { %v6578_v49 = vadd.f32 %v6571_v35, %v6507_v46  ;;  %v6580_v4 = vadd.f32 %v6574_v9, %v6509_v27  ;;  %v7014_v46 = vld [vmem:[%s16882_s27 + $0x20] sm:$0xff] }
 0x5eb   :  { %v6693_v52 = vpop.f32.mrf.mxu2 }
 0x5ec   :  { %v6721_v2 = vadd.f32 %v6693_v52, %v6650_v13 }
 0x5ed   :  { %v6642_v34 = vpop.f32.mrf.mxu1 }
 0x5ee   :  { %v6903_v20 = vpop.f32.mrf.mxu0  ;;  %v6792_v12 = vadd.f32 %v6764_v6, %v6721_v2  ;;  %v6649_v33 = vadd.f32 %v6642_v34, %v6578_v49  ;;  %v6855_v58 = vpop.f32.mrf.mxu3  ;;  %v7022_v2 = vld [vmem:[%s16882_s27 + $0x60] sm:$0xff] }
 0x5ef   :  { %7045 = vmatpush.msrb.mxu2 %v7022_v2  ;;  %v7473_v2 = vld [vmem:[%s16612_s9 + $0xe8] sm:$0xff] }
 0x5f0   :  { %v6720_v29 = vadd.f32 %v6713_v23, %v6649_v33 }
 0x5f3   :  { %v6832_v26 = vpop.f32.mrf.mxu2 }
 0x5f4   :  { %v6861_v8 = vadd.f32 %v6832_v26, %v6790_v42 }
 0x5f5   :  { %v6645_v63 = vpop.f32.mrf.mxu1 }
 0x5f6   :  { %v6932_v61 = vadd.f32 %v6903_v20, %v6861_v8  ;;  %v6906_v45 = vpop.f32.mrf.mxu0  ;;  %v6651_v28 = vadd.f32 %v6645_v63, %v6580_v4  ;;  %v6858_v57 = vpop.f32.mrf.mxu3  ;;  %v7027_v20 = vld [vmem:[%s16882_s27 + $0x88] sm:$0xff]  ;;  %v7366_v4 = vld [vmem:[%s16612_s9 + $0xb0] sm:$0xff] }
 0x5f7   :  { %7079 = vmatpush.msra.mxu3 %v7027_v20  ;;  %v7582_v20 = vld [vmem:[%s16612_s9 + $0x130] sm:$0xff] }
 0x5f8   :  { %v15138_v10 = vadd.f32 %v6941_v43, %v6932_v61  ;;  %v6722_v24 = vadd.f32 %v6716_v19, %v6651_v28  ;;  %v7021_v61 = vld [vmem:[%s16882_s27 + $0x58] sm:$0xff]  ;;  %v7011_v19 = vld [vmem:[%s16882_s27 + $0x8] sm:$0xff] }
 0x5f9   :  { %7046 = vmatpush.msrb.mxu2 %v7021_v61  ;;  %v7094_v28 = vld [vmem:[%s16612_s9 + $0x8] sm:$0xff]  ;;  %v7420_v61 = vld [vmem:[%s16612_s9 + $0xd0] sm:$0xff] }
 0x5fa   :  { %v6952_v56 = vmax.f32 %v15138_v10, 0.0  ;;  %v7019_v10 = vld [vmem:[%s16882_s27 + $0x48] sm:$0xff] }
 0x5fb   :  { %v6835_v51 = vpop.f32.mrf.mxu2  ;;  %7047 = vmatpush.msrb.mxu2 %v7020_v17  ;;  %v7421_v17 = vld [vmem:[%s16612_s9 + $0xd8] sm:$0xff] }
 0x5fc   :  { %v6863_v48 = vadd.f32 %v6835_v51, %v6792_v12  ;;  %6970 = vrot.lane.b32.xlu2 %v6952_v56, %s11913_s23  ;;  %v7017_v12 = vld [vmem:[%s16882_s27 + $0x38] sm:$0xff] }
 0x5fd   :  { %v6784_v31 = vpop.f32.mrf.mxu1  ;;  %7048 = vmatpush.msrb.mxu2 %v7019_v10  ;;  %v7013_v51 = vld [vmem:[%s16882_s27 + $0x18] sm:$0xff] }
 0x5fe   :  { %v6934_v21 = vadd.f32 %v6906_v45, %v6863_v48  ;;  %v6791_v30 = vadd.f32 %v6784_v31, %v6720_v29  ;;  %v7012_v45 = vld [vmem:[%s16882_s27 + $0x10] sm:$0xff]  ;;  %v7010_v48 = vld [vmem:[%s16882_s27] sm:$0xff] }
 0x5ff   :  { %7049 = vmatpush.msrb.mxu2 %v7018_v15  ;;  %v7095_v29 = vld [vmem:[%s16612_s9 + $0x10] sm:$0xff]  ;;  %v7583_v15 = vld [vmem:[%s16612_s9 + $0x138] sm:$0xff] }
 0x600   :  { %v6950_v60 = vadd.f32 %v6946_v44, %v6934_v21  ;;  %v6862_v32 = vadd.f32 %v6855_v58, %v6791_v30  ;;  %7114 = vmatpush.msrb.mxu0 %v7095_v29  ;;  %v7204_v58 = vld [vmem:[%s16612_s9 + $0x50] sm:$0xff]  ;;  %v7093_v30 = vld [vmem:[%s16612_s9] sm:$0xff]  ;;  %v7701_v29 = vld [vmem:[%s16614_s11 + $0x68] sm:$0xff] }
 0x601   :  { %7050 = vmatpush.msrb.mxu2 %v7017_v12  ;;  %v7418_v12 = vld [vmem:[%s16612_s9 + $0xc0] sm:$0xff] }
 0x602   :  { %v6954_v36 = vmax.f32 %v6950_v60, 0.0  ;;  %7115 = vmatpush.msrb.mxu0 %v7093_v30  ;;  %v7698_v30 = vld [vmem:[%s16614_s11 + $0x50] sm:$0xff] }
 0x604   :  { %6959 = vst [vmem:[#allocation4 + $0x10] sm:$0x3] %v6954_v36 }
 0x605   :  { %v6787_v6 = vpop.f32.mrf.mxu1 }
 0x606   :  { %v6793_v38 = vadd.f32 %v6787_v6, %v6722_v24  ;;  %v7096_v6 = vld [vmem:[%s16612_s9 + $0x18] sm:$0xff] }
 0x607   :  { %7134 = vmatpush.msrb.mxu1 %v7096_v6  ;;  %v7151_v24 = vld [vmem:[%s16612_s9 + $0x38] sm:$0xff] }
 0x608   :  { %v6864_v39 = vadd.f32 %v6858_v57, %v6793_v38  ;;  %v7474_v38 = vld [vmem:[%s16612_s9 + $0xf0] sm:$0xff]  ;;  %v7149_v57 = vld [vmem:[%s16612_s9 + $0x28] sm:$0xff] }
 0x609   :  { %7135 = vmatpush.msrb.mxu1 %v7094_v28 }
 0x60b   :  { %v6964_v0 = vld [vmem:[#allocation4 + $0x10] sm:$0x3]  ;;  %7189 = vmatpush.msra.mxu1 %v7151_v24 }
 0x60c   :  { %6974 = vrot.lane.b32.xlu2 %v6964_v0, %s11913_s23  ;;  %v7696_v24 = vld [vmem:[%s16614_s11 + $0x40] sm:$0xff] }
 0x60d   :  { %v6926_v50 = vpop.f32.mrf.mxu1  ;;  %7190 = vmatpush.msra.mxu1 %v7149_v57  ;;  %v7694_v57 = vld [vmem:[%s16614_s11 + $0x30] sm:$0xff] }
 0x60e   :  { %v6933_v35 = vadd.f32 %v6926_v50, %v6862_v32  ;;  %v7202_v32 = vld [vmem:[%s16612_s9 + $0x40] sm:$0xff]  ;;  %v7150_v50 = vld [vmem:[%s16612_s9 + $0x30] sm:$0xff] }
 0x60f   :  { %7169 = vmatpush.msra.mxu0 %v7150_v50  ;;  %v7697_v50 = vld [vmem:[%s16614_s11 + $0x48] sm:$0xff] }
 0x610   :  { %v6949_v52 = vadd.f32 %v6941_v43, %v6933_v35  ;;  %v7026_v43 = vld [vmem:[%s16882_s27 + $0x80] sm:$0xff]  ;;  %v7259_v35 = vld [vmem:[%s16612_s9 + $0x78] sm:$0xff] }
 0x611   :  { %7080 = vmatpush.msra.mxu3 %v7026_v43  ;;  %v7311_v43 = vld [vmem:[%s16612_s9 + $0x88] sm:$0xff] }
 0x612   :  { %v6953_v1 = vmax.f32 %v6949_v52, 0.0  ;;  %v7148_v52 = vld [vmem:[%s16612_s9 + $0x20] sm:$0xff] }
 0x613   :  { %7223 = vmatpush.msrb.mxu3 %v7204_v58  ;;  %7170 = vmatpush.msra.mxu0 %v7148_v52  ;;  %v7700_v58 = vld [vmem:[%s16614_s11 + $0x60] sm:$0xff]  ;;  %v7711_v52 = vld [vmem:[%s16614_s11 + $0xb8] sm:$0xff] }
 0x614   :  { %6958 = vst.msk [vmem:[#allocation4 + $0x8] sm:$0xff] %vm6957_vm15, %v6953_v1  ;;  %v7257_v1 = vld [vmem:[%s16612_s9 + $0x68] sm:$0xff]  ;;  %vm16892_vm15 = vmmov %vm16863_vm3 }
 0x615   :  { %v6929_v34 = vpop.f32.mrf.mxu1  ;;  %7224 = vmatpush.msrb.mxu3 %v7202_v32 }
 0x616   :  { %v6935_v14 = vadd.f32 %v6929_v34, %v6864_v39  ;;  %v7472_v39 = vld [vmem:[%s16612_s9 + $0xe0] sm:$0xff] }
 0x618   :  { %v6951_v41 = vadd.f32 %v6946_v44, %v6935_v14 }
 0x61a   :  { %v6955_v9 = vmax.f32 %v6951_v41, 0.0 }
 0x61b   :  { %v6963_v54 = vld [vmem:[#allocation4 + $0x8] sm:$0xff] }
 0x61c   :  { %6961 = vst.msk [vmem:[#allocation4 + $0x18] sm:$0x3] %vm6960_vm0, %v6955_v9  ;;  %6972 = vrot.lane.b32.xlu1 %v6963_v54, %s11913_s23  ;;  %vm16893_vm0 = vmmov %vm16863_vm3 }
 0x61d   :  { %vm16894_vm1 = vmmov %vm16893_vm0 }
 0x623   :  { %v6965_v16 = vld [vmem:[#allocation4 + $0x18] sm:$0x3] }
 0x624   :  { %6976 = vrot.lane.b32.xlu0 %v6965_v16, %s11913_s23 }
 0x656   :  { %v6971_v42 = vpop.permute.xlu2 %6970 }
 0x666   :  { %v6975_v13 = vpop.permute.xlu2 %6974 }
 0x68e   :  { %v6973_v23 = vpop.permute.xlu1 %6972 }
 0x68f   :  { %v6978_v7 = vsel %vm112_vm2, %v6971_v42, %v6973_v23  ;;  %v6985_v62 = vmax.f32 %v6963_v54, %v6973_v23  ;;  %v7203_v42 = vld [vmem:[%s16612_s9 + $0x48] sm:$0xff]  ;;  %v7256_v23 = vld [vmem:[%s16612_s9 + $0x60] sm:$0xff] }
 0x690   :  { %v6984_v26 = vmax.f32 %v6952_v56, %v6978_v7  ;;  %v7016_v56 = vld [vmem:[%s16882_s27 + $0x30] sm:$0xff]  ;;  %v7365_v7 = vld [vmem:[%s16612_s9 + $0xa8] sm:$0xff] }
 0x691   :  { %6994 = vrot.lane.b32.xlu2 %v6985_v62, %s11917_s0  ;;  %7051 = vmatpush.msrb.mxu2 %v7016_v56  ;;  %v7419_v56 = vld [vmem:[%s16612_s9 + $0xc8] sm:$0xff] }
 0x692   :  { %6992 = vrot.lane.b32.xlu1 %v6984_v26, %s11917_s0 }
 0x693   :  { %7052 = vmatpush.msrb.mxu2 %v7015_v55  ;;  %v7581_v55 = vld [vmem:[%s16612_s9 + $0x128] sm:$0xff] }
 0x695   :  { %7053 = vmatpush.msrb.mxu2 %v7014_v46  ;;  %v7528_v46 = vld [vmem:[%s16612_s9 + $0x110] sm:$0xff] }
 0x696   :  { %v6977_v8 = vpop.permute.xlu0 %6976 }
 0x697   :  { %v6979_v63 = vsel %vm112_vm2, %v6975_v13, %v6977_v8  ;;  %v6987_v37 = vmax.f32 %v6965_v16, %v6977_v8  ;;  %7054 = vmatpush.msrb.mxu2 %v7013_v51  ;;  %vm7032_vm2 = vcmask 384000   ;;  %v7312_v13 = vld [vmem:[%s16612_s9 + $0x90] sm:$0xff]  ;;  %v7313_v8 = vld [vmem:[%s16612_s9 + $0x98] sm:$0xff] }
 0x698   :  { %v6986_v22 = vmax.f32 %v6964_v0, %v6979_v63  ;;  %v7364_v0 = vld [vmem:[%s16612_s9 + $0xa0] sm:$0xff] }
 0x699   :  { %7055 = vmatpush.msrb.mxu2 %v7012_v45  ;;  %v7529_v45 = vld [vmem:[%s16612_s9 + $0x118] sm:$0xff] }
 0x69a   :  { %6998 = vrot.lane.b32.xlu1 %v6987_v37, %s11917_s0  ;;  %6996 = vrot.lane.b32.xlu0 %v6986_v22, %s11917_s0  ;;  %s11052_s0 = sshll.u32 %s16627_s24, 4  ;;  %s11053_s0 = int_to_ptr.hbm [resolvable:$true] %s11052_s0 }
 0x69b   :  { %7056 = vmatpush.msrb.mxu2 %v7011_v19  ;;  %v7526_v19 = vld [vmem:[%s16612_s9 + $0x100] sm:$0xff] }
 0x69d   :  { %7057 = vmatpush.msrb.mxu2 %v7010_v48  ;;  %v7527_v48 = vld [vmem:[%s16612_s9 + $0x108] sm:$0xff] }
 0x69f   :  { %7385 = vmatpush.msra.mxu2 %v7366_v4  ;;  %v7699_v4 = vld [vmem:[%s16614_s11 + $0x58] sm:$0xff] }
 0x6a1   :  { %7386 = vmatpush.msra.mxu2 %v7364_v0 }
 0x6eb   :  { %v6995_v31 = vpop.permute.xlu2 %6994 }
 0x6ec   :  { %v7007_v18 = vmax.f32 %v6985_v62, %v6995_v31  ;;  %v7580_v62 = vld [vmem:[%s16612_s9 + $0x120] sm:$0xff] }
 0x6ee   :  { %11590 = vmatmul.msk.f32.vlgmr.msra.gmra.mxu3 %vm7032_vm2, %v7007_v18 }
 0x6ef   :  { %7297 = vmatpush.msra.mxu3 %v7259_v35  ;;  %v7712_v35 = vld [vmem:[%s16614_s11 + $0xc0] sm:$0xff] }
 0x6f1   :  { %7298 = vmatpush.msra.mxu3 %v7257_v1  ;;  %v7710_v1 = vld [vmem:[%s16614_s11 + $0xb0] sm:$0xff] }
 0x704   :  { %v6993_v44 = vpop.permute.xlu1 %6992 }
 0x705   :  { %v7000_v21 = vsel %vm966_vm6, %v6993_v44, %v6995_v31  ;;  %v7637_v31 = vld [vmem:[%s16612_s9 + $0x158] sm:$0xff]  ;;  %v7636_v44 = vld [vmem:[%s16612_s9 + $0x150] sm:$0xff] }
 0x706   :  { %v7006_v49 = vmax.f32 %v6984_v26, %v7000_v21  ;;  %v7635_v21 = vld [vmem:[%s16612_s9 + $0x148] sm:$0xff] }
 0x708   :  { %7058 = vmatmul.f32.vlgmr.msrb.gmra.mxu2 %v7006_v49  ;;  %v7634_v49 = vld [vmem:[%s16612_s9 + $0x140] sm:$0xff] }
 0x709   :  { %7493 = vmatpush.msrb.mxu2 %v7474_v38  ;;  %v7695_v38 = vld [vmem:[%s16614_s11 + $0x38] sm:$0xff] }
 0x70b   :  { %7494 = vmatpush.msrb.mxu2 %v7472_v39  ;;  %v7693_v39 = vld [vmem:[%s16614_s11 + $0x28] sm:$0xff] }
 0x70c   :  { %v6999_v60 = vpop.permute.xlu1 %6998  ;;  %v6997_v5 = vpop.permute.xlu0 %6996 }
 0x70d   :  { %v7009_v33 = vmax.f32 %v6987_v37, %v6999_v60  ;;  %v7001_v36 = vsel %vm966_vm6, %v6997_v5, %v6999_v60  ;;  %v7633_v5 = vld [vmem:[%s16904_s28] sm:$0x1] }
 0x70e   :  { %v7008_v27 = vmax.f32 %v6986_v22, %v7001_v36  ;;  %v7475_v22 = vld [vmem:[%s16612_s9 + $0xf8] sm:$0xff]  ;;  %v7702_v36 = vld [vmem:[%s16614_s11 + $0x70] sm:$0xff] }
 0x70f   :  { %11591 = vmatmul.msk.f32.gmra.mxu3 %vm7032_vm2, %v7009_v33  ;;  %vm16895_vm2 = vmmov %vm16893_vm0  ;;  %v7703_v33 = vld [vmem:[%s16614_s11 + $0x78] sm:$0xff] }
 0x710   :  { %7061 = vmatmul.f32.gmra.mxu2 %v7008_v27 }
 0x771   :  { %v7082_v34 = vpop.f32.mrf.mxu3 }
 0x78b   :  { %v7059_v14 = vpop.f32.mrf.mxu2 }
 0x78c   :  { %v7083_v41 = vadd.f32 %v7082_v34, %v7059_v14  ;;  %v7709_v34 = vld [vmem:[%s16614_s11 + $0xa8] sm:$0xff] }
 0x78e   :  { %7088 = vst.msk [vmem:[#allocation5] sm:$0xff] %vm16884_vm4, %v7083_v41  ;;  %vm16896_vm4 = vmmov %vm16893_vm0 }
 0x792   :  { %v7085_v9 = vpop.f32.mrf.mxu3 }
 0x793   :  { %v7062_v54 = vpop.f32.mrf.mxu2 }
 0x794   :  { %v7086_v16 = vadd.f32 %v7085_v9, %v7062_v54 }
 0x795   :  { %v7092_v25 = vld [vmem:[#allocation5] sm:$0x1]  ;;  %v7201_v59 = vld [vmem:[#allocation5 + $0x2] sm:$0x1]  ;;  %v7363_v47 = vld [vmem:[#allocation5 + $0x5] sm:$0x1] }
 0x796   :  { %7090 = vst.msk [vmem:[#allocation5 + $0x8] sm:$0x3] %vm7089_vm5, %v7086_v16  ;;  %11592 = vmatmul.msk.f32.vlgmr.msrb.gmra.mxu0 %vm16885_vm7, %v7092_v25  ;;  %11593 = vmatmul.msk.f32.vlgmr.msrb.gmra.mxu1 %vm16886_vm8, %v7092_v25  ;;  %v7147_v26 = vld [vmem:[#allocation5 + $0x1] sm:$0x1]  ;;  %v7255_v63 = vld [vmem:[#allocation5 + $0x3] sm:$0x1]  ;;  %vm16897_vm5 = vmmov %vm16893_vm0 }
 0x797   :  { %11596 = vmatmul.msk.f32.vlgmr.msrb.gmra.mxu3 %vm16887_vm9, %v7201_v59  ;;  %11602 = vmatmul.msk.f32.vlgmr.msra.gmra.mxu2 %vm16888_vm10, %v7363_v47  ;;  %v7471_v37 = vld [vmem:[#allocation5 + $0x7] sm:$0x1]  ;;  %v7309_v51 = vld [vmem:[#allocation5 + $0x4] sm:$0x1]  ;;  %vm16898_vm7 = vmmov %vm16893_vm0 }
 0x798   :  { %7243 = vmatpush.msrb.mxu0 %v7205_v40  ;;  %7277 = vmatpush.msrb.mxu1 %v7258_v3  ;;  %v7417_v18 = vld [vmem:[#allocation5 + $0x6] sm:$0x1]  ;;  %vm16899_vm8 = vmmov %vm16893_vm0  ;;  %v7692_v16 = vld [vmem:[%s16614_s11 + $0x20] sm:$0xff] }
 0x799   :  { %7405 = vmatpush.msrb.mxu3 %v7367_v53  ;;  %7601 = vmatpush.msra.mxu2 %v7582_v20  ;;  %vm16900_vm9 = vmmov %vm16893_vm0  ;;  %v7708_v40 = vld [vmem:[%s16614_s11 + $0xa0] sm:$0xff]  ;;  %v7691_v25 = vld [vmem:[%s16614_s11 + $0x18] sm:$0xff] }
 0x79a   :  { %7244 = vmatpush.msrb.mxu0 %v7203_v42  ;;  %7278 = vmatpush.msrb.mxu1 %v7256_v23  ;;  %vm16901_vm10 = vmmov %vm16893_vm0  ;;  %v7690_v42 = vld [vmem:[%s16614_s11 + $0x10] sm:$0xff] }
 0x79b   :  { %7406 = vmatpush.msrb.mxu3 %v7365_v7  ;;  %7602 = vmatpush.msra.mxu2 %v7580_v62  ;;  %v7706_v23 = vld [vmem:[%s16614_s11 + $0x90] sm:$0xff] }
 0x79d   :  { %v7579_v10 = vld [vmem:[#allocation5 + $0x9] sm:$0x1]  ;;  %v7525_v60 = vld [vmem:[#allocation5 + $0x8] sm:$0x1] }
 0x79e   :  { %11594 = vmatmul.msk.f32.vlgmr.msra.gmra.mxu0 %vm16889_vm12, %v7147_v26  ;;  %11595 = vmatmul.msk.f32.vlgmr.msra.gmra.mxu1 %vm16890_vm13, %v7147_v26  ;;  %vm16902_vm12 = vmmov %vm16893_vm0 }
 0x79f   :  { %11599 = vmatmul.msk.f32.vlgmr.msra.gmra.mxu3 %vm16863_vm3, %v7255_v63  ;;  %11606 = vmatmul.msk.f32.vlgmr.msrb.gmra.mxu2 %vm16891_vm14, %v7471_v37  ;;  %vm16903_vm13 = vmmov %vm16893_vm0 }
 0x7a0   :  { %7331 = vmatpush.msra.mxu0 %v7312_v13  ;;  %7351 = vmatpush.msra.mxu1 %v7313_v8  ;;  %vm16905_vm3 = vmmov %vm16893_vm0 }
 0x7a1   :  { %7513 = vmatpush.msra.mxu3 %v7475_v22  ;;  %vm16906_vm14 = vmmov %vm16893_vm0  ;;  %7720 = vmatpush.msrb.mxu2 %v7703_v33  ;;  %v7688_v22 = vld [vmem:[%s16614_s11] sm:$0xff] }
 0x7a2   :  { %7332 = vmatpush.msra.mxu0 %v7310_v11  ;;  %7352 = vmatpush.msra.mxu1 %v7311_v43  ;;  %v7704_v43 = vld [vmem:[%s16614_s11 + $0x80] sm:$0xff] }
 0x7a3   :  { %7514 = vmatpush.msra.mxu3 %v7473_v2  ;;  %7721 = vmatpush.msrb.mxu2 %v7702_v36 }
 0x7a5   :  { %7722 = vmatpush.msrb.mxu2 %v7701_v29 }
 0x7a6   :  { %11597 = vmatmul.msk.f32.vlgmr.msrb.gmra.mxu0 %vm16892_vm15, %v7201_v59  ;;  %11598 = vmatmul.msk.f32.vlgmr.msrb.gmra.mxu1 %vm16893_vm0, %v7255_v63  ;;  %vm7143_vm15 = vcmask 1040384   ;;  %v7707_v59 = vld [vmem:[%s16614_s11 + $0x98] sm:$0xff]  ;;  %v7689_v63 = vld [vmem:[%s16614_s11 + $0x8] sm:$0xff]  ;;  %vm7778_vm0 = vcmask 1043456  }
 0x7a7   :  { %11603 = vmatmul.msk.f32.vlgmr.msrb.gmra.mxu3 %vm16894_vm1, %v7363_v47  ;;  %11610 = vmatmul.msk.f32.vlgmr.msra.gmra.mxu2 %vm16895_vm2, %v7579_v10  ;;  %v7091_v47 = vld [vmem:[%s16613_s10] sm:$0x3] }
 0x7a8   :  { %7439 = vmatpush.msrb.mxu0 %v7420_v61  ;;  %7459 = vmatpush.msrb.mxu1 %v7421_v17  ;;  %v7773_v61 = vld [vmem:[%s16616_s13 + $0x60] sm:$0xf] }
 0x7a9   :  { %7621 = vmatpush.msrb.mxu3 %v7583_v15  ;;  %7723 = vmatpush.msrb.mxu2 %v7700_v58 }
 0x7aa   :  { %7440 = vmatpush.msrb.mxu0 %v7418_v12  ;;  %7460 = vmatpush.msrb.mxu1 %v7419_v56  ;;  %v7772_v12 = vld [vmem:[%s16616_s13 + $0x58] sm:$0xff] }
 0x7ab   :  { %7622 = vmatpush.msrb.mxu3 %v7581_v55  ;;  %7724 = vmatpush.msrb.mxu2 %v7699_v4  ;;  %v7771_v55 = vld [vmem:[%s16616_s13 + $0x50] sm:$0xff]  ;;  %v7766_v4 = vld [vmem:[%s16616_s13 + $0x28] sm:$0xff] }
 0x7ad   :  { %7725 = vmatpush.msrb.mxu2 %v7698_v30 }
 0x7ae   :  { %11600 = vmatmul.msk.f32.vlgmr.msra.gmra.mxu0 %vm16896_vm4, %v7309_v51  ;;  %11601 = vmatmul.msk.f32.vlgmr.msra.gmra.mxu1 %vm16897_vm5, %v7309_v51  ;;  %vm7813_vm5 = vcmask 64512  }
 0x7af   :  { %11607 = vmatmul.msk.f32.vlgmr.msra.gmra.mxu3 %vm16898_vm7, %v7471_v37  ;;  %7547 = vmatpush.msra.mxu0 %v7528_v46  ;;  %v7705_v37 = vld [vmem:[%s16614_s11 + $0x88] sm:$0xff]  ;;  %s11942_s11 = smov 112  }
 0x7b0   :  { %7567 = vmatpush.msra.mxu1 %v7529_v45  ;;  %7726 = vmatpush.msrb.mxu2 %v7697_v50  ;;  %v7765_v50 = vld [vmem:[%s16616_s13 + $0x20] sm:$0xff] }
 0x7b1   :  { %7548 = vmatpush.msra.mxu0 %v7526_v19  ;;  %7747 = vmatpush.msra.mxu3 %v7712_v35  ;;  %v7770_v19 = vld [vmem:[%s16616_s13 + $0x48] sm:$0xff] }
 0x7b2   :  { %7568 = vmatpush.msra.mxu1 %v7527_v48  ;;  %7727 = vmatpush.msrb.mxu2 %v7696_v24 }
 0x7b3   :  { %7748 = vmatpush.msra.mxu3 %v7711_v52 }
 0x7b4   :  { %7728 = vmatpush.msrb.mxu2 %v7695_v38 }
 0x7b5   :  { %7749 = vmatpush.msra.mxu3 %v7710_v1 }
 0x7b6   :  { %11604 = vmatmul.msk.f32.vlgmr.msrb.gmra.mxu0 %vm16899_vm8, %v7417_v18  ;;  %11605 = vmatmul.msk.f32.vlgmr.msrb.gmra.mxu1 %vm16900_vm9, %v7417_v18 }
 0x7b7   :  { %11611 = vmatmul.msk.f32.vlgmr.msrb.gmra.mxu3 %vm16901_vm10, %v7579_v10  ;;  %7675 = vmatpush.msrb.mxu1 %v7637_v31 }
 0x7b8   :  { %7655 = vmatpush.msrb.mxu0 %v7636_v44  ;;  %7729 = vmatpush.msrb.mxu2 %v7694_v57 }
 0x7b9   :  { %7676 = vmatpush.msrb.mxu1 %v7635_v21  ;;  %7750 = vmatpush.msra.mxu3 %v7709_v34 }
 0x7ba   :  { %7656 = vmatpush.msrb.mxu0 %v7634_v49  ;;  %7730 = vmatpush.msrb.mxu2 %v7693_v39  ;;  %v7769_v49 = vld [vmem:[%s16616_s13 + $0x40] sm:$0xff] }
 0x7bb   :  { %7751 = vmatpush.msra.mxu3 %v7708_v40 }
 0x7bc   :  { %7731 = vmatpush.msrb.mxu2 %v7692_v16 }
 0x7bd   :  { %7752 = vmatpush.msra.mxu3 %v7707_v59 }
 0x7be   :  { %11608 = vmatmul.msk.f32.vlgmr.msra.gmra.mxu0 %vm16902_vm12, %v7525_v60  ;;  %11609 = vmatmul.msk.f32.vlgmr.msra.gmra.mxu1 %vm16903_vm13, %v7525_v60  ;;  %vm8065_vm12 = vcmask 1042434   ;;  %vm8069_vm13 = vcmask 1044484  }
 0x7bf   :  { %7732 = vmatpush.msrb.mxu2 %v7691_v25  ;;  %7753 = vmatpush.msra.mxu3 %v7706_v23  ;;  %v15519_v23 = vld [vmem:[%s16619_s16] sm:$0xff] }
 0x7c0   :  { %11615 = vmatpush.msk.msra.mxu0 %vm7778_vm0, %v7773_v61  ;;  %7832 = vmatpush.msra.mxu1 %v15519_v23 }
 0x7c1   :  { %7733 = vmatpush.msrb.mxu2 %v7690_v42  ;;  %7754 = vmatpush.msra.mxu3 %v7705_v37  ;;  %v7761_v42 = vld [vmem:[%s16616_s13] sm:$0xff] }
 0x7c2   :  { %7786 = vmatpush.msra.mxu0 %v7772_v12 }
 0x7c3   :  { %7734 = vmatpush.msrb.mxu2 %v7689_v63  ;;  %7755 = vmatpush.msra.mxu3 %v7704_v43 }
 0x7c4   :  { %7787 = vmatpush.msra.mxu0 %v7771_v55 }
 0x7c5   :  { %7735 = vmatpush.msrb.mxu2 %v7688_v22  ;;  %v7774_v22 = vld [vmem:[%s16617_s14] sm:$0x1]  ;;  %s11939_s14 = smov 104  }
 0x7c6   :  { %11613 = vmatmul.msk.f32.vlgmr.msrb.gmra.mxu1 %vm16905_vm3, %v7633_v5  ;;  %11612 = vmatmul.msk.f32.vlgmr.msrb.gmra.mxu0 %vm16906_vm14, %v7633_v5  ;;  %v7768_v5 = vld [vmem:[%s16616_s13 + $0x38] sm:$0xff]  ;;  %vm8071_vm3 = vcmask 1046534   ;;  %vm8067_vm14 = vcmask 1041408  }
 0x7c7   :  { %7788 = vmatpush.msra.mxu0 %v7770_v19  ;;  %v11940_v19 = vmov 1  }
 0x7c8   :  { %11784 = vset.pattern.permute.xlu1 %v11940_v19 }
 0x7c9   :  { %7789 = vmatpush.msra.mxu0 %v7769_v49 }
 0x7cb   :  { %7790 = vmatpush.msra.mxu0 %v7768_v5 }
 0x813   :  { %v7117_v27 = vpop.f32.mrf.mxu0  ;;  %v7137_v6 = vpop.f32.mrf.mxu1 }
 0x814   :  { %v7142_v54 = vrot.slane %v7137_v6, 7  ;;  %v7767_v6 = vld [vmem:[%s16616_s13 + $0x30] sm:$0xff] }
 0x815   :  { %7791 = vmatpush.msra.mxu0 %v7767_v6 }
 0x816   :  { %v7144_v53 = vsel %vm7143_vm15, %v7117_v27, %v7142_v54 }
 0x817   :  { %v7146_v26 = vadd.f32 %v7144_v53, %v7091_v47  ;;  %7792 = vmatpush.msra.mxu0 %v7766_v4  ;;  %v7764_v47 = vld [vmem:[%s16616_s13 + $0x18] sm:$0xff]  ;;  %v7763_v53 = vld [vmem:[%s16616_s13 + $0x10] sm:$0xff] }
 0x819   :  { %7793 = vmatpush.msra.mxu0 %v7765_v50  ;;  %v7882_v50 = vld [vmem:[%s16621_s18 + $0x30] sm:$0xff] }
 0x81a   :  { %v7226_v28 = vpop.f32.mrf.mxu3  ;;  %v7388_v17 = vpop.f32.mrf.mxu2 }
 0x81b   :  { %v7172_v32 = vpop.f32.mrf.mxu0  ;;  %v7192_v0 = vpop.f32.mrf.mxu1  ;;  %7794 = vmatpush.msra.mxu0 %v7764_v47 }
 0x81c   :  { %v7197_v3 = vrot.slane %v7192_v0, 7 }
 0x81d   :  { %7795 = vmatpush.msra.mxu0 %v7763_v53 }
 0x81e   :  { %v7198_v7 = vsel %vm7143_vm15, %v7172_v32, %v7197_v3 }
 0x81f   :  { %v7200_v2 = vadd.f32 %v7198_v7, %v7146_v26  ;;  %v11938_v7 = vmov 0.0  }
 0x820   :  { %7833 = vmatmul.f32.vlgmr.msra.gmra.mxu1 %v11938_v7 }
 0x822   :  { %v7300_v14 = vpop.f32.mrf.mxu3  ;;  %v7496_v33 = vpop.f32.mrf.mxu2 }
 0x823   :  { %v7246_v41 = vpop.f32.mrf.mxu0  ;;  %v7280_v9 = vpop.f32.mrf.mxu1  ;;  %v7305_v10 = vrot.slane %v7300_v14, 7 }
 0x824   :  { %v7251_v20 = vrot.slane %v7246_v41, 7 }
 0x825   :  { %v7306_v46 = vsel %vm7143_vm15, %v7280_v9, %v7305_v10 }
 0x826   :  { %v7252_v11 = vsel %vm7143_vm15, %v7226_v28, %v7251_v20  ;;  %v7762_v20 = vld [vmem:[%s16616_s13 + $0x8] sm:$0xff]  ;;  %s16908_s13 = sld [smem:[#allocation76_spill]] }
 0x827   :  { %v7254_v56 = vadd.f32 %v7252_v11, %v7200_v2  ;;  %7796 = vmatpush.msra.mxu0 %v7762_v20  ;;  %v15535_v2 = vld [vmem:[%s16618_s15] sm:$0x1]  ;;  %v11943_v20 = vmov 2  }
 0x828   :  { %11785 = vset.pattern.permute.xlu0 %v11943_v20 }
 0x829   :  { %v7308_v48 = vadd.f32 %v7306_v46, %v7254_v56  ;;  %7797 = vmatpush.msra.mxu0 %v7761_v42 }
 0x82a   :  { %v7408_v62 = vpop.f32.mrf.mxu3  ;;  %v7604_v39 = vpop.f32.mrf.mxu2 }
 0x82b   :  { %v7334_v13 = vpop.f32.mrf.mxu0  ;;  %v7354_v8 = vpop.f32.mrf.mxu1  ;;  %v7413_v44 = vrot.slane %v7408_v62, 7  ;;  %v7713_v62 = vld [vmem:[%s16615_s12] sm:$0x1]  ;;  %8024 = vmatpush.msrb.mxu0 %v7882_v50 }
 0x82c   :  { %v7359_v15 = vrot.slane %v7354_v8, 7 }
 0x82d   :  { %v7414_v36 = vsel %vm7143_vm15, %v7388_v17, %v7413_v44 }
 0x82e   :  { %v7360_v51 = vsel %vm7143_vm15, %v7334_v13, %v7359_v15  ;;  %v15541_v15 = vld [vmem:[%s16620_s17] sm:$0x1] }
 0x82f   :  { %v7362_v60 = vadd.f32 %v7360_v51, %v7308_v48 }
 0x831   :  { %v7416_v29 = vadd.f32 %v7414_v36, %v7362_v60 }
 0x832   :  { %v7516_v45 = vpop.f32.mrf.mxu3 }
 0x833   :  { %v7442_v31 = vpop.f32.mrf.mxu0  ;;  %v7462_v18 = vpop.f32.mrf.mxu1  ;;  %v7521_v58 = vrot.slane %v7516_v45, 7 }
 0x834   :  { %v7467_v21 = vrot.slane %v7462_v18, 7 }
 0x835   :  { %v7522_v35 = vsel %vm7143_vm15, %v7496_v33, %v7521_v58 }
 0x836   :  { %v7468_v27 = vsel %vm7143_vm15, %v7442_v31, %v7467_v21 }
 0x837   :  { %v7470_v30 = vadd.f32 %v7468_v27, %v7416_v29 }
 0x839   :  { %v7524_v52 = vadd.f32 %v7522_v35, %v7470_v30 }
 0x83a   :  { %v7624_v24 = vpop.f32.mrf.mxu3 }
 0x83b   :  { %v7550_v28 = vpop.f32.mrf.mxu0  ;;  %v7570_v32 = vpop.f32.mrf.mxu1  ;;  %v7629_v57 = vrot.slane %v7624_v24, 7 }
 0x83c   :  { %v7575_v0 = vrot.slane %v7570_v32, 7  ;;  %v7877_v32 = vld [vmem:[%s16621_s18 + $0x8] sm:$0xff] }
 0x83d   :  { %v7630_v9 = vsel %vm7143_vm15, %v7604_v39, %v7629_v57  ;;  %7924 = vmatpush.msrb.mxu3 %v7877_v32  ;;  %v7883_v39 = vld [vmem:[%s16621_s18 + $0x38] sm:$0xff] }
 0x83e   :  { %v7576_v38 = vsel %vm7143_vm15, %v7550_v28, %v7575_v0  ;;  %v7876_v28 = vld [vmem:[%s16621_s18] sm:$0xff]  ;;  %v7881_v0 = vld [vmem:[%s16621_s18 + $0x28] sm:$0xff] }
 0x83f   :  { %v7578_v1 = vadd.f32 %v7576_v38, %v7524_v52  ;;  %7904 = vmatpush.msrb.mxu1 %v7876_v28  ;;  %8004 = vmatpush.msra.mxu2 %v7881_v0  ;;  %v7878_v38 = vld [vmem:[%s16621_s18 + $0x10] sm:$0xff]  ;;  %v7879_v52 = vld [vmem:[%s16621_s18 + $0x18] sm:$0xff] }
 0x841   :  { %v7632_v54 = vadd.f32 %v7630_v9, %v7578_v1  ;;  %7944 = vmatpush.msra.mxu1 %v7878_v38  ;;  %v7880_v1 = vld [vmem:[%s16621_s18 + $0x20] sm:$0xff] }
 0x843   :  { %v7678_v34 = vpop.f32.mrf.mxu1  ;;  %v7658_v14 = vpop.f32.mrf.mxu0 }
 0x844   :  { %v7683_v41 = vrot.slane %v7678_v34, 7 }
 0x846   :  { %v7684_v16 = vsel %vm7143_vm15, %v7658_v14, %v7683_v41 }
 0x847   :  { %v7686_v40 = vadd.f32 %v7684_v16, %v7632_v54 }
 0x849   :  { %v7687_v3 = vmax.f32 %v7686_v40, 0.0 }
 0x84b   :  { %v7715_v25 = vperm.slane %v7687_v3, 0  ;;  %v7716_v59 = vperm.slane %v7687_v3, 1 }
 0x84d   :  { %7736 = vmatmul.f32.vlgmr.msrb.gmra.mxu2 %v7715_v25  ;;  %11614 = vmatmul.msk.f32.vlgmr.msra.gmra.mxu3 %vm1856_vm11, %v7716_v59 }
 0x84e   :  { %7964 = vmatpush.msra.mxu3 %v7879_v52 }
 0x89d   :  { %v7834_v17 = vpop.f32.mrf.mxu1 }
 0x8d0   :  { %v7737_v26 = vpop.f32.mrf.mxu2  ;;  %v7757_v8 = vpop.f32.mrf.mxu3 }
 0x8d1   :  { %v7738_v13 = vadd.f32 %v7737_v26, %v7713_v62 }
 0x8d3   :  { %v7758_v63 = vadd.f32 %v7757_v8, %v7738_v13 }
 0x8d5   :  { %v7760_v37 = vmax.f32 %v7758_v63, 0.0 }
 0x8d7   :  { %11616 = vmatmul.msk.f32.vlgmr.msra.gmra.mxu0 %vm966_vm6, %v7760_v37 }
 0x954   :  { %v7799_v11 = vpop.f32.mrf.mxu0 }
 0x955   :  { %v15529_v43 = vadd.f32 %v7799_v11, %v7774_v22 }
 0x957   :  { %7809 = vperm.xlu2 %11766, %v15529_v43  }
 0x9b1   :  { %v7810_v61 = vpop.permute.xlu2 %7809 }
 0x9b2   :  { %v7812_v10 = vmul.f32 %v7810_v61, %v15535_v2 }
 0x9b4   :  { %v7837_v12 = vadd.f32 %v7834_v17, %v7812_v10  ;;  %v11944_v10 = vmov 3  }
 0x9b6   :  { %v7838_v56 = vadd.f32 %v7837_v12, %v15541_v15  ;;  %v11945_v12 = vmov 4  }
 0x9b8   :  { %11794 = vtanh.f32 %v7838_v56  ;;  %v11617_v46 = vmul.f32 -1.442695, %v7838_v56  ;;  %v11946_v56 = vmov 5  }
 0x9ba   :  { %11796 = vpow2.f32 %v11617_v46  ;;  %v11948_v46 = vmov 7  }
 0x9be   :  { %v11795_v55 = vpop.eup %11794 }
 0x9bf   :  { %7861 = vrot.lane.b32.xlu0 %v11795_v55, %s11939_s14  ;;  %v11947_v55 = vmov 6  }
 0x9c0   :  { %v11797_v51 = vpop.eup %11796 }
 0x9c1   :  { %v7842_v45 = vadd.f32 1.0, %v11797_v51  ;;  %v16907_v51 = vmov 0  }
 0x9c3   :  { %11798 = vrcp.f32 %v7842_v45  ;;  %v7854_v49 = vand.u32 2147483648, %v7842_v45  ;;  %vm7848_vm1 = vweird.f32 %v7842_v45  ;;  %v7852_v60 = vand.u32 2147483647, %v7842_v45 }
 0x9c5   :  { %v7855_v33 = vor.u32 1.1754944e-38, %v7854_v49  ;;  %vm7853_vm4 = vcmp.eq.f32.partialorder %v7852_v60, 8.507059e+37  ;;  %v8145_v49 = vld [vmem:[%s16621_s18 + $0x58] sm:$0xff] }
 0x9c9   :  { %v11799_v48 = vpop.eup %11798 }
 0x9ca   :  { %v7844_v31 = vmul.f32 %v11799_v48, %v7842_v45  ;;  %vm7849_vm11 = vweird.f32 %v11799_v48 }
 0x9cb   :  { %vm7850_vm2 = vmor %vm7848_vm1, %vm7849_vm11  ;;  %vm8073_vm11 = vcmask 1045508  }
 0x9cc   :  { %v7845_v18 = vsub.f32 1.0, %v7844_v31 }
 0x9ce   :  { %v7846_v44 = vmul.f32 %v11799_v48, %v7845_v18 }
 0x9d0   :  { %v7847_v21 = vadd.f32 %v11799_v48, %v7846_v44  ;;  %v8142_v44 = vld [vmem:[%s16621_s18 + $0x40] sm:$0xff] }
 0x9d1   :  { %8170 = vmatpush.msrb.mxu2 %v8142_v44 }
 0x9d2   :  { %v7851_v5 = vsel %vm7850_vm2, %v11799_v48, %v7847_v21  ;;  %v8144_v21 = vld [vmem:[%s16621_s18 + $0x50] sm:$0xff] }
 0x9d3   :  { %v7856_v27 = vsel %vm7853_vm4, %v7855_v33, %v7851_v5  ;;  %v8146_v33 = vld [vmem:[%s16621_s18 + $0x60] sm:$0xff] }
 0x9d4   :  { %v7859_v29 = vmul.f32 0.0, %v7856_v27 }
 0xa31   :  { %v7862_v36 = vpop.permute.xlu0 %7861 }
 0xa32   :  { %v7864_v6 = vmul.f32 %v7862_v36, %v7856_v27  ;;  %v8147_v36 = vld [vmem:[%s16621_s18 + $0x68] sm:$0xff] }
 0xa34   :  { %7866 = vrot.lane.b32.xlu1 %v7864_v6, %s11941_s6  ;;  %v8149_v6 = vld [vmem:[%s16621_s18 + $0x78] sm:$0xff] }
 0xa3c   :  { %8079 = vperm.xlu1 %11784, %v15529_v43  }
 0xaa6   :  { %v7867_v58 = vpop.permute.xlu1 %7866 }
 0xaa7   :  { %v15548_v4 = vadd.f32 %v7867_v58, %v7859_v29 }
 0xaa9   :  { %11800 = vtanh.f32 %v15548_v4 }
 0xaae   :  { %v8080_v9 = vpop.permute.xlu1 %8079 }
 0xaaf   :  { %v11801_v30 = vpop.eup %11800  ;;  %v8082_v54 = vmul.f32 %v8080_v9, %v15535_v2 }
 0xab0   :  { %7872 = vrot.lane.b32.xlu2 %v11801_v30, %s11941_s6 }
 0xb0a   :  { %v7873_v24 = vpop.permute.xlu2 %7872 }
 0xb0b   :  { %v7875_v35 = vmul.f32 %v7873_v24, %v7856_v27  ;;  %v8148_v27 = vld [vmem:[%s16621_s18 + $0x70] sm:$0xff] }
 0xb0d   :  { %7885 = vrot.lane.b32.xlu0 %v7875_v35, %s11942_s11 }
 0xb7f   :  { %v7886_v57 = vpop.permute.xlu0 %7885 }
 0xb80   :  { %11618 = vmatmul.msk.f32.vlgmr.msrb.gmra.mxu1 %vm7813_vm5, %v7886_v57  ;;  %11619 = vmatmul.msk.f32.vlgmr.msrb.gmra.mxu3 %vm7813_vm5, %v7886_v57 }
 0xb81   :  { %11623 = vmatmul.msk.f32.vlgmr.msra.gmra.mxu2 %vm7813_vm5, %v7886_v57  ;;  %11624 = vmatmul.msk.f32.vlgmr.msrb.gmra.mxu0 %vm7813_vm5, %v7886_v57 }
 0xb82   :  { %7984 = vmatpush.msrb.mxu1 %v7880_v1  ;;  %8044 = vmatpush.msrb.mxu3 %v7883_v39 }
 0xb83   :  { %8250 = vmatpush.msra.mxu2 %v8146_v33 }
 0xb88   :  { %11620 = vmatmul.msk.f32.vlgmr.msra.gmra.mxu1 %vm7813_vm5, %v7886_v57  ;;  %11621 = vmatmul.msk.f32.vlgmr.msra.gmra.mxu3 %vm7813_vm5, %v7886_v57 }
 0xb89   :  { %8098 = vmatpush.msra.mxu1 %v15519_v23  ;;  %8210 = vmatpush.msra.mxu3 %v8144_v21 }
 0xb90   :  { %11622 = vmatmul.msk.f32.vlgmr.msrb.gmra.mxu1 %vm7813_vm5, %v7886_v57  ;;  %11625 = vmatmul.msk.f32.vlgmr.msrb.gmra.mxu3 %vm7813_vm5, %v7886_v57 }
 0xb91   :  { %8230 = vmatpush.msrb.mxu1 %v8145_v49  ;;  %8290 = vmatpush.msrb.mxu3 %v8148_v27  ;;  %v8403_v27 = vld [vmem:[%s16621_s18 + $0x80] sm:$0xff] }
 0xb98   :  { %11626 = vmatmul.msk.f32.vlgmr.msra.gmra.mxu1 %vm7813_vm5, %v7886_v57 }
 0xb99   :  { %8310 = vmatpush.msra.mxu1 %v8149_v6  ;;  %v8404_v6 = vld [vmem:[%s16621_s18 + $0x88] sm:$0xff] }
 0xbfd   :  { %v15587_v34 = vpop.f32.mrf.mxu1 }
 0xbfe   :  { %v15649_v30 = vpop.f32.mrf.mxu0 }
 0xc03   :  { %v15645_v58 = vpop.f32.mrf.mxu3 }
 0xc04   :  { %v15651_v28 = vpop.f32.mrf.mxu2 }
 0xc05   :  { %v15589_v14 = vpop.f32.mrf.mxu1 }
 0xc0d   :  { %v15591_v41 = vpop.f32.mrf.mxu1 }
 0xc15   :  { %v8100_v16 = vpop.f32.mrf.mxu1 }
 0xc16   :  { %v8103_v40 = vadd.f32 %v8100_v16, %v8082_v54 }
 0xc18   :  { %v8104_v3 = vadd.f32 %v8103_v40, %v15541_v15 }
 0xc1a   :  { %11802 = vtanh.f32 %v8104_v3  ;;  %v11627_v59 = vmul.f32 -1.442695, %v8104_v3 }
 0xc1c   :  { %11804 = vpow2.f32 %v11627_v59 }
 0xc20   :  { %v11803_v25 = vpop.eup %11802 }
 0xc21   :  { %8127 = vrot.lane.b32.xlu2 %v11803_v25, %s11939_s14 }
 0xc22   :  { %v11805_v47 = vpop.eup %11804 }
 0xc23   :  { %v8108_v53 = vadd.f32 1.0, %v11805_v47 }
 0xc25   :  { %11806 = vrcp.f32 %v8108_v53  ;;  %v8120_v8 = vand.u32 2147483648, %v8108_v53  ;;  %vm8114_vm8 = vweird.f32 %v8108_v53  ;;  %v8118_v63 = vand.u32 2147483647, %v8108_v53 }
 0xc27   :  { %v8121_v22 = vor.u32 1.1754944e-38, %v8120_v8  ;;  %vm8119_vm10 = vcmp.eq.f32.partialorder %v8118_v63, 8.507059e+37 }
 0xc2b   :  { %v11807_v42 = vpop.eup %11806 }
 0xc2c   :  { %v8110_v7 = vmul.f32 %v11807_v42, %v8108_v53  ;;  %vm8115_vm7 = vweird.f32 %v11807_v42 }
 0xc2d   :  { %vm8116_vm9 = vmor %vm8114_vm8, %vm8115_vm7 }
 0xc2e   :  { %v8111_v62 = vsub.f32 1.0, %v8110_v7 }
 0xc30   :  { %v8112_v26 = vmul.f32 %v11807_v42, %v8111_v62 }
 0xc32   :  { %v8113_v13 = vadd.f32 %v11807_v42, %v8112_v26 }
 0xc34   :  { %v8117_v37 = vsel %vm8116_vm9, %v11807_v42, %v8113_v13 }
 0xc35   :  { %v8122_v61 = vsel %vm8119_vm10, %v8121_v22, %v8117_v37 }
 0xc36   :  { %v8125_v45 = vmul.f32 %v8122_v61, %v15548_v4  ;;  %v15647_v4 = vpop.f32.mrf.mxu3 }
 0xc3e   :  { %v15653_v32 = vpop.f32.mrf.mxu3 }
 0xc7b   :  { %v8128_v11 = vpop.permute.xlu2 %8127 }
 0xc7c   :  { %v8130_v17 = vmul.f32 %v8128_v11, %v8122_v61 }
 0xc7e   :  { %8132 = vrot.lane.b32.xlu0 %v8130_v17, %s11941_s6 }
 0xc86   :  { %8340 = vperm.xlu0 %11785, %v15529_v43  }
 0xc8e   :  { %11786 = vset.pattern.permute.xlu0 %v11944_v10 }
 0xc8f   :  { %8601 = vperm.xlu0 %11786, %v15529_v43  }
 0xc97   :  { %11787 = vset.pattern.permute.xlu0 %v11945_v12 }
 0xc98   :  { %8862 = vperm.xlu0 %11787, %v15529_v43  }
 0xca0   :  { %11788 = vset.pattern.permute.xlu0 %v11946_v56 }
 0xca1   :  { %9123 = vperm.xlu0 %11788, %v15529_v43  }
 0xca9   :  { %11789 = vset.pattern.permute.xlu0 %v11947_v55 }
 0xcaa   :  { %9384 = vperm.xlu0 %11789, %v15529_v43  }
 0xcb2   :  { %11790 = vset.pattern.permute.xlu0 %v11948_v46 }
 0xcb3   :  { %9645 = vperm.xlu0 %11790, %v15529_v43   ;;  %v8143_v43 = vld [vmem:[%s16621_s18 + $0x48] sm:$0xff] }
 0xcb4   :  { %8190 = vmatpush.msra.mxu0 %v8143_v43 }
 0xcb6   :  { %8270 = vmatpush.msrb.mxu0 %v8147_v36 }
 0xcbb   :  { %11791 = vset.pattern.permute.xlu0 %v16907_v51 }
 0xcf0   :  { %v8133_v48 = vpop.permute.xlu0 %8132 }
 0xcf1   :  { %v15606_v31 = vadd.f32 %v8133_v48, %v8125_v45 }
 0xcf3   :  { %11808 = vtanh.f32 %v15606_v31 }
 0xcf8   :  { %v8341_v53 = vpop.permute.xlu0 %8340 }
 0xcf9   :  { %v11809_v18 = vpop.eup %11808  ;;  %v8343_v8 = vmul.f32 %v8341_v53, %v15535_v2 }
 0xcfa   :  { %8138 = vrot.lane.b32.xlu1 %v11809_v18, %s11941_s6 }
 0xd6c   :  { %v8139_v60 = vpop.permute.xlu1 %8138 }
 0xd6d   :  { %v8141_v5 = vmul.f32 %v8139_v60, %v8122_v61 }
 0xd6f   :  { %8151 = vrot.lane.b32.xlu2 %v8141_v5, %s11942_s11 }
 0xdc9   :  { %v8152_v29 = vpop.permute.xlu2 %8151 }
 0xdca   :  { %11628 = vmatmul.msk.f32.vlgmr.msrb.gmra.mxu2 %vm7813_vm5, %v8152_v29  ;;  %11629 = vmatmul.msk.f32.vlgmr.msra.gmra.mxu0 %vm7813_vm5, %v8152_v29 }
 0xdcb   :  { %11630 = vmatmul.msk.f32.vlgmr.msra.gmra.mxu3 %vm7813_vm5, %v8152_v29  ;;  %11631 = vmatmul.msk.f32.vlgmr.msrb.gmra.mxu1 %vm7813_vm5, %v8152_v29 }
 0xdcc   :  { %8359 = vmatpush.msrb.mxu2 %v15519_v23  ;;  %8431 = vmatpush.msra.mxu0 %v8403_v27 }
 0xdcd   :  { %8451 = vmatpush.msra.mxu3 %v8404_v6 }
 0xdd2   :  { %11632 = vmatmul.msk.f32.vlgmr.msra.gmra.mxu2 %vm7813_vm5, %v8152_v29  ;;  %11633 = vmatmul.msk.f32.vlgmr.msrb.gmra.mxu0 %vm7813_vm5, %v8152_v29 }
 0xdd3   :  { %11634 = vmatmul.msk.f32.vlgmr.msrb.gmra.mxu3 %vm7813_vm5, %v8152_v29  ;;  %11635 = vmatmul.msk.f32.vlgmr.msra.gmra.mxu1 %vm7813_vm5, %v8152_v29 }
 0xdda   :  { %11636 = vmatmul.msk.f32.vlgmr.msrb.gmra.mxu2 %vm7813_vm5, %v8152_v29  ;;  %v8406_v29 = vld [vmem:[%s16621_s18 + $0x98] sm:$0xff] }
 0xddb   :  { %8491 = vmatpush.msra.mxu2 %v8406_v29 }
 0xe47   :  { %v8192_v0 = vpop.f32.mrf.mxu0 }
 0xe48   :  { %v8232_v50 = vpop.f32.mrf.mxu1  ;;  %v8323_v3 = vrot.slane %v8192_v0, 7 }
 0xe49   :  { %v8325_v38 = vrot.slane %v8232_v50, 5 }
 0xe4d   :  { %v8172_v24 = vpop.f32.mrf.mxu2 }
 0xe4e   :  { %v8212_v35 = vpop.f32.mrf.mxu3  ;;  %v8330_v42 = vsel %vm7143_vm15, %v8172_v24, %v8323_v3  ;;  %v8407_v24 = vld [vmem:[%s16621_s18 + $0xa0] sm:$0xff] }
 0xe4f   :  { %v8324_v52 = vrot.slane %v8212_v35, 6  ;;  %v8272_v1 = vpop.f32.mrf.mxu0  ;;  %v8408_v35 = vld [vmem:[%s16621_s18 + $0xa8] sm:$0xff]  ;;  %8511 = vmatpush.msrb.mxu0 %v8407_v24 }
 0xe50   :  { %v8312_v39 = vpop.f32.mrf.mxu1  ;;  %v8327_v54 = vrot.slane %v8272_v1, 3  ;;  %8531 = vmatpush.msrb.mxu3 %v8408_v35 }
 0xe51   :  { %v8331_v57 = vsel %vm8065_vm12, %v8324_v52, %v8325_v38  ;;  %v8329_v25 = vrot.slane %v8312_v39, 1  ;;  %v8409_v38 = vld [vmem:[%s16621_s18 + $0xb0] sm:$0xff]  ;;  %v8410_v52 = vld [vmem:[%s16621_s18 + $0xb8] sm:$0xff] }
 0xe52   :  { %v8332_v62 = vsel %vm8067_vm14, %v8330_v42, %v8331_v57  ;;  %8571 = vmatpush.msrb.mxu2 %v8410_v52  ;;  %v8058_v42 = vrot.slane %v15589_v14, 6 }
 0xe55   :  { %v8252_v9 = vpop.f32.mrf.mxu2 }
 0xe56   :  { %v8326_v16 = vrot.slane %v8252_v9, 4  ;;  %v8292_v40 = vpop.f32.mrf.mxu3  ;;  %v8063_v9 = vrot.slane %v15653_v32, 1 }
 0xe57   :  { %v8328_v59 = vrot.slane %v8292_v40, 2  ;;  %v8060_v40 = vrot.slane %v15591_v41, 4 }
 0xe58   :  { %v8333_v47 = vsel %vm8069_vm13, %v8326_v16, %v8327_v54  ;;  %v8062_v54 = vrot.slane %v15649_v30, 2  ;;  %v8059_v16 = vrot.slane %v15647_v4, 5 }
 0xe59   :  { %v8334_v7 = vsel %vm8071_vm3, %v8328_v59, %v8329_v25  ;;  %v8057_v25 = vrot.slane %v15645_v58, 7  ;;  %v8061_v59 = vrot.slane %v15651_v28, 3 }
 0xe5a   :  { %v8335_v26 = vsel %vm8073_vm11, %v8333_v47, %v8334_v7  ;;  %v8072_v7 = vsel %vm8071_vm3, %v8062_v54, %v8063_v9  ;;  %v8066_v4 = vsel %vm8065_vm12, %v8058_v42, %v8059_v16 }
 0xe5b   :  { %v15662_v13 = vsel %vm7778_vm0, %v8332_v62, %v8335_v26  ;;  %v8070_v41 = vsel %vm8069_vm13, %v8060_v40, %v8061_v59  ;;  %v8064_v14 = vsel %vm7143_vm15, %v15587_v34, %v8057_v25  ;;  %v8664_v25 = vld [vmem:[%s16621_s18 + $0xc0] sm:$0xff]  ;;  %v8665_v59 = vld [vmem:[%s16621_s18 + $0xc8] sm:$0xff] }
 0xe5c   :  { %v8074_v58 = vsel %vm8073_vm11, %v8070_v41, %v8072_v7  ;;  %v8668_v7 = vld [vmem:[%s16621_s18 + $0xe0] sm:$0xff] }
 0xe5d   :  { %v8361_v63 = vpop.f32.mrf.mxu2 }
 0xe5e   :  { %v8364_v37 = vadd.f32 %v8361_v63, %v8343_v8  ;;  %v8602_v63 = vpop.permute.xlu0 %8601 }
 0xe60   :  { %v8365_v22 = vadd.f32 %v8364_v37, %v15541_v15  ;;  %v8068_v37 = vsel %vm8067_vm14, %v8064_v14, %v8066_v4 }
 0xe62   :  { %11810 = vtanh.f32 %v8365_v22  ;;  %v11637_v61 = vmul.f32 -1.442695, %v8365_v22 }
 0xe64   :  { %11812 = vpow2.f32 %v11637_v61  ;;  %v8075_v61 = vsel %vm7778_vm0, %v8068_v37, %v8074_v58 }
 0xe68   :  { %v11811_v11 = vpop.eup %11810 }
 0xe69   :  { %8388 = vrot.lane.b32.xlu1 %v11811_v11, %s11939_s14  ;;  %v7806_v11 = vld [vmem:[%s16622_s19] sm:$0xff] }
 0xe6a   :  { %v11813_v17 = vpop.eup %11812  ;;  %v8077_v34 = vadd.f32 %v8075_v61, %v7806_v11 }
 0xe6b   :  { %v8369_v10 = vadd.f32 1.0, %v11813_v17 }
 0xe6d   :  { %11814 = vrcp.f32 %v8369_v10  ;;  %v8381_v45 = vand.u32 2147483648, %v8369_v10  ;;  %vm8375_vm2 = vweird.f32 %v8369_v10  ;;  %v8379_v48 = vand.u32 2147483647, %v8369_v10 }
 0xe6f   :  { %v8382_v44 = vor.u32 1.1754944e-38, %v8381_v45  ;;  %vm8380_vm7 = vcmp.eq.f32.partialorder %v8379_v48, 8.507059e+37 }
 0xe73   :  { %v11815_v12 = vpop.eup %11814 }
 0xe74   :  { %v8371_v56 = vmul.f32 %v11815_v12, %v8369_v10  ;;  %vm8376_vm1 = vweird.f32 %v11815_v12  ;;  %v8604_v10 = vmul.f32 %v8602_v63, %v15535_v2 }
 0xe75   :  { %vm8377_vm4 = vmor %vm8375_vm2, %vm8376_vm1 }
 0xe76   :  { %v8372_v55 = vsub.f32 1.0, %v8371_v56 }
 0xe78   :  { %v8373_v46 = vmul.f32 %v11815_v12, %v8372_v55 }
 0xe7a   :  { %v8374_v51 = vadd.f32 %v11815_v12, %v8373_v46 }
 0xe7c   :  { %v8378_v18 = vsel %vm8377_vm4, %v11815_v12, %v8374_v51 }
 0xe7d   :  { %v8383_v21 = vsel %vm8380_vm7, %v8382_v44, %v8378_v18 }
 0xe7e   :  { %v8386_v60 = vmul.f32 %v8383_v21, %v15606_v31  ;;  %v8405_v31 = vld [vmem:[%s16621_s18 + $0x90] sm:$0xff] }
 0xe7f   :  { %8471 = vmatpush.msrb.mxu1 %v8405_v31 }
 0xe81   :  { %8551 = vmatpush.msra.mxu1 %v8409_v38 }
 0xedb   :  { %v8389_v43 = vpop.permute.xlu1 %8388 }
 0xedc   :  { %v8391_v49 = vmul.f32 %v8389_v43, %v8383_v21  ;;  %v8338_v43 = vadd.f32 %v15662_v13, %v8077_v34  ;;  %v8863_v34 = vpop.permute.xlu0 %8862 }
 0xede   :  { %8393 = vrot.lane.b32.xlu2 %v8391_v49, %s11941_s6 }
 0xf38   :  { %v8394_v5 = vpop.permute.xlu2 %8393 }
 0xf39   :  { %v15669_v33 = vadd.f32 %v8394_v5, %v8386_v60 }
 0xf3b   :  { %11816 = vtanh.f32 %v15669_v33 }
 0xf41   :  { %v11817_v36 = vpop.eup %11816 }
 0xf42   :  { %8399 = vrot.lane.b32.xlu1 %v11817_v36, %s11941_s6 }
 0xfb4   :  { %v8400_v0 = vpop.permute.xlu1 %8399 }
 0xfb5   :  { %v8402_v50 = vmul.f32 %v8400_v0, %v8383_v21 }
 0xfb7   :  { %8412 = vrot.lane.b32.xlu2 %v8402_v50, %s11942_s11 }
0x1011   :  { %v8413_v57 = vpop.permute.xlu2 %8412 }
0x1012   :  { %11638 = vmatmul.msk.f32.vlgmr.msra.gmra.mxu0 %vm7813_vm5, %v8413_v57  ;;  %11639 = vmatmul.msk.f32.vlgmr.msra.gmra.mxu3 %vm7813_vm5, %v8413_v57 }
0x1013   :  { %11640 = vmatmul.msk.f32.vlgmr.msrb.gmra.mxu1 %vm7813_vm5, %v8413_v57  ;;  %11641 = vmatmul.msk.f32.vlgmr.msra.gmra.mxu2 %vm7813_vm5, %v8413_v57 }
0x1014   :  { %8620 = vmatpush.msra.mxu0 %v15519_v23  ;;  %8692 = vmatpush.msra.mxu3 %v8664_v25 }
0x1015   :  { %8712 = vmatpush.msrb.mxu1 %v8665_v59  ;;  %v8925_v59 = vld [vmem:[%s16621_s18 + $0x100] sm:$0xff] }
0x101a   :  { %11642 = vmatmul.msk.f32.vlgmr.msrb.gmra.mxu0 %vm7813_vm5, %v8413_v57  ;;  %11643 = vmatmul.msk.f32.vlgmr.msrb.gmra.mxu3 %vm7813_vm5, %v8413_v57 }
0x101b   :  { %11644 = vmatmul.msk.f32.vlgmr.msra.gmra.mxu1 %vm7813_vm5, %v8413_v57  ;;  %11645 = vmatmul.msk.f32.vlgmr.msrb.gmra.mxu2 %vm7813_vm5, %v8413_v57 }
0x101c   :  { %8772 = vmatpush.msrb.mxu3 %v8668_v7  ;;  %v8929_v7 = vld [vmem:[%s16621_s18 + $0x120] sm:$0xff] }
0x1022   :  { %11646 = vmatmul.msk.f32.vlgmr.msra.gmra.mxu0 %vm7813_vm5, %v8413_v57 }
0x108f   :  { %v8433_v1 = vpop.f32.mrf.mxu0 }
0x1090   :  { %v8473_v39 = vpop.f32.mrf.mxu1 }
0x1091   :  { %v8585_v62 = vrot.slane %v8473_v39, 6 }
0x1095   :  { %v8453_v3 = vpop.f32.mrf.mxu3 }
0x1096   :  { %v8584_v47 = vrot.slane %v8453_v3, 7  ;;  %v8493_v53 = vpop.f32.mrf.mxu2 }
0x1097   :  { %v8586_v26 = vrot.slane %v8493_v53, 5  ;;  %v8513_v32 = vpop.f32.mrf.mxu0 }
0x1098   :  { %v8591_v30 = vsel %vm7143_vm15, %v8433_v1, %v8584_v47  ;;  %v8553_v22 = vpop.f32.mrf.mxu1  ;;  %v8587_v12 = vrot.slane %v8513_v32, 4  ;;  %v8667_v47 = vld [vmem:[%s16621_s18 + $0xd8] sm:$0xff] }
0x1099   :  { %v8592_v8 = vsel %vm8065_vm12, %v8585_v62, %v8586_v26  ;;  %v8589_v46 = vrot.slane %v8553_v22, 2  ;;  %8752 = vmatpush.msrb.mxu0 %v8667_v47  ;;  %v8669_v62 = vld [vmem:[%s16621_s18 + $0xe8] sm:$0xff]  ;;  %v8670_v26 = vld [vmem:[%s16621_s18 + $0xf0] sm:$0xff]  ;;  %v8671_v32 = vld [vmem:[%s16621_s18 + $0xf8] sm:$0xff] }
0x109a   :  { %v8593_v28 = vsel %vm8067_vm14, %v8591_v30, %v8592_v8  ;;  %8792 = vmatpush.msra.mxu1 %v8669_v62  ;;  %v8928_v47 = vld [vmem:[%s16621_s18 + $0x118] sm:$0xff]  ;;  %v8930_v62 = vld [vmem:[%s16621_s18 + $0x128] sm:$0xff] }
0x109b   :  { %8832 = vmatpush.msra.mxu0 %v8671_v32  ;;  %v8932_v32 = vld [vmem:[%s16621_s18 + $0x138] sm:$0xff] }
0x109d   :  { %v8533_v17 = vpop.f32.mrf.mxu3 }
0x109e   :  { %v8588_v56 = vrot.slane %v8533_v17, 3  ;;  %v8573_v55 = vpop.f32.mrf.mxu2 }
0x109f   :  { %v8590_v51 = vrot.slane %v8573_v55, 1  ;;  %v8622_v45 = vpop.f32.mrf.mxu0 }
0x10a0   :  { %v8594_v48 = vsel %vm8069_vm13, %v8587_v12, %v8588_v56  ;;  %v8625_v18 = vadd.f32 %v8622_v45, %v8604_v10 }
0x10a1   :  { %v8595_v44 = vsel %vm8071_vm3, %v8589_v46, %v8590_v51 }
0x10a2   :  { %v8596_v21 = vsel %vm8073_vm11, %v8594_v48, %v8595_v44  ;;  %v8626_v49 = vadd.f32 %v8625_v18, %v15541_v15 }
0x10a3   :  { %v8597_v60 = vsel %vm7778_vm0, %v8593_v28, %v8596_v21 }
0x10a4   :  { %v15736_v5 = vadd.f32 %v8597_v60, %v8338_v43  ;;  %11818 = vtanh.f32 %v8626_v49  ;;  %v11647_v27 = vmul.f32 -1.442695, %v8626_v49  ;;  %v8865_v43 = vmul.f32 %v8863_v34, %v15535_v2 }
0x10a6   :  { %11820 = vpow2.f32 %v11647_v27 }
0x10aa   :  { %v11819_v36 = vpop.eup %11818 }
0x10ab   :  { %8649 = vrot.lane.b32.xlu1 %v11819_v36, %s11939_s14 }
0x10ac   :  { %v11821_v6 = vpop.eup %11820 }
0x10ad   :  { %v8630_v31 = vadd.f32 1.0, %v11821_v6 }
0x10af   :  { %11822 = vrcp.f32 %v8630_v31  ;;  %v8642_v35 = vand.u32 2147483648, %v8630_v31  ;;  %vm8636_vm9 = vweird.f32 %v8630_v31  ;;  %v8640_v38 = vand.u32 2147483647, %v8630_v31 }
0x10b1   :  { %v8643_v57 = vor.u32 1.1754944e-38, %v8642_v35  ;;  %vm8641_vm1 = vcmp.eq.f32.partialorder %v8640_v38, 8.507059e+37 }
0x10b5   :  { %v11823_v29 = vpop.eup %11822 }
0x10b6   :  { %v8632_v0 = vmul.f32 %v11823_v29, %v8630_v31  ;;  %vm8637_vm8 = vweird.f32 %v11823_v29 }
0x10b7   :  { %vm8638_vm10 = vmor %vm8636_vm9, %vm8637_vm8 }
0x10b8   :  { %v8633_v13 = vsub.f32 1.0, %v8632_v0 }
0x10ba   :  { %v8634_v50 = vmul.f32 %v11823_v29, %v8633_v13 }
0x10bc   :  { %v8635_v24 = vadd.f32 %v11823_v29, %v8634_v50 }
0x10be   :  { %v8639_v52 = vsel %vm8638_vm10, %v11823_v29, %v8635_v24 }
0x10bf   :  { %v8644_v39 = vsel %vm8641_vm1, %v8643_v57, %v8639_v52 }
0x10c0   :  { %v8647_v54 = vmul.f32 %v8644_v39, %v15669_v33  ;;  %v8666_v33 = vld [vmem:[%s16621_s18 + $0xd0] sm:$0xff] }
0x10c1   :  { %8732 = vmatpush.msra.mxu2 %v8666_v33  ;;  %v8926_v33 = vld [vmem:[%s16621_s18 + $0x108] sm:$0xff] }
0x10c3   :  { %8812 = vmatpush.msrb.mxu2 %v8670_v26  ;;  %v8931_v26 = vld [vmem:[%s16621_s18 + $0x130] sm:$0xff] }
0x111d   :  { %v8650_v1 = vpop.permute.xlu1 %8649 }
0x111e   :  { %v8652_v9 = vmul.f32 %v8650_v1, %v8644_v39 }
0x1120   :  { %8654 = vrot.lane.b32.xlu2 %v8652_v9, %s11941_s6 }
0x117a   :  { %v8655_v16 = vpop.permute.xlu2 %8654 }
0x117b   :  { %v15741_v40 = vadd.f32 %v8655_v16, %v8647_v54 }
0x117d   :  { %11824 = vtanh.f32 %v15741_v40 }
0x1183   :  { %v11825_v3 = vpop.eup %11824 }
0x1184   :  { %8660 = vrot.lane.b32.xlu1 %v11825_v3, %s11941_s6 }
0x11f6   :  { %v8661_v53 = vpop.permute.xlu1 %8660 }
0x11f7   :  { %v8663_v42 = vmul.f32 %v8661_v53, %v8644_v39 }
0x11f9   :  { %8673 = vrot.lane.b32.xlu2 %v8663_v42, %s11942_s11 }
0x1253   :  { %v8674_v30 = vpop.permute.xlu2 %8673 }
0x1254   :  { %11648 = vmatmul.msk.f32.vlgmr.msra.gmra.mxu3 %vm7813_vm5, %v8674_v30  ;;  %11649 = vmatmul.msk.f32.vlgmr.msrb.gmra.mxu1 %vm7813_vm5, %v8674_v30 }
0x1255   :  { %11650 = vmatmul.msk.f32.vlgmr.msra.gmra.mxu2 %vm7813_vm5, %v8674_v30  ;;  %11651 = vmatmul.msk.f32.vlgmr.msrb.gmra.mxu0 %vm7813_vm5, %v8674_v30 }
0x1256   :  { %8881 = vmatpush.msra.mxu3 %v15519_v23  ;;  %8953 = vmatpush.msrb.mxu1 %v8925_v59  ;;  %v9189_v59 = vld [vmem:[%s16621_s18 + $0x158] sm:$0xff] }
0x1257   :  { %8973 = vmatpush.msra.mxu2 %v8926_v33 }
0x125c   :  { %11652 = vmatmul.msk.f32.vlgmr.msrb.gmra.mxu3 %vm7813_vm5, %v8674_v30  ;;  %11653 = vmatmul.msk.f32.vlgmr.msra.gmra.mxu1 %vm7813_vm5, %v8674_v30 }
0x125d   :  { %11654 = vmatmul.msk.f32.vlgmr.msrb.gmra.mxu2 %vm7813_vm5, %v8674_v30  ;;  %11655 = vmatmul.msk.f32.vlgmr.msra.gmra.mxu0 %vm7813_vm5, %v8674_v30 }
0x125e   :  { %9013 = vmatpush.msrb.mxu3 %v8928_v47  ;;  %9033 = vmatpush.msra.mxu1 %v8929_v7  ;;  %v9190_v47 = vld [vmem:[%s16621_s18 + $0x160] sm:$0xff]  ;;  %v9193_v7 = vld [vmem:[%s16621_s18 + $0x178] sm:$0xff] }
0x125f   :  { %9053 = vmatpush.msrb.mxu2 %v8930_v62 }
0x1264   :  { %11656 = vmatmul.msk.f32.vlgmr.msra.gmra.mxu3 %vm7813_vm5, %v8674_v30 }
0x1265   :  { %9093 = vmatpush.msra.mxu3 %v8932_v32 }
0x12d1   :  { %v8714_v4 = vpop.f32.mrf.mxu1 }
0x12d2   :  { %v8754_v41 = vpop.f32.mrf.mxu0  ;;  %v8845_v8 = vrot.slane %v8714_v4, 7 }
0x12d3   :  { %v8847_v63 = vrot.slane %v8754_v41, 5 }
0x12d7   :  { %v8694_v58 = vpop.f32.mrf.mxu3 }
0x12d8   :  { %v8852_v28 = vsel %vm7143_vm15, %v8694_v58, %v8845_v8  ;;  %v8734_v14 = vpop.f32.mrf.mxu2 }
0x12d9   :  { %v8846_v37 = vrot.slane %v8734_v14, 6  ;;  %v8794_v61 = vpop.f32.mrf.mxu1 }
0x12da   :  { %v8834_v17 = vpop.f32.mrf.mxu0  ;;  %v8849_v12 = vrot.slane %v8794_v61, 3  ;;  %v9124_v61 = vpop.permute.xlu0 %9123 }
0x12db   :  { %v8853_v22 = vsel %vm8065_vm12, %v8846_v37, %v8847_v63  ;;  %v8851_v46 = vrot.slane %v8834_v17, 1 }
0x12dc   :  { %v8854_v11 = vsel %vm8067_vm14, %v8852_v28, %v8853_v22 }
0x12df   :  { %v8774_v10 = vpop.f32.mrf.mxu3 }
0x12e0   :  { %v8848_v56 = vrot.slane %v8774_v10, 4  ;;  %v8814_v55 = vpop.f32.mrf.mxu2 }
0x12e1   :  { %v8850_v51 = vrot.slane %v8814_v55, 2 }
0x12e2   :  { %v8855_v45 = vsel %vm8069_vm13, %v8848_v56, %v8849_v12  ;;  %v9126_v12 = vmul.f32 %v9124_v61, %v15535_v2 }
0x12e3   :  { %v8856_v48 = vsel %vm8071_vm3, %v8850_v51, %v8851_v46 }
0x12e4   :  { %v8857_v18 = vsel %vm8073_vm11, %v8855_v45, %v8856_v48 }
0x12e5   :  { %v8858_v44 = vsel %vm7778_vm0, %v8854_v11, %v8857_v18 }
0x12e6   :  { %v15789_v21 = vadd.f32 %v8858_v44, %v15736_v5 }
0x12e7   :  { %v8883_v49 = vpop.f32.mrf.mxu3 }
0x12e8   :  { %v8886_v60 = vadd.f32 %v8883_v49, %v8865_v43 }
0x12ea   :  { %v8887_v36 = vadd.f32 %v8886_v60, %v15541_v15 }
0x12ec   :  { %11826 = vtanh.f32 %v8887_v36  ;;  %v11657_v6 = vmul.f32 -1.442695, %v8887_v36 }
0x12ee   :  { %11828 = vpow2.f32 %v11657_v6 }
0x12f2   :  { %v11827_v27 = vpop.eup %11826 }
0x12f3   :  { %8910 = vrot.lane.b32.xlu1 %v11827_v27, %s11939_s14 }
0x12f4   :  { %v11829_v31 = vpop.eup %11828 }
0x12f5   :  { %v8891_v29 = vadd.f32 1.0, %v11829_v31 }
0x12f7   :  { %11830 = vrcp.f32 %v8891_v29  ;;  %v8903_v5 = vand.u32 2147483648, %v8891_v29  ;;  %vm8897_vm4 = vweird.f32 %v8891_v29  ;;  %v8901_v38 = vand.u32 2147483647, %v8891_v29 }
0x12f9   :  { %v8904_v57 = vor.u32 1.1754944e-38, %v8903_v5  ;;  %vm8902_vm8 = vcmp.eq.f32.partialorder %v8901_v38, 8.507059e+37 }
0x12fd   :  { %v11831_v0 = vpop.eup %11830 }
0x12fe   :  { %v8893_v13 = vmul.f32 %v11831_v0, %v8891_v29  ;;  %vm8898_vm2 = vweird.f32 %v11831_v0 }
0x12ff   :  { %vm8899_vm7 = vmor %vm8897_vm4, %vm8898_vm2 }
0x1300   :  { %v8894_v50 = vsub.f32 1.0, %v8893_v13 }
0x1302   :  { %v8895_v24 = vmul.f32 %v11831_v0, %v8894_v50 }
0x1304   :  { %v8896_v35 = vadd.f32 %v11831_v0, %v8895_v24 }
0x1306   :  { %v8900_v52 = vsel %vm8899_vm7, %v11831_v0, %v8896_v35 }
0x1307   :  { %v8905_v39 = vsel %vm8902_vm8, %v8904_v57, %v8900_v52 }
0x1308   :  { %v8908_v54 = vmul.f32 %v8905_v39, %v15741_v40  ;;  %v8927_v40 = vld [vmem:[%s16621_s18 + $0x110] sm:$0xff] }
0x1309   :  { %8993 = vmatpush.msrb.mxu0 %v8927_v40 }
0x130b   :  { %9073 = vmatpush.msra.mxu0 %v8931_v26  ;;  %v15885_v26 = vld [vmem:[%s16619_s16] sm:$0xff] }
0x1365   :  { %v8911_v1 = vpop.permute.xlu1 %8910 }
0x1366   :  { %v8913_v9 = vmul.f32 %v8911_v1, %v8905_v39 }
0x1368   :  { %8915 = vrot.lane.b32.xlu2 %v8913_v9, %s11941_s6 }
0x13c2   :  { %v8916_v16 = vpop.permute.xlu2 %8915 }
0x13c3   :  { %v15795_v3 = vadd.f32 %v8916_v16, %v8908_v54  ;;  %v9186_v16 = vld [vmem:[%s16621_s18 + $0x140] sm:$0xff] }
0x13c5   :  { %11832 = vtanh.f32 %v15795_v3 }
0x13cb   :  { %v11833_v25 = vpop.eup %11832 }
0x13cc   :  { %8921 = vrot.lane.b32.xlu1 %v11833_v25, %s11941_s6  ;;  %v9187_v25 = vld [vmem:[%s16621_s18 + $0x148] sm:$0xff] }
0x143e   :  { %v8922_v53 = vpop.permute.xlu1 %8921 }
0x143f   :  { %v8924_v42 = vmul.f32 %v8922_v53, %v8905_v39  ;;  %v9191_v53 = vld [vmem:[%s16621_s18 + $0x168] sm:$0xff] }
0x1441   :  { %8934 = vrot.lane.b32.xlu2 %v8924_v42, %s11942_s11  ;;  %v9192_v42 = vld [vmem:[%s16621_s18 + $0x170] sm:$0xff] }
0x149b   :  { %v8935_v30 = vpop.permute.xlu2 %8934 }
0x149c   :  { %11658 = vmatmul.msk.f32.vlgmr.msrb.gmra.mxu1 %vm7813_vm5, %v8935_v30  ;;  %11659 = vmatmul.msk.f32.vlgmr.msra.gmra.mxu2 %vm7813_vm5, %v8935_v30 }
0x149d   :  { %11660 = vmatmul.msk.f32.vlgmr.msrb.gmra.mxu0 %vm7813_vm5, %v8935_v30  ;;  %11661 = vmatmul.msk.f32.vlgmr.msrb.gmra.mxu3 %vm7813_vm5, %v8935_v30 }
0x149e   :  { %9142 = vmatpush.msrb.mxu1 %v15519_v23  ;;  %9214 = vmatpush.msra.mxu2 %v9186_v16 }
0x149f   :  { %9234 = vmatpush.msrb.mxu0 %v9187_v25  ;;  %v9447_v25 = vld [vmem:[%s16621_s18 + $0x180] sm:$0xff] }
0x14a4   :  { %11662 = vmatmul.msk.f32.vlgmr.msra.gmra.mxu1 %vm7813_vm5, %v8935_v30  ;;  %11663 = vmatmul.msk.f32.vlgmr.msrb.gmra.mxu2 %vm7813_vm5, %v8935_v30 }
0x14a5   :  { %11664 = vmatmul.msk.f32.vlgmr.msra.gmra.mxu0 %vm7813_vm5, %v8935_v30  ;;  %11665 = vmatmul.msk.f32.vlgmr.msra.gmra.mxu3 %vm7813_vm5, %v8935_v30 }
0x14a6   :  { %9274 = vmatpush.msra.mxu1 %v9189_v59  ;;  %9294 = vmatpush.msrb.mxu2 %v9190_v47  ;;  %v9450_v59 = vld [vmem:[%s16621_s18 + $0x198] sm:$0xff]  ;;  %v9451_v47 = vld [vmem:[%s16621_s18 + $0x1a0] sm:$0xff] }
0x14a7   :  { %9314 = vmatpush.msra.mxu0 %v9191_v53  ;;  %v9452_v53 = vld [vmem:[%s16621_s18 + $0x1a8] sm:$0xff] }
0x14ac   :  { %11666 = vmatmul.msk.f32.vlgmr.msrb.gmra.mxu1 %vm7813_vm5, %v8935_v30 }
0x14ad   :  { %9354 = vmatpush.msrb.mxu1 %v9193_v7  ;;  %v9454_v7 = vld [vmem:[%s16621_s18 + $0x1b8] sm:$0xff] }
0x1519   :  { %v8955_v4 = vpop.f32.mrf.mxu1 }
0x151a   :  { %v8995_v41 = vpop.f32.mrf.mxu0 }
0x151b   :  { %v9107_v14 = vrot.slane %v8995_v41, 6 }
0x151f   :  { %v8975_v8 = vpop.f32.mrf.mxu2 }
0x1520   :  { %v9106_v58 = vrot.slane %v8975_v8, 7  ;;  %v9015_v28 = vpop.f32.mrf.mxu3 }
0x1521   :  { %v9108_v63 = vrot.slane %v9015_v28, 5  ;;  %v9035_v37 = vpop.f32.mrf.mxu1 }
0x1522   :  { %v9113_v23 = vsel %vm7143_vm15, %v8955_v4, %v9106_v58  ;;  %v9075_v17 = vpop.f32.mrf.mxu0  ;;  %v9109_v56 = vrot.slane %v9035_v37, 4 }
0x1523   :  { %v9114_v22 = vsel %vm8065_vm12, %v9107_v14, %v9108_v63  ;;  %v9111_v51 = vrot.slane %v9075_v17, 2 }
0x1524   :  { %v9115_v11 = vsel %vm8067_vm14, %v9113_v23, %v9114_v22 }
0x1527   :  { %v9055_v10 = vpop.f32.mrf.mxu2 }
0x1528   :  { %v9110_v55 = vrot.slane %v9055_v10, 3  ;;  %v9095_v46 = vpop.f32.mrf.mxu3 }
0x1529   :  { %v9112_v45 = vrot.slane %v9095_v46, 1  ;;  %v9144_v34 = vpop.f32.mrf.mxu1  ;;  %v9385_v46 = vpop.permute.xlu0 %9384 }
0x152a   :  { %v9116_v48 = vsel %vm8069_vm13, %v9109_v56, %v9110_v55  ;;  %v9147_v18 = vadd.f32 %v9144_v34, %v9126_v12 }
0x152b   :  { %v9117_v44 = vsel %vm8071_vm3, %v9111_v51, %v9112_v45 }
0x152c   :  { %v9118_v43 = vsel %vm8073_vm11, %v9116_v48, %v9117_v44  ;;  %v9148_v49 = vadd.f32 %v9147_v18, %v15541_v15  ;;  %v15903_v48 = vld [vmem:[%s16618_s15] sm:$0x1] }
0x152d   :  { %v9119_v60 = vsel %vm7778_vm0, %v9115_v11, %v9118_v43  ;;  %v9387_v18 = vmul.f32 %v15903_v48, %v9385_v46 }
0x152e   :  { %v15844_v36 = vadd.f32 %v9119_v60, %v15789_v21  ;;  %11834 = vtanh.f32 %v9148_v49  ;;  %v11667_v27 = vmul.f32 -1.442695, %v9148_v49  ;;  %v15912_v60 = vld [vmem:[%s16620_s17] sm:$0x1] }
0x1530   :  { %11836 = vpow2.f32 %v11667_v27 }
0x1534   :  { %v11835_v2 = vpop.eup %11834 }
0x1535   :  { %9171 = vrot.lane.b32.xlu1 %v11835_v2, %s11939_s14 }
0x1536   :  { %v11837_v6 = vpop.eup %11836 }
0x1537   :  { %v9152_v31 = vadd.f32 1.0, %v11837_v6 }
0x1539   :  { %11838 = vrcp.f32 %v9152_v31  ;;  %v9164_v15 = vand.u32 2147483648, %v9152_v31  ;;  %vm9158_vm10 = vweird.f32 %v9152_v31  ;;  %v9162_v35 = vand.u32 2147483647, %v9152_v31 }
0x153b   :  { %v9165_v5 = vor.u32 1.1754944e-38, %v9164_v15  ;;  %vm9163_vm2 = vcmp.eq.f32.partialorder %v9162_v35, 8.507059e+37 }
0x153f   :  { %v11839_v29 = vpop.eup %11838 }
0x1540   :  { %v9154_v0 = vmul.f32 %v11839_v29, %v9152_v31  ;;  %vm9159_vm9 = vweird.f32 %v11839_v29 }
0x1541   :  { %vm9160_vm1 = vmor %vm9158_vm10, %vm9159_vm9 }
0x1542   :  { %v9155_v13 = vsub.f32 1.0, %v9154_v0 }
0x1544   :  { %v9156_v50 = vmul.f32 %v11839_v29, %v9155_v13 }
0x1546   :  { %v9157_v24 = vadd.f32 %v11839_v29, %v9156_v50 }
0x1548   :  { %v9161_v21 = vsel %vm9160_vm1, %v11839_v29, %v9157_v24 }
0x1549   :  { %v9166_v52 = vsel %vm9163_vm2, %v9165_v5, %v9161_v21 }
0x154a   :  { %v9169_v1 = vmul.f32 %v9166_v52, %v15795_v3  ;;  %v9188_v3 = vld [vmem:[%s16621_s18 + $0x150] sm:$0xff] }
0x154b   :  { %9254 = vmatpush.msrb.mxu3 %v9188_v3  ;;  %v9448_v3 = vld [vmem:[%s16621_s18 + $0x188] sm:$0xff] }
0x154d   :  { %9334 = vmatpush.msra.mxu3 %v9192_v42  ;;  %v9453_v42 = vld [vmem:[%s16621_s18 + $0x1b0] sm:$0xff] }
0x15a7   :  { %v9172_v38 = vpop.permute.xlu1 %9171 }
0x15a8   :  { %v9174_v57 = vmul.f32 %v9172_v38, %v9166_v52 }
0x15aa   :  { %9176 = vrot.lane.b32.xlu2 %v9174_v57, %s11941_s6 }
0x1604   :  { %v9177_v39 = vpop.permute.xlu2 %9176 }
0x1605   :  { %v15849_v9 = vadd.f32 %v9177_v39, %v9169_v1 }
0x1607   :  { %11840 = vtanh.f32 %v15849_v9 }
0x160d   :  { %v11841_v54 = vpop.eup %11840 }
0x160e   :  { %9182 = vrot.lane.b32.xlu1 %v11841_v54, %s11941_s6 }
0x1680   :  { %v9183_v33 = vpop.permute.xlu1 %9182 }
0x1681   :  { %v9185_v40 = vmul.f32 %v9183_v33, %v9166_v52 }
0x1683   :  { %9195 = vrot.lane.b32.xlu2 %v9185_v40, %s11942_s11 }
0x16dd   :  { %v9196_v62 = vpop.permute.xlu2 %9195 }
0x16de   :  { %11668 = vmatmul.msk.f32.vlgmr.msra.gmra.mxu2 %vm7813_vm5, %v9196_v62  ;;  %11669 = vmatmul.msk.f32.vlgmr.msrb.gmra.mxu0 %vm7813_vm5, %v9196_v62 }
0x16df   :  { %11670 = vmatmul.msk.f32.vlgmr.msrb.gmra.mxu3 %vm7813_vm5, %v9196_v62  ;;  %11671 = vmatmul.msk.f32.vlgmr.msra.gmra.mxu1 %vm7813_vm5, %v9196_v62 }
0x16e0   :  { %9403 = vmatpush.msra.mxu2 %v15885_v26  ;;  %9475 = vmatpush.msrb.mxu0 %v9447_v25 }
0x16e1   :  { %9495 = vmatpush.msrb.mxu3 %v9448_v3  ;;  %v9708_v3 = vld [vmem:[%s16621_s18 + $0x1c0] sm:$0xff] }
0x16e6   :  { %11672 = vmatmul.msk.f32.vlgmr.msrb.gmra.mxu2 %vm7813_vm5, %v9196_v62  ;;  %11673 = vmatmul.msk.f32.vlgmr.msra.gmra.mxu0 %vm7813_vm5, %v9196_v62 }
0x16e7   :  { %11674 = vmatmul.msk.f32.vlgmr.msra.gmra.mxu3 %vm7813_vm5, %v9196_v62  ;;  %11675 = vmatmul.msk.f32.vlgmr.msrb.gmra.mxu1 %vm7813_vm5, %v9196_v62 }
0x16e8   :  { %9535 = vmatpush.msrb.mxu2 %v9450_v59  ;;  %9555 = vmatpush.msra.mxu0 %v9451_v47  ;;  %v9711_v59 = vld [vmem:[%s16621_s18 + $0x1d8] sm:$0xff]  ;;  %v9712_v47 = vld [vmem:[%s16621_s18 + $0x1e0] sm:$0xff] }
0x16e9   :  { %9575 = vmatpush.msra.mxu3 %v9452_v53  ;;  %v9713_v53 = vld [vmem:[%s16621_s18 + $0x1e8] sm:$0xff] }
0x16ee   :  { %11676 = vmatmul.msk.f32.vlgmr.msra.gmra.mxu2 %vm7813_vm5, %v9196_v62 }
0x16ef   :  { %9615 = vmatpush.msra.mxu2 %v9454_v7  ;;  %v9715_v7 = vld [vmem:[%s16621_s18 + $0x1f8] sm:$0xff] }
0x175b   :  { %v9236_v32 = vpop.f32.mrf.mxu0 }
0x175c   :  { %v9276_v30 = vpop.f32.mrf.mxu1  ;;  %v9367_v4 = vrot.slane %v9236_v32, 7 }
0x175d   :  { %v9369_v28 = vrot.slane %v9276_v30, 5 }
0x1761   :  { %v9216_v41 = vpop.f32.mrf.mxu2 }
0x1762   :  { %v9374_v8 = vsel %vm7143_vm15, %v9216_v41, %v9367_v4  ;;  %v9256_v58 = vpop.f32.mrf.mxu3 }
0x1763   :  { %v9368_v14 = vrot.slane %v9256_v58, 6  ;;  %v9316_v23 = vpop.f32.mrf.mxu0 }
0x1764   :  { %v9356_v22 = vpop.f32.mrf.mxu1  ;;  %v9371_v61 = vrot.slane %v9316_v23, 3 }
0x1765   :  { %v9375_v63 = vsel %vm8065_vm12, %v9368_v14, %v9369_v28  ;;  %v9373_v12 = vrot.slane %v9356_v22, 1  ;;  %v9646_v22 = vpop.permute.xlu0 %9645 }
0x1766   :  { %v9376_v37 = vsel %vm8067_vm14, %v9374_v8, %v9375_v63 }
0x1769   :  { %v9296_v11 = vpop.f32.mrf.mxu2 }
0x176a   :  { %v9370_v17 = vrot.slane %v9296_v11, 4  ;;  %v9336_v10 = vpop.f32.mrf.mxu3 }
0x176b   :  { %v9372_v56 = vrot.slane %v9336_v10, 2 }
0x176c   :  { %v9377_v55 = vsel %vm8069_vm13, %v9370_v17, %v9371_v61  ;;  %v9648_v17 = vmul.f32 %v15903_v48, %v9646_v22 }
0x176d   :  { %v9378_v51 = vsel %vm8071_vm3, %v9372_v56, %v9373_v12 }
0x176e   :  { %v9379_v45 = vsel %vm8073_vm11, %v9377_v55, %v9378_v51 }
0x176f   :  { %v9380_v34 = vsel %vm7778_vm0, %v9376_v37, %v9379_v45 }
0x1770   :  { %v15907_v44 = vadd.f32 %v9380_v34, %v15844_v36 }
0x1771   :  { %v9405_v43 = vpop.f32.mrf.mxu2 }
0x1772   :  { %v9408_v49 = vadd.f32 %v9405_v43, %v9387_v18 }
0x1774   :  { %v9409_v2 = vadd.f32 %v15912_v60, %v9408_v49 }
0x1776   :  { %11842 = vtanh.f32 %v9409_v2  ;;  %v11677_v6 = vmul.f32 -1.442695, %v9409_v2 }
0x1778   :  { %11844 = vpow2.f32 %v11677_v6 }
0x177c   :  { %v11843_v27 = vpop.eup %11842 }
0x177d   :  { %9432 = vrot.lane.b32.xlu1 %v11843_v27, %s11939_s14 }
0x177e   :  { %v11845_v31 = vpop.eup %11844 }
0x177f   :  { %v9413_v29 = vadd.f32 1.0, %v11845_v31 }
0x1781   :  { %11846 = vrcp.f32 %v9413_v29  ;;  %v9425_v15 = vand.u32 2147483648, %v9413_v29  ;;  %vm9419_vm7 = vweird.f32 %v9413_v29  ;;  %v9423_v35 = vand.u32 2147483647, %v9413_v29 }
0x1783   :  { %v9426_v5 = vor.u32 1.1754944e-38, %v9425_v15  ;;  %vm9424_vm9 = vcmp.eq.f32.partialorder %v9423_v35, 8.507059e+37 }
0x1787   :  { %v11847_v36 = vpop.eup %11846 }
0x1788   :  { %v9415_v0 = vmul.f32 %v11847_v36, %v9413_v29  ;;  %vm9420_vm4 = vweird.f32 %v11847_v36 }
0x1789   :  { %vm9421_vm8 = vmor %vm9419_vm7, %vm9420_vm4 }
0x178a   :  { %v9416_v13 = vsub.f32 1.0, %v9415_v0 }
0x178c   :  { %v9417_v50 = vmul.f32 %v11847_v36, %v9416_v13 }
0x178e   :  { %v9418_v24 = vadd.f32 %v11847_v36, %v9417_v50 }
0x1790   :  { %v9422_v21 = vsel %vm9421_vm8, %v11847_v36, %v9418_v24 }
0x1791   :  { %v9427_v52 = vsel %vm9424_vm9, %v9426_v5, %v9422_v21 }
0x1792   :  { %v9430_v1 = vmul.f32 %v9427_v52, %v15849_v9  ;;  %v9449_v9 = vld [vmem:[%s16621_s18 + $0x190] sm:$0xff] }
0x1793   :  { %9515 = vmatpush.msra.mxu1 %v9449_v9  ;;  %v9709_v9 = vld [vmem:[%s16621_s18 + $0x1c8] sm:$0xff] }
0x1795   :  { %9595 = vmatpush.msrb.mxu1 %v9453_v42  ;;  %v9714_v42 = vld [vmem:[%s16621_s18 + $0x1f0] sm:$0xff] }
0x17ef   :  { %v9433_v38 = vpop.permute.xlu1 %9432 }
0x17f0   :  { %v9435_v57 = vmul.f32 %v9433_v38, %v9427_v52 }
0x17f2   :  { %9437 = vrot.lane.b32.xlu2 %v9435_v57, %s11941_s6 }
0x184c   :  { %v9438_v39 = vpop.permute.xlu2 %9437 }
0x184d   :  { %v15918_v54 = vadd.f32 %v9438_v39, %v9430_v1 }
0x184f   :  { %11848 = vtanh.f32 %v15918_v54 }
0x1855   :  { %v11849_v16 = vpop.eup %11848 }
0x1856   :  { %9443 = vrot.lane.b32.xlu1 %v11849_v16, %s11941_s6 }
0x18c8   :  { %v9444_v33 = vpop.permute.xlu1 %9443 }
0x18c9   :  { %v9446_v40 = vmul.f32 %v9444_v33, %v9427_v52 }
0x18cb   :  { %9456 = vrot.lane.b32.xlu2 %v9446_v40, %s11942_s11 }
0x1925   :  { %v9457_v62 = vpop.permute.xlu2 %9456 }
0x1926   :  { %11678 = vmatmul.msk.f32.vlgmr.msrb.gmra.mxu0 %vm7813_vm5, %v9457_v62  ;;  %11679 = vmatmul.msk.f32.vlgmr.msrb.gmra.mxu3 %vm7813_vm5, %v9457_v62 }
0x1927   :  { %11680 = vmatmul.msk.f32.vlgmr.msra.gmra.mxu1 %vm7813_vm5, %v9457_v62  ;;  %11681 = vmatmul.msk.f32.vlgmr.msrb.gmra.mxu2 %vm7813_vm5, %v9457_v62 }
0x1928   :  { %9664 = vmatpush.msrb.mxu0 %v15885_v26  ;;  %9736 = vmatpush.msrb.mxu3 %v9708_v3 }
0x1929   :  { %9756 = vmatpush.msra.mxu1 %v9709_v9  ;;  %v9971_v9 = vld [vmem:[%s16621_s18 + $0x200] sm:$0xff] }
0x192e   :  { %11682 = vmatmul.msk.f32.vlgmr.msra.gmra.mxu0 %vm7813_vm5, %v9457_v62  ;;  %11683 = vmatmul.msk.f32.vlgmr.msra.gmra.mxu3 %vm7813_vm5, %v9457_v62 }
0x192f   :  { %11684 = vmatmul.msk.f32.vlgmr.msrb.gmra.mxu1 %vm7813_vm5, %v9457_v62  ;;  %11685 = vmatmul.msk.f32.vlgmr.msra.gmra.mxu2 %vm7813_vm5, %v9457_v62 }
0x1930   :  { %9796 = vmatpush.msra.mxu0 %v9711_v59  ;;  %9816 = vmatpush.msra.mxu3 %v9712_v47  ;;  %v9974_v59 = vld [vmem:[%s16621_s18 + $0x218] sm:$0xff] }
0x1931   :  { %9836 = vmatpush.msrb.mxu1 %v9713_v53  ;;  %v9975_v53 = vld [vmem:[%s16621_s18 + $0x220] sm:$0xff] }
0x1936   :  { %11686 = vmatmul.msk.f32.vlgmr.msrb.gmra.mxu0 %vm7813_vm5, %v9457_v62  ;;  %v7805_v62 = vld [vmem:[%s16908_s13] sm:$0x1] }
0x1937   :  { %9876 = vmatpush.msrb.mxu0 %v9715_v7  ;;  %9907 = vperm.xlu0 %11791, %v7805_v62   ;;  %v9977_v7 = vld [vmem:[%s16621_s18 + $0x230] sm:$0xff] }
0x193f   :  { %11792 = vset.pattern.permute.xlu0 %v11940_v19 }
0x1940   :  { %10170 = vperm.xlu0 %11792, %v7805_v62  }
0x1948   :  { %11793 = vset.pattern.permute.xlu0 %v11943_v20 }
0x1949   :  { %10433 = vperm.xlu0 %11793, %v7805_v62   ;;  %v9978_v62 = vld [vmem:[%s16621_s18 + $0x238] sm:$0xff] }
0x19a3   :  { %v9477_v32 = vpop.f32.mrf.mxu0 }
0x19a4   :  { %v9517_v30 = vpop.f32.mrf.mxu1 }
0x19a5   :  { %v9629_v58 = vrot.slane %v9517_v30, 6 }
0x19a9   :  { %v9497_v4 = vpop.f32.mrf.mxu3 }
0x19aa   :  { %v9628_v41 = vrot.slane %v9497_v4, 7  ;;  %v9537_v8 = vpop.f32.mrf.mxu2 }
0x19ab   :  { %v9630_v28 = vrot.slane %v9537_v8, 5  ;;  %v9557_v14 = vpop.f32.mrf.mxu0 }
0x19ac   :  { %v9635_v63 = vsel %vm7143_vm15, %v9477_v32, %v9628_v41  ;;  %v9597_v11 = vpop.f32.mrf.mxu1  ;;  %v9631_v10 = vrot.slane %v9557_v14, 4 }
0x19ad   :  { %v9636_v37 = vsel %vm8065_vm12, %v9629_v58, %v9630_v28  ;;  %v9633_v55 = vrot.slane %v9597_v11, 2 }
0x19ae   :  { %v9637_v23 = vsel %vm8067_vm14, %v9635_v63, %v9636_v37 }
0x19b1   :  { %v9577_v61 = vpop.f32.mrf.mxu3 }
0x19b2   :  { %v9632_v12 = vrot.slane %v9577_v61, 3  ;;  %v9617_v56 = vpop.f32.mrf.mxu2 }
0x19b3   :  { %v9634_v46 = vrot.slane %v9617_v56, 1  ;;  %v9666_v51 = vpop.f32.mrf.mxu0 }
0x19b4   :  { %v9638_v45 = vsel %vm8069_vm13, %v9631_v10, %v9632_v12  ;;  %v9669_v34 = vadd.f32 %v9666_v51, %v9648_v17 }
0x19b5   :  { %v9639_v18 = vsel %vm8071_vm3, %v9633_v55, %v9634_v46 }
0x19b6   :  { %v9640_v43 = vsel %vm8073_vm11, %v9638_v45, %v9639_v18  ;;  %v9670_v49 = vadd.f32 %v15912_v60, %v9669_v34 }
0x19b7   :  { %v9641_v2 = vsel %vm7778_vm0, %v9637_v23, %v9640_v43  ;;  %v9908_v23 = vpop.permute.xlu0 %9907 }
0x19b8   :  { %v15967_v27 = vadd.f32 %v9641_v2, %v15907_v44  ;;  %11850 = vtanh.f32 %v9670_v49  ;;  %v11687_v31 = vmul.f32 -1.442695, %v9670_v49  ;;  %v9910_v12 = vperm.slane %v9908_v23, 0 }
0x19ba   :  { %11852 = vpow2.f32 %v11687_v31  ;;  %v9911_v34 = vmul.f32 %v15903_v48, %v9910_v12 }
0x19be   :  { %v11851_v6 = vpop.eup %11850 }
0x19bf   :  { %9693 = vrot.lane.b32.xlu1 %v11851_v6, %s11939_s14 }
0x19c0   :  { %v11853_v29 = vpop.eup %11852 }
0x19c1   :  { %v9674_v36 = vadd.f32 1.0, %v11853_v29 }
0x19c3   :  { %11854 = vrcp.f32 %v9674_v36  ;;  %v9686_v35 = vand.u32 2147483648, %v9674_v36  ;;  %vm9680_vm1 = vweird.f32 %v9674_v36  ;;  %v9684_v21 = vand.u32 2147483647, %v9674_v36 }
0x19c5   :  { %v9687_v5 = vor.u32 1.1754944e-38, %v9686_v35  ;;  %vm9685_vm4 = vcmp.eq.f32.partialorder %v9684_v21, 8.507059e+37 }
0x19c9   :  { %v11855_v0 = vpop.eup %11854 }
0x19ca   :  { %v9676_v13 = vmul.f32 %v11855_v0, %v9674_v36  ;;  %vm9681_vm10 = vweird.f32 %v11855_v0 }
0x19cb   :  { %vm9682_vm2 = vmor %vm9680_vm1, %vm9681_vm10 }
0x19cc   :  { %v9677_v50 = vsub.f32 1.0, %v9676_v13 }
0x19ce   :  { %v9678_v24 = vmul.f32 %v11855_v0, %v9677_v50 }
0x19d0   :  { %v9679_v15 = vadd.f32 %v11855_v0, %v9678_v24 }
0x19d2   :  { %v9683_v44 = vsel %vm9682_vm2, %v11855_v0, %v9679_v15 }
0x19d3   :  { %v9688_v52 = vsel %vm9685_vm4, %v9687_v5, %v9683_v44 }
0x19d4   :  { %v9691_v1 = vmul.f32 %v9688_v52, %v15918_v54  ;;  %v9710_v54 = vld [vmem:[%s16621_s18 + $0x1d0] sm:$0xff] }
0x19d5   :  { %9776 = vmatpush.msrb.mxu2 %v9710_v54  ;;  %v9972_v54 = vld [vmem:[%s16621_s18 + $0x208] sm:$0xff] }
0x19d7   :  { %9856 = vmatpush.msra.mxu2 %v9714_v42  ;;  %v9976_v42 = vld [vmem:[%s16621_s18 + $0x228] sm:$0xff] }
0x1a31   :  { %v9694_v38 = vpop.permute.xlu1 %9693 }
0x1a32   :  { %v9696_v57 = vmul.f32 %v9694_v38, %v9688_v52 }
0x1a34   :  { %9698 = vrot.lane.b32.xlu2 %v9696_v57, %s11941_s6 }
0x1a8e   :  { %v9699_v39 = vpop.permute.xlu2 %9698 }
0x1a8f   :  { %v15972_v16 = vadd.f32 %v9699_v39, %v9691_v1 }
0x1a91   :  { %11856 = vtanh.f32 %v15972_v16 }
0x1a97   :  { %v11857_v25 = vpop.eup %11856 }
0x1a98   :  { %9704 = vrot.lane.b32.xlu1 %v11857_v25, %s11941_s6 }
0x1b0a   :  { %v9705_v33 = vpop.permute.xlu1 %9704 }
0x1b0b   :  { %v9707_v40 = vmul.f32 %v9705_v33, %v9688_v52 }
0x1b0d   :  { %9717 = vrot.lane.b32.xlu2 %v9707_v40, %s11942_s11 }
0x1b67   :  { %v9718_v32 = vpop.permute.xlu2 %9717 }
0x1b68   :  { %11688 = vmatmul.msk.f32.vlgmr.msrb.gmra.mxu3 %vm7813_vm5, %v9718_v32  ;;  %11689 = vmatmul.msk.f32.vlgmr.msra.gmra.mxu1 %vm7813_vm5, %v9718_v32 }
0x1b69   :  { %11690 = vmatmul.msk.f32.vlgmr.msrb.gmra.mxu2 %vm7813_vm5, %v9718_v32  ;;  %11691 = vmatmul.msk.f32.vlgmr.msra.gmra.mxu0 %vm7813_vm5, %v9718_v32 }
0x1b6a   :  { %9927 = vmatpush.msrb.mxu3 %v15885_v26  ;;  %10000 = vmatpush.msra.mxu1 %v9971_v9 }
0x1b6b   :  { %10020 = vmatpush.msrb.mxu2 %v9972_v54  ;;  %v10234_v54 = vld [vmem:[%s16621_s18 + $0x240] sm:$0xff] }
0x1b70   :  { %11692 = vmatmul.msk.f32.vlgmr.msra.gmra.mxu3 %vm7813_vm5, %v9718_v32  ;;  %11693 = vmatmul.msk.f32.vlgmr.msrb.gmra.mxu1 %vm7813_vm5, %v9718_v32 }
0x1b71   :  { %11694 = vmatmul.msk.f32.vlgmr.msra.gmra.mxu2 %vm7813_vm5, %v9718_v32  ;;  %11695 = vmatmul.msk.f32.vlgmr.msrb.gmra.mxu0 %vm7813_vm5, %v9718_v32 }
0x1b72   :  { %10060 = vmatpush.msra.mxu3 %v9974_v59  ;;  %10080 = vmatpush.msrb.mxu1 %v9975_v53  ;;  %v10237_v59 = vld [vmem:[%s16621_s18 + $0x258] sm:$0xff]  ;;  %v10238_v53 = vld [vmem:[%s16621_s18 + $0x260] sm:$0xff] }
0x1b73   :  { %10100 = vmatpush.msra.mxu2 %v9976_v42  ;;  %v10239_v42 = vld [vmem:[%s16621_s18 + $0x268] sm:$0xff] }
0x1b78   :  { %11696 = vmatmul.msk.f32.vlgmr.msrb.gmra.mxu3 %vm7813_vm5, %v9718_v32 }
0x1b79   :  { %10140 = vmatpush.msrb.mxu3 %v9978_v62  ;;  %v10241_v62 = vld [vmem:[%s16621_s18 + $0x278] sm:$0xff] }
0x1be5   :  { %v9758_v19 = vpop.f32.mrf.mxu1 }
0x1be6   :  { %v9798_v30 = vpop.f32.mrf.mxu0  ;;  %v9889_v4 = vrot.slane %v9758_v19, 7 }
0x1be7   :  { %v9891_v28 = vrot.slane %v9798_v30, 5 }
0x1beb   :  { %v9738_v41 = vpop.f32.mrf.mxu3 }
0x1bec   :  { %v9896_v8 = vsel %vm7143_vm15, %v9738_v41, %v9889_v4  ;;  %v9778_v58 = vpop.f32.mrf.mxu2  ;;  %v10171_v41 = vpop.permute.xlu0 %10170 }
0x1bed   :  { %v9890_v20 = vrot.slane %v9778_v58, 6  ;;  %v9838_v37 = vpop.f32.mrf.mxu1 }
0x1bee   :  { %v9878_v22 = vpop.f32.mrf.mxu0  ;;  %v9893_v61 = vrot.slane %v9838_v37, 3 }
0x1bef   :  { %v9897_v14 = vsel %vm8065_vm12, %v9890_v20, %v9891_v28  ;;  %v9895_v56 = vrot.slane %v9878_v22, 1 }
0x1bf0   :  { %v9898_v63 = vsel %vm8067_vm14, %v9896_v8, %v9897_v14  ;;  %v10173_v14 = vperm.slane %v10171_v41, 0 }
0x1bf2   :  { %v10174_v23 = vmul.f32 %v15903_v48, %v10173_v14 }
0x1bf3   :  { %v9818_v11 = vpop.f32.mrf.mxu3 }
0x1bf4   :  { %v9892_v17 = vrot.slane %v9818_v11, 4  ;;  %v9858_v10 = vpop.f32.mrf.mxu2 }
0x1bf5   :  { %v9894_v55 = vrot.slane %v9858_v10, 2 }
0x1bf6   :  { %v9899_v46 = vsel %vm8069_vm13, %v9892_v17, %v9893_v61 }
0x1bf7   :  { %v9900_v51 = vsel %vm8071_vm3, %v9894_v55, %v9895_v56 }
0x1bf8   :  { %v9901_v45 = vsel %vm8073_vm11, %v9899_v46, %v9900_v51 }
0x1bf9   :  { %v9902_v18 = vsel %vm7778_vm0, %v9898_v63, %v9901_v45 }
0x1bfa   :  { %v16025_v43 = vadd.f32 %v9902_v18, %v15967_v27 }
0x1bfb   :  { %v9929_v49 = vpop.f32.mrf.mxu3 }
0x1bfc   :  { %v9932_v2 = vadd.f32 %v9929_v49, %v9911_v34 }
0x1bfe   :  { %v9933_v6 = vadd.f32 %v15912_v60, %v9932_v2 }
0x1c00   :  { %11858 = vtanh.f32 %v9933_v6  ;;  %v11697_v29 = vmul.f32 -1.442695, %v9933_v6 }
0x1c02   :  { %11860 = vpow2.f32 %v11697_v29 }
0x1c06   :  { %v11859_v31 = vpop.eup %11858 }
0x1c07   :  { %9956 = vrot.lane.b32.xlu1 %v11859_v31, %s11939_s14 }
0x1c08   :  { %v11861_v36 = vpop.eup %11860 }
0x1c09   :  { %v9937_v0 = vadd.f32 1.0, %v11861_v36 }
0x1c0b   :  { %11862 = vrcp.f32 %v9937_v0  ;;  %v9949_v27 = vand.u32 2147483648, %v9937_v0  ;;  %vm9943_vm8 = vweird.f32 %v9937_v0  ;;  %v9947_v21 = vand.u32 2147483647, %v9937_v0 }
0x1c0d   :  { %v9950_v5 = vor.u32 1.1754944e-38, %v9949_v27  ;;  %vm9948_vm10 = vcmp.eq.f32.partialorder %v9947_v21, 8.507059e+37 }
0x1c11   :  { %v11863_v13 = vpop.eup %11862 }
0x1c12   :  { %v9939_v50 = vmul.f32 %v11863_v13, %v9937_v0  ;;  %vm9944_vm7 = vweird.f32 %v11863_v13 }
0x1c13   :  { %vm9945_vm9 = vmor %vm9943_vm8, %vm9944_vm7 }
0x1c14   :  { %v9940_v24 = vsub.f32 1.0, %v9939_v50 }
0x1c16   :  { %v9941_v15 = vmul.f32 %v11863_v13, %v9940_v24 }
0x1c18   :  { %v9942_v35 = vadd.f32 %v11863_v13, %v9941_v15 }
0x1c1a   :  { %v9946_v44 = vsel %vm9945_vm9, %v11863_v13, %v9942_v35 }
0x1c1b   :  { %v9951_v52 = vsel %vm9948_vm10, %v9950_v5, %v9946_v44 }
0x1c1c   :  { %v9954_v1 = vmul.f32 %v9951_v52, %v15972_v16  ;;  %v9973_v16 = vld [vmem:[%s16621_s18 + $0x210] sm:$0xff] }
0x1c1d   :  { %10040 = vmatpush.msra.mxu0 %v9973_v16  ;;  %v10235_v16 = vld [vmem:[%s16621_s18 + $0x248] sm:$0xff] }
0x1c1f   :  { %10120 = vmatpush.msrb.mxu0 %v9977_v7  ;;  %v10240_v7 = vld [vmem:[%s16621_s18 + $0x270] sm:$0xff] }
0x1c79   :  { %v9957_v38 = vpop.permute.xlu1 %9956 }
0x1c7a   :  { %v9959_v57 = vmul.f32 %v9957_v38, %v9951_v52 }
0x1c7c   :  { %9961 = vrot.lane.b32.xlu2 %v9959_v57, %s11941_s6 }
0x1cd6   :  { %v9962_v39 = vpop.permute.xlu2 %9961 }
0x1cd7   :  { %v16031_v25 = vadd.f32 %v9962_v39, %v9954_v1 }
0x1cd9   :  { %11864 = vtanh.f32 %v16031_v25 }
0x1cdf   :  { %v11865_v3 = vpop.eup %11864 }
0x1ce0   :  { %9967 = vrot.lane.b32.xlu1 %v11865_v3, %s11941_s6 }
0x1d52   :  { %v9968_v33 = vpop.permute.xlu1 %9967 }
0x1d53   :  { %v9970_v40 = vmul.f32 %v9968_v33, %v9951_v52 }
0x1d55   :  { %v9980_v47 = vperm.slane %v9970_v40, 0 }
0x1d57   :  { %9981 = vrot.lane.b32.xlu2 %v9980_v47, %s11942_s11 }
0x1db1   :  { %v9982_v32 = vpop.permute.xlu2 %9981 }
0x1db2   :  { %11698 = vmatmul.msk.f32.vlgmr.msra.gmra.mxu1 %vm7813_vm5, %v9982_v32  ;;  %11699 = vmatmul.msk.f32.vlgmr.msrb.gmra.mxu2 %vm7813_vm5, %v9982_v32 }
0x1db3   :  { %11700 = vmatmul.msk.f32.vlgmr.msra.gmra.mxu0 %vm7813_vm5, %v9982_v32  ;;  %11701 = vmatmul.msk.f32.vlgmr.msra.gmra.mxu3 %vm7813_vm5, %v9982_v32 }
0x1db4   :  { %10190 = vmatpush.msra.mxu1 %v15885_v26  ;;  %10263 = vmatpush.msrb.mxu2 %v10234_v54  ;;  %v10499_v54 = vld [vmem:[%s16621_s18 + $0x290] sm:$0xff] }
0x1db5   :  { %10283 = vmatpush.msra.mxu0 %v10235_v16 }
0x1dba   :  { %11702 = vmatmul.msk.f32.vlgmr.msrb.gmra.mxu1 %vm7813_vm5, %v9982_v32  ;;  %11703 = vmatmul.msk.f32.vlgmr.msra.gmra.mxu2 %vm7813_vm5, %v9982_v32 }
0x1dbb   :  { %11704 = vmatmul.msk.f32.vlgmr.msrb.gmra.mxu0 %vm7813_vm5, %v9982_v32  ;;  %11705 = vmatmul.msk.f32.vlgmr.msrb.gmra.mxu3 %vm7813_vm5, %v9982_v32 }
0x1dbc   :  { %10323 = vmatpush.msrb.mxu1 %v10237_v59  ;;  %10343 = vmatpush.msra.mxu2 %v10238_v53  ;;  %v10504_v53 = vld [vmem:[%s16621_s18 + $0x2b8] sm:$0xff] }
0x1dbd   :  { %10363 = vmatpush.msrb.mxu0 %v10239_v42 }
0x1dc2   :  { %11706 = vmatmul.msk.f32.vlgmr.msra.gmra.mxu1 %vm7813_vm5, %v9982_v32 }
0x1dc3   :  { %10403 = vmatpush.msra.mxu1 %v10241_v62  ;;  %v10727_v62 = vld [vmem:[%s16623_s20 + $0xf8] sm:$0xff] }
0x1e2f   :  { %v10002_v19 = vpop.f32.mrf.mxu1 }
0x1e30   :  { %v10042_v30 = vpop.f32.mrf.mxu0 }
0x1e31   :  { %v10154_v22 = vrot.slane %v10042_v30, 6 }
0x1e35   :  { %v10022_v4 = vpop.f32.mrf.mxu2 }
0x1e36   :  { %v10153_v8 = vrot.slane %v10022_v4, 7  ;;  %v10062_v58 = vpop.f32.mrf.mxu3 }
0x1e37   :  { %v10082_v28 = vpop.f32.mrf.mxu1  ;;  %v10155_v63 = vrot.slane %v10062_v58, 5 }
0x1e38   :  { %v10160_v20 = vsel %vm7143_vm15, %v10002_v19, %v10153_v8  ;;  %v10122_v37 = vpop.f32.mrf.mxu0  ;;  %v10156_v61 = vrot.slane %v10082_v28, 4  ;;  %v10434_v28 = vpop.permute.xlu0 %10433 }
0x1e39   :  { %v10161_v12 = vsel %vm8065_vm12, %v10154_v22, %v10155_v63  ;;  %v10158_v56 = vrot.slane %v10122_v37, 2  ;;  %v10436_v22 = vperm.slane %v10434_v28, 0  ;;  %v10725_v28 = vld [vmem:[%s16623_s20 + $0xe8] sm:$0xff] }
0x1e3a   :  { %v10162_v18 = vsel %vm8067_vm14, %v10160_v20, %v10161_v12 }
0x1e3d   :  { %v10102_v11 = vpop.f32.mrf.mxu2 }
0x1e3e   :  { %v10157_v17 = vrot.slane %v10102_v11, 3  ;;  %v10142_v10 = vpop.f32.mrf.mxu3 }
0x1e3f   :  { %v10159_v55 = vrot.slane %v10142_v10, 1  ;;  %v10192_v46 = vpop.f32.mrf.mxu1 }
0x1e40   :  { %v10163_v51 = vsel %vm8069_vm13, %v10156_v61, %v10157_v17  ;;  %v10195_v45 = vadd.f32 %v10192_v46, %v10174_v23 }
0x1e41   :  { %v10164_v34 = vsel %vm8071_vm3, %v10158_v56, %v10159_v55 }
0x1e42   :  { %v10165_v49 = vsel %vm8073_vm11, %v10163_v51, %v10164_v34  ;;  %v10196_v2 = vadd.f32 %v15912_v60, %v10195_v45  ;;  %v10437_v45 = vmul.f32 %v15903_v48, %v10436_v22  ;;  %v10707_v22 = vld [vmem:[%s16623_s20 + $0x58] sm:$0xff] }
0x1e43   :  { %v10166_v6 = vsel %vm7778_vm0, %v10162_v18, %v10165_v49 }
0x1e44   :  { %v16080_v31 = vadd.f32 %v10166_v6, %v16025_v43  ;;  %11866 = vtanh.f32 %v10196_v2  ;;  %v11707_v36 = vmul.f32 -1.442695, %v10196_v2 }
0x1e46   :  { %11868 = vpow2.f32 %v11707_v36 }
0x1e4a   :  { %v11867_v29 = vpop.eup %11866 }
0x1e4b   :  { %10219 = vrot.lane.b32.xlu1 %v11867_v29, %s11939_s14 }
0x1e4c   :  { %v11869_v0 = vpop.eup %11868 }
0x1e4d   :  { %v10200_v13 = vadd.f32 1.0, %v11869_v0 }
0x1e4f   :  { %11870 = vrcp.f32 %v10200_v13  ;;  %v10212_v21 = vand.u32 2147483648, %v10200_v13  ;;  %vm10206_vm2 = vweird.f32 %v10200_v13  ;;  %v10210_v44 = vand.u32 2147483647, %v10200_v13 }
0x1e51   :  { %v10213_v5 = vor.u32 1.1754944e-38, %v10212_v21  ;;  %vm10211_vm7 = vcmp.eq.f32.partialorder %v10210_v44, 8.507059e+37 }
0x1e55   :  { %v11871_v50 = vpop.eup %11870 }
0x1e56   :  { %v10202_v24 = vmul.f32 %v11871_v50, %v10200_v13  ;;  %vm10207_vm1 = vweird.f32 %v11871_v50 }
0x1e57   :  { %vm10208_vm4 = vmor %vm10206_vm2, %vm10207_vm1 }
0x1e58   :  { %v10203_v15 = vsub.f32 1.0, %v10202_v24 }
0x1e5a   :  { %v10204_v35 = vmul.f32 %v11871_v50, %v10203_v15 }
0x1e5c   :  { %v10205_v27 = vadd.f32 %v11871_v50, %v10204_v35 }
0x1e5e   :  { %v10209_v43 = vsel %vm10208_vm4, %v11871_v50, %v10205_v27 }
0x1e5f   :  { %v10214_v52 = vsel %vm10211_vm7, %v10213_v5, %v10209_v43 }
0x1e60   :  { %v10217_v1 = vmul.f32 %v10214_v52, %v16031_v25  ;;  %v10236_v25 = vld [vmem:[%s16621_s18 + $0x250] sm:$0xff] }
0x1e61   :  { %10303 = vmatpush.msra.mxu3 %v10236_v25 }
0x1e63   :  { %10383 = vmatpush.msrb.mxu3 %v10240_v7  ;;  %v10711_v7 = vld [vmem:[%s16623_s20 + $0x78] sm:$0xff] }
0x1ebd   :  { %v10220_v38 = vpop.permute.xlu1 %10219 }
0x1ebe   :  { %v10222_v57 = vmul.f32 %v10220_v38, %v10214_v52 }
0x1ec0   :  { %10224 = vrot.lane.b32.xlu2 %v10222_v57, %s11941_s6 }
0x1f1a   :  { %v10225_v39 = vpop.permute.xlu2 %10224 }
0x1f1b   :  { %v16085_v3 = vadd.f32 %v10225_v39, %v10217_v1  ;;  %v10497_v39 = vld [vmem:[%s16621_s18 + $0x280] sm:$0xff] }
0x1f1d   :  { %11872 = vtanh.f32 %v16085_v3 }
0x1f23   :  { %v11873_v9 = vpop.eup %11872 }
0x1f24   :  { %10230 = vrot.lane.b32.xlu1 %v11873_v9, %s11941_s6  ;;  %v10498_v9 = vld [vmem:[%s16621_s18 + $0x288] sm:$0xff] }
0x1f96   :  { %v10231_v33 = vpop.permute.xlu1 %10230 }
0x1f97   :  { %v10233_v40 = vmul.f32 %v10231_v33, %v10214_v52  ;;  %v10501_v33 = vld [vmem:[%s16621_s18 + $0x2a0] sm:$0xff] }
0x1f99   :  { %v10243_v47 = vperm.slane %v10233_v40, 0  ;;  %v10502_v40 = vld [vmem:[%s16621_s18 + $0x2a8] sm:$0xff] }
0x1f9b   :  { %10244 = vrot.lane.b32.xlu2 %v10243_v47, %s11942_s11  ;;  %v10503_v47 = vld [vmem:[%s16621_s18 + $0x2b0] sm:$0xff] }
0x1ff5   :  { %v10245_v32 = vpop.permute.xlu2 %10244 }
0x1ff6   :  { %11708 = vmatmul.msk.f32.vlgmr.msrb.gmra.mxu2 %vm7813_vm5, %v10245_v32  ;;  %11709 = vmatmul.msk.f32.vlgmr.msra.gmra.mxu0 %vm7813_vm5, %v10245_v32 }
0x1ff7   :  { %11710 = vmatmul.msk.f32.vlgmr.msra.gmra.mxu3 %vm7813_vm5, %v10245_v32  ;;  %11711 = vmatmul.msk.f32.vlgmr.msrb.gmra.mxu1 %vm7813_vm5, %v10245_v32 }
0x1ff8   :  { %10453 = vmatpush.msrb.mxu2 %v15885_v26  ;;  %10526 = vmatpush.msra.mxu0 %v10497_v39  ;;  %v10714_v39 = vld [vmem:[%s16623_s20 + $0x90] sm:$0xff] }
0x1ff9   :  { %10546 = vmatpush.msra.mxu3 %v10498_v9  ;;  %10566 = vmatpush.msrb.mxu1 %v10499_v54  ;;  %v10730_v9 = vld [vmem:[%s16623_s20 + $0x110] sm:$0xff]  ;;  %v10697_v54 = vld [vmem:[%s16623_s20 + $0x8] sm:$0xff] }
0x1ffe   :  { %11712 = vmatmul.msk.f32.vlgmr.msra.gmra.mxu2 %vm7813_vm5, %v10245_v32  ;;  %11713 = vmatmul.msk.f32.vlgmr.msrb.gmra.mxu0 %vm7813_vm5, %v10245_v32 }
0x1fff   :  { %11714 = vmatmul.msk.f32.vlgmr.msrb.gmra.mxu3 %vm7813_vm5, %v10245_v32  ;;  %11715 = vmatmul.msk.f32.vlgmr.msra.gmra.mxu1 %vm7813_vm5, %v10245_v32 }
0x2000   :  { %10606 = vmatpush.msrb.mxu0 %v10501_v33  ;;  %10626 = vmatpush.msrb.mxu3 %v10502_v40  ;;  %v10712_v33 = vld [vmem:[%s16623_s20 + $0x80] sm:$0xff] }
0x2001   :  { %10646 = vmatpush.msra.mxu1 %v10503_v47  ;;  %v10728_v40 = vld [vmem:[%s16623_s20 + $0x100] sm:$0xff]  ;;  %v10747_v47 = vld [vmem:[%s16623_s20 + $0x198] sm:$0xff] }
0x2006   :  { %11716 = vmatmul.msk.f32.vlgmr.msrb.gmra.mxu2 %vm7813_vm5, %v10245_v32  ;;  %v10743_v32 = vld [vmem:[%s16623_s20 + $0x178] sm:$0xff] }
0x2073   :  { %v10285_v19 = vpop.f32.mrf.mxu0 }
0x2074   :  { %v10325_v30 = vpop.f32.mrf.mxu1  ;;  %v10416_v11 = vrot.slane %v10285_v19, 7  ;;  %v10759_v19 = vld [vmem:[%s16623_s20 + $0x1f8] sm:$0xff] }
0x2075   :  { %v10418_v14 = vrot.slane %v10325_v30, 5  ;;  %v10710_v30 = vld [vmem:[%s16623_s20 + $0x70] sm:$0xff] }
0x2079   :  { %v10265_v4 = vpop.f32.mrf.mxu2 }
0x207a   :  { %v10305_v41 = vpop.f32.mrf.mxu3  ;;  %v10423_v56 = vsel %vm7143_vm15, %v10265_v4, %v10416_v11  ;;  %v10726_v4 = vld [vmem:[%s16623_s20 + $0xf0] sm:$0xff]  ;;  %v10723_v11 = vld [vmem:[%s16623_s20 + $0xd8] sm:$0xff] }
0x207b   :  { %v10417_v8 = vrot.slane %v10305_v41, 6  ;;  %v10365_v58 = vpop.f32.mrf.mxu0  ;;  %v10742_v41 = vld [vmem:[%s16623_s20 + $0x170] sm:$0xff] }
0x207c   :  { %v10405_v20 = vpop.f32.mrf.mxu1  ;;  %v10420_v63 = vrot.slane %v10365_v58, 3  ;;  %v10709_v58 = vld [vmem:[%s16623_s20 + $0x68] sm:$0xff] }
0x207d   :  { %v10424_v61 = vsel %vm8065_vm12, %v10417_v8, %v10418_v14  ;;  %v10422_v17 = vrot.slane %v10405_v20, 1  ;;  %v10758_v8 = vld [vmem:[%s16623_s20 + $0x1f0] sm:$0xff]  ;;  %v10741_v20 = vld [vmem:[%s16623_s20 + $0x168] sm:$0xff] }
0x207e   :  { %v10425_v46 = vsel %vm8067_vm14, %v10423_v56, %v10424_v61  ;;  %v10757_v14 = vld [vmem:[%s16623_s20 + $0x1e8] sm:$0xff]  ;;  %v10739_v61 = vld [vmem:[%s16623_s20 + $0x158] sm:$0xff]  ;;  %v10738_v56 = vld [vmem:[%s16623_s20 + $0x150] sm:$0xff] }
0x2081   :  { %v10345_v26 = vpop.f32.mrf.mxu2 }
0x2082   :  { %v10419_v37 = vrot.slane %v10345_v26, 4  ;;  %v10385_v23 = vpop.f32.mrf.mxu3  ;;  %v10708_v26 = vld [vmem:[%s16623_s20 + $0x60] sm:$0xff] }
0x2083   :  { %v10421_v10 = vrot.slane %v10385_v23, 2  ;;  %v10756_v23 = vld [vmem:[%s16623_s20 + $0x1e0] sm:$0xff] }
0x2084   :  { %v10426_v12 = vsel %vm8069_vm13, %v10419_v37, %v10420_v63  ;;  %v10724_v63 = vld [vmem:[%s16623_s20 + $0xe0] sm:$0xff] }
0x2085   :  { %v10427_v55 = vsel %vm8071_vm3, %v10421_v10, %v10422_v17  ;;  %v10740_v37 = vld [vmem:[%s16623_s20 + $0x160] sm:$0xff]  ;;  %v10755_v17 = vld [vmem:[%s16623_s20 + $0x1d8] sm:$0xff]  ;;  %v10706_v10 = vld [vmem:[%s16623_s20 + $0x50] sm:$0xff] }
0x2086   :  { %v10428_v51 = vsel %vm8073_vm11, %v10426_v12, %v10427_v55  ;;  %v10722_v12 = vld [vmem:[%s16623_s20 + $0xd0] sm:$0xff] }
0x2087   :  { %v10429_v34 = vsel %vm7778_vm0, %v10425_v46, %v10428_v51  ;;  %v10754_v55 = vld [vmem:[%s16623_s20 + $0x1d0] sm:$0xff]  ;;  %v10705_v46 = vld [vmem:[%s16623_s20 + $0x48] sm:$0xff] }
0x2088   :  { %v16133_v18 = vadd.f32 %v10429_v34, %v16080_v31  ;;  %v10721_v51 = vld [vmem:[%s16623_s20 + $0xc8] sm:$0xff] }
0x2089   :  { %v10455_v49 = vpop.f32.mrf.mxu2  ;;  %v10753_v34 = vld [vmem:[%s16623_s20 + $0x1c8] sm:$0xff] }
0x208a   :  { %v10458_v2 = vadd.f32 %v10455_v49, %v10437_v45  ;;  %v10737_v45 = vld [vmem:[%s16623_s20 + $0x148] sm:$0xff]  ;;  %v10704_v49 = vld [vmem:[%s16623_s20 + $0x40] sm:$0xff] }
0x208c   :  { %v10459_v6 = vadd.f32 %v15912_v60, %v10458_v2  ;;  %v10720_v2 = vld [vmem:[%s16623_s20 + $0xc0] sm:$0xff] }
0x208e   :  { %11874 = vtanh.f32 %v10459_v6  ;;  %v11717_v36 = vmul.f32 -1.442695, %v10459_v6  ;;  %v10736_v6 = vld [vmem:[%s16623_s20 + $0x140] sm:$0xff] }
0x2090   :  { %11876 = vpow2.f32 %v11717_v36  ;;  %v10703_v36 = vld [vmem:[%s16623_s20 + $0x38] sm:$0xff] }
0x2094   :  { %v11875_v29 = vpop.eup %11874 }
0x2095   :  { %10482 = vrot.lane.b32.xlu1 %v11875_v29, %s11939_s14  ;;  %v10752_v29 = vld [vmem:[%s16623_s20 + $0x1c0] sm:$0xff] }
0x2096   :  { %v11877_v0 = vpop.eup %11876 }
0x2097   :  { %v10463_v13 = vadd.f32 1.0, %v11877_v0  ;;  %v10719_v0 = vld [vmem:[%s16623_s20 + $0xb8] sm:$0xff] }
0x2099   :  { %11878 = vrcp.f32 %v10463_v13  ;;  %v10475_v31 = vand.u32 2147483648, %v10463_v13  ;;  %vm10469_vm9 = vweird.f32 %v10463_v13  ;;  %v10473_v27 = vand.u32 2147483647, %v10463_v13 }
0x209b   :  { %v10476_v21 = vor.u32 1.1754944e-38, %v10475_v31  ;;  %vm10474_vm1 = vcmp.eq.f32.partialorder %v10473_v27, 8.507059e+37  ;;  %v10701_v31 = vld [vmem:[%s16623_s20 + $0x28] sm:$0xff] }
0x209c   :  { %v10717_v27 = vld [vmem:[%s16623_s20 + $0xa8] sm:$0xff] }
0x209f   :  { %v11879_v50 = vpop.eup %11878 }
0x20a0   :  { %v10465_v48 = vmul.f32 %v11879_v50, %v10463_v13  ;;  %vm10470_vm8 = vweird.f32 %v11879_v50  ;;  %v10735_v13 = vld [vmem:[%s16623_s20 + $0x138] sm:$0xff] }
0x20a1   :  { %vm10471_vm10 = vmor %vm10469_vm9, %vm10470_vm8 }
0x20a2   :  { %v10466_v24 = vsub.f32 1.0, %v10465_v48  ;;  %v10702_v48 = vld [vmem:[%s16623_s20 + $0x30] sm:$0xff] }
0x20a4   :  { %v10467_v15 = vmul.f32 %v11879_v50, %v10466_v24  ;;  %v10718_v24 = vld [vmem:[%s16623_s20 + $0xb0] sm:$0xff] }
0x20a6   :  { %v10468_v35 = vadd.f32 %v11879_v50, %v10467_v15  ;;  %v10734_v15 = vld [vmem:[%s16623_s20 + $0x130] sm:$0xff] }
0x20a8   :  { %v10472_v60 = vsel %vm10471_vm10, %v11879_v50, %v10468_v35  ;;  %v10751_v50 = vld [vmem:[%s16623_s20 + $0x1b8] sm:$0xff]  ;;  %v10750_v35 = vld [vmem:[%s16623_s20 + $0x1b0] sm:$0xff] }
0x20a9   :  { %v10477_v43 = vsel %vm10474_vm1, %v10476_v21, %v10472_v60  ;;  %v10733_v60 = vld [vmem:[%s16623_s20 + $0x128] sm:$0xff] }
0x20aa   :  { %v10480_v38 = vmul.f32 %v10477_v43, %v16085_v3  ;;  %v10500_v3 = vld [vmem:[%s16621_s18 + $0x298] sm:$0xff]  ;;  %v10749_v21 = vld [vmem:[%s16623_s20 + $0x1a8] sm:$0xff] }
0x20ab   :  { %10586 = vmatpush.msra.mxu2 %v10500_v3  ;;  %v10713_v3 = vld [vmem:[%s16623_s20 + $0x88] sm:$0xff] }
0x20ad   :  { %10666 = vmatpush.msrb.mxu2 %v10504_v53  ;;  %v10775_v53 = vld [vmem:[%s16623_s20 + $0x278] sm:$0xff] }
0x2107   :  { %v10483_v44 = vpop.permute.xlu1 %10482 }
0x2108   :  { %v10485_v5 = vmul.f32 %v10483_v44, %v10477_v43  ;;  %v10700_v44 = vld [vmem:[%s16623_s20 + $0x20] sm:$0xff] }
0x210a   :  { %10487 = vrot.lane.b32.xlu2 %v10485_v5, %s11941_s6  ;;  %v10732_v5 = vld [vmem:[%s16623_s20 + $0x120] sm:$0xff] }
0x2164   :  { %v10488_v52 = vpop.permute.xlu2 %10487 }
0x2165   :  { %v10490_v57 = vadd.f32 %v10488_v52, %v10480_v38  ;;  %v10699_v38 = vld [vmem:[%s16623_s20 + $0x18] sm:$0xff] }
0x2166   :  { %v10715_v52 = vld [vmem:[%s16623_s20 + $0x98] sm:$0xff] }
0x2167   :  { %11880 = vtanh.f32 %v10490_v57  ;;  %v10731_v57 = vld [vmem:[%s16623_s20 + $0x118] sm:$0xff] }
0x216d   :  { %v11881_v1 = vpop.eup %11880 }
0x216e   :  { %10493 = vrot.lane.b32.xlu1 %v11881_v1, %s11941_s6  ;;  %v10698_v1 = vld [vmem:[%s16623_s20 + $0x10] sm:$0xff] }
0x21e0   :  { %v10494_v16 = vpop.permute.xlu1 %10493 }
0x21e1   :  { %v10496_v25 = vmul.f32 %v10494_v16, %v10477_v43  ;;  %v10716_v43 = vld [vmem:[%s16623_s20 + $0xa0] sm:$0xff]  ;;  %v10729_v16 = vld [vmem:[%s16623_s20 + $0x108] sm:$0xff] }
0x21e3   :  { %v10506_v59 = vperm.slane %v10496_v25, 0  ;;  %v10748_v25 = vld [vmem:[%s16623_s20 + $0x1a0] sm:$0xff] }
0x21e5   :  { %10507 = vrot.lane.b32.xlu2 %v10506_v59, %s11942_s11  ;;  %v10696_v59 = vld [vmem:[%s16623_s20] sm:$0xff] }
0x223f   :  { %v10508_v42 = vpop.permute.xlu2 %10507 }
0x2240   :  { %11718 = vmatmul.msk.f32.vlgmr.msra.gmra.mxu0 %vm7813_vm5, %v10508_v42  ;;  %11719 = vmatmul.msk.f32.vlgmr.msra.gmra.mxu3 %vm7813_vm5, %v10508_v42 }
0x2241   :  { %11720 = vmatmul.msk.f32.vlgmr.msrb.gmra.mxu1 %vm7813_vm5, %v10508_v42  ;;  %11721 = vmatmul.msk.f32.vlgmr.msra.gmra.mxu2 %vm7813_vm5, %v10508_v42 }
0x2242   :  { %10841 = vmatpush.msra.mxu0 %v10711_v7  ;;  %10861 = vmatpush.msra.mxu3 %v10727_v62  ;;  %v10807_v7 = vld [vmem:[%s16623_s20 + $0x378] sm:$0xff]  ;;  %v10746_v62 = vld [vmem:[%s16623_s20 + $0x190] sm:$0xff] }
0x2243   :  { %10881 = vmatpush.msrb.mxu1 %v10743_v32  ;;  %10901 = vmatpush.msra.mxu2 %v10759_v19  ;;  %v10774_v32 = vld [vmem:[%s16623_s20 + $0x270] sm:$0xff] }
0x2244   :  { %10842 = vmatpush.msra.mxu0 %v10710_v30  ;;  %10862 = vmatpush.msra.mxu3 %v10726_v4  ;;  %v10790_v19 = vld [vmem:[%s16623_s20 + $0x2f0] sm:$0xff]  ;;  %v10745_v4 = vld [vmem:[%s16623_s20 + $0x188] sm:$0xff] }
0x2245   :  { %10882 = vmatpush.msrb.mxu1 %v10742_v41  ;;  %10902 = vmatpush.msra.mxu2 %v10758_v8  ;;  %v10806_v30 = vld [vmem:[%s16623_s20 + $0x370] sm:$0xff]  ;;  %v10773_v41 = vld [vmem:[%s16623_s20 + $0x268] sm:$0xff] }
0x2246   :  { %10843 = vmatpush.msra.mxu0 %v10709_v58  ;;  %10863 = vmatpush.msra.mxu3 %v10725_v28  ;;  %v10789_v8 = vld [vmem:[%s16623_s20 + $0x2e8] sm:$0xff]  ;;  %v10744_v28 = vld [vmem:[%s16623_s20 + $0x180] sm:$0xff] }
0x2247   :  { %10883 = vmatpush.msrb.mxu1 %v10741_v20  ;;  %10903 = vmatpush.msra.mxu2 %v10757_v14  ;;  %v10805_v58 = vld [vmem:[%s16623_s20 + $0x368] sm:$0xff]  ;;  %v10772_v20 = vld [vmem:[%s16623_s20 + $0x260] sm:$0xff] }
0x2248   :  { %11722 = vmatmul.msk.f32.vlgmr.msrb.gmra.mxu0 %vm7813_vm5, %v10508_v42  ;;  %11723 = vmatmul.msk.f32.vlgmr.msrb.gmra.mxu3 %vm7813_vm5, %v10508_v42  ;;  %v10788_v14 = vld [vmem:[%s16623_s20 + $0x2e0] sm:$0xff] }
0x2249   :  { %11724 = vmatmul.msk.f32.vlgmr.msra.gmra.mxu1 %vm7813_vm5, %v10508_v42  ;;  %11725 = vmatmul.msk.f32.vlgmr.msrb.gmra.mxu2 %vm7813_vm5, %v10508_v42  ;;  %v10791_v42 = vld [vmem:[%s16623_s20 + $0x2f8] sm:$0xff] }
0x224a   :  { %10844 = vmatpush.msra.mxu0 %v10708_v26  ;;  %10864 = vmatpush.msra.mxu3 %v10724_v63  ;;  %v10804_v26 = vld [vmem:[%s16623_s20 + $0x360] sm:$0xff] }
0x224b   :  { %10884 = vmatpush.msrb.mxu1 %v10740_v37  ;;  %10904 = vmatpush.msra.mxu2 %v10756_v23  ;;  %v10820_v63 = vld [vmem:[%s16623_s20 + $0x3e0] sm:$0xff]  ;;  %v10771_v37 = vld [vmem:[%s16623_s20 + $0x258] sm:$0xff] }
0x224c   :  { %10845 = vmatpush.msra.mxu0 %v10707_v22  ;;  %10865 = vmatpush.msra.mxu3 %v10723_v11  ;;  %v10787_v23 = vld [vmem:[%s16623_s20 + $0x2d8] sm:$0xff] }
0x224d   :  { %10885 = vmatpush.msrb.mxu1 %v10739_v61  ;;  %10905 = vmatpush.msra.mxu2 %v10755_v17  ;;  %v10803_v22 = vld [vmem:[%s16623_s20 + $0x358] sm:$0xff]  ;;  %v10770_v61 = vld [vmem:[%s16623_s20 + $0x250] sm:$0xff] }
0x224e   :  { %10846 = vmatpush.msra.mxu0 %v10706_v10  ;;  %10866 = vmatpush.msra.mxu3 %v10722_v12  ;;  %v10819_v11 = vld [vmem:[%s16623_s20 + $0x3d8] sm:$0xff]  ;;  %v10786_v17 = vld [vmem:[%s16623_s20 + $0x2d0] sm:$0xff] }
0x224f   :  { %10886 = vmatpush.msrb.mxu1 %v10738_v56  ;;  %10906 = vmatpush.msra.mxu2 %v10754_v55  ;;  %v10802_v10 = vld [vmem:[%s16623_s20 + $0x350] sm:$0xff]  ;;  %v10769_v56 = vld [vmem:[%s16623_s20 + $0x248] sm:$0xff] }
0x2250   :  { %10847 = vmatpush.msra.mxu0 %v10705_v46  ;;  %10867 = vmatpush.msra.mxu3 %v10721_v51  ;;  %v10818_v12 = vld [vmem:[%s16623_s20 + $0x3d0] sm:$0xff]  ;;  %v10785_v55 = vld [vmem:[%s16623_s20 + $0x2c8] sm:$0xff] }
0x2251   :  { %10887 = vmatpush.msrb.mxu1 %v10737_v45  ;;  %10907 = vmatpush.msra.mxu2 %v10753_v34  ;;  %v10801_v46 = vld [vmem:[%s16623_s20 + $0x348] sm:$0xff]  ;;  %v10768_v45 = vld [vmem:[%s16623_s20 + $0x240] sm:$0xff] }
0x2252   :  { %10848 = vmatpush.msra.mxu0 %v10704_v49  ;;  %10868 = vmatpush.msra.mxu3 %v10720_v2  ;;  %v10817_v51 = vld [vmem:[%s16623_s20 + $0x3c8] sm:$0xff]  ;;  %v10784_v34 = vld [vmem:[%s16623_s20 + $0x2c0] sm:$0xff] }
0x2253   :  { %10888 = vmatpush.msrb.mxu1 %v10736_v6  ;;  %10908 = vmatpush.msra.mxu2 %v10752_v29  ;;  %v10800_v49 = vld [vmem:[%s16623_s20 + $0x340] sm:$0xff]  ;;  %v10767_v6 = vld [vmem:[%s16623_s20 + $0x238] sm:$0xff] }
0x2254   :  { %10849 = vmatpush.msra.mxu0 %v10703_v36  ;;  %10869 = vmatpush.msra.mxu3 %v10719_v0  ;;  %v10816_v2 = vld [vmem:[%s16623_s20 + $0x3c0] sm:$0xff]  ;;  %v10783_v29 = vld [vmem:[%s16623_s20 + $0x2b8] sm:$0xff] }
0x2255   :  { %10889 = vmatpush.msrb.mxu1 %v10735_v13  ;;  %10909 = vmatpush.msra.mxu2 %v10751_v50  ;;  %v10799_v36 = vld [vmem:[%s16623_s20 + $0x338] sm:$0xff]  ;;  %v10766_v13 = vld [vmem:[%s16623_s20 + $0x230] sm:$0xff] }
0x2256   :  { %10850 = vmatpush.msra.mxu0 %v10702_v48  ;;  %10870 = vmatpush.msra.mxu3 %v10718_v24  ;;  %v10815_v0 = vld [vmem:[%s16623_s20 + $0x3b8] sm:$0xff]  ;;  %v10782_v50 = vld [vmem:[%s16623_s20 + $0x2b0] sm:$0xff] }
0x2257   :  { %10890 = vmatpush.msrb.mxu1 %v10734_v15  ;;  %10910 = vmatpush.msra.mxu2 %v10750_v35  ;;  %v10798_v48 = vld [vmem:[%s16623_s20 + $0x330] sm:$0xff]  ;;  %v10765_v15 = vld [vmem:[%s16623_s20 + $0x228] sm:$0xff] }
0x2258   :  { %10851 = vmatpush.msra.mxu0 %v10701_v31  ;;  %10871 = vmatpush.msra.mxu3 %v10717_v27  ;;  %v10814_v24 = vld [vmem:[%s16623_s20 + $0x3b0] sm:$0xff]  ;;  %v10781_v35 = vld [vmem:[%s16623_s20 + $0x2a8] sm:$0xff] }
0x2259   :  { %10891 = vmatpush.msrb.mxu1 %v10733_v60  ;;  %10911 = vmatpush.msra.mxu2 %v10749_v21  ;;  %v10797_v31 = vld [vmem:[%s16623_s20 + $0x328] sm:$0xff]  ;;  %v10764_v60 = vld [vmem:[%s16623_s20 + $0x220] sm:$0xff] }
0x225a   :  { %10852 = vmatpush.msra.mxu0 %v10700_v44  ;;  %10872 = vmatpush.msra.mxu3 %v10716_v43  ;;  %v10813_v27 = vld [vmem:[%s16623_s20 + $0x3a8] sm:$0xff]  ;;  %v10780_v21 = vld [vmem:[%s16623_s20 + $0x2a0] sm:$0xff] }
0x225b   :  { %10892 = vmatpush.msrb.mxu1 %v10732_v5  ;;  %10912 = vmatpush.msra.mxu2 %v10748_v25  ;;  %v10796_v44 = vld [vmem:[%s16623_s20 + $0x320] sm:$0xff]  ;;  %v10763_v5 = vld [vmem:[%s16623_s20 + $0x218] sm:$0xff]  ;;  %v10793_v25 = vld [vmem:[%s16623_s20 + $0x308] sm:$0xff] }
0x225c   :  { %10853 = vmatpush.msra.mxu0 %v10699_v38  ;;  %10873 = vmatpush.msra.mxu3 %v10715_v52  ;;  %v10812_v43 = vld [vmem:[%s16623_s20 + $0x3a0] sm:$0xff]  ;;  %v10779_v38 = vld [vmem:[%s16623_s20 + $0x298] sm:$0xff] }
0x225d   :  { %10893 = vmatpush.msrb.mxu1 %v10731_v57  ;;  %10913 = vmatpush.msra.mxu2 %v10747_v47  ;;  %v10795_v52 = vld [vmem:[%s16623_s20 + $0x318] sm:$0xff] }
0x225e   :  { %10854 = vmatpush.msra.mxu0 %v10698_v1  ;;  %10874 = vmatpush.msra.mxu3 %v10714_v39  ;;  %v10811_v57 = vld [vmem:[%s16623_s20 + $0x398] sm:$0xff]  ;;  %v10762_v1 = vld [vmem:[%s16623_s20 + $0x210] sm:$0xff] }
0x225f   :  { %10894 = vmatpush.msrb.mxu1 %v10730_v9  ;;  %10914 = vmatpush.msra.mxu2 %v10746_v62  ;;  %v10778_v39 = vld [vmem:[%s16623_s20 + $0x290] sm:$0xff] }
0x2260   :  { %10855 = vmatpush.msra.mxu0 %v10697_v54  ;;  %10875 = vmatpush.msra.mxu3 %v10713_v3  ;;  %v10794_v9 = vld [vmem:[%s16623_s20 + $0x310] sm:$0xff]  ;;  %v10761_v3 = vld [vmem:[%s16623_s20 + $0x208] sm:$0xff] }
0x2261   :  { %10895 = vmatpush.msrb.mxu1 %v10729_v16  ;;  %10915 = vmatpush.msra.mxu2 %v10745_v4  ;;  %v10810_v54 = vld [vmem:[%s16623_s20 + $0x390] sm:$0xff]  ;;  %v10777_v16 = vld [vmem:[%s16623_s20 + $0x288] sm:$0xff] }
0x2262   :  { %10856 = vmatpush.msra.mxu0 %v10696_v59  ;;  %10876 = vmatpush.msra.mxu3 %v10712_v33  ;;  %v10809_v59 = vld [vmem:[%s16623_s20 + $0x388] sm:$0xff]  ;;  %v10760_v33 = vld [vmem:[%s16623_s20 + $0x200] sm:$0xff] }
0x2263   :  { %10896 = vmatpush.msrb.mxu1 %v10728_v40  ;;  %10916 = vmatpush.msra.mxu2 %v10744_v28  ;;  %v10776_v40 = vld [vmem:[%s16623_s20 + $0x280] sm:$0xff] }
0x2264   :  { %10921 = vmatpush.msrb.mxu0 %v10775_v53  ;;  %10941 = vmatpush.msrb.mxu3 %v10791_v42  ;;  %v10792_v53 = vld [vmem:[%s16623_s20 + $0x300] sm:$0xff] }
0x2265   :  { %10961 = vmatpush.msra.mxu1 %v10807_v7  ;;  %10984 = vmatpush.msrb.mxu2 %v10820_v63  ;;  %v10808_v42 = vld [vmem:[%s16623_s20 + $0x380] sm:$0xff] }
0x2266   :  { %10922 = vmatpush.msrb.mxu0 %v10774_v32  ;;  %10942 = vmatpush.msrb.mxu3 %v10790_v19 }
0x2267   :  { %10962 = vmatpush.msra.mxu1 %v10806_v30  ;;  %10985 = vmatpush.msrb.mxu2 %v10819_v11 }
0x2268   :  { %10923 = vmatpush.msrb.mxu0 %v10773_v41  ;;  %10943 = vmatpush.msrb.mxu3 %v10789_v8 }
0x2269   :  { %10963 = vmatpush.msra.mxu1 %v10805_v58  ;;  %10986 = vmatpush.msrb.mxu2 %v10818_v12 }
0x226a   :  { %10924 = vmatpush.msrb.mxu0 %v10772_v20  ;;  %10944 = vmatpush.msrb.mxu3 %v10788_v14 }
0x226b   :  { %10964 = vmatpush.msra.mxu1 %v10804_v26  ;;  %10987 = vmatpush.msrb.mxu2 %v10817_v51 }
0x226c   :  { %10925 = vmatpush.msrb.mxu0 %v10771_v37  ;;  %10945 = vmatpush.msrb.mxu3 %v10787_v23 }
0x226d   :  { %10965 = vmatpush.msra.mxu1 %v10803_v22  ;;  %10988 = vmatpush.msrb.mxu2 %v10816_v2 }
0x226e   :  { %10926 = vmatpush.msrb.mxu0 %v10770_v61  ;;  %10946 = vmatpush.msrb.mxu3 %v10786_v17 }
0x226f   :  { %10966 = vmatpush.msra.mxu1 %v10802_v10  ;;  %10989 = vmatpush.msrb.mxu2 %v10815_v0  ;;  %v11011_v0 = vld [vmem:[%s16625_s22 + $0x48] sm:$0xff] }
0x2270   :  { %10927 = vmatpush.msrb.mxu0 %v10769_v56  ;;  %10947 = vmatpush.msrb.mxu3 %v10785_v55 }
0x2271   :  { %10967 = vmatpush.msra.mxu1 %v10801_v46  ;;  %10990 = vmatpush.msrb.mxu2 %v10814_v24  ;;  %v11007_v24 = vld [vmem:[%s16625_s22 + $0x28] sm:$0xff] }
0x2272   :  { %10928 = vmatpush.msrb.mxu0 %v10768_v45  ;;  %10948 = vmatpush.msrb.mxu3 %v10784_v34  ;;  %v11014_v34 = vld [vmem:[%s16625_s22 + $0x60] sm:$0xf] }
0x2273   :  { %10968 = vmatpush.msra.mxu1 %v10800_v49  ;;  %10991 = vmatpush.msrb.mxu2 %v10813_v27  ;;  %v11003_v27 = vld [vmem:[%s16625_s22 + $0x8] sm:$0xff] }
0x2274   :  { %10929 = vmatpush.msrb.mxu0 %v10767_v6  ;;  %10949 = vmatpush.msrb.mxu3 %v10783_v29  ;;  %v11013_v29 = vld [vmem:[%s16625_s22 + $0x58] sm:$0xff] }
0x2275   :  { %10969 = vmatpush.msra.mxu1 %v10799_v36  ;;  %10992 = vmatpush.msrb.mxu2 %v10812_v43  ;;  %v11012_v36 = vld [vmem:[%s16625_s22 + $0x50] sm:$0xff] }
0x2276   :  { %10930 = vmatpush.msrb.mxu0 %v10766_v13  ;;  %10950 = vmatpush.msrb.mxu3 %v10782_v50  ;;  %v11010_v13 = vld [vmem:[%s16625_s22 + $0x40] sm:$0xff]  ;;  %v11009_v50 = vld [vmem:[%s16625_s22 + $0x38] sm:$0xff] }
0x2277   :  { %10970 = vmatpush.msra.mxu1 %v10798_v48  ;;  %10993 = vmatpush.msrb.mxu2 %v10811_v57  ;;  %v11008_v48 = vld [vmem:[%s16625_s22 + $0x30] sm:$0xff] }
0x2278   :  { %10931 = vmatpush.msrb.mxu0 %v10765_v15  ;;  %10951 = vmatpush.msrb.mxu3 %v10781_v35  ;;  %v11006_v15 = vld [vmem:[%s16625_s22 + $0x20] sm:$0xff]  ;;  %v11005_v35 = vld [vmem:[%s16625_s22 + $0x18] sm:$0xff] }
0x2279   :  { %10971 = vmatpush.msra.mxu1 %v10797_v31  ;;  %10994 = vmatpush.msrb.mxu2 %v10810_v54  ;;  %v11004_v31 = vld [vmem:[%s16625_s22 + $0x10] sm:$0xff] }
0x227a   :  { %10932 = vmatpush.msrb.mxu0 %v10764_v60  ;;  %10952 = vmatpush.msrb.mxu3 %v10780_v21  ;;  %v11002_v60 = vld [vmem:[%s16625_s22] sm:$0xff] }
0x227b   :  { %10972 = vmatpush.msra.mxu1 %v10796_v44  ;;  %10995 = vmatpush.msrb.mxu2 %v10809_v59  ;;  %v10821_v21 = vld [vmem:[%s16624_s21] sm:$0x1]  ;;  %s11949_s21 = smov [#allocation7]  }
0x227c   :  { %10933 = vmatpush.msrb.mxu0 %v10763_v5  ;;  %10953 = vmatpush.msrb.mxu3 %v10779_v38  ;;  %s11050_s22 = sshll.u32 %s11949_s21, 4  ;;  %s11051_s22 = int_to_ptr.vmem [resolvable:$true] %s11050_s22 }
0x227d   :  { %10973 = vmatpush.msra.mxu1 %v10795_v52  ;;  %10996 = vmatpush.msrb.mxu2 %v10808_v42 }
0x227e   :  { %10934 = vmatpush.msrb.mxu0 %v10762_v1  ;;  %10954 = vmatpush.msrb.mxu3 %v10778_v39 }
0x227f   :  { %10974 = vmatpush.msra.mxu1 %v10794_v9 }
0x2280   :  { %10935 = vmatpush.msrb.mxu0 %v10761_v3  ;;  %10955 = vmatpush.msrb.mxu3 %v10777_v16 }
0x2281   :  { %10975 = vmatpush.msra.mxu1 %v10793_v25 }
0x2282   :  { %10936 = vmatpush.msrb.mxu0 %v10760_v33  ;;  %10956 = vmatpush.msrb.mxu3 %v10776_v40 }
0x2283   :  { %10976 = vmatpush.msra.mxu1 %v10792_v53  ;;  %v11015_v53 = vld [vmem:[#allocation6] sm:$0x1] }
0x22bd   :  { %v10528_v47 = vpop.f32.mrf.mxu0 }
0x22be   :  { %v10568_v7 = vpop.f32.mrf.mxu1 }
0x22bf   :  { %v10680_v8 = vrot.slane %v10568_v7, 6 }
0x22c3   :  { %v10548_v62 = vpop.f32.mrf.mxu3 }
0x22c4   :  { %v10588_v32 = vpop.f32.mrf.mxu2  ;;  %v10679_v19 = vrot.slane %v10548_v62, 7 }
0x22c5   :  { %v10681_v30 = vrot.slane %v10588_v32, 5  ;;  %v10608_v4 = vpop.f32.mrf.mxu0 }
0x22c6   :  { %v10648_v41 = vpop.f32.mrf.mxu1  ;;  %v10682_v28 = vrot.slane %v10608_v4, 4  ;;  %v10686_v26 = vsel %vm7143_vm15, %v10528_v47, %v10679_v19  ;;  %vm10838_vm15 = vcmask 850944  }
0x22c7   :  { %v10687_v63 = vsel %vm8065_vm12, %v10680_v8, %v10681_v30  ;;  %v10684_v37 = vrot.slane %v10648_v41, 2 }
0x22c8   :  { %v10688_v61 = vsel %vm8067_vm14, %v10686_v26, %v10687_v63 }
0x22cb   :  { %v10628_v58 = vpop.f32.mrf.mxu3 }
0x22cc   :  { %v10683_v20 = vrot.slane %v10628_v58, 3  ;;  %v10668_v14 = vpop.f32.mrf.mxu2 }
0x22cd   :  { %v10685_v23 = vrot.slane %v10668_v14, 1 }
0x22ce   :  { %v10689_v22 = vsel %vm8069_vm13, %v10682_v28, %v10683_v20 }
0x22cf   :  { %v10690_v11 = vsel %vm8071_vm3, %v10684_v37, %v10685_v23 }
0x22d0   :  { %v10691_v17 = vsel %vm8073_vm11, %v10689_v22, %v10690_v11 }
0x22d1   :  { %v10692_v10 = vsel %vm7778_vm0, %v10688_v61, %v10691_v17 }
0x22d2   :  { %v10694_v12 = vadd.f32 %v10692_v10, %v16133_v18 }
0x22d4   :  { %v10695_v56 = vmax.f32 %v10694_v12, 0.0 }
0x22d6   :  { %v10823_v55 = vperm.slane %v10695_v56, 0  ;;  %v10824_v46 = vperm.slane %v10695_v56, 1  ;;  %v10825_v51 = vperm.slane %v10695_v56, 2  ;;  %v10826_v45 = vperm.slane %v10695_v56, 3 }
0x22d7   :  { %v10827_v49 = vperm.slane %v10695_v56, 4  ;;  %v10828_v2 = vperm.slane %v10695_v56, 5  ;;  %v10829_v6 = vperm.slane %v10695_v56, 6  ;;  %v10830_v18 = vperm.slane %v10695_v56, 7 }
0x22d8   :  { %10857 = vmatmul.f32.vlgmr.msra.gmra.mxu0 %v10823_v55  ;;  %10877 = vmatmul.f32.vlgmr.msra.gmra.mxu3 %v10824_v46 }
0x22d9   :  { %10897 = vmatmul.f32.vlgmr.msrb.gmra.mxu1 %v10825_v51  ;;  %10917 = vmatmul.f32.vlgmr.msra.gmra.mxu2 %v10826_v45 }
0x22da   :  { %11727 = vmatpush.msk.msra.mxu0 %vm7778_vm0, %v11014_v34  ;;  %vm11043_vm0 = vcmask 0  }
0x22dc   :  { %11026 = vmatpush.msra.mxu0 %v11013_v29 }
0x22de   :  { %11027 = vmatpush.msra.mxu0 %v11012_v36 }
0x22e0   :  { %10937 = vmatmul.f32.vlgmr.msrb.gmra.mxu0 %v10827_v49  ;;  %10957 = vmatmul.f32.vlgmr.msrb.gmra.mxu3 %v10828_v2 }
0x22e1   :  { %10977 = vmatmul.f32.vlgmr.msra.gmra.mxu1 %v10829_v6  ;;  %11726 = vmatmul.msk.f32.vlgmr.msrb.gmra.mxu2 %vm10838_vm15, %v10830_v18 }
0x22e2   :  { %11028 = vmatpush.msra.mxu0 %v11011_v0 }
0x22e4   :  { %11029 = vmatpush.msra.mxu0 %v11010_v13 }
0x22e6   :  { %11030 = vmatpush.msra.mxu0 %v11009_v50 }
0x22e8   :  { %11031 = vmatpush.msra.mxu0 %v11008_v48 }
0x22ea   :  { %11032 = vmatpush.msra.mxu0 %v11007_v24 }
0x22ec   :  { %11033 = vmatpush.msra.mxu0 %v11006_v15 }
0x22ee   :  { %11034 = vmatpush.msra.mxu0 %v11005_v35 }
0x22f0   :  { %11035 = vmatpush.msra.mxu0 %v11004_v31 }
0x22f2   :  { %11036 = vmatpush.msra.mxu0 %v11003_v27 }
0x22f4   :  { %11037 = vmatpush.msra.mxu0 %v11002_v60 }
0x2355   :  { %v10858_v44 = vpop.f32.mrf.mxu0 }
0x2356   :  { %v10859_v43 = vadd.f32 %v10858_v44, %v10821_v21  ;;  %v10898_v5 = vpop.f32.mrf.mxu1 }
0x235b   :  { %v10878_v38 = vpop.f32.mrf.mxu3 }
0x235c   :  { %v10879_v52 = vadd.f32 %v10878_v38, %v10859_v43  ;;  %v10918_v57 = vpop.f32.mrf.mxu2 }
0x235d   :  { %v10938_v9 = vpop.f32.mrf.mxu0 }
0x235e   :  { %v10899_v1 = vadd.f32 %v10898_v5, %v10879_v52  ;;  %v10978_v25 = vpop.f32.mrf.mxu1 }
0x2360   :  { %v10919_v39 = vadd.f32 %v10918_v57, %v10899_v1 }
0x2362   :  { %v10939_v54 = vadd.f32 %v10938_v9, %v10919_v39 }
0x2363   :  { %v10958_v3 = vpop.f32.mrf.mxu3 }
0x2364   :  { %v10959_v16 = vadd.f32 %v10958_v3, %v10939_v54  ;;  %v10998_v33 = vpop.f32.mrf.mxu2 }
0x2366   :  { %v10979_v59 = vadd.f32 %v10978_v25, %v10959_v16 }
0x2368   :  { %v10999_v40 = vadd.f32 %v10998_v33, %v10979_v59 }
0x236a   :  { %v11001_v47 = vmax.f32 %v10999_v40, 0.0 }
0x236c   :  { %11728 = vmatmul.msk.f32.vlgmr.msra.gmra.mxu0 %vm966_vm6, %v11001_v47 }
0x23e9   :  { %v11039_v42 = vpop.f32.mrf.mxu0 }
0x23ea   :  { %v11040_v7 = vadd.f32 %v11039_v42, %v11015_v53 }
0x23ec   :  { %11882 = vtanh.f32 %v11040_v7 }
0x23f2   :  { %v11883_v62 = vpop.eup %11882 }
0x23f3   :  { %11044 = vst.msk [vmem:[#allocation7] sm:$0x1] %vm11043_vm0, %v11883_v62 }
0x23f4   :  { %11055 = dma.vmem_to_hbm [thread:$0]  %s11051_s22, 16, %s11053_s0, [#allocation8]  }
0x23f5   :  { %11911 = dma.done.wait [#allocation8], 16  }
0x23f6   :  { %11912 = vsyncadd [#allocation8], 4294967280 }
0x23f7   :  { %11060 = vsyncpa [#allocation8], 1 }

</bundles_post_ra>
